<compile_context>
chip_gen: v5e
topology: v5e:2x2
jax: 0.10.0
libtpu: 0.0.40
codegen_flags: <defaults>
</compile_context>

<pallas_src>
import functools

import jax
import jax.numpy as jnp
from jax import lax
from jax.experimental import pallas as pl
from jax.experimental.pallas import tpu as pltpu

_BN_EPS = 1e-5
_LANE = 128
_MAX_TILE = 512          # lane-tile width (multiple of 128)
_VMEM_LIMIT = 64 * 1024 * 1024


def _round_up(x, m):
    return (x + m - 1) // m * m


def _pad_last(x, target):
    pad = target - x.shape[-1]
    if pad == 0:
        return x
    cfg = [(0, 0)] * (x.ndim - 1) + [(0, pad)]
    return jnp.pad(x, cfg)


# ------------------------------------------------------------------
# Kernels
# ------------------------------------------------------------------

def _deconv_bn_relu_kernel(slabs_ref, w_ref, g_ref, b_ref, o_ref,
                           y_scr, sum_scr, ssq_scr, *, n_valid, eps):
    """Fused ConvTranspose2d(4,2,1,bias=False) + BatchNorm2d(train) + ReLU.

    grid = (2, n_m_tiles): sweep 0 = sub-pixel matmuls + batch-stat accumulation,
                           sweep 1 = BN affine + ReLU + lane-dense bf16 store.

    slabs_ref: (9, Cin, TM)  bf16   shifted slabs of the 1-padded input, this m-tile
    w_ref:     (4, 4, Cout, Cin) f32  per-phase / per-tap weight matrices
    g_ref,b_ref: (Cout, 1) f32
    o_ref:     (4, Cout, TM) bf16  phase-major output tile (pixels on the lane axis)
    y_scr:     (n_m_tiles*4, Cout, TM) bf16 pre-BN activations
    sum_scr/ssq_scr: (Cout, 1) f32 running per-channel sum / sum-of-squares
    """
    sweep = pl.program_id(0)
    m = pl.program_id(1)
    cout, tm = o_ref.shape[1], o_ref.shape[2]

    @pl.when(jnp.logical_and(sweep == 0, m == 0))
    def _():
        sum_scr[...] = jnp.zeros_like(sum_scr)
        ssq_scr[...] = jnp.zeros_like(ssq_scr)

    @pl.when(sweep == 0)
    def _():
        s = jnp.zeros((cout, 1), jnp.float32)
        ss = jnp.zeros((cout, 1), jnp.float32)
        for p in range(4):                                  # unrolled output phases
            rh, rw = divmod(p, 2)
            y = jnp.zeros((cout, tm), jnp.float32)
            for t in range(4):                              # 4 accumulating matmuls / phase
                dh, dw = divmod(t, 2)
                si = (rh + dh) * 3 + (rw + dw)
                y = y + jnp.dot(w_ref[p, t],
                                slabs_ref[si].astype(jnp.float32),
                                preferred_element_type=jnp.float32)
            s = s + jnp.sum(y, axis=1, keepdims=True)
            ss = ss + jnp.sum(y * y, axis=1, keepdims=True)
            y_scr[m * 4 + p] = y.astype(y_scr.dtype)
        sum_scr[...] += s
        ssq_scr[...] += ss

    @pl.when(sweep == 1)
    def _():
        mean = sum_scr[...] / n_valid
        var = jnp.maximum(ssq_scr[...] / n_valid - mean * mean, 0.0)
        scale = g_ref[...] * lax.rsqrt(var + eps)
        shift = b_ref[...] - mean * scale
        scale_b = jnp.broadcast_to(scale, (cout, tm))       # hoisted out of the phase loop
        shift_b = jnp.broadcast_to(shift, (cout, tm))
        for p in range(4):
            y = y_scr[m * 4 + p].astype(jnp.float32)
            o_ref[p] = jnp.maximum(y * scale_b + shift_b, 0.0).astype(o_ref.dtype)


def _head_kernel(x_ref, w3_ref, g3_ref, b3_ref, w4_ref, g4_ref, b4_ref, w5_ref, o_ref,
                 y3_scr, y4_scr, s3_scr, q3_scr, s4_scr, q4_scr, *, n_valid, eps):
    """Fused layers 3..5: (1x1 conv + BN + ReLU) x 2, then 1x1 conv + Tanh.

    grid = (3, n_m_tiles): sweep 0: y3 = w3 @ x, accumulate stats3
                           sweep 1: h3 = bn3+relu, y4 = w4 @ h3, accumulate stats4
                           sweep 2: h4 = bn4+relu, out = tanh(w5 @ h4)
    Pixels live on the 128-lane axis; padded columns are masked out of the BN chain.
    """
    sweep = pl.program_id(0)
    m = pl.program_id(1)
    tm = o_ref.shape[-1]

    col = m * tm + lax.broadcasted_iota(jnp.int32, (1, tm), 1)
    valid = (col < n_valid).astype(jnp.float32)

    def bn_affine(sum_ref, ssq_ref, g_ref, b_ref):
        mean = sum_ref[...] / n_valid
        var = jnp.maximum(ssq_ref[...] / n_valid - mean * mean, 0.0)
        scale = g_ref[...] * lax.rsqrt(var + eps)
        shift = b_ref[...] - mean * scale
        return scale, shift

    @pl.when(jnp.logical_and(sweep == 0, m == 0))
    def _():
        s3_scr[...] = jnp.zeros_like(s3_scr)
        q3_scr[...] = jnp.zeros_like(q3_scr)
        s4_scr[...] = jnp.zeros_like(s4_scr)
        q4_scr[...] = jnp.zeros_like(q4_scr)

    @pl.when(sweep == 0)
    def _():
        y3 = jnp.dot(w3_ref[...], x_ref[...].astype(jnp.float32),
                     preferred_element_type=jnp.float32)
        s3_scr[...] += jnp.sum(y3, axis=1, keepdims=True)
        q3_scr[...] += jnp.sum(y3 * y3, axis=1, keepdims=True)
        y3_scr[m] = y3.astype(y3_scr.dtype)

    @pl.when(sweep == 1)
    def _():
        scale, shift = bn_affine(s3_scr, q3_scr, g3_ref, b3_ref)
        h3 = jnp.maximum(y3_scr[m].astype(jnp.float32) * scale + shift, 0.0) * valid
        y4 = jnp.dot(w4_ref[...], h3, preferred_element_type=jnp.float32)
        s4_scr[...] += jnp.sum(y4, axis=1, keepdims=True)
        q4_scr[...] += jnp.sum(y4 * y4, axis=1, keepdims=True)
        y4_scr[m] = y4.astype(y4_scr.dtype)

    @pl.when(sweep == 2)
    def _():
        scale, shift = bn_affine(s4_scr, q4_scr, g4_ref, b4_ref)
        h4 = jnp.maximum(y4_scr[m].astype(jnp.float32) * scale + shift, 0.0) * valid
        y5 = jnp.dot(w5_ref[...], h4, preferred_element_type=jnp.float32)
        o_ref[...] = jnp.tanh(y5)


# ------------------------------------------------------------------
# Host-side shaping helpers (channel-major layout end-to-end)
# ------------------------------------------------------------------

def _shifted_slabs(x_cmaj):
    """x: (C, N, H, W) channel-major -> (9, C, N*H*W) shifted slabs of the 1-padded input.

    Slices + reshapes only (no transposes); 9 slabs instead of the 16-slab im2col.
    """
    C, N, H, W = x_cmaj.shape
    xp = jnp.pad(x_cmaj, ((0, 0), (0, 0), (1, 1), (1, 1)))
    slabs = []
    for sh in range(3):
        for sw in range(3):
            slabs.append(xp[:, :, sh:sh + H, sw:sw + W].reshape(C, N * H * W))
    return jnp.stack(slabs, axis=0)


def _phase_tap_weights(w):
    """PyTorch ConvTranspose2d weight (Cin, Cout, 4, 4) -> (4, 4, Cout, Cin) f32.

    Phase p = rh*2+rw, tap t = dh*2+dw uses kernel element (3-rh-2dh, 3-rw-2dw) applied to
    the padded-input slab shifted by (rh+dh, rw+dw).
    """
    mats = []
    for rh in range(2):
        for rw in range(2):
            taps = []
            for dh in range(2):
                for dw in range(2):
                    kh = 3 - rh - 2 * dh
                    kw = 3 - rw - 2 * dw
                    taps.append(jnp.transpose(w[:, :, kh, kw]))     # (Cout, Cin), tiny
            mats.append(jnp.stack(taps, axis=0))                    # (4, Cout, Cin)
    return jnp.stack(mats, axis=0).astype(jnp.float32)              # (4, 4, Cout, Cin)


def _phases_to_cmaj(out_phases, cout, N, H, W):
    """(4, Cout, N*H*W) phase-major -> (Cout, N, 2H, 2W) channel-major spatial."""
    t = out_phases.reshape(2, 2, cout, N, H, W)
    t = jnp.transpose(t, (2, 3, 4, 0, 5, 1))        # (Cout, N, H, rh, W, rw)
    return t.reshape(cout, N, 2 * H, 2 * W)


# ------------------------------------------------------------------
# Layer wrappers (pallas_call plumbing)
# ------------------------------------------------------------------

def deconv4x4_s2_bn_relu(x_cmaj, w, gamma, beta):
    """Fused ConvTranspose2d(4,2,1) + BatchNorm2d + ReLU.  x_cmaj: (Cin, N, H, W).

    Returns (phase-major output (4, Cout, M_pad) bf16, valid pixel count M = N*H*W).
    """
    cin, N, H, W = x_cmaj.shape
    cout = w.shape[1]
    M = N * H * W
    tile = min(_MAX_TILE, _round_up(M, _LANE))
    m_pad = _round_up(M, tile)
    n_tiles = m_pad // tile

    slabs = _pad_last(_shifted_slabs(x_cmaj), m_pad).astype(jnp.bfloat16)   # (9, Cin, m_pad)
    wm = _phase_tap_weights(w)                                              # (4, 4, Cout, Cin)
    g = gamma.reshape(cout, 1).astype(jnp.float32)
    b = beta.reshape(cout, 1).astype(jnp.float32)

    kernel = functools.partial(_deconv_bn_relu_kernel, n_valid=4 * M, eps=_BN_EPS)
    out = pl.pallas_call(
        kernel,
        out_shape=jax.ShapeDtypeStruct((4, cout, m_pad), jnp.bfloat16),
        grid_spec=pltpu.PrefetchScalarGridSpec(
            num_scalar_prefetch=0,
            grid=(2, n_tiles),
            in_specs=[
                # slabs are only consumed in sweep 0; pin the block index afterwards so
                # the pipeline does not re-DMA them during the apply sweep.
                pl.BlockSpec((9, cin, tile),
                             lambda s, m: (0, 0, jnp.where(s == 0, m, n_tiles - 1))),
                pl.BlockSpec((4, 4, cout, cin), lambda s, m: (0, 0, 0, 0)),
                pl.BlockSpec((cout, 1), lambda s, m: (0, 0)),
                pl.BlockSpec((cout, 1), lambda s, m: (0, 0)),
            ],
            out_specs=pl.BlockSpec((4, cout, tile),
                                   lambda s, m: (0, 0, jnp.where(s == 1, m, 0))),
            scratch_shapes=[
                pltpu.VMEM((n_tiles * 4, cout, tile), jnp.bfloat16),
                pltpu.VMEM((cout, 1), jnp.float32),
                pltpu.VMEM((cout, 1), jnp.float32),
            ],
        ),
        compiler_params=pltpu.CompilerParams(
            dimension_semantics=("arbitrary", "arbitrary"),
            vmem_limit_bytes=_VMEM_LIMIT),
    )(slabs, wm, g, b)
    return out, M


def head_1x1_layers(xT, w3, g3, b3, w4, g4, b4, w5):
    """Fused layers 3..5 (pixelwise 1x1 convs).  xT: (Cin, P) lane-dense transposed."""
    cin, P = xT.shape
    c3, c4, c5 = w3.shape[1], w4.shape[1], w5.shape[1]
    tile = min(_MAX_TILE, _round_up(P, _LANE))
    p_pad = _round_up(P, tile)
    n_tiles = p_pad // tile

    x = _pad_last(xT, p_pad).astype(jnp.bfloat16)
    w3t = jnp.transpose(w3[:, :, 0, 0]).astype(jnp.float32)       # (C3, Cin)
    w4t = jnp.transpose(w4[:, :, 0, 0]).astype(jnp.float32)       # (C4, C3)
    w5t = jnp.transpose(w5[:, :, 0, 0]).astype(jnp.float32)       # (C5, C4)
    g3r = g3.reshape(c3, 1).astype(jnp.float32)
    b3r = b3.reshape(c3, 1).astype(jnp.float32)
    g4r = g4.reshape(c4, 1).astype(jnp.float32)
    b4r = b4.reshape(c4, 1).astype(jnp.float32)

    kernel = functools.partial(_head_kernel, n_valid=P, eps=_BN_EPS)
    out = pl.pallas_call(
        kernel,
        out_shape=jax.ShapeDtypeStruct((c5, p_pad), jnp.float32),
        grid_spec=pltpu.PrefetchScalarGridSpec(
            num_scalar_prefetch=0,
            grid=(3, n_tiles),
            in_specs=[
                pl.BlockSpec((cin, tile),
                             lambda s, m: (0, jnp.where(s == 0, m, n_tiles - 1))),
                pl.BlockSpec((c3, cin), lambda s, m: (0, 0)),
                pl.BlockSpec((c3, 1), lambda s, m: (0, 0)),
                pl.BlockSpec((c3, 1), lambda s, m: (0, 0)),
                pl.BlockSpec((c4, c3), lambda s, m: (0, 0)),
                pl.BlockSpec((c4, 1), lambda s, m: (0, 0)),
                pl.BlockSpec((c4, 1), lambda s, m: (0, 0)),
                pl.BlockSpec((c5, c4), lambda s, m: (0, 0)),
            ],
            out_specs=pl.BlockSpec((c5, tile),
                                   lambda s, m: (0, jnp.where(s == 2, m, 0))),
            scratch_shapes=[
                pltpu.VMEM((n_tiles, c3, tile), jnp.bfloat16),
                pltpu.VMEM((n_tiles, c4, tile), jnp.bfloat16),
                pltpu.VMEM((c3, 1), jnp.float32),
                pltpu.VMEM((c3, 1), jnp.float32),
                pltpu.VMEM((c4, 1), jnp.float32),
                pltpu.VMEM((c4, 1), jnp.float32),
            ],
        ),
        compiler_params=pltpu.CompilerParams(
            dimension_semantics=("arbitrary", "arbitrary"),
            vmem_limit_bytes=_VMEM_LIMIT),
    )(x, w3t, g3r, b3r, w4t, g4r, b4r, w5t)
    return out, P


# ------------------------------------------------------------------
# Generator forward + deterministic parameter init
# ------------------------------------------------------------------

def init_generator_params(key, ngf, nz):
    ks = jax.random.split(key, 5)

    def w(k, cin, cout, ksz):
        return (0.05 * jax.random.normal(k, (cin, cout, ksz, ksz))).astype(jnp.float32)

    params = {
        "w1": w(ks[0], nz,      ngf * 8, 4),
        "w2": w(ks[1], ngf * 8, ngf * 4, 4),
        "w3": w(ks[2], ngf * 4, ngf * 2, 1),
        "w4": w(ks[3], ngf * 2, ngf,     1),
        "w5": w(ks[4], ngf,     3,       1),
    }
    for i, c in zip((1, 2, 3, 4), (ngf * 8, ngf * 4, ngf * 2, ngf)):
        params[f"g{i}"] = jnp.ones((c,), jnp.float32)   # BatchNorm default gamma
        params[f"b{i}"] = jnp.zeros((c,), jnp.float32)  # BatchNorm default beta
    return params


def generator_forward(x_nchw, params):
    # Public interface is NCHW; internally everything is channel-major (C, N, H, W) /
    # phase-major transposed so the (large) pixel axis sits on the 128-lane axis.
    x = jnp.transpose(x_nchw.astype(jnp.float32), (1, 0, 2, 3))      # (nz, N, H0, W0)
    _, N, H0, W0 = x.shape

    # layer1: deconv 4x4/s2/p1 + BN + ReLU (one fused pallas_call)
    out1, M1 = deconv4x4_s2_bn_relu(x, params["w1"], params["g1"], params["b1"])
    C1 = params["w1"].shape[1]
    h1 = _phases_to_cmaj(out1[:, :, :M1], C1, N, H0, W0)             # (C1, N, 2H0, 2W0), bf16

    # layer2: deconv 4x4/s2/p1 + BN + ReLU (one fused pallas_call)
    out2, M2 = deconv4x4_s2_bn_relu(h1, params["w2"], params["g2"], params["b2"])
    C2 = params["w2"].shape[1]

    # layers 3..5 are pixelwise 1x1 convs: keep the phase-major pixel ordering, just
    # flatten to lane-dense (C, n_pix) form (no spatial interleave until the end).
    xT = jnp.transpose(out2[:, :, :M2], (1, 0, 2)).reshape(C2, 4 * M2)
    yT, P = head_1x1_layers(xT, params["w3"], params["g3"], params["b3"],
                            params["w4"], params["g4"], params["b4"], params["w5"])

    # phase-major -> NCHW image
    H1, W1 = 2 * H0, 2 * W0
    phases = jnp.transpose(yT[:, :P].reshape(3, 4, M2), (1, 0, 2))   # (4, 3, M2)
    img = _phases_to_cmaj(phases, 3, N, H1, W1)                      # (3, N, 4H0, 4W0)
    return jnp.transpose(img, (1, 0, 2, 3))                          # (N, 3, 4H0, 4W0)


if __name__ == "__main__":
    ngf, nz = 8, 8
    key = jax.random.PRNGKey(0)
    kx, kp = jax.random.split(key)

    # latent "image": (N, nz, 8, 8) -> output (N, 3, 32, 32)
    x = jax.random.normal(kx, (2, nz, 8, 8), dtype=jnp.float32)
    params = init_generator_params(kp, ngf, nz)

    out = jax.jit(generator_forward)(x, params)
    out = jax.block_until_ready(out)

    assert out.shape == (2, 3, 32, 32), out.shape
    assert bool(jnp.all(jnp.isfinite(out)))
    assert bool(jnp.all(jnp.abs(out) <= 1.0 + 1e-6))   # tanh range
    print("KERNEL_OK")
</pallas_src>

<mosaic_0001>
module attributes {stable_mosaic.version = 11 : i64} {
  func.func @_deconv_bn_relu_kernel(%arg0: i32, %arg1: i32, %arg2: memref<9x8x128xbf16, #tpu.memory_space<vmem>>, %arg3: memref<4x4x64x8xf32, #tpu.memory_space<vmem>>, %arg4: memref<64x1xf32, #tpu.memory_space<vmem>>, %arg5: memref<64x1xf32, #tpu.memory_space<vmem>>, %arg6: memref<4x64x128xbf16, #tpu.memory_space<vmem>>, %arg7: memref<4x64x128xbf16, #tpu.memory_space<vmem>>, %arg8: memref<64x1xf32, #tpu.memory_space<vmem>>, %arg9: memref<64x1xf32, #tpu.memory_space<vmem>>) attributes {dimension_semantics = [#tpu.dimension_semantics<arbitrary>, #tpu.dimension_semantics<arbitrary>], iteration_bounds = array<i64: 2, 1>, scalar_prefetch = 0 : i64, scratch_operands = 3 : i64, tpu.core_type = #tpu.core_type<tc>, window_params = [{transform_indices = @transform_0, window_bounds = array<i64: 9, 8, 128>}, {pipeline_mode = #tpu.pipeline_mode<synchronous>, transform_indices = @transform_1, window_bounds = array<i64: 4, 4, 64, 8>}, {pipeline_mode = #tpu.pipeline_mode<synchronous>, transform_indices = @transform_2, window_bounds = array<i64: 64, 1>}, {pipeline_mode = #tpu.pipeline_mode<synchronous>, transform_indices = @transform_3, window_bounds = array<i64: 64, 1>}, {transform_indices = @transform_4, window_bounds = array<i64: 4, 64, 128>}]} {
    %c0_i32 = arith.constant 0 : i32
    %0 = arith.cmpi eq, %arg0, %c0_i32 : i32
    %c0_i32_0 = arith.constant 0 : i32
    %1 = arith.cmpi eq, %arg1, %c0_i32_0 : i32
    %2 = arith.andi %0, %1 : i1
    %3 = arith.extui %2 : i1 to i32
    %c0_i32_1 = arith.constant 0 : i32
    %4 = arith.cmpi ne, %3, %c0_i32_1 : i32
    scf.if %4 {
      %cst = arith.constant 0.000000e+00 : f32
      %11 = vector.broadcast %cst : f32 to vector<64x1xf32>
      %c0 = arith.constant 0 : index
      %c0_5 = arith.constant 0 : index
      %12 = vector.load %arg8[%c0, %c0_5] : memref<64x1xf32, #tpu.memory_space<vmem>>, vector<64x1xf32>
      tpu.vector_store %arg8[%c0, %c0_5], %11 {strides = array<i32>} : memref<64x1xf32, #tpu.memory_space<vmem>>, vector<64x1xf32>,
      %cst_6 = arith.constant 0.000000e+00 : f32
      %13 = vector.broadcast %cst_6 : f32 to vector<64x1xf32>
      %c0_7 = arith.constant 0 : index
      %c0_8 = arith.constant 0 : index
      %14 = vector.load %arg9[%c0_7, %c0_8] : memref<64x1xf32, #tpu.memory_space<vmem>>, vector<64x1xf32>
      tpu.vector_store %arg9[%c0_7, %c0_8], %13 {strides = array<i32>} : memref<64x1xf32, #tpu.memory_space<vmem>>, vector<64x1xf32>,
    } else {
    }
    %c0_i32_2 = arith.constant 0 : i32
    %5 = arith.cmpi eq, %arg0, %c0_i32_2 : i32
    %6 = arith.extui %5 : i1 to i32
    %c0_i32_3 = arith.constant 0 : i32
    %7 = arith.cmpi ne, %6, %c0_i32_3 : i32
    scf.if %7 {
      %cst = arith.constant 0.000000e+00 : f32
      %11 = vector.broadcast %cst : f32 to vector<64x1xf32>
      %cst_5 = arith.constant 0.000000e+00 : f32
      %12 = vector.broadcast %cst_5 : f32 to vector<64x1xf32>
      %cst_6 = arith.constant 0.000000e+00 : f32
      %13 = vector.broadcast %cst_6 : f32 to vector<64x128xf32>
      %c0 = arith.constant 0 : index
      %c0_7 = arith.constant 0 : index
      %c0_8 = arith.constant 0 : index
      %c0_9 = arith.constant 0 : index
      %14 = vector.load %arg3[%c0, %c0_7, %c0_8, %c0_9] : memref<4x4x64x8xf32, #tpu.memory_space<vmem>>, vector<1x1x64x8xf32>
      %15 = vector.shape_cast %14 : vector<1x1x64x8xf32> to vector<64x8xf32>
      %c0_10 = arith.constant 0 : index
      %c0_11 = arith.constant 0 : index
      %c0_12 = arith.constant 0 : index
      %16 = vector.load %arg2[%c0_10, %c0_11, %c0_12] : memref<9x8x128xbf16, #tpu.memory_space<vmem>>, vector<1x8x128xbf16>
      %17 = vector.shape_cast %16 : vector<1x8x128xbf16> to vector<8x128xbf16>
      %18 = arith.extf %17 : vector<8x128xbf16> to vector<8x128xf32>
      %cst_13 = arith.constant dense<0.000000e+00> : vector<64x128xf32>
      %19 = tpu.matmul %15, %18, %cst_13 {dimension_numbers = #tpu.dot_dimension_numbers<[1], [0], [0], [1], [0, 0, 1, 1], [], []>} : vector<64x8xf32>, vector<8x128xf32>, vector<64x128xf32> -> vector<64x128xf32>
      %20 = arith.addf %13, %19 : vector<64x128xf32>
      %c0_14 = arith.constant 0 : index
      %c1 = arith.constant 1 : index
      %c0_15 = arith.constant 0 : index
      %c0_16 = arith.constant 0 : index
      %21 = vector.load %arg3[%c0_14, %c1, %c0_15, %c0_16] : memref<4x4x64x8xf32, #tpu.memory_space<vmem>>, vector<1x1x64x8xf32>
      %22 = vector.shape_cast %21 : vector<1x1x64x8xf32> to vector<64x8xf32>
      %c1_17 = arith.constant 1 : index
      %c0_18 = arith.constant 0 : index
      %c0_19 = arith.constant 0 : index
      %23 = vector.load %arg2[%c1_17, %c0_18, %c0_19] : memref<9x8x128xbf16, #tpu.memory_space<vmem>>, vector<1x8x128xbf16>
      %24 = vector.shape_cast %23 : vector<1x8x128xbf16> to vector<8x128xbf16>
      %25 = arith.extf %24 : vector<8x128xbf16> to vector<8x128xf32>
      %cst_20 = arith.constant dense<0.000000e+00> : vector<64x128xf32>
      %26 = tpu.matmul %22, %25, %cst_20 {dimension_numbers = #tpu.dot_dimension_numbers<[1], [0], [0], [1], [0, 0, 1, 1], [], []>} : vector<64x8xf32>, vector<8x128xf32>, vector<64x128xf32> -> vector<64x128xf32>
      %27 = arith.addf %20, %26 : vector<64x128xf32>
      %c0_21 = arith.constant 0 : index
      %c2 = arith.constant 2 : index
      %c0_22 = arith.constant 0 : index
      %c0_23 = arith.constant 0 : index
      %28 = vector.load %arg3[%c0_21, %c2, %c0_22, %c0_23] : memref<4x4x64x8xf32, #tpu.memory_space<vmem>>, vector<1x1x64x8xf32>
      %29 = vector.shape_cast %28 : vector<1x1x64x8xf32> to vector<64x8xf32>
      %c3 = arith.constant 3 : index
      %c0_24 = arith.constant 0 : index
      %c0_25 = arith.constant 0 : index
      %30 = vector.load %arg2[%c3, %c0_24, %c0_25] : memref<9x8x128xbf16, #tpu.memory_space<vmem>>, vector<1x8x128xbf16>
      %31 = vector.shape_cast %30 : vector<1x8x128xbf16> to vector<8x128xbf16>
      %32 = arith.extf %31 : vector<8x128xbf16> to vector<8x128xf32>
      %cst_26 = arith.constant dense<0.000000e+00> : vector<64x128xf32>
      %33 = tpu.matmul %29, %32, %cst_26 {dimension_numbers = #tpu.dot_dimension_numbers<[1], [0], [0], [1], [0, 0, 1, 1], [], []>} : vector<64x8xf32>, vector<8x128xf32>, vector<64x128xf32> -> vector<64x128xf32>
      %34 = arith.addf %27, %33 : vector<64x128xf32>
      %c0_27 = arith.constant 0 : index
      %c3_28 = arith.constant 3 : index
      %c0_29 = arith.constant 0 : index
      %c0_30 = arith.constant 0 : index
      %35 = vector.load %arg3[%c0_27, %c3_28, %c0_29, %c0_30] : memref<4x4x64x8xf32, #tpu.memory_space<vmem>>, vector<1x1x64x8xf32>
      %36 = vector.shape_cast %35 : vector<1x1x64x8xf32> to vector<64x8xf32>
      %c4 = arith.constant 4 : index
      %c0_31 = arith.constant 0 : index
      %c0_32 = arith.constant 0 : index
      %37 = vector.load %arg2[%c4, %c0_31, %c0_32] : memref<9x8x128xbf16, #tpu.memory_space<vmem>>, vector<1x8x128xbf16>
      %38 = vector.shape_cast %37 : vector<1x8x128xbf16> to vector<8x128xbf16>
      %39 = arith.extf %38 : vector<8x128xbf16> to vector<8x128xf32>
      %cst_33 = arith.constant dense<0.000000e+00> : vector<64x128xf32>
      %40 = tpu.matmul %36, %39, %cst_33 {dimension_numbers = #tpu.dot_dimension_numbers<[1], [0], [0], [1], [0, 0, 1, 1], [], []>} : vector<64x8xf32>, vector<8x128xf32>, vector<64x128xf32> -> vector<64x128xf32>
      %41 = arith.addf %34, %40 : vector<64x128xf32>
      %cst_34 = arith.constant dense<0.000000e+00> : vector<64xf32>
      %42 = vector.multi_reduction <add>, %41, %cst_34 [1] : vector<64x128xf32> to vector<64xf32>
      %43 = vector.shape_cast %42 : vector<64xf32> to vector<64x1xf32>
      %44 = arith.addf %11, %43 : vector<64x1xf32>
      %45 = arith.mulf %41, %41 : vector<64x128xf32>
      %cst_35 = arith.constant dense<0.000000e+00> : vector<64xf32>
      %46 = vector.multi_reduction <add>, %45, %cst_35 [1] : vector<64x128xf32> to vector<64xf32>
      %47 = vector.shape_cast %46 : vector<64xf32> to vector<64x1xf32>
      %48 = arith.addf %12, %47 : vector<64x1xf32>
      %49 = arith.truncf %41 : vector<64x128xf32> to vector<64x128xbf16>
      %c4_i32 = arith.constant 4 : i32
      %50 = arith.muli %arg1, %c4_i32 : i32
      %c0_i32_36 = arith.constant 0 : i32
      %51 = arith.addi %50, %c0_i32_36 : i32
      %52 = arith.index_cast %51 : i32 to index
      %c0_37 = arith.constant 0 : index
      %c0_38 = arith.constant 0 : index
      %53 = vector.load %arg7[%52, %c0_37, %c0_38] : memref<4x64x128xbf16, #tpu.memory_space<vmem>>, vector<1x64x128xbf16>
      %54 = vector.shape_cast %53 : vector<1x64x128xbf16> to vector<64x128xbf16>
      %55 = vector.shape_cast %49 : vector<64x128xbf16> to vector<1x64x128xbf16>
      tpu.vector_store %arg7[%52, %c0_37, %c0_38], %55 {strides = array<i32>} : memref<4x64x128xbf16, #tpu.memory_space<vmem>>, vector<1x64x128xbf16>,
      %cst_39 = arith.constant 0.000000e+00 : f32
      %56 = vector.broadcast %cst_39 : f32 to vector<64x128xf32>
      %c1_40 = arith.constant 1 : index
      %c0_41 = arith.constant 0 : index
      %c0_42 = arith.constant 0 : index
      %c0_43 = arith.constant 0 : index
      %57 = vector.load %arg3[%c1_40, %c0_41, %c0_42, %c0_43] : memref<4x4x64x8xf32, #tpu.memory_space<vmem>>, vector<1x1x64x8xf32>
      %58 = vector.shape_cast %57 : vector<1x1x64x8xf32> to vector<64x8xf32>
      %c1_44 = arith.constant 1 : index
      %c0_45 = arith.constant 0 : index
      %c0_46 = arith.constant 0 : index
      %59 = vector.load %arg2[%c1_44, %c0_45, %c0_46] : memref<9x8x128xbf16, #tpu.memory_space<vmem>>, vector<1x8x128xbf16>
      %60 = vector.shape_cast %59 : vector<1x8x128xbf16> to vector<8x128xbf16>
      %61 = arith.extf %60 : vector<8x128xbf16> to vector<8x128xf32>
      %cst_47 = arith.constant dense<0.000000e+00> : vector<64x128xf32>
      %62 = tpu.matmul %58, %61, %cst_47 {dimension_numbers = #tpu.dot_dimension_numbers<[1], [0], [0], [1], [0, 0, 1, 1], [], []>} : vector<64x8xf32>, vector<8x128xf32>, vector<64x128xf32> -> vector<64x128xf32>
      %63 = arith.addf %56, %62 : vector<64x128xf32>
      %c1_48 = arith.constant 1 : index
      %c1_49 = arith.constant 1 : index
      %c0_50 = arith.constant 0 : index
      %c0_51 = arith.constant 0 : index
      %64 = vector.load %arg3[%c1_48, %c1_49, %c0_50, %c0_51] : memref<4x4x64x8xf32, #tpu.memory_space<vmem>>, vector<1x1x64x8xf32>
      %65 = vector.shape_cast %64 : vector<1x1x64x8xf32> to vector<64x8xf32>
      %c2_52 = arith.constant 2 : index
      %c0_53 = arith.constant 0 : index
      %c0_54 = arith.constant 0 : index
      %66 = vector.load %arg2[%c2_52, %c0_53, %c0_54] : memref<9x8x128xbf16, #tpu.memory_space<vmem>>, vector<1x8x128xbf16>
      %67 = vector.shape_cast %66 : vector<1x8x128xbf16> to vector<8x128xbf16>
      %68 = arith.extf %67 : vector<8x128xbf16> to vector<8x128xf32>
      %cst_55 = arith.constant dense<0.000000e+00> : vector<64x128xf32>
      %69 = tpu.matmul %65, %68, %cst_55 {dimension_numbers = #tpu.dot_dimension_numbers<[1], [0], [0], [1], [0, 0, 1, 1], [], []>} : vector<64x8xf32>, vector<8x128xf32>, vector<64x128xf32> -> vector<64x128xf32>
      %70 = arith.addf %63, %69 : vector<64x128xf32>
      %c1_56 = arith.constant 1 : index
      %c2_57 = arith.constant 2 : index
      %c0_58 = arith.constant 0 : index
      %c0_59 = arith.constant 0 : index
      %71 = vector.load %arg3[%c1_56, %c2_57, %c0_58, %c0_59] : memref<4x4x64x8xf32, #tpu.memory_space<vmem>>, vector<1x1x64x8xf32>
      %72 = vector.shape_cast %71 : vector<1x1x64x8xf32> to vector<64x8xf32>
      %c4_60 = arith.constant 4 : index
      %c0_61 = arith.constant 0 : index
      %c0_62 = arith.constant 0 : index
      %73 = vector.load %arg2[%c4_60, %c0_61, %c0_62] : memref<9x8x128xbf16, #tpu.memory_space<vmem>>, vector<1x8x128xbf16>
      %74 = vector.shape_cast %73 : vector<1x8x128xbf16> to vector<8x128xbf16>
      %75 = arith.extf %74 : vector<8x128xbf16> to vector<8x128xf32>
      %cst_63 = arith.constant dense<0.000000e+00> : vector<64x128xf32>
      %76 = tpu.matmul %72, %75, %cst_63 {dimension_numbers = #tpu.dot_dimension_numbers<[1], [0], [0], [1], [0, 0, 1, 1], [], []>} : vector<64x8xf32>, vector<8x128xf32>, vector<64x128xf32> -> vector<64x128xf32>
      %77 = arith.addf %70, %76 : vector<64x128xf32>
      %c1_64 = arith.constant 1 : index
      %c3_65 = arith.constant 3 : index
      %c0_66 = arith.constant 0 : index
      %c0_67 = arith.constant 0 : index
      %78 = vector.load %arg3[%c1_64, %c3_65, %c0_66, %c0_67] : memref<4x4x64x8xf32, #tpu.memory_space<vmem>>, vector<1x1x64x8xf32>
      %79 = vector.shape_cast %78 : vector<1x1x64x8xf32> to vector<64x8xf32>
      %c5 = arith.constant 5 : index
      %c0_68 = arith.constant 0 : index
      %c0_69 = arith.constant 0 : index
      %80 = vector.load %arg2[%c5, %c0_68, %c0_69] : memref<9x8x128xbf16, #tpu.memory_space<vmem>>, vector<1x8x128xbf16>
      %81 = vector.shape_cast %80 : vector<1x8x128xbf16> to vector<8x128xbf16>
      %82 = arith.extf %81 : vector<8x128xbf16> to vector<8x128xf32>
      %cst_70 = arith.constant dense<0.000000e+00> : vector<64x128xf32>
      %83 = tpu.matmul %79, %82, %cst_70 {dimension_numbers = #tpu.dot_dimension_numbers<[1], [0], [0], [1], [0, 0, 1, 1], [], []>} : vector<64x8xf32>, vector<8x128xf32>, vector<64x128xf32> -> vector<64x128xf32>
      %84 = arith.addf %77, %83 : vector<64x128xf32>
      %cst_71 = arith.constant dense<0.000000e+00> : vector<64xf32>
      %85 = vector.multi_reduction <add>, %84, %cst_71 [1] : vector<64x128xf32> to vector<64xf32>
      %86 = vector.shape_cast %85 : vector<64xf32> to vector<64x1xf32>
      %87 = arith.addf %44, %86 : vector<64x1xf32>
      %88 = arith.mulf %84, %84 : vector<64x128xf32>
      %cst_72 = arith.constant dense<0.000000e+00> : vector<64xf32>
      %89 = vector.multi_reduction <add>, %88, %cst_72 [1] : vector<64x128xf32> to vector<64xf32>
      %90 = vector.shape_cast %89 : vector<64xf32> to vector<64x1xf32>
      %91 = arith.addf %48, %90 : vector<64x1xf32>
      %92 = arith.truncf %84 : vector<64x128xf32> to vector<64x128xbf16>
      %c4_i32_73 = arith.constant 4 : i32
      %93 = arith.muli %arg1, %c4_i32_73 : i32
      %c1_i32_74 = arith.constant 1 : i32
      %94 = arith.addi %93, %c1_i32_74 : i32
      %95 = arith.index_cast %94 : i32 to index
      %c0_75 = arith.constant 0 : index
      %c0_76 = arith.constant 0 : index
      %96 = vector.load %arg7[%95, %c0_75, %c0_76] : memref<4x64x128xbf16, #tpu.memory_space<vmem>>, vector<1x64x128xbf16>
      %97 = vector.shape_cast %96 : vector<1x64x128xbf16> to vector<64x128xbf16>
      %98 = vector.shape_cast %92 : vector<64x128xbf16> to vector<1x64x128xbf16>
      tpu.vector_store %arg7[%95, %c0_75, %c0_76], %98 {strides = array<i32>} : memref<4x64x128xbf16, #tpu.memory_space<vmem>>, vector<1x64x128xbf16>,
      %cst_77 = arith.constant 0.000000e+00 : f32
      %99 = vector.broadcast %cst_77 : f32 to vector<64x128xf32>
      %c2_78 = arith.constant 2 : index
      %c0_79 = arith.constant 0 : index
      %c0_80 = arith.constant 0 : index
      %c0_81 = arith.constant 0 : index
      %100 = vector.load %arg3[%c2_78, %c0_79, %c0_80, %c0_81] : memref<4x4x64x8xf32, #tpu.memory_space<vmem>>, vector<1x1x64x8xf32>
      %101 = vector.shape_cast %100 : vector<1x1x64x8xf32> to vector<64x8xf32>
      %c3_82 = arith.constant 3 : index
      %c0_83 = arith.constant 0 : index
      %c0_84 = arith.constant 0 : index
      %102 = vector.load %arg2[%c3_82, %c0_83, %c0_84] : memref<9x8x128xbf16, #tpu.memory_space<vmem>>, vector<1x8x128xbf16>
      %103 = vector.shape_cast %102 : vector<1x8x128xbf16> to vector<8x128xbf16>
      %104 = arith.extf %103 : vector<8x128xbf16> to vector<8x128xf32>
      %cst_85 = arith.constant dense<0.000000e+00> : vector<64x128xf32>
      %105 = tpu.matmul %101, %104, %cst_85 {dimension_numbers = #tpu.dot_dimension_numbers<[1], [0], [0], [1], [0, 0, 1, 1], [], []>} : vector<64x8xf32>, vector<8x128xf32>, vector<64x128xf32> -> vector<64x128xf32>
      %106 = arith.addf %99, %105 : vector<64x128xf32>
      %c2_86 = arith.constant 2 : index
      %c1_87 = arith.constant 1 : index
      %c0_88 = arith.constant 0 : index
      %c0_89 = arith.constant 0 : index
      %107 = vector.load %arg3[%c2_86, %c1_87, %c0_88, %c0_89] : memref<4x4x64x8xf32, #tpu.memory_space<vmem>>, vector<1x1x64x8xf32>
      %108 = vector.shape_cast %107 : vector<1x1x64x8xf32> to vector<64x8xf32>
      %c4_90 = arith.constant 4 : index
      %c0_91 = arith.constant 0 : index
      %c0_92 = arith.constant 0 : index
      %109 = vector.load %arg2[%c4_90, %c0_91, %c0_92] : memref<9x8x128xbf16, #tpu.memory_space<vmem>>, vector<1x8x128xbf16>
      %110 = vector.shape_cast %109 : vector<1x8x128xbf16> to vector<8x128xbf16>
      %111 = arith.extf %110 : vector<8x128xbf16> to vector<8x128xf32>
      %cst_93 = arith.constant dense<0.000000e+00> : vector<64x128xf32>
      %112 = tpu.matmul %108, %111, %cst_93 {dimension_numbers = #tpu.dot_dimension_numbers<[1], [0], [0], [1], [0, 0, 1, 1], [], []>} : vector<64x8xf32>, vector<8x128xf32>, vector<64x128xf32> -> vector<64x128xf32>
      %113 = arith.addf %106, %112 : vector<64x128xf32>
      %c2_94 = arith.constant 2 : index
      %c2_95 = arith.constant 2 : index
      %c0_96 = arith.constant 0 : index
      %c0_97 = arith.constant 0 : index
      %114 = vector.load %arg3[%c2_94, %c2_95, %c0_96, %c0_97] : memref<4x4x64x8xf32, #tpu.memory_space<vmem>>, vector<1x1x64x8xf32>
      %115 = vector.shape_cast %114 : vector<1x1x64x8xf32> to vector<64x8xf32>
      %c6 = arith.constant 6 : index
      %c0_98 = arith.constant 0 : index
      %c0_99 = arith.constant 0 : index
      %116 = vector.load %arg2[%c6, %c0_98, %c0_99] : memref<9x8x128xbf16, #tpu.memory_space<vmem>>, vector<1x8x128xbf16>
      %117 = vector.shape_cast %116 : vector<1x8x128xbf16> to vector<8x128xbf16>
      %118 = arith.extf %117 : vector<8x128xbf16> to vector<8x128xf32>
      %cst_100 = arith.constant dense<0.000000e+00> : vector<64x128xf32>
      %119 = tpu.matmul %115, %118, %cst_100 {dimension_numbers = #tpu.dot_dimension_numbers<[1], [0], [0], [1], [0, 0, 1, 1], [], []>} : vector<64x8xf32>, vector<8x128xf32>, vector<64x128xf32> -> vector<64x128xf32>
      %120 = arith.addf %113, %119 : vector<64x128xf32>
      %c2_101 = arith.constant 2 : index
      %c3_102 = arith.constant 3 : index
      %c0_103 = arith.constant 0 : index
      %c0_104 = arith.constant 0 : index
      %121 = vector.load %arg3[%c2_101, %c3_102, %c0_103, %c0_104] : memref<4x4x64x8xf32, #tpu.memory_space<vmem>>, vector<1x1x64x8xf32>
      %122 = vector.shape_cast %121 : vector<1x1x64x8xf32> to vector<64x8xf32>
      %c7 = arith.constant 7 : index
      %c0_105 = arith.constant 0 : index
      %c0_106 = arith.constant 0 : index
      %123 = vector.load %arg2[%c7, %c0_105, %c0_106] : memref<9x8x128xbf16, #tpu.memory_space<vmem>>, vector<1x8x128xbf16>
      %124 = vector.shape_cast %123 : vector<1x8x128xbf16> to vector<8x128xbf16>
      %125 = arith.extf %124 : vector<8x128xbf16> to vector<8x128xf32>
      %cst_107 = arith.constant dense<0.000000e+00> : vector<64x128xf32>
      %126 = tpu.matmul %122, %125, %cst_107 {dimension_numbers = #tpu.dot_dimension_numbers<[1], [0], [0], [1], [0, 0, 1, 1], [], []>} : vector<64x8xf32>, vector<8x128xf32>, vector<64x128xf32> -> vector<64x128xf32>
      %127 = arith.addf %120, %126 : vector<64x128xf32>
      %cst_108 = arith.constant dense<0.000000e+00> : vector<64xf32>
      %128 = vector.multi_reduction <add>, %127, %cst_108 [1] : vector<64x128xf32> to vector<64xf32>
      %129 = vector.shape_cast %128 : vector<64xf32> to vector<64x1xf32>
      %130 = arith.addf %87, %129 : vector<64x1xf32>
      %131 = arith.mulf %127, %127 : vector<64x128xf32>
      %cst_109 = arith.constant dense<0.000000e+00> : vector<64xf32>
      %132 = vector.multi_reduction <add>, %131, %cst_109 [1] : vector<64x128xf32> to vector<64xf32>
      %133 = vector.shape_cast %132 : vector<64xf32> to vector<64x1xf32>
      %134 = arith.addf %91, %133 : vector<64x1xf32>
      %135 = arith.truncf %127 : vector<64x128xf32> to vector<64x128xbf16>
      %c4_i32_110 = arith.constant 4 : i32
      %136 = arith.muli %arg1, %c4_i32_110 : i32
      %c2_i32 = arith.constant 2 : i32
      %137 = arith.addi %136, %c2_i32 : i32
      %138 = arith.index_cast %137 : i32 to index
      %c0_111 = arith.constant 0 : index
      %c0_112 = arith.constant 0 : index
      %139 = vector.load %arg7[%138, %c0_111, %c0_112] : memref<4x64x128xbf16, #tpu.memory_space<vmem>>, vector<1x64x128xbf16>
      %140 = vector.shape_cast %139 : vector<1x64x128xbf16> to vector<64x128xbf16>
      %141 = vector.shape_cast %135 : vector<64x128xbf16> to vector<1x64x128xbf16>
      tpu.vector_store %arg7[%138, %c0_111, %c0_112], %141 {strides = array<i32>} : memref<4x64x128xbf16, #tpu.memory_space<vmem>>, vector<1x64x128xbf16>,
      %cst_113 = arith.constant 0.000000e+00 : f32
      %142 = vector.broadcast %cst_113 : f32 to vector<64x128xf32>
      %c3_114 = arith.constant 3 : index
      %c0_115 = arith.constant 0 : index
      %c0_116 = arith.constant 0 : index
      %c0_117 = arith.constant 0 : index
      %143 = vector.load %arg3[%c3_114, %c0_115, %c0_116, %c0_117] : memref<4x4x64x8xf32, #tpu.memory_space<vmem>>, vector<1x1x64x8xf32>
      %144 = vector.shape_cast %143 : vector<1x1x64x8xf32> to vector<64x8xf32>
      %c4_118 = arith.constant 4 : index
      %c0_119 = arith.constant 0 : index
      %c0_120 = arith.constant 0 : index
      %145 = vector.load %arg2[%c4_118, %c0_119, %c0_120] : memref<9x8x128xbf16, #tpu.memory_space<vmem>>, vector<1x8x128xbf16>
      %146 = vector.shape_cast %145 : vector<1x8x128xbf16> to vector<8x128xbf16>
      %147 = arith.extf %146 : vector<8x128xbf16> to vector<8x128xf32>
      %cst_121 = arith.constant dense<0.000000e+00> : vector<64x128xf32>
      %148 = tpu.matmul %144, %147, %cst_121 {dimension_numbers = #tpu.dot_dimension_numbers<[1], [0], [0], [1], [0, 0, 1, 1], [], []>} : vector<64x8xf32>, vector<8x128xf32>, vector<64x128xf32> -> vector<64x128xf32>
      %149 = arith.addf %142, %148 : vector<64x128xf32>
      %c3_122 = arith.constant 3 : index
      %c1_123 = arith.constant 1 : index
      %c0_124 = arith.constant 0 : index
      %c0_125 = arith.constant 0 : index
      %150 = vector.load %arg3[%c3_122, %c1_123, %c0_124, %c0_125] : memref<4x4x64x8xf32, #tpu.memory_space<vmem>>, vector<1x1x64x8xf32>
      %151 = vector.shape_cast %150 : vector<1x1x64x8xf32> to vector<64x8xf32>
      %c5_126 = arith.constant 5 : index
      %c0_127 = arith.constant 0 : index
      %c0_128 = arith.constant 0 : index
      %152 = vector.load %arg2[%c5_126, %c0_127, %c0_128] : memref<9x8x128xbf16, #tpu.memory_space<vmem>>, vector<1x8x128xbf16>
      %153 = vector.shape_cast %152 : vector<1x8x128xbf16> to vector<8x128xbf16>
      %154 = arith.extf %153 : vector<8x128xbf16> to vector<8x128xf32>
      %cst_129 = arith.constant dense<0.000000e+00> : vector<64x128xf32>
      %155 = tpu.matmul %151, %154, %cst_129 {dimension_numbers = #tpu.dot_dimension_numbers<[1], [0], [0], [1], [0, 0, 1, 1], [], []>} : vector<64x8xf32>, vector<8x128xf32>, vector<64x128xf32> -> vector<64x128xf32>
      %156 = arith.addf %149, %155 : vector<64x128xf32>
      %c3_130 = arith.constant 3 : index
      %c2_131 = arith.constant 2 : index
      %c0_132 = arith.constant 0 : index
      %c0_133 = arith.constant 0 : index
      %157 = vector.load %arg3[%c3_130, %c2_131, %c0_132, %c0_133] : memref<4x4x64x8xf32, #tpu.memory_space<vmem>>, vector<1x1x64x8xf32>
      %158 = vector.shape_cast %157 : vector<1x1x64x8xf32> to vector<64x8xf32>
      %c7_134 = arith.constant 7 : index
      %c0_135 = arith.constant 0 : index
      %c0_136 = arith.constant 0 : index
      %159 = vector.load %arg2[%c7_134, %c0_135, %c0_136] : memref<9x8x128xbf16, #tpu.memory_space<vmem>>, vector<1x8x128xbf16>
      %160 = vector.shape_cast %159 : vector<1x8x128xbf16> to vector<8x128xbf16>
      %161 = arith.extf %160 : vector<8x128xbf16> to vector<8x128xf32>
      %cst_137 = arith.constant dense<0.000000e+00> : vector<64x128xf32>
      %162 = tpu.matmul %158, %161, %cst_137 {dimension_numbers = #tpu.dot_dimension_numbers<[1], [0], [0], [1], [0, 0, 1, 1], [], []>} : vector<64x8xf32>, vector<8x128xf32>, vector<64x128xf32> -> vector<64x128xf32>
      %163 = arith.addf %156, %162 : vector<64x128xf32>
      %c3_138 = arith.constant 3 : index
      %c3_139 = arith.constant 3 : index
      %c0_140 = arith.constant 0 : index
      %c0_141 = arith.constant 0 : index
      %164 = vector.load %arg3[%c3_138, %c3_139, %c0_140, %c0_141] : memref<4x4x64x8xf32, #tpu.memory_space<vmem>>, vector<1x1x64x8xf32>
      %165 = vector.shape_cast %164 : vector<1x1x64x8xf32> to vector<64x8xf32>
      %c8 = arith.constant 8 : index
      %c0_142 = arith.constant 0 : index
      %c0_143 = arith.constant 0 : index
      %166 = vector.load %arg2[%c8, %c0_142, %c0_143] : memref<9x8x128xbf16, #tpu.memory_space<vmem>>, vector<1x8x128xbf16>
      %167 = vector.shape_cast %166 : vector<1x8x128xbf16> to vector<8x128xbf16>
      %168 = arith.extf %167 : vector<8x128xbf16> to vector<8x128xf32>
      %cst_144 = arith.constant dense<0.000000e+00> : vector<64x128xf32>
      %169 = tpu.matmul %165, %168, %cst_144 {dimension_numbers = #tpu.dot_dimension_numbers<[1], [0], [0], [1], [0, 0, 1, 1], [], []>} : vector<64x8xf32>, vector<8x128xf32>, vector<64x128xf32> -> vector<64x128xf32>
      %170 = arith.addf %163, %169 : vector<64x128xf32>
      %cst_145 = arith.constant dense<0.000000e+00> : vector<64xf32>
      %171 = vector.multi_reduction <add>, %170, %cst_145 [1] : vector<64x128xf32> to vector<64xf32>
      %172 = vector.shape_cast %171 : vector<64xf32> to vector<64x1xf32>
      %173 = arith.addf %130, %172 : vector<64x1xf32>
      %174 = arith.mulf %170, %170 : vector<64x128xf32>
      %cst_146 = arith.constant dense<0.000000e+00> : vector<64xf32>
      %175 = vector.multi_reduction <add>, %174, %cst_146 [1] : vector<64x128xf32> to vector<64xf32>
      %176 = vector.shape_cast %175 : vector<64xf32> to vector<64x1xf32>
      %177 = arith.addf %134, %176 : vector<64x1xf32>
      %178 = arith.truncf %170 : vector<64x128xf32> to vector<64x128xbf16>
      %c4_i32_147 = arith.constant 4 : i32
      %179 = arith.muli %arg1, %c4_i32_147 : i32
      %c3_i32 = arith.constant 3 : i32
      %180 = arith.addi %179, %c3_i32 : i32
      %181 = arith.index_cast %180 : i32 to index
      %c0_148 = arith.constant 0 : index
      %c0_149 = arith.constant 0 : index
      %182 = vector.load %arg7[%181, %c0_148, %c0_149] : memref<4x64x128xbf16, #tpu.memory_space<vmem>>, vector<1x64x128xbf16>
      %183 = vector.shape_cast %182 : vector<1x64x128xbf16> to vector<64x128xbf16>
      %184 = vector.shape_cast %178 : vector<64x128xbf16> to vector<1x64x128xbf16>
      tpu.vector_store %arg7[%181, %c0_148, %c0_149], %184 {strides = array<i32>} : memref<4x64x128xbf16, #tpu.memory_space<vmem>>, vector<1x64x128xbf16>,
      %c0_150 = arith.constant 0 : index
      %c0_151 = arith.constant 0 : index
      %185 = vector.load %arg8[%c0_150, %c0_151] : memref<64x1xf32, #tpu.memory_space<vmem>>, vector<64x1xf32>
      %186 = arith.addf %185, %173 : vector<64x1xf32>
      %c0_152 = arith.constant 0 : index
      %c0_153 = arith.constant 0 : index
      %187 = vector.load %arg8[%c0_152, %c0_153] : memref<64x1xf32, #tpu.memory_space<vmem>>, vector<64x1xf32>
      tpu.vector_store %arg8[%c0_152, %c0_153], %186 {strides = array<i32>} : memref<64x1xf32, #tpu.memory_space<vmem>>, vector<64x1xf32>,
      %c0_154 = arith.constant 0 : index
      %c0_155 = arith.constant 0 : index
      %188 = vector.load %arg9[%c0_154, %c0_155] : memref<64x1xf32, #tpu.memory_space<vmem>>, vector<64x1xf32>
      %189 = arith.addf %188, %177 : vector<64x1xf32>
      %c0_156 = arith.constant 0 : index
      %c0_157 = arith.constant 0 : index
      %190 = vector.load %arg9[%c0_156, %c0_157] : memref<64x1xf32, #tpu.memory_space<vmem>>, vector<64x1xf32>
      tpu.vector_store %arg9[%c0_156, %c0_157], %189 {strides = array<i32>} : memref<64x1xf32, #tpu.memory_space<vmem>>, vector<64x1xf32>,
    } else {
    }
    %c1_i32 = arith.constant 1 : i32
    %8 = arith.cmpi eq, %arg0, %c1_i32 : i32
    %9 = arith.extui %8 : i1 to i32
    %c0_i32_4 = arith.constant 0 : i32
    %10 = arith.cmpi ne, %9, %c0_i32_4 : i32
    scf.if %10 {
      %c0 = arith.constant 0 : index
      %c0_5 = arith.constant 0 : index
      %11 = vector.load %arg8[%c0, %c0_5] : memref<64x1xf32, #tpu.memory_space<vmem>>, vector<64x1xf32>
      %cst = arith.constant 5.120000e+02 : f32
      %12 = vector.broadcast %cst : f32 to vector<64x1xf32>
      %13 = arith.divf %11, %12 : vector<64x1xf32>
      %c0_6 = arith.constant 0 : index
      %c0_7 = arith.constant 0 : index
      %14 = vector.load %arg9[%c0_6, %c0_7] : memref<64x1xf32, #tpu.memory_space<vmem>>, vector<64x1xf32>
      %cst_8 = arith.constant 5.120000e+02 : f32
      %15 = vector.broadcast %cst_8 : f32 to vector<64x1xf32>
      %16 = arith.divf %14, %15 : vector<64x1xf32>
      %17 = arith.mulf %13, %13 : vector<64x1xf32>
      %18 = arith.subf %16, %17 : vector<64x1xf32>
      %cst_9 = arith.constant 0.000000e+00 : f32
      %19 = vector.broadcast %cst_9 : f32 to vector<64x1xf32>
      %20 = arith.maximumf %18, %19 : vector<64x1xf32>
      %c0_10 = arith.constant 0 : index
      %c0_11 = arith.constant 0 : index
      %21 = vector.load %arg4[%c0_10, %c0_11] : memref<64x1xf32, #tpu.memory_space<vmem>>, vector<64x1xf32>
      %cst_12 = arith.constant 9.99999974E-6 : f32
      %22 = vector.broadcast %cst_12 : f32 to vector<64x1xf32>
      %23 = arith.addf %20, %22 : vector<64x1xf32>
      %24 = math.rsqrt %23 : vector<64x1xf32>
      %25 = arith.mulf %21, %24 : vector<64x1xf32>
      %c0_13 = arith.constant 0 : index
      %c0_14 = arith.constant 0 : index
      %26 = vector.load %arg5[%c0_13, %c0_14] : memref<64x1xf32, #tpu.memory_space<vmem>>, vector<64x1xf32>
      %27 = arith.mulf %13, %25 : vector<64x1xf32>
      %28 = arith.subf %26, %27 : vector<64x1xf32>
      %29 = vector.shape_cast %25 : vector<64x1xf32> to vector<64x1xf32>
      %30 = vector.broadcast %29 : vector<64x1xf32> to vector<64x128xf32>
      %31 = vector.shape_cast %28 : vector<64x1xf32> to vector<64x1xf32>
      %32 = vector.broadcast %31 : vector<64x1xf32> to vector<64x128xf32>
      %c4_i32 = arith.constant 4 : i32
      %33 = arith.muli %arg1, %c4_i32 : i32
      %c0_i32_15 = arith.constant 0 : i32
      %34 = arith.addi %33, %c0_i32_15 : i32
      %35 = arith.index_cast %34 : i32 to index
      %c0_16 = arith.constant 0 : index
      %c0_17 = arith.constant 0 : index
      %36 = vector.load %arg7[%35, %c0_16, %c0_17] : memref<4x64x128xbf16, #tpu.memory_space<vmem>>, vector<1x64x128xbf16>
      %37 = vector.shape_cast %36 : vector<1x64x128xbf16> to vector<64x128xbf16>
      %38 = arith.extf %37 : vector<64x128xbf16> to vector<64x128xf32>
      %39 = arith.mulf %38, %30 : vector<64x128xf32>
      %40 = arith.addf %39, %32 : vector<64x128xf32>
      %cst_18 = arith.constant 0.000000e+00 : f32
      %41 = vector.broadcast %cst_18 : f32 to vector<64x128xf32>
      %42 = arith.maximumf %40, %41 : vector<64x128xf32>
      %43 = arith.truncf %42 : vector<64x128xf32> to vector<64x128xbf16>
      %c0_19 = arith.constant 0 : index
      %c0_20 = arith.constant 0 : index
      %c0_21 = arith.constant 0 : index
      %44 = vector.load %arg6[%c0_19, %c0_20, %c0_21] : memref<4x64x128xbf16, #tpu.memory_space<vmem>>, vector<1x64x128xbf16>
      %45 = vector.shape_cast %44 : vector<1x64x128xbf16> to vector<64x128xbf16>
      %46 = vector.shape_cast %43 : vector<64x128xbf16> to vector<1x64x128xbf16>
      tpu.vector_store %arg6[%c0_19, %c0_20, %c0_21], %46 {strides = array<i32>} : memref<4x64x128xbf16, #tpu.memory_space<vmem>>, vector<1x64x128xbf16>,
      %c4_i32_22 = arith.constant 4 : i32
      %47 = arith.muli %arg1, %c4_i32_22 : i32
      %c1_i32_23 = arith.constant 1 : i32
      %48 = arith.addi %47, %c1_i32_23 : i32
      %49 = arith.index_cast %48 : i32 to index
      %c0_24 = arith.constant 0 : index
      %c0_25 = arith.constant 0 : index
      %50 = vector.load %arg7[%49, %c0_24, %c0_25] : memref<4x64x128xbf16, #tpu.memory_space<vmem>>, vector<1x64x128xbf16>
      %51 = vector.shape_cast %50 : vector<1x64x128xbf16> to vector<64x128xbf16>
      %52 = arith.extf %51 : vector<64x128xbf16> to vector<64x128xf32>
      %53 = arith.mulf %52, %30 : vector<64x128xf32>
      %54 = arith.addf %53, %32 : vector<64x128xf32>
      %cst_26 = arith.constant 0.000000e+00 : f32
      %55 = vector.broadcast %cst_26 : f32 to vector<64x128xf32>
      %56 = arith.maximumf %54, %55 : vector<64x128xf32>
      %57 = arith.truncf %56 : vector<64x128xf32> to vector<64x128xbf16>
      %c1 = arith.constant 1 : index
      %c0_27 = arith.constant 0 : index
      %c0_28 = arith.constant 0 : index
      %58 = vector.load %arg6[%c1, %c0_27, %c0_28] : memref<4x64x128xbf16, #tpu.memory_space<vmem>>, vector<1x64x128xbf16>
      %59 = vector.shape_cast %58 : vector<1x64x128xbf16> to vector<64x128xbf16>
      %60 = vector.shape_cast %57 : vector<64x128xbf16> to vector<1x64x128xbf16>
      tpu.vector_store %arg6[%c1, %c0_27, %c0_28], %60 {strides = array<i32>} : memref<4x64x128xbf16, #tpu.memory_space<vmem>>, vector<1x64x128xbf16>,
      %c4_i32_29 = arith.constant 4 : i32
      %61 = arith.muli %arg1, %c4_i32_29 : i32
      %c2_i32 = arith.constant 2 : i32
      %62 = arith.addi %61, %c2_i32 : i32
      %63 = arith.index_cast %62 : i32 to index
      %c0_30 = arith.constant 0 : index
      %c0_31 = arith.constant 0 : index
      %64 = vector.load %arg7[%63, %c0_30, %c0_31] : memref<4x64x128xbf16, #tpu.memory_space<vmem>>, vector<1x64x128xbf16>
      %65 = vector.shape_cast %64 : vector<1x64x128xbf16> to vector<64x128xbf16>
      %66 = arith.extf %65 : vector<64x128xbf16> to vector<64x128xf32>
      %67 = arith.mulf %66, %30 : vector<64x128xf32>
      %68 = arith.addf %67, %32 : vector<64x128xf32>
      %cst_32 = arith.constant 0.000000e+00 : f32
      %69 = vector.broadcast %cst_32 : f32 to vector<64x128xf32>
      %70 = arith.maximumf %68, %69 : vector<64x128xf32>
      %71 = arith.truncf %70 : vector<64x128xf32> to vector<64x128xbf16>
      %c2 = arith.constant 2 : index
      %c0_33 = arith.constant 0 : index
      %c0_34 = arith.constant 0 : index
      %72 = vector.load %arg6[%c2, %c0_33, %c0_34] : memref<4x64x128xbf16, #tpu.memory_space<vmem>>, vector<1x64x128xbf16>
      %73 = vector.shape_cast %72 : vector<1x64x128xbf16> to vector<64x128xbf16>
      %74 = vector.shape_cast %71 : vector<64x128xbf16> to vector<1x64x128xbf16>
      tpu.vector_store %arg6[%c2, %c0_33, %c0_34], %74 {strides = array<i32>} : memref<4x64x128xbf16, #tpu.memory_space<vmem>>, vector<1x64x128xbf16>,
      %c4_i32_35 = arith.constant 4 : i32
      %75 = arith.muli %arg1, %c4_i32_35 : i32
      %c3_i32 = arith.constant 3 : i32
      %76 = arith.addi %75, %c3_i32 : i32
      %77 = arith.index_cast %76 : i32 to index
      %c0_36 = arith.constant 0 : index
      %c0_37 = arith.constant 0 : index
      %78 = vector.load %arg7[%77, %c0_36, %c0_37] : memref<4x64x128xbf16, #tpu.memory_space<vmem>>, vector<1x64x128xbf16>
      %79 = vector.shape_cast %78 : vector<1x64x128xbf16> to vector<64x128xbf16>
      %80 = arith.extf %79 : vector<64x128xbf16> to vector<64x128xf32>
      %81 = arith.mulf %80, %30 : vector<64x128xf32>
      %82 = arith.addf %81, %32 : vector<64x128xf32>
      %cst_38 = arith.constant 0.000000e+00 : f32
      %83 = vector.broadcast %cst_38 : f32 to vector<64x128xf32>
      %84 = arith.maximumf %82, %83 : vector<64x128xf32>
      %85 = arith.truncf %84 : vector<64x128xf32> to vector<64x128xbf16>
      %c3 = arith.constant 3 : index
      %c0_39 = arith.constant 0 : index
      %c0_40 = arith.constant 0 : index
      %86 = vector.load %arg6[%c3, %c0_39, %c0_40] : memref<4x64x128xbf16, #tpu.memory_space<vmem>>, vector<1x64x128xbf16>
      %87 = vector.shape_cast %86 : vector<1x64x128xbf16> to vector<64x128xbf16>
      %88 = vector.shape_cast %85 : vector<64x128xbf16> to vector<1x64x128xbf16>
      tpu.vector_store %arg6[%c3, %c0_39, %c0_40], %88 {strides = array<i32>} : memref<4x64x128xbf16, #tpu.memory_space<vmem>>, vector<1x64x128xbf16>,
    } else {
    }
    return
  }
  func.func @transform_0(%arg0: i32, %arg1: i32) -> (i32, i32, i32) {
    %c0_i32 = arith.constant 0 : i32
    %0 = arith.cmpi eq, %arg0, %c0_i32 : i32
    %c0_i32_0 = arith.constant 0 : i32
    %1 = arith.select %0, %arg1, %c0_i32_0 : i32
    %c0_i32_1 = arith.constant 0 : i32
    %c0_i32_2 = arith.constant 0 : i32
    %c0_i32_3 = arith.constant 0 : i32
    return %c0_i32_1, %c0_i32_2, %1 : i32, i32, i32
  }
  func.func @transform_1(%arg0: i32, %arg1: i32) -> (i32, i32, i32, i32) {
    %c0_i32 = arith.constant 0 : i32
    %c0_i32_0 = arith.constant 0 : i32
    %c0_i32_1 = arith.constant 0 : i32
    %c0_i32_2 = arith.constant 0 : i32
    %c0_i32_3 = arith.constant 0 : i32
    return %c0_i32, %c0_i32_0, %c0_i32_1, %c0_i32_2 : i32, i32, i32, i32
  }
  func.func @transform_2(%arg0: i32, %arg1: i32) -> (i32, i32) {
    %c0_i32 = arith.constant 0 : i32
    %c0_i32_0 = arith.constant 0 : i32
    %c0_i32_1 = arith.constant 0 : i32
    return %c0_i32, %c0_i32_0 : i32, i32
  }
  func.func @transform_3(%arg0: i32, %arg1: i32) -> (i32, i32) {
    %c0_i32 = arith.constant 0 : i32
    %c0_i32_0 = arith.constant 0 : i32
    %c0_i32_1 = arith.constant 0 : i32
    return %c0_i32, %c0_i32_0 : i32, i32
  }
  func.func @transform_4(%arg0: i32, %arg1: i32) -> (i32, i32, i32) {
    %c1_i32 = arith.constant 1 : i32
    %0 = arith.cmpi eq, %arg0, %c1_i32 : i32
    %c0_i32 = arith.constant 0 : i32
    %1 = arith.select %0, %arg1, %c0_i32 : i32
    %c0_i32_0 = arith.constant 0 : i32
    %c0_i32_1 = arith.constant 0 : i32
    %c0_i32_2 = arith.constant 0 : i32
    return %c0_i32_0, %c0_i32_1, %1 : i32, i32, i32
  }
}

module attributes {stable_mosaic.version = 11 : i64} {
  func.func @_deconv_bn_relu_kernel(%arg0: i32, %arg1: i32, %arg2: memref<9x64x512xbf16, #tpu.memory_space<vmem>>, %arg3: memref<4x4x32x64xf32, #tpu.memory_space<vmem>>, %arg4: memref<32x1xf32, #tpu.memory_space<vmem>>, %arg5: memref<32x1xf32, #tpu.memory_space<vmem>>, %arg6: memref<4x32x512xbf16, #tpu.memory_space<vmem>>, %arg7: memref<4x32x512xbf16, #tpu.memory_space<vmem>>, %arg8: memref<32x1xf32, #tpu.memory_space<vmem>>, %arg9: memref<32x1xf32, #tpu.memory_space<vmem>>) attributes {dimension_semantics = [#tpu.dimension_semantics<arbitrary>, #tpu.dimension_semantics<arbitrary>], iteration_bounds = array<i64: 2, 1>, scalar_prefetch = 0 : i64, scratch_operands = 3 : i64, tpu.core_type = #tpu.core_type<tc>, window_params = [{transform_indices = @transform_0, window_bounds = array<i64: 9, 64, 512>}, {pipeline_mode = #tpu.pipeline_mode<synchronous>, transform_indices = @transform_1, window_bounds = array<i64: 4, 4, 32, 64>}, {pipeline_mode = #tpu.pipeline_mode<synchronous>, transform_indices = @transform_2, window_bounds = array<i64: 32, 1>}, {pipeline_mode = #tpu.pipeline_mode<synchronous>, transform_indices = @transform_3, window_bounds = array<i64: 32, 1>}, {transform_indices = @transform_4, window_bounds = array<i64: 4, 32, 512>}]} {
    %c0_i32 = arith.constant 0 : i32
    %0 = arith.cmpi eq, %arg0, %c0_i32 : i32
    %c0_i32_0 = arith.constant 0 : i32
    %1 = arith.cmpi eq, %arg1, %c0_i32_0 : i32
    %2 = arith.andi %0, %1 : i1
    %3 = arith.extui %2 : i1 to i32
    %c0_i32_1 = arith.constant 0 : i32
    %4 = arith.cmpi ne, %3, %c0_i32_1 : i32
    scf.if %4 {
      %cst = arith.constant 0.000000e+00 : f32
      %11 = vector.broadcast %cst : f32 to vector<32x1xf32>
      %c0 = arith.constant 0 : index
      %c0_5 = arith.constant 0 : index
      %12 = vector.load %arg8[%c0, %c0_5] : memref<32x1xf32, #tpu.memory_space<vmem>>, vector<32x1xf32>
      tpu.vector_store %arg8[%c0, %c0_5], %11 {strides = array<i32>} : memref<32x1xf32, #tpu.memory_space<vmem>>, vector<32x1xf32>,
      %cst_6 = arith.constant 0.000000e+00 : f32
      %13 = vector.broadcast %cst_6 : f32 to vector<32x1xf32>
      %c0_7 = arith.constant 0 : index
      %c0_8 = arith.constant 0 : index
      %14 = vector.load %arg9[%c0_7, %c0_8] : memref<32x1xf32, #tpu.memory_space<vmem>>, vector<32x1xf32>
      tpu.vector_store %arg9[%c0_7, %c0_8], %13 {strides = array<i32>} : memref<32x1xf32, #tpu.memory_space<vmem>>, vector<32x1xf32>,
    } else {
    }
    %c0_i32_2 = arith.constant 0 : i32
    %5 = arith.cmpi eq, %arg0, %c0_i32_2 : i32
    %6 = arith.extui %5 : i1 to i32
    %c0_i32_3 = arith.constant 0 : i32
    %7 = arith.cmpi ne, %6, %c0_i32_3 : i32
    scf.if %7 {
      %cst = arith.constant 0.000000e+00 : f32
      %11 = vector.broadcast %cst : f32 to vector<32x1xf32>
      %cst_5 = arith.constant 0.000000e+00 : f32
      %12 = vector.broadcast %cst_5 : f32 to vector<32x1xf32>
      %cst_6 = arith.constant 0.000000e+00 : f32
      %13 = vector.broadcast %cst_6 : f32 to vector<32x512xf32>
      %c0 = arith.constant 0 : index
      %c0_7 = arith.constant 0 : index
      %c0_8 = arith.constant 0 : index
      %c0_9 = arith.constant 0 : index
      %14 = vector.load %arg3[%c0, %c0_7, %c0_8, %c0_9] : memref<4x4x32x64xf32, #tpu.memory_space<vmem>>, vector<1x1x32x64xf32>
      %15 = vector.shape_cast %14 : vector<1x1x32x64xf32> to vector<32x64xf32>
      %c0_10 = arith.constant 0 : index
      %c0_11 = arith.constant 0 : index
      %c0_12 = arith.constant 0 : index
      %16 = vector.load %arg2[%c0_10, %c0_11, %c0_12] : memref<9x64x512xbf16, #tpu.memory_space<vmem>>, vector<1x64x512xbf16>
      %17 = vector.shape_cast %16 : vector<1x64x512xbf16> to vector<64x512xbf16>
      %18 = arith.extf %17 : vector<64x512xbf16> to vector<64x512xf32>
      %cst_13 = arith.constant dense<0.000000e+00> : vector<32x512xf32>
      %19 = tpu.matmul %15, %18, %cst_13 {dimension_numbers = #tpu.dot_dimension_numbers<[1], [0], [0], [1], [0, 0, 1, 1], [], []>} : vector<32x64xf32>, vector<64x512xf32>, vector<32x512xf32> -> vector<32x512xf32>
      %20 = arith.addf %13, %19 : vector<32x512xf32>
      %c0_14 = arith.constant 0 : index
      %c1 = arith.constant 1 : index
      %c0_15 = arith.constant 0 : index
      %c0_16 = arith.constant 0 : index
      %21 = vector.load %arg3[%c0_14, %c1, %c0_15, %c0_16] : memref<4x4x32x64xf32, #tpu.memory_space<vmem>>, vector<1x1x32x64xf32>
      %22 = vector.shape_cast %21 : vector<1x1x32x64xf32> to vector<32x64xf32>
      %c1_17 = arith.constant 1 : index
      %c0_18 = arith.constant 0 : index
      %c0_19 = arith.constant 0 : index
      %23 = vector.load %arg2[%c1_17, %c0_18, %c0_19] : memref<9x64x512xbf16, #tpu.memory_space<vmem>>, vector<1x64x512xbf16>
      %24 = vector.shape_cast %23 : vector<1x64x512xbf16> to vector<64x512xbf16>
      %25 = arith.extf %24 : vector<64x512xbf16> to vector<64x512xf32>
      %cst_20 = arith.constant dense<0.000000e+00> : vector<32x512xf32>
      %26 = tpu.matmul %22, %25, %cst_20 {dimension_numbers = #tpu.dot_dimension_numbers<[1], [0], [0], [1], [0, 0, 1, 1], [], []>} : vector<32x64xf32>, vector<64x512xf32>, vector<32x512xf32> -> vector<32x512xf32>
      %27 = arith.addf %20, %26 : vector<32x512xf32>
      %c0_21 = arith.constant 0 : index
      %c2 = arith.constant 2 : index
      %c0_22 = arith.constant 0 : index
      %c0_23 = arith.constant 0 : index
      %28 = vector.load %arg3[%c0_21, %c2, %c0_22, %c0_23] : memref<4x4x32x64xf32, #tpu.memory_space<vmem>>, vector<1x1x32x64xf32>
      %29 = vector.shape_cast %28 : vector<1x1x32x64xf32> to vector<32x64xf32>
      %c3 = arith.constant 3 : index
      %c0_24 = arith.constant 0 : index
      %c0_25 = arith.constant 0 : index
      %30 = vector.load %arg2[%c3, %c0_24, %c0_25] : memref<9x64x512xbf16, #tpu.memory_space<vmem>>, vector<1x64x512xbf16>
      %31 = vector.shape_cast %30 : vector<1x64x512xbf16> to vector<64x512xbf16>
      %32 = arith.extf %31 : vector<64x512xbf16> to vector<64x512xf32>
      %cst_26 = arith.constant dense<0.000000e+00> : vector<32x512xf32>
      %33 = tpu.matmul %29, %32, %cst_26 {dimension_numbers = #tpu.dot_dimension_numbers<[1], [0], [0], [1], [0, 0, 1, 1], [], []>} : vector<32x64xf32>, vector<64x512xf32>, vector<32x512xf32> -> vector<32x512xf32>
      %34 = arith.addf %27, %33 : vector<32x512xf32>
      %c0_27 = arith.constant 0 : index
      %c3_28 = arith.constant 3 : index
      %c0_29 = arith.constant 0 : index
      %c0_30 = arith.constant 0 : index
      %35 = vector.load %arg3[%c0_27, %c3_28, %c0_29, %c0_30] : memref<4x4x32x64xf32, #tpu.memory_space<vmem>>, vector<1x1x32x64xf32>
      %36 = vector.shape_cast %35 : vector<1x1x32x64xf32> to vector<32x64xf32>
      %c4 = arith.constant 4 : index
      %c0_31 = arith.constant 0 : index
      %c0_32 = arith.constant 0 : index
      %37 = vector.load %arg2[%c4, %c0_31, %c0_32] : memref<9x64x512xbf16, #tpu.memory_space<vmem>>, vector<1x64x512xbf16>
      %38 = vector.shape_cast %37 : vector<1x64x512xbf16> to vector<64x512xbf16>
      %39 = arith.extf %38 : vector<64x512xbf16> to vector<64x512xf32>
      %cst_33 = arith.constant dense<0.000000e+00> : vector<32x512xf32>
      %40 = tpu.matmul %36, %39, %cst_33 {dimension_numbers = #tpu.dot_dimension_numbers<[1], [0], [0], [1], [0, 0, 1, 1], [], []>} : vector<32x64xf32>, vector<64x512xf32>, vector<32x512xf32> -> vector<32x512xf32>
      %41 = arith.addf %34, %40 : vector<32x512xf32>
      %cst_34 = arith.constant dense<0.000000e+00> : vector<32xf32>
      %42 = vector.multi_reduction <add>, %41, %cst_34 [1] : vector<32x512xf32> to vector<32xf32>
      %43 = vector.shape_cast %42 : vector<32xf32> to vector<32x1xf32>
      %44 = arith.addf %11, %43 : vector<32x1xf32>
      %45 = arith.mulf %41, %41 : vector<32x512xf32>
      %cst_35 = arith.constant dense<0.000000e+00> : vector<32xf32>
      %46 = vector.multi_reduction <add>, %45, %cst_35 [1] : vector<32x512xf32> to vector<32xf32>
      %47 = vector.shape_cast %46 : vector<32xf32> to vector<32x1xf32>
      %48 = arith.addf %12, %47 : vector<32x1xf32>
      %49 = arith.truncf %41 : vector<32x512xf32> to vector<32x512xbf16>
      %c4_i32 = arith.constant 4 : i32
      %50 = arith.muli %arg1, %c4_i32 : i32
      %c0_i32_36 = arith.constant 0 : i32
      %51 = arith.addi %50, %c0_i32_36 : i32
      %52 = arith.index_cast %51 : i32 to index
      %c0_37 = arith.constant 0 : index
      %c0_38 = arith.constant 0 : index
      %53 = vector.load %arg7[%52, %c0_37, %c0_38] : memref<4x32x512xbf16, #tpu.memory_space<vmem>>, vector<1x32x512xbf16>
      %54 = vector.shape_cast %53 : vector<1x32x512xbf16> to vector<32x512xbf16>
      %55 = vector.shape_cast %49 : vector<32x512xbf16> to vector<1x32x512xbf16>
      tpu.vector_store %arg7[%52, %c0_37, %c0_38], %55 {strides = array<i32>} : memref<4x32x512xbf16, #tpu.memory_space<vmem>>, vector<1x32x512xbf16>,
      %cst_39 = arith.constant 0.000000e+00 : f32
      %56 = vector.broadcast %cst_39 : f32 to vector<32x512xf32>
      %c1_40 = arith.constant 1 : index
      %c0_41 = arith.constant 0 : index
      %c0_42 = arith.constant 0 : index
      %c0_43 = arith.constant 0 : index
      %57 = vector.load %arg3[%c1_40, %c0_41, %c0_42, %c0_43] : memref<4x4x32x64xf32, #tpu.memory_space<vmem>>, vector<1x1x32x64xf32>
      %58 = vector.shape_cast %57 : vector<1x1x32x64xf32> to vector<32x64xf32>
      %c1_44 = arith.constant 1 : index
      %c0_45 = arith.constant 0 : index
      %c0_46 = arith.constant 0 : index
      %59 = vector.load %arg2[%c1_44, %c0_45, %c0_46] : memref<9x64x512xbf16, #tpu.memory_space<vmem>>, vector<1x64x512xbf16>
      %60 = vector.shape_cast %59 : vector<1x64x512xbf16> to vector<64x512xbf16>
      %61 = arith.extf %60 : vector<64x512xbf16> to vector<64x512xf32>
      %cst_47 = arith.constant dense<0.000000e+00> : vector<32x512xf32>
      %62 = tpu.matmul %58, %61, %cst_47 {dimension_numbers = #tpu.dot_dimension_numbers<[1], [0], [0], [1], [0, 0, 1, 1], [], []>} : vector<32x64xf32>, vector<64x512xf32>, vector<32x512xf32> -> vector<32x512xf32>
      %63 = arith.addf %56, %62 : vector<32x512xf32>
      %c1_48 = arith.constant 1 : index
      %c1_49 = arith.constant 1 : index
      %c0_50 = arith.constant 0 : index
      %c0_51 = arith.constant 0 : index
      %64 = vector.load %arg3[%c1_48, %c1_49, %c0_50, %c0_51] : memref<4x4x32x64xf32, #tpu.memory_space<vmem>>, vector<1x1x32x64xf32>
      %65 = vector.shape_cast %64 : vector<1x1x32x64xf32> to vector<32x64xf32>
      %c2_52 = arith.constant 2 : index
      %c0_53 = arith.constant 0 : index
      %c0_54 = arith.constant 0 : index
      %66 = vector.load %arg2[%c2_52, %c0_53, %c0_54] : memref<9x64x512xbf16, #tpu.memory_space<vmem>>, vector<1x64x512xbf16>
      %67 = vector.shape_cast %66 : vector<1x64x512xbf16> to vector<64x512xbf16>
      %68 = arith.extf %67 : vector<64x512xbf16> to vector<64x512xf32>
      %cst_55 = arith.constant dense<0.000000e+00> : vector<32x512xf32>
      %69 = tpu.matmul %65, %68, %cst_55 {dimension_numbers = #tpu.dot_dimension_numbers<[1], [0], [0], [1], [0, 0, 1, 1], [], []>} : vector<32x64xf32>, vector<64x512xf32>, vector<32x512xf32> -> vector<32x512xf32>
      %70 = arith.addf %63, %69 : vector<32x512xf32>
      %c1_56 = arith.constant 1 : index
      %c2_57 = arith.constant 2 : index
      %c0_58 = arith.constant 0 : index
      %c0_59 = arith.constant 0 : index
      %71 = vector.load %arg3[%c1_56, %c2_57, %c0_58, %c0_59] : memref<4x4x32x64xf32, #tpu.memory_space<vmem>>, vector<1x1x32x64xf32>
      %72 = vector.shape_cast %71 : vector<1x1x32x64xf32> to vector<32x64xf32>
      %c4_60 = arith.constant 4 : index
      %c0_61 = arith.constant 0 : index
      %c0_62 = arith.constant 0 : index
      %73 = vector.load %arg2[%c4_60, %c0_61, %c0_62] : memref<9x64x512xbf16, #tpu.memory_space<vmem>>, vector<1x64x512xbf16>
      %74 = vector.shape_cast %73 : vector<1x64x512xbf16> to vector<64x512xbf16>
      %75 = arith.extf %74 : vector<64x512xbf16> to vector<64x512xf32>
      %cst_63 = arith.constant dense<0.000000e+00> : vector<32x512xf32>
      %76 = tpu.matmul %72, %75, %cst_63 {dimension_numbers = #tpu.dot_dimension_numbers<[1], [0], [0], [1], [0, 0, 1, 1], [], []>} : vector<32x64xf32>, vector<64x512xf32>, vector<32x512xf32> -> vector<32x512xf32>
      %77 = arith.addf %70, %76 : vector<32x512xf32>
      %c1_64 = arith.constant 1 : index
      %c3_65 = arith.constant 3 : index
      %c0_66 = arith.constant 0 : index
      %c0_67 = arith.constant 0 : index
      %78 = vector.load %arg3[%c1_64, %c3_65, %c0_66, %c0_67] : memref<4x4x32x64xf32, #tpu.memory_space<vmem>>, vector<1x1x32x64xf32>
      %79 = vector.shape_cast %78 : vector<1x1x32x64xf32> to vector<32x64xf32>
      %c5 = arith.constant 5 : index
      %c0_68 = arith.constant 0 : index
      %c0_69 = arith.constant 0 : index
      %80 = vector.load %arg2[%c5, %c0_68, %c0_69] : memref<9x64x512xbf16, #tpu.memory_space<vmem>>, vector<1x64x512xbf16>
      %81 = vector.shape_cast %80 : vector<1x64x512xbf16> to vector<64x512xbf16>
      %82 = arith.extf %81 : vector<64x512xbf16> to vector<64x512xf32>
      %cst_70 = arith.constant dense<0.000000e+00> : vector<32x512xf32>
      %83 = tpu.matmul %79, %82, %cst_70 {dimension_numbers = #tpu.dot_dimension_numbers<[1], [0], [0], [1], [0, 0, 1, 1], [], []>} : vector<32x64xf32>, vector<64x512xf32>, vector<32x512xf32> -> vector<32x512xf32>
      %84 = arith.addf %77, %83 : vector<32x512xf32>
      %cst_71 = arith.constant dense<0.000000e+00> : vector<32xf32>
      %85 = vector.multi_reduction <add>, %84, %cst_71 [1] : vector<32x512xf32> to vector<32xf32>
      %86 = vector.shape_cast %85 : vector<32xf32> to vector<32x1xf32>
      %87 = arith.addf %44, %86 : vector<32x1xf32>
      %88 = arith.mulf %84, %84 : vector<32x512xf32>
      %cst_72 = arith.constant dense<0.000000e+00> : vector<32xf32>
      %89 = vector.multi_reduction <add>, %88, %cst_72 [1] : vector<32x512xf32> to vector<32xf32>
      %90 = vector.shape_cast %89 : vector<32xf32> to vector<32x1xf32>
      %91 = arith.addf %48, %90 : vector<32x1xf32>
      %92 = arith.truncf %84 : vector<32x512xf32> to vector<32x512xbf16>
      %c4_i32_73 = arith.constant 4 : i32
      %93 = arith.muli %arg1, %c4_i32_73 : i32
      %c1_i32_74 = arith.constant 1 : i32
      %94 = arith.addi %93, %c1_i32_74 : i32
      %95 = arith.index_cast %94 : i32 to index
      %c0_75 = arith.constant 0 : index
      %c0_76 = arith.constant 0 : index
      %96 = vector.load %arg7[%95, %c0_75, %c0_76] : memref<4x32x512xbf16, #tpu.memory_space<vmem>>, vector<1x32x512xbf16>
      %97 = vector.shape_cast %96 : vector<1x32x512xbf16> to vector<32x512xbf16>
      %98 = vector.shape_cast %92 : vector<32x512xbf16> to vector<1x32x512xbf16>
      tpu.vector_store %arg7[%95, %c0_75, %c0_76], %98 {strides = array<i32>} : memref<4x32x512xbf16, #tpu.memory_space<vmem>>, vector<1x32x512xbf16>,
      %cst_77 = arith.constant 0.000000e+00 : f32
      %99 = vector.broadcast %cst_77 : f32 to vector<32x512xf32>
      %c2_78 = arith.constant 2 : index
      %c0_79 = arith.constant 0 : index
      %c0_80 = arith.constant 0 : index
      %c0_81 = arith.constant 0 : index
      %100 = vector.load %arg3[%c2_78, %c0_79, %c0_80, %c0_81] : memref<4x4x32x64xf32, #tpu.memory_space<vmem>>, vector<1x1x32x64xf32>
      %101 = vector.shape_cast %100 : vector<1x1x32x64xf32> to vector<32x64xf32>
      %c3_82 = arith.constant 3 : index
      %c0_83 = arith.constant 0 : index
      %c0_84 = arith.constant 0 : index
      %102 = vector.load %arg2[%c3_82, %c0_83, %c0_84] : memref<9x64x512xbf16, #tpu.memory_space<vmem>>, vector<1x64x512xbf16>
      %103 = vector.shape_cast %102 : vector<1x64x512xbf16> to vector<64x512xbf16>
      %104 = arith.extf %103 : vector<64x512xbf16> to vector<64x512xf32>
      %cst_85 = arith.constant dense<0.000000e+00> : vector<32x512xf32>
      %105 = tpu.matmul %101, %104, %cst_85 {dimension_numbers = #tpu.dot_dimension_numbers<[1], [0], [0], [1], [0, 0, 1, 1], [], []>} : vector<32x64xf32>, vector<64x512xf32>, vector<32x512xf32> -> vector<32x512xf32>
      %106 = arith.addf %99, %105 : vector<32x512xf32>
      %c2_86 = arith.constant 2 : index
      %c1_87 = arith.constant 1 : index
      %c0_88 = arith.constant 0 : index
      %c0_89 = arith.constant 0 : index
      %107 = vector.load %arg3[%c2_86, %c1_87, %c0_88, %c0_89] : memref<4x4x32x64xf32, #tpu.memory_space<vmem>>, vector<1x1x32x64xf32>
      %108 = vector.shape_cast %107 : vector<1x1x32x64xf32> to vector<32x64xf32>
      %c4_90 = arith.constant 4 : index
      %c0_91 = arith.constant 0 : index
      %c0_92 = arith.constant 0 : index
      %109 = vector.load %arg2[%c4_90, %c0_91, %c0_92] : memref<9x64x512xbf16, #tpu.memory_space<vmem>>, vector<1x64x512xbf16>
      %110 = vector.shape_cast %109 : vector<1x64x512xbf16> to vector<64x512xbf16>
      %111 = arith.extf %110 : vector<64x512xbf16> to vector<64x512xf32>
      %cst_93 = arith.constant dense<0.000000e+00> : vector<32x512xf32>
      %112 = tpu.matmul %108, %111, %cst_93 {dimension_numbers = #tpu.dot_dimension_numbers<[1], [0], [0], [1], [0, 0, 1, 1], [], []>} : vector<32x64xf32>, vector<64x512xf32>, vector<32x512xf32> -> vector<32x512xf32>
      %113 = arith.addf %106, %112 : vector<32x512xf32>
      %c2_94 = arith.constant 2 : index
      %c2_95 = arith.constant 2 : index
      %c0_96 = arith.constant 0 : index
      %c0_97 = arith.constant 0 : index
      %114 = vector.load %arg3[%c2_94, %c2_95, %c0_96, %c0_97] : memref<4x4x32x64xf32, #tpu.memory_space<vmem>>, vector<1x1x32x64xf32>
      %115 = vector.shape_cast %114 : vector<1x1x32x64xf32> to vector<32x64xf32>
      %c6 = arith.constant 6 : index
      %c0_98 = arith.constant 0 : index
      %c0_99 = arith.constant 0 : index
      %116 = vector.load %arg2[%c6, %c0_98, %c0_99] : memref<9x64x512xbf16, #tpu.memory_space<vmem>>, vector<1x64x512xbf16>
      %117 = vector.shape_cast %116 : vector<1x64x512xbf16> to vector<64x512xbf16>
      %118 = arith.extf %117 : vector<64x512xbf16> to vector<64x512xf32>
      %cst_100 = arith.constant dense<0.000000e+00> : vector<32x512xf32>
      %119 = tpu.matmul %115, %118, %cst_100 {dimension_numbers = #tpu.dot_dimension_numbers<[1], [0], [0], [1], [0, 0, 1, 1], [], []>} : vector<32x64xf32>, vector<64x512xf32>, vector<32x512xf32> -> vector<32x512xf32>
      %120 = arith.addf %113, %119 : vector<32x512xf32>
      %c2_101 = arith.constant 2 : index
      %c3_102 = arith.constant 3 : index
      %c0_103 = arith.constant 0 : index
      %c0_104 = arith.constant 0 : index
      %121 = vector.load %arg3[%c2_101, %c3_102, %c0_103, %c0_104] : memref<4x4x32x64xf32, #tpu.memory_space<vmem>>, vector<1x1x32x64xf32>
      %122 = vector.shape_cast %121 : vector<1x1x32x64xf32> to vector<32x64xf32>
      %c7 = arith.constant 7 : index
      %c0_105 = arith.constant 0 : index
      %c0_106 = arith.constant 0 : index
      %123 = vector.load %arg2[%c7, %c0_105, %c0_106] : memref<9x64x512xbf16, #tpu.memory_space<vmem>>, vector<1x64x512xbf16>
      %124 = vector.shape_cast %123 : vector<1x64x512xbf16> to vector<64x512xbf16>
      %125 = arith.extf %124 : vector<64x512xbf16> to vector<64x512xf32>
      %cst_107 = arith.constant dense<0.000000e+00> : vector<32x512xf32>
      %126 = tpu.matmul %122, %125, %cst_107 {dimension_numbers = #tpu.dot_dimension_numbers<[1], [0], [0], [1], [0, 0, 1, 1], [], []>} : vector<32x64xf32>, vector<64x512xf32>, vector<32x512xf32> -> vector<32x512xf32>
      %127 = arith.addf %120, %126 : vector<32x512xf32>
      %cst_108 = arith.constant dense<0.000000e+00> : vector<32xf32>
      %128 = vector.multi_reduction <add>, %127, %cst_108 [1] : vector<32x512xf32> to vector<32xf32>
      %129 = vector.shape_cast %128 : vector<32xf32> to vector<32x1xf32>
      %130 = arith.addf %87, %129 : vector<32x1xf32>
      %131 = arith.mulf %127, %127 : vector<32x512xf32>
      %cst_109 = arith.constant dense<0.000000e+00> : vector<32xf32>
      %132 = vector.multi_reduction <add>, %131, %cst_109 [1] : vector<32x512xf32> to vector<32xf32>
      %133 = vector.shape_cast %132 : vector<32xf32> to vector<32x1xf32>
      %134 = arith.addf %91, %133 : vector<32x1xf32>
      %135 = arith.truncf %127 : vector<32x512xf32> to vector<32x512xbf16>
      %c4_i32_110 = arith.constant 4 : i32
      %136 = arith.muli %arg1, %c4_i32_110 : i32
      %c2_i32 = arith.constant 2 : i32
      %137 = arith.addi %136, %c2_i32 : i32
      %138 = arith.index_cast %137 : i32 to index
      %c0_111 = arith.constant 0 : index
      %c0_112 = arith.constant 0 : index
      %139 = vector.load %arg7[%138, %c0_111, %c0_112] : memref<4x32x512xbf16, #tpu.memory_space<vmem>>, vector<1x32x512xbf16>
      %140 = vector.shape_cast %139 : vector<1x32x512xbf16> to vector<32x512xbf16>
      %141 = vector.shape_cast %135 : vector<32x512xbf16> to vector<1x32x512xbf16>
      tpu.vector_store %arg7[%138, %c0_111, %c0_112], %141 {strides = array<i32>} : memref<4x32x512xbf16, #tpu.memory_space<vmem>>, vector<1x32x512xbf16>,
      %cst_113 = arith.constant 0.000000e+00 : f32
      %142 = vector.broadcast %cst_113 : f32 to vector<32x512xf32>
      %c3_114 = arith.constant 3 : index
      %c0_115 = arith.constant 0 : index
      %c0_116 = arith.constant 0 : index
      %c0_117 = arith.constant 0 : index
      %143 = vector.load %arg3[%c3_114, %c0_115, %c0_116, %c0_117] : memref<4x4x32x64xf32, #tpu.memory_space<vmem>>, vector<1x1x32x64xf32>
      %144 = vector.shape_cast %143 : vector<1x1x32x64xf32> to vector<32x64xf32>
      %c4_118 = arith.constant 4 : index
      %c0_119 = arith.constant 0 : index
      %c0_120 = arith.constant 0 : index
      %145 = vector.load %arg2[%c4_118, %c0_119, %c0_120] : memref<9x64x512xbf16, #tpu.memory_space<vmem>>, vector<1x64x512xbf16>
      %146 = vector.shape_cast %145 : vector<1x64x512xbf16> to vector<64x512xbf16>
      %147 = arith.extf %146 : vector<64x512xbf16> to vector<64x512xf32>
      %cst_121 = arith.constant dense<0.000000e+00> : vector<32x512xf32>
      %148 = tpu.matmul %144, %147, %cst_121 {dimension_numbers = #tpu.dot_dimension_numbers<[1], [0], [0], [1], [0, 0, 1, 1], [], []>} : vector<32x64xf32>, vector<64x512xf32>, vector<32x512xf32> -> vector<32x512xf32>
      %149 = arith.addf %142, %148 : vector<32x512xf32>
      %c3_122 = arith.constant 3 : index
      %c1_123 = arith.constant 1 : index
      %c0_124 = arith.constant 0 : index
      %c0_125 = arith.constant 0 : index
      %150 = vector.load %arg3[%c3_122, %c1_123, %c0_124, %c0_125] : memref<4x4x32x64xf32, #tpu.memory_space<vmem>>, vector<1x1x32x64xf32>
      %151 = vector.shape_cast %150 : vector<1x1x32x64xf32> to vector<32x64xf32>
      %c5_126 = arith.constant 5 : index
      %c0_127 = arith.constant 0 : index
      %c0_128 = arith.constant 0 : index
      %152 = vector.load %arg2[%c5_126, %c0_127, %c0_128] : memref<9x64x512xbf16, #tpu.memory_space<vmem>>, vector<1x64x512xbf16>
      %153 = vector.shape_cast %152 : vector<1x64x512xbf16> to vector<64x512xbf16>
      %154 = arith.extf %153 : vector<64x512xbf16> to vector<64x512xf32>
      %cst_129 = arith.constant dense<0.000000e+00> : vector<32x512xf32>
      %155 = tpu.matmul %151, %154, %cst_129 {dimension_numbers = #tpu.dot_dimension_numbers<[1], [0], [0], [1], [0, 0, 1, 1], [], []>} : vector<32x64xf32>, vector<64x512xf32>, vector<32x512xf32> -> vector<32x512xf32>
      %156 = arith.addf %149, %155 : vector<32x512xf32>
      %c3_130 = arith.constant 3 : index
      %c2_131 = arith.constant 2 : index
      %c0_132 = arith.constant 0 : index
      %c0_133 = arith.constant 0 : index
      %157 = vector.load %arg3[%c3_130, %c2_131, %c0_132, %c0_133] : memref<4x4x32x64xf32, #tpu.memory_space<vmem>>, vector<1x1x32x64xf32>
      %158 = vector.shape_cast %157 : vector<1x1x32x64xf32> to vector<32x64xf32>
      %c7_134 = arith.constant 7 : index
      %c0_135 = arith.constant 0 : index
      %c0_136 = arith.constant 0 : index
      %159 = vector.load %arg2[%c7_134, %c0_135, %c0_136] : memref<9x64x512xbf16, #tpu.memory_space<vmem>>, vector<1x64x512xbf16>
      %160 = vector.shape_cast %159 : vector<1x64x512xbf16> to vector<64x512xbf16>
      %161 = arith.extf %160 : vector<64x512xbf16> to vector<64x512xf32>
      %cst_137 = arith.constant dense<0.000000e+00> : vector<32x512xf32>
      %162 = tpu.matmul %158, %161, %cst_137 {dimension_numbers = #tpu.dot_dimension_numbers<[1], [0], [0], [1], [0, 0, 1, 1], [], []>} : vector<32x64xf32>, vector<64x512xf32>, vector<32x512xf32> -> vector<32x512xf32>
      %163 = arith.addf %156, %162 : vector<32x512xf32>
      %c3_138 = arith.constant 3 : index
      %c3_139 = arith.constant 3 : index
      %c0_140 = arith.constant 0 : index
      %c0_141 = arith.constant 0 : index
      %164 = vector.load %arg3[%c3_138, %c3_139, %c0_140, %c0_141] : memref<4x4x32x64xf32, #tpu.memory_space<vmem>>, vector<1x1x32x64xf32>
      %165 = vector.shape_cast %164 : vector<1x1x32x64xf32> to vector<32x64xf32>
      %c8 = arith.constant 8 : index
      %c0_142 = arith.constant 0 : index
      %c0_143 = arith.constant 0 : index
      %166 = vector.load %arg2[%c8, %c0_142, %c0_143] : memref<9x64x512xbf16, #tpu.memory_space<vmem>>, vector<1x64x512xbf16>
      %167 = vector.shape_cast %166 : vector<1x64x512xbf16> to vector<64x512xbf16>
      %168 = arith.extf %167 : vector<64x512xbf16> to vector<64x512xf32>
      %cst_144 = arith.constant dense<0.000000e+00> : vector<32x512xf32>
      %169 = tpu.matmul %165, %168, %cst_144 {dimension_numbers = #tpu.dot_dimension_numbers<[1], [0], [0], [1], [0, 0, 1, 1], [], []>} : vector<32x64xf32>, vector<64x512xf32>, vector<32x512xf32> -> vector<32x512xf32>
      %170 = arith.addf %163, %169 : vector<32x512xf32>
      %cst_145 = arith.constant dense<0.000000e+00> : vector<32xf32>
      %171 = vector.multi_reduction <add>, %170, %cst_145 [1] : vector<32x512xf32> to vector<32xf32>
      %172 = vector.shape_cast %171 : vector<32xf32> to vector<32x1xf32>
      %173 = arith.addf %130, %172 : vector<32x1xf32>
      %174 = arith.mulf %170, %170 : vector<32x512xf32>
      %cst_146 = arith.constant dense<0.000000e+00> : vector<32xf32>
      %175 = vector.multi_reduction <add>, %174, %cst_146 [1] : vector<32x512xf32> to vector<32xf32>
      %176 = vector.shape_cast %175 : vector<32xf32> to vector<32x1xf32>
      %177 = arith.addf %134, %176 : vector<32x1xf32>
      %178 = arith.truncf %170 : vector<32x512xf32> to vector<32x512xbf16>
      %c4_i32_147 = arith.constant 4 : i32
      %179 = arith.muli %arg1, %c4_i32_147 : i32
      %c3_i32 = arith.constant 3 : i32
      %180 = arith.addi %179, %c3_i32 : i32
      %181 = arith.index_cast %180 : i32 to index
      %c0_148 = arith.constant 0 : index
      %c0_149 = arith.constant 0 : index
      %182 = vector.load %arg7[%181, %c0_148, %c0_149] : memref<4x32x512xbf16, #tpu.memory_space<vmem>>, vector<1x32x512xbf16>
      %183 = vector.shape_cast %182 : vector<1x32x512xbf16> to vector<32x512xbf16>
      %184 = vector.shape_cast %178 : vector<32x512xbf16> to vector<1x32x512xbf16>
      tpu.vector_store %arg7[%181, %c0_148, %c0_149], %184 {strides = array<i32>} : memref<4x32x512xbf16, #tpu.memory_space<vmem>>, vector<1x32x512xbf16>,
      %c0_150 = arith.constant 0 : index
      %c0_151 = arith.constant 0 : index
      %185 = vector.load %arg8[%c0_150, %c0_151] : memref<32x1xf32, #tpu.memory_space<vmem>>, vector<32x1xf32>
      %186 = arith.addf %185, %173 : vector<32x1xf32>
      %c0_152 = arith.constant 0 : index
      %c0_153 = arith.constant 0 : index
      %187 = vector.load %arg8[%c0_152, %c0_153] : memref<32x1xf32, #tpu.memory_space<vmem>>, vector<32x1xf32>
      tpu.vector_store %arg8[%c0_152, %c0_153], %186 {strides = array<i32>} : memref<32x1xf32, #tpu.memory_space<vmem>>, vector<32x1xf32>,
      %c0_154 = arith.constant 0 : index
      %c0_155 = arith.constant 0 : index
      %188 = vector.load %arg9[%c0_154, %c0_155] : memref<32x1xf32, #tpu.memory_space<vmem>>, vector<32x1xf32>
      %189 = arith.addf %188, %177 : vector<32x1xf32>
      %c0_156 = arith.constant 0 : index
      %c0_157 = arith.constant 0 : index
      %190 = vector.load %arg9[%c0_156, %c0_157] : memref<32x1xf32, #tpu.memory_space<vmem>>, vector<32x1xf32>
      tpu.vector_store %arg9[%c0_156, %c0_157], %189 {strides = array<i32>} : memref<32x1xf32, #tpu.memory_space<vmem>>, vector<32x1xf32>,
    } else {
    }
    %c1_i32 = arith.constant 1 : i32
    %8 = arith.cmpi eq, %arg0, %c1_i32 : i32
    %9 = arith.extui %8 : i1 to i32
    %c0_i32_4 = arith.constant 0 : i32
    %10 = arith.cmpi ne, %9, %c0_i32_4 : i32
    scf.if %10 {
      %c0 = arith.constant 0 : index
      %c0_5 = arith.constant 0 : index
      %11 = vector.load %arg8[%c0, %c0_5] : memref<32x1xf32, #tpu.memory_space<vmem>>, vector<32x1xf32>
      %cst = arith.constant 2.048000e+03 : f32
      %12 = vector.broadcast %cst : f32 to vector<32x1xf32>
      %13 = arith.divf %11, %12 : vector<32x1xf32>
      %c0_6 = arith.constant 0 : index
      %c0_7 = arith.constant 0 : index
      %14 = vector.load %arg9[%c0_6, %c0_7] : memref<32x1xf32, #tpu.memory_space<vmem>>, vector<32x1xf32>
      %cst_8 = arith.constant 2.048000e+03 : f32
      %15 = vector.broadcast %cst_8 : f32 to vector<32x1xf32>
      %16 = arith.divf %14, %15 : vector<32x1xf32>
      %17 = arith.mulf %13, %13 : vector<32x1xf32>
      %18 = arith.subf %16, %17 : vector<32x1xf32>
      %cst_9 = arith.constant 0.000000e+00 : f32
      %19 = vector.broadcast %cst_9 : f32 to vector<32x1xf32>
      %20 = arith.maximumf %18, %19 : vector<32x1xf32>
      %c0_10 = arith.constant 0 : index
      %c0_11 = arith.constant 0 : index
      %21 = vector.load %arg4[%c0_10, %c0_11] : memref<32x1xf32, #tpu.memory_space<vmem>>, vector<32x1xf32>
      %cst_12 = arith.constant 9.99999974E-6 : f32
      %22 = vector.broadcast %cst_12 : f32 to vector<32x1xf32>
      %23 = arith.addf %20, %22 : vector<32x1xf32>
      %24 = math.rsqrt %23 : vector<32x1xf32>
      %25 = arith.mulf %21, %24 : vector<32x1xf32>
      %c0_13 = arith.constant 0 : index
      %c0_14 = arith.constant 0 : index
      %26 = vector.load %arg5[%c0_13, %c0_14] : memref<32x1xf32, #tpu.memory_space<vmem>>, vector<32x1xf32>
      %27 = arith.mulf %13, %25 : vector<32x1xf32>
      %28 = arith.subf %26, %27 : vector<32x1xf32>
      %29 = vector.shape_cast %25 : vector<32x1xf32> to vector<32x1xf32>
      %30 = vector.broadcast %29 : vector<32x1xf32> to vector<32x512xf32>
      %31 = vector.shape_cast %28 : vector<32x1xf32> to vector<32x1xf32>
      %32 = vector.broadcast %31 : vector<32x1xf32> to vector<32x512xf32>
      %c4_i32 = arith.constant 4 : i32
      %33 = arith.muli %arg1, %c4_i32 : i32
      %c0_i32_15 = arith.constant 0 : i32
      %34 = arith.addi %33, %c0_i32_15 : i32
      %35 = arith.index_cast %34 : i32 to index
      %c0_16 = arith.constant 0 : index
      %c0_17 = arith.constant 0 : index
      %36 = vector.load %arg7[%35, %c0_16, %c0_17] : memref<4x32x512xbf16, #tpu.memory_space<vmem>>, vector<1x32x512xbf16>
      %37 = vector.shape_cast %36 : vector<1x32x512xbf16> to vector<32x512xbf16>
      %38 = arith.extf %37 : vector<32x512xbf16> to vector<32x512xf32>
      %39 = arith.mulf %38, %30 : vector<32x512xf32>
      %40 = arith.addf %39, %32 : vector<32x512xf32>
      %cst_18 = arith.constant 0.000000e+00 : f32
      %41 = vector.broadcast %cst_18 : f32 to vector<32x512xf32>
      %42 = arith.maximumf %40, %41 : vector<32x512xf32>
      %43 = arith.truncf %42 : vector<32x512xf32> to vector<32x512xbf16>
      %c0_19 = arith.constant 0 : index
      %c0_20 = arith.constant 0 : index
      %c0_21 = arith.constant 0 : index
      %44 = vector.load %arg6[%c0_19, %c0_20, %c0_21] : memref<4x32x512xbf16, #tpu.memory_space<vmem>>, vector<1x32x512xbf16>
      %45 = vector.shape_cast %44 : vector<1x32x512xbf16> to vector<32x512xbf16>
      %46 = vector.shape_cast %43 : vector<32x512xbf16> to vector<1x32x512xbf16>
      tpu.vector_store %arg6[%c0_19, %c0_20, %c0_21], %46 {strides = array<i32>} : memref<4x32x512xbf16, #tpu.memory_space<vmem>>, vector<1x32x512xbf16>,
      %c4_i32_22 = arith.constant 4 : i32
      %47 = arith.muli %arg1, %c4_i32_22 : i32
      %c1_i32_23 = arith.constant 1 : i32
      %48 = arith.addi %47, %c1_i32_23 : i32
      %49 = arith.index_cast %48 : i32 to index
      %c0_24 = arith.constant 0 : index
      %c0_25 = arith.constant 0 : index
      %50 = vector.load %arg7[%49, %c0_24, %c0_25] : memref<4x32x512xbf16, #tpu.memory_space<vmem>>, vector<1x32x512xbf16>
      %51 = vector.shape_cast %50 : vector<1x32x512xbf16> to vector<32x512xbf16>
      %52 = arith.extf %51 : vector<32x512xbf16> to vector<32x512xf32>
      %53 = arith.mulf %52, %30 : vector<32x512xf32>
      %54 = arith.addf %53, %32 : vector<32x512xf32>
      %cst_26 = arith.constant 0.000000e+00 : f32
      %55 = vector.broadcast %cst_26 : f32 to vector<32x512xf32>
      %56 = arith.maximumf %54, %55 : vector<32x512xf32>
      %57 = arith.truncf %56 : vector<32x512xf32> to vector<32x512xbf16>
      %c1 = arith.constant 1 : index
      %c0_27 = arith.constant 0 : index
      %c0_28 = arith.constant 0 : index
      %58 = vector.load %arg6[%c1, %c0_27, %c0_28] : memref<4x32x512xbf16, #tpu.memory_space<vmem>>, vector<1x32x512xbf16>
      %59 = vector.shape_cast %58 : vector<1x32x512xbf16> to vector<32x512xbf16>
      %60 = vector.shape_cast %57 : vector<32x512xbf16> to vector<1x32x512xbf16>
      tpu.vector_store %arg6[%c1, %c0_27, %c0_28], %60 {strides = array<i32>} : memref<4x32x512xbf16, #tpu.memory_space<vmem>>, vector<1x32x512xbf16>,
      %c4_i32_29 = arith.constant 4 : i32
      %61 = arith.muli %arg1, %c4_i32_29 : i32
      %c2_i32 = arith.constant 2 : i32
      %62 = arith.addi %61, %c2_i32 : i32
      %63 = arith.index_cast %62 : i32 to index
      %c0_30 = arith.constant 0 : index
      %c0_31 = arith.constant 0 : index
      %64 = vector.load %arg7[%63, %c0_30, %c0_31] : memref<4x32x512xbf16, #tpu.memory_space<vmem>>, vector<1x32x512xbf16>
      %65 = vector.shape_cast %64 : vector<1x32x512xbf16> to vector<32x512xbf16>
      %66 = arith.extf %65 : vector<32x512xbf16> to vector<32x512xf32>
      %67 = arith.mulf %66, %30 : vector<32x512xf32>
      %68 = arith.addf %67, %32 : vector<32x512xf32>
      %cst_32 = arith.constant 0.000000e+00 : f32
      %69 = vector.broadcast %cst_32 : f32 to vector<32x512xf32>
      %70 = arith.maximumf %68, %69 : vector<32x512xf32>
      %71 = arith.truncf %70 : vector<32x512xf32> to vector<32x512xbf16>
      %c2 = arith.constant 2 : index
      %c0_33 = arith.constant 0 : index
      %c0_34 = arith.constant 0 : index
      %72 = vector.load %arg6[%c2, %c0_33, %c0_34] : memref<4x32x512xbf16, #tpu.memory_space<vmem>>, vector<1x32x512xbf16>
      %73 = vector.shape_cast %72 : vector<1x32x512xbf16> to vector<32x512xbf16>
      %74 = vector.shape_cast %71 : vector<32x512xbf16> to vector<1x32x512xbf16>
      tpu.vector_store %arg6[%c2, %c0_33, %c0_34], %74 {strides = array<i32>} : memref<4x32x512xbf16, #tpu.memory_space<vmem>>, vector<1x32x512xbf16>,
      %c4_i32_35 = arith.constant 4 : i32
      %75 = arith.muli %arg1, %c4_i32_35 : i32
      %c3_i32 = arith.constant 3 : i32
      %76 = arith.addi %75, %c3_i32 : i32
      %77 = arith.index_cast %76 : i32 to index
      %c0_36 = arith.constant 0 : index
      %c0_37 = arith.constant 0 : index
      %78 = vector.load %arg7[%77, %c0_36, %c0_37] : memref<4x32x512xbf16, #tpu.memory_space<vmem>>, vector<1x32x512xbf16>
      %79 = vector.shape_cast %78 : vector<1x32x512xbf16> to vector<32x512xbf16>
      %80 = arith.extf %79 : vector<32x512xbf16> to vector<32x512xf32>
      %81 = arith.mulf %80, %30 : vector<32x512xf32>
      %82 = arith.addf %81, %32 : vector<32x512xf32>
      %cst_38 = arith.constant 0.000000e+00 : f32
      %83 = vector.broadcast %cst_38 : f32 to vector<32x512xf32>
      %84 = arith.maximumf %82, %83 : vector<32x512xf32>
      %85 = arith.truncf %84 : vector<32x512xf32> to vector<32x512xbf16>
      %c3 = arith.constant 3 : index
      %c0_39 = arith.constant 0 : index
      %c0_40 = arith.constant 0 : index
      %86 = vector.load %arg6[%c3, %c0_39, %c0_40] : memref<4x32x512xbf16, #tpu.memory_space<vmem>>, vector<1x32x512xbf16>
      %87 = vector.shape_cast %86 : vector<1x32x512xbf16> to vector<32x512xbf16>
      %88 = vector.shape_cast %85 : vector<32x512xbf16> to vector<1x32x512xbf16>
      tpu.vector_store %arg6[%c3, %c0_39, %c0_40], %88 {strides = array<i32>} : memref<4x32x512xbf16, #tpu.memory_space<vmem>>, vector<1x32x512xbf16>,
    } else {
    }
    return
  }
  func.func @transform_0(%arg0: i32, %arg1: i32) -> (i32, i32, i32) {
    %c0_i32 = arith.constant 0 : i32
    %0 = arith.cmpi eq, %arg0, %c0_i32 : i32
    %c0_i32_0 = arith.constant 0 : i32
    %1 = arith.select %0, %arg1, %c0_i32_0 : i32
    %c0_i32_1 = arith.constant 0 : i32
    %c0_i32_2 = arith.constant 0 : i32
    %c0_i32_3 = arith.constant 0 : i32
    return %c0_i32_1, %c0_i32_2, %1 : i32, i32, i32
  }
  func.func @transform_1(%arg0: i32, %arg1: i32) -> (i32, i32, i32, i32) {
    %c0_i32 = arith.constant 0 : i32
    %c0_i32_0 = arith.constant 0 : i32
    %c0_i32_1 = arith.constant 0 : i32
    %c0_i32_2 = arith.constant 0 : i32
    %c0_i32_3 = arith.constant 0 : i32
    return %c0_i32, %c0_i32_0, %c0_i32_1, %c0_i32_2 : i32, i32, i32, i32
  }
  func.func @transform_2(%arg0: i32, %arg1: i32) -> (i32, i32) {
    %c0_i32 = arith.constant 0 : i32
    %c0_i32_0 = arith.constant 0 : i32
    %c0_i32_1 = arith.constant 0 : i32
    return %c0_i32, %c0_i32_0 : i32, i32
  }
  func.func @transform_3(%arg0: i32, %arg1: i32) -> (i32, i32) {
    %c0_i32 = arith.constant 0 : i32
    %c0_i32_0 = arith.constant 0 : i32
    %c0_i32_1 = arith.constant 0 : i32
    return %c0_i32, %c0_i32_0 : i32, i32
  }
  func.func @transform_4(%arg0: i32, %arg1: i32) -> (i32, i32, i32) {
    %c1_i32 = arith.constant 1 : i32
    %0 = arith.cmpi eq, %arg0, %c1_i32 : i32
    %c0_i32 = arith.constant 0 : i32
    %1 = arith.select %0, %arg1, %c0_i32 : i32
    %c0_i32_0 = arith.constant 0 : i32
    %c0_i32_1 = arith.constant 0 : i32
    %c0_i32_2 = arith.constant 0 : i32
    return %c0_i32_0, %c0_i32_1, %1 : i32, i32, i32
  }
}

module attributes {stable_mosaic.version = 11 : i64} {
  func.func @_head_kernel(%arg0: i32, %arg1: i32, %arg2: memref<32x512xbf16, #tpu.memory_space<vmem>>, %arg3: memref<16x32xf32, #tpu.memory_space<vmem>>, %arg4: memref<16x1xf32, #tpu.memory_space<vmem>>, %arg5: memref<16x1xf32, #tpu.memory_space<vmem>>, %arg6: memref<8x16xf32, #tpu.memory_space<vmem>>, %arg7: memref<8x1xf32, #tpu.memory_space<vmem>>, %arg8: memref<8x1xf32, #tpu.memory_space<vmem>>, %arg9: memref<3x8xf32, #tpu.memory_space<vmem>>, %arg10: memref<3x512xf32, #tpu.memory_space<vmem>>, %arg11: memref<4x16x512xbf16, #tpu.memory_space<vmem>>, %arg12: memref<4x8x512xbf16, #tpu.memory_space<vmem>>, %arg13: memref<16x1xf32, #tpu.memory_space<vmem>>, %arg14: memref<16x1xf32, #tpu.memory_space<vmem>>, %arg15: memref<8x1xf32, #tpu.memory_space<vmem>>, %arg16: memref<8x1xf32, #tpu.memory_space<vmem>>) attributes {dimension_semantics = [#tpu.dimension_semantics<arbitrary>, #tpu.dimension_semantics<arbitrary>], iteration_bounds = array<i64: 3, 4>, scalar_prefetch = 0 : i64, scratch_operands = 6 : i64, tpu.core_type = #tpu.core_type<tc>, window_params = [{transform_indices = @transform_0, window_bounds = array<i64: 32, 512>}, {pipeline_mode = #tpu.pipeline_mode<synchronous>, transform_indices = @transform_1, window_bounds = array<i64: 16, 32>}, {pipeline_mode = #tpu.pipeline_mode<synchronous>, transform_indices = @transform_2, window_bounds = array<i64: 16, 1>}, {pipeline_mode = #tpu.pipeline_mode<synchronous>, transform_indices = @transform_3, window_bounds = array<i64: 16, 1>}, {pipeline_mode = #tpu.pipeline_mode<synchronous>, transform_indices = @transform_4, window_bounds = array<i64: 8, 16>}, {pipeline_mode = #tpu.pipeline_mode<synchronous>, transform_indices = @transform_5, window_bounds = array<i64: 8, 1>}, {pipeline_mode = #tpu.pipeline_mode<synchronous>, transform_indices = @transform_6, window_bounds = array<i64: 8, 1>}, {pipeline_mode = #tpu.pipeline_mode<synchronous>, transform_indices = @transform_7, window_bounds = array<i64: 3, 8>}, {transform_indices = @transform_8, window_bounds = array<i64: 3, 512>}]} {
    %c512_i32 = arith.constant 512 : i32
    %0 = arith.muli %arg1, %c512_i32 : i32
    %1 = tpu.iota {dimensions = array<i32: 1>} : vector<1x512xi32>
    %2 = vector.broadcast %0 : i32 to vector<1x512xi32>
    %3 = arith.addi %2, %1 : vector<1x512xi32>
    %c2048_i32 = arith.constant 2048 : i32
    %4 = vector.broadcast %c2048_i32 : i32 to vector<1x512xi32>
    %5 = arith.cmpi slt, %3, %4 : vector<1x512xi32>
    %6 = arith.extui %5 : vector<1x512xi1> to vector<1x512xi32>
    %7 = arith.sitofp %6 : vector<1x512xi32> to vector<1x512xf32>
    %c0_i32 = arith.constant 0 : i32
    %8 = arith.cmpi eq, %arg0, %c0_i32 : i32
    %c0_i32_0 = arith.constant 0 : i32
    %9 = arith.cmpi eq, %arg1, %c0_i32_0 : i32
    %10 = arith.andi %8, %9 : i1
    %11 = arith.extui %10 : i1 to i32
    %c0_i32_1 = arith.constant 0 : i32
    %12 = arith.cmpi ne, %11, %c0_i32_1 : i32
    scf.if %12 {
      %cst = arith.constant 0.000000e+00 : f32
      %22 = vector.broadcast %cst : f32 to vector<16x1xf32>
      %c0 = arith.constant 0 : index
      %c0_6 = arith.constant 0 : index
      %23 = vector.load %arg13[%c0, %c0_6] : memref<16x1xf32, #tpu.memory_space<vmem>>, vector<16x1xf32>
      tpu.vector_store %arg13[%c0, %c0_6], %22 {strides = array<i32>} : memref<16x1xf32, #tpu.memory_space<vmem>>, vector<16x1xf32>,
      %cst_7 = arith.constant 0.000000e+00 : f32
      %24 = vector.broadcast %cst_7 : f32 to vector<16x1xf32>
      %c0_8 = arith.constant 0 : index
      %c0_9 = arith.constant 0 : index
      %25 = vector.load %arg14[%c0_8, %c0_9] : memref<16x1xf32, #tpu.memory_space<vmem>>, vector<16x1xf32>
      tpu.vector_store %arg14[%c0_8, %c0_9], %24 {strides = array<i32>} : memref<16x1xf32, #tpu.memory_space<vmem>>, vector<16x1xf32>,
      %cst_10 = arith.constant 0.000000e+00 : f32
      %26 = vector.broadcast %cst_10 : f32 to vector<8x1xf32>
      %c0_11 = arith.constant 0 : index
      %c0_12 = arith.constant 0 : index
      %27 = vector.load %arg15[%c0_11, %c0_12] : memref<8x1xf32, #tpu.memory_space<vmem>>, vector<8x1xf32>
      tpu.vector_store %arg15[%c0_11, %c0_12], %26 {strides = array<i32>} : memref<8x1xf32, #tpu.memory_space<vmem>>, vector<8x1xf32>,
      %cst_13 = arith.constant 0.000000e+00 : f32
      %28 = vector.broadcast %cst_13 : f32 to vector<8x1xf32>
      %c0_14 = arith.constant 0 : index
      %c0_15 = arith.constant 0 : index
      %29 = vector.load %arg16[%c0_14, %c0_15] : memref<8x1xf32, #tpu.memory_space<vmem>>, vector<8x1xf32>
      tpu.vector_store %arg16[%c0_14, %c0_15], %28 {strides = array<i32>} : memref<8x1xf32, #tpu.memory_space<vmem>>, vector<8x1xf32>,
    } else {
    }
    %c0_i32_2 = arith.constant 0 : i32
    %13 = arith.cmpi eq, %arg0, %c0_i32_2 : i32
    %14 = arith.extui %13 : i1 to i32
    %c0_i32_3 = arith.constant 0 : i32
    %15 = arith.cmpi ne, %14, %c0_i32_3 : i32
    scf.if %15 {
      %c0 = arith.constant 0 : index
      %c0_6 = arith.constant 0 : index
      %22 = vector.load %arg3[%c0, %c0_6] : memref<16x32xf32, #tpu.memory_space<vmem>>, vector<16x32xf32>
      %c0_7 = arith.constant 0 : index
      %c0_8 = arith.constant 0 : index
      %23 = vector.load %arg2[%c0_7, %c0_8] : memref<32x512xbf16, #tpu.memory_space<vmem>>, vector<32x512xbf16>
      %24 = arith.extf %23 : vector<32x512xbf16> to vector<32x512xf32>
      %cst = arith.constant dense<0.000000e+00> : vector<16x512xf32>
      %25 = tpu.matmul %22, %24, %cst {dimension_numbers = #tpu.dot_dimension_numbers<[1], [0], [0], [1], [0, 0, 1, 1], [], []>} : vector<16x32xf32>, vector<32x512xf32>, vector<16x512xf32> -> vector<16x512xf32>
      %c0_9 = arith.constant 0 : index
      %c0_10 = arith.constant 0 : index
      %26 = vector.load %arg13[%c0_9, %c0_10] : memref<16x1xf32, #tpu.memory_space<vmem>>, vector<16x1xf32>
      %cst_11 = arith.constant dense<0.000000e+00> : vector<16xf32>
      %27 = vector.multi_reduction <add>, %25, %cst_11 [1] : vector<16x512xf32> to vector<16xf32>
      %28 = vector.shape_cast %27 : vector<16xf32> to vector<16x1xf32>
      %29 = arith.addf %26, %28 : vector<16x1xf32>
      %c0_12 = arith.constant 0 : index
      %c0_13 = arith.constant 0 : index
      %30 = vector.load %arg13[%c0_12, %c0_13] : memref<16x1xf32, #tpu.memory_space<vmem>>, vector<16x1xf32>
      tpu.vector_store %arg13[%c0_12, %c0_13], %29 {strides = array<i32>} : memref<16x1xf32, #tpu.memory_space<vmem>>, vector<16x1xf32>,
      %c0_14 = arith.constant 0 : index
      %c0_15 = arith.constant 0 : index
      %31 = vector.load %arg14[%c0_14, %c0_15] : memref<16x1xf32, #tpu.memory_space<vmem>>, vector<16x1xf32>
      %32 = arith.mulf %25, %25 : vector<16x512xf32>
      %cst_16 = arith.constant dense<0.000000e+00> : vector<16xf32>
      %33 = vector.multi_reduction <add>, %32, %cst_16 [1] : vector<16x512xf32> to vector<16xf32>
      %34 = vector.shape_cast %33 : vector<16xf32> to vector<16x1xf32>
      %35 = arith.addf %31, %34 : vector<16x1xf32>
      %c0_17 = arith.constant 0 : index
      %c0_18 = arith.constant 0 : index
      %36 = vector.load %arg14[%c0_17, %c0_18] : memref<16x1xf32, #tpu.memory_space<vmem>>, vector<16x1xf32>
      tpu.vector_store %arg14[%c0_17, %c0_18], %35 {strides = array<i32>} : memref<16x1xf32, #tpu.memory_space<vmem>>, vector<16x1xf32>,
      %37 = arith.truncf %25 : vector<16x512xf32> to vector<16x512xbf16>
      %38 = arith.index_cast %arg1 : i32 to index
      %c0_19 = arith.constant 0 : index
      %c0_20 = arith.constant 0 : index
      %39 = vector.load %arg11[%38, %c0_19, %c0_20] : memref<4x16x512xbf16, #tpu.memory_space<vmem>>, vector<1x16x512xbf16>
      %40 = vector.shape_cast %39 : vector<1x16x512xbf16> to vector<16x512xbf16>
      %41 = vector.shape_cast %37 : vector<16x512xbf16> to vector<1x16x512xbf16>
      tpu.vector_store %arg11[%38, %c0_19, %c0_20], %41 {strides = array<i32>} : memref<4x16x512xbf16, #tpu.memory_space<vmem>>, vector<1x16x512xbf16>,
    } else {
    }
    %c1_i32 = arith.constant 1 : i32
    %16 = arith.cmpi eq, %arg0, %c1_i32 : i32
    %17 = arith.extui %16 : i1 to i32
    %c0_i32_4 = arith.constant 0 : i32
    %18 = arith.cmpi ne, %17, %c0_i32_4 : i32
    scf.if %18 {
      %c0 = arith.constant 0 : index
      %c0_6 = arith.constant 0 : index
      %22 = vector.load %arg13[%c0, %c0_6] : memref<16x1xf32, #tpu.memory_space<vmem>>, vector<16x1xf32>
      %cst = arith.constant 2.048000e+03 : f32
      %23 = vector.broadcast %cst : f32 to vector<16x1xf32>
      %24 = arith.divf %22, %23 : vector<16x1xf32>
      %c0_7 = arith.constant 0 : index
      %c0_8 = arith.constant 0 : index
      %25 = vector.load %arg14[%c0_7, %c0_8] : memref<16x1xf32, #tpu.memory_space<vmem>>, vector<16x1xf32>
      %cst_9 = arith.constant 2.048000e+03 : f32
      %26 = vector.broadcast %cst_9 : f32 to vector<16x1xf32>
      %27 = arith.divf %25, %26 : vector<16x1xf32>
      %28 = arith.mulf %24, %24 : vector<16x1xf32>
      %29 = arith.subf %27, %28 : vector<16x1xf32>
      %cst_10 = arith.constant 0.000000e+00 : f32
      %30 = vector.broadcast %cst_10 : f32 to vector<16x1xf32>
      %31 = arith.maximumf %29, %30 : vector<16x1xf32>
      %c0_11 = arith.constant 0 : index
      %c0_12 = arith.constant 0 : index
      %32 = vector.load %arg4[%c0_11, %c0_12] : memref<16x1xf32, #tpu.memory_space<vmem>>, vector<16x1xf32>
      %cst_13 = arith.constant 9.99999974E-6 : f32
      %33 = vector.broadcast %cst_13 : f32 to vector<16x1xf32>
      %34 = arith.addf %31, %33 : vector<16x1xf32>
      %35 = math.rsqrt %34 : vector<16x1xf32>
      %36 = arith.mulf %32, %35 : vector<16x1xf32>
      %c0_14 = arith.constant 0 : index
      %c0_15 = arith.constant 0 : index
      %37 = vector.load %arg5[%c0_14, %c0_15] : memref<16x1xf32, #tpu.memory_space<vmem>>, vector<16x1xf32>
      %38 = arith.mulf %24, %36 : vector<16x1xf32>
      %39 = arith.subf %37, %38 : vector<16x1xf32>
      %40 = arith.index_cast %arg1 : i32 to index
      %c0_16 = arith.constant 0 : index
      %c0_17 = arith.constant 0 : index
      %41 = vector.load %arg11[%40, %c0_16, %c0_17] : memref<4x16x512xbf16, #tpu.memory_space<vmem>>, vector<1x16x512xbf16>
      %42 = vector.shape_cast %41 : vector<1x16x512xbf16> to vector<16x512xbf16>
      %43 = arith.extf %42 : vector<16x512xbf16> to vector<16x512xf32>
      %44 = vector.broadcast %36 : vector<16x1xf32> to vector<16x512xf32>
      %45 = arith.mulf %43, %44 : vector<16x512xf32>
      %46 = vector.broadcast %39 : vector<16x1xf32> to vector<16x512xf32>
      %47 = arith.addf %45, %46 : vector<16x512xf32>
      %cst_18 = arith.constant 0.000000e+00 : f32
      %48 = vector.broadcast %cst_18 : f32 to vector<16x512xf32>
      %49 = arith.maximumf %47, %48 : vector<16x512xf32>
      %50 = vector.broadcast %7 : vector<1x512xf32> to vector<16x512xf32>
      %51 = arith.mulf %49, %50 : vector<16x512xf32>
      %c0_19 = arith.constant 0 : index
      %c0_20 = arith.constant 0 : index
      %52 = vector.load %arg6[%c0_19, %c0_20] : memref<8x16xf32, #tpu.memory_space<vmem>>, vector<8x16xf32>
      %cst_21 = arith.constant dense<0.000000e+00> : vector<8x512xf32>
      %53 = tpu.matmul %52, %51, %cst_21 {dimension_numbers = #tpu.dot_dimension_numbers<[1], [0], [0], [1], [0, 0, 1, 1], [], []>} : vector<8x16xf32>, vector<16x512xf32>, vector<8x512xf32> -> vector<8x512xf32>
      %c0_22 = arith.constant 0 : index
      %c0_23 = arith.constant 0 : index
      %54 = vector.load %arg15[%c0_22, %c0_23] : memref<8x1xf32, #tpu.memory_space<vmem>>, vector<8x1xf32>
      %cst_24 = arith.constant dense<0.000000e+00> : vector<8xf32>
      %55 = vector.multi_reduction <add>, %53, %cst_24 [1] : vector<8x512xf32> to vector<8xf32>
      %56 = vector.shape_cast %55 : vector<8xf32> to vector<8x1xf32>
      %57 = arith.addf %54, %56 : vector<8x1xf32>
      %c0_25 = arith.constant 0 : index
      %c0_26 = arith.constant 0 : index
      %58 = vector.load %arg15[%c0_25, %c0_26] : memref<8x1xf32, #tpu.memory_space<vmem>>, vector<8x1xf32>
      tpu.vector_store %arg15[%c0_25, %c0_26], %57 {strides = array<i32>} : memref<8x1xf32, #tpu.memory_space<vmem>>, vector<8x1xf32>,
      %c0_27 = arith.constant 0 : index
      %c0_28 = arith.constant 0 : index
      %59 = vector.load %arg16[%c0_27, %c0_28] : memref<8x1xf32, #tpu.memory_space<vmem>>, vector<8x1xf32>
      %60 = arith.mulf %53, %53 : vector<8x512xf32>
      %cst_29 = arith.constant dense<0.000000e+00> : vector<8xf32>
      %61 = vector.multi_reduction <add>, %60, %cst_29 [1] : vector<8x512xf32> to vector<8xf32>
      %62 = vector.shape_cast %61 : vector<8xf32> to vector<8x1xf32>
      %63 = arith.addf %59, %62 : vector<8x1xf32>
      %c0_30 = arith.constant 0 : index
      %c0_31 = arith.constant 0 : index
      %64 = vector.load %arg16[%c0_30, %c0_31] : memref<8x1xf32, #tpu.memory_space<vmem>>, vector<8x1xf32>
      tpu.vector_store %arg16[%c0_30, %c0_31], %63 {strides = array<i32>} : memref<8x1xf32, #tpu.memory_space<vmem>>, vector<8x1xf32>,
      %65 = arith.truncf %53 : vector<8x512xf32> to vector<8x512xbf16>
      %66 = arith.index_cast %arg1 : i32 to index
      %c0_32 = arith.constant 0 : index
      %c0_33 = arith.constant 0 : index
      %67 = vector.load %arg12[%66, %c0_32, %c0_33] : memref<4x8x512xbf16, #tpu.memory_space<vmem>>, vector<1x8x512xbf16>
      %68 = vector.shape_cast %67 : vector<1x8x512xbf16> to vector<8x512xbf16>
      %69 = vector.shape_cast %65 : vector<8x512xbf16> to vector<1x8x512xbf16>
      tpu.vector_store %arg12[%66, %c0_32, %c0_33], %69 {strides = array<i32>} : memref<4x8x512xbf16, #tpu.memory_space<vmem>>, vector<1x8x512xbf16>,
    } else {
    }
    %c2_i32 = arith.constant 2 : i32
    %19 = arith.cmpi eq, %arg0, %c2_i32 : i32
    %20 = arith.extui %19 : i1 to i32
    %c0_i32_5 = arith.constant 0 : i32
    %21 = arith.cmpi ne, %20, %c0_i32_5 : i32
    scf.if %21 {
      %c0 = arith.constant 0 : index
      %c0_6 = arith.constant 0 : index
      %22 = vector.load %arg15[%c0, %c0_6] : memref<8x1xf32, #tpu.memory_space<vmem>>, vector<8x1xf32>
      %cst = arith.constant 2.048000e+03 : f32
      %23 = vector.broadcast %cst : f32 to vector<8x1xf32>
      %24 = arith.divf %22, %23 : vector<8x1xf32>
      %c0_7 = arith.constant 0 : index
      %c0_8 = arith.constant 0 : index
      %25 = vector.load %arg16[%c0_7, %c0_8] : memref<8x1xf32, #tpu.memory_space<vmem>>, vector<8x1xf32>
      %cst_9 = arith.constant 2.048000e+03 : f32
      %26 = vector.broadcast %cst_9 : f32 to vector<8x1xf32>
      %27 = arith.divf %25, %26 : vector<8x1xf32>
      %28 = arith.mulf %24, %24 : vector<8x1xf32>
      %29 = arith.subf %27, %28 : vector<8x1xf32>
      %cst_10 = arith.constant 0.000000e+00 : f32
      %30 = vector.broadcast %cst_10 : f32 to vector<8x1xf32>
      %31 = arith.maximumf %29, %30 : vector<8x1xf32>
      %c0_11 = arith.constant 0 : index
      %c0_12 = arith.constant 0 : index
      %32 = vector.load %arg7[%c0_11, %c0_12] : memref<8x1xf32, #tpu.memory_space<vmem>>, vector<8x1xf32>
      %cst_13 = arith.constant 9.99999974E-6 : f32
      %33 = vector.broadcast %cst_13 : f32 to vector<8x1xf32>
      %34 = arith.addf %31, %33 : vector<8x1xf32>
      %35 = math.rsqrt %34 : vector<8x1xf32>
      %36 = arith.mulf %32, %35 : vector<8x1xf32>
      %c0_14 = arith.constant 0 : index
      %c0_15 = arith.constant 0 : index
      %37 = vector.load %arg8[%c0_14, %c0_15] : memref<8x1xf32, #tpu.memory_space<vmem>>, vector<8x1xf32>
      %38 = arith.mulf %24, %36 : vector<8x1xf32>
      %39 = arith.subf %37, %38 : vector<8x1xf32>
      %40 = arith.index_cast %arg1 : i32 to index
      %c0_16 = arith.constant 0 : index
      %c0_17 = arith.constant 0 : index
      %41 = vector.load %arg12[%40, %c0_16, %c0_17] : memref<4x8x512xbf16, #tpu.memory_space<vmem>>, vector<1x8x512xbf16>
      %42 = vector.shape_cast %41 : vector<1x8x512xbf16> to vector<8x512xbf16>
      %43 = arith.extf %42 : vector<8x512xbf16> to vector<8x512xf32>
      %44 = vector.broadcast %36 : vector<8x1xf32> to vector<8x512xf32>
      %45 = arith.mulf %43, %44 : vector<8x512xf32>
      %46 = vector.broadcast %39 : vector<8x1xf32> to vector<8x512xf32>
      %47 = arith.addf %45, %46 : vector<8x512xf32>
      %cst_18 = arith.constant 0.000000e+00 : f32
      %48 = vector.broadcast %cst_18 : f32 to vector<8x512xf32>
      %49 = arith.maximumf %47, %48 : vector<8x512xf32>
      %50 = vector.broadcast %7 : vector<1x512xf32> to vector<8x512xf32>
      %51 = arith.mulf %49, %50 : vector<8x512xf32>
      %c0_19 = arith.constant 0 : index
      %c0_20 = arith.constant 0 : index
      %52 = vector.load %arg9[%c0_19, %c0_20] : memref<3x8xf32, #tpu.memory_space<vmem>>, vector<3x8xf32>
      %cst_21 = arith.constant dense<0.000000e+00> : vector<3x512xf32>
      %53 = tpu.matmul %52, %51, %cst_21 {dimension_numbers = #tpu.dot_dimension_numbers<[1], [0], [0], [1], [0, 0, 1, 1], [], []>} : vector<3x8xf32>, vector<8x512xf32>, vector<3x512xf32> -> vector<3x512xf32>
      %54 = math.tanh %53 : vector<3x512xf32>
      %c0_22 = arith.constant 0 : index
      %c0_23 = arith.constant 0 : index
      %55 = vector.load %arg10[%c0_22, %c0_23] : memref<3x512xf32, #tpu.memory_space<vmem>>, vector<3x512xf32>
      tpu.vector_store %arg10[%c0_22, %c0_23], %54 {strides = array<i32>} : memref<3x512xf32, #tpu.memory_space<vmem>>, vector<3x512xf32>,
    } else {
    }
    return
  }
  func.func @transform_0(%arg0: i32, %arg1: i32) -> (i32, i32) {
    %c0_i32 = arith.constant 0 : i32
    %0 = arith.cmpi eq, %arg0, %c0_i32 : i32
    %c3_i32 = arith.constant 3 : i32
    %1 = arith.select %0, %arg1, %c3_i32 : i32
    %c0_i32_0 = arith.constant 0 : i32
    %c0_i32_1 = arith.constant 0 : i32
    return %c0_i32_0, %1 : i32, i32
  }
  func.func @transform_1(%arg0: i32, %arg1: i32) -> (i32, i32) {
    %c0_i32 = arith.constant 0 : i32
    %c0_i32_0 = arith.constant 0 : i32
    %c0_i32_1 = arith.constant 0 : i32
    return %c0_i32, %c0_i32_0 : i32, i32
  }
  func.func @transform_2(%arg0: i32, %arg1: i32) -> (i32, i32) {
    %c0_i32 = arith.constant 0 : i32
    %c0_i32_0 = arith.constant 0 : i32
    %c0_i32_1 = arith.constant 0 : i32
    return %c0_i32, %c0_i32_0 : i32, i32
  }
  func.func @transform_3(%arg0: i32, %arg1: i32) -> (i32, i32) {
    %c0_i32 = arith.constant 0 : i32
    %c0_i32_0 = arith.constant 0 : i32
    %c0_i32_1 = arith.constant 0 : i32
    return %c0_i32, %c0_i32_0 : i32, i32
  }
  func.func @transform_4(%arg0: i32, %arg1: i32) -> (i32, i32) {
    %c0_i32 = arith.constant 0 : i32
    %c0_i32_0 = arith.constant 0 : i32
    %c0_i32_1 = arith.constant 0 : i32
    return %c0_i32, %c0_i32_0 : i32, i32
  }
  func.func @transform_5(%arg0: i32, %arg1: i32) -> (i32, i32) {
    %c0_i32 = arith.constant 0 : i32
    %c0_i32_0 = arith.constant 0 : i32
    %c0_i32_1 = arith.constant 0 : i32
    return %c0_i32, %c0_i32_0 : i32, i32
  }
  func.func @transform_6(%arg0: i32, %arg1: i32) -> (i32, i32) {
    %c0_i32 = arith.constant 0 : i32
    %c0_i32_0 = arith.constant 0 : i32
    %c0_i32_1 = arith.constant 0 : i32
    return %c0_i32, %c0_i32_0 : i32, i32
  }
  func.func @transform_7(%arg0: i32, %arg1: i32) -> (i32, i32) {
    %c0_i32 = arith.constant 0 : i32
    %c0_i32_0 = arith.constant 0 : i32
    %c0_i32_1 = arith.constant 0 : i32
    return %c0_i32, %c0_i32_0 : i32, i32
  }
  func.func @transform_8(%arg0: i32, %arg1: i32) -> (i32, i32) {
    %c2_i32 = arith.constant 2 : i32
    %0 = arith.cmpi eq, %arg0, %c2_i32 : i32
    %c0_i32 = arith.constant 0 : i32
    %1 = arith.select %0, %arg1, %c0_i32 : i32
    %c0_i32_0 = arith.constant 0 : i32
    %c0_i32_1 = arith.constant 0 : i32
    return %c0_i32_0, %1 : i32, i32
  }
}

</mosaic_0001>

<bundles_post_ra>
// kernel: generator_forward.3
= control target key start
LH: loop header
LB: loop body
LE: loop exit
PB: predicated region body
PF: predicated region fallthrough
CT: control target
= control target key end

     0   :  { %s3228_s15 = smov 0   ;;  %s3230_s16 = smov 0   ;;  %s4354_s0 = inlined_call_operand.vmem [shape: bf16[9,8,128], index: 0, kind: input, shape index: {}]   ;;  %s4355_s1 = inlined_call_operand.vmem [shape: f32[4,4,64,8], index: 1, kind: input, shape index: {}]   ;;  %s4356_s2 = inlined_call_operand.vmem [shape: f32[64,1], index: 2, kind: input, shape index: {}]   ;;  %s4357_s3 = inlined_call_operand.vmem [shape: f32[64,1], index: 3, kind: input, shape index: {}]   ;;  %s4358_s4 = inlined_call_operand.vmem [shape: bf16[4,64,128], index: 4, kind: output, shape index: {}]  }
   0x1   :  { %s3232_s17 = smov 0  }
   0x2 LB: > { %s26_s18 = sadd.s32 1, %s3194_s16  ;;  %p2515_p0 = scmp.ge.s32.totalorder %s3198_s17, 1  ;;  %s3198_s17 = sphi %s3232_s17, %s14_s17   ;;  %s3194_s16 = sphi %s3230_s16, %s4372_s16   ;;  %s3190_s15 = sphi %s3228_s15, %s4371_s15  }
   0x3   : > { %p28_p1 = scmp.ge.s32.totalorder %s26_s18, 2  ;;  %p185_p2 = scmp.lt.s32.totalorder %s3198_s17, 3 }
   0x5   : > { %s4374_s18 = smov (%p28_p1, %s26_s18), 0  ;;  %p186_p3 = pnand %p2515_p0, %p185_p2 }
   0x6   : > { %p229_p4 = scmp.eq.s32.totalorder (!%p186_p3), %s3190_s15, 0 }
   0x7   : > { %189 = sbr.rel (%p186_p3) target bundleno = 774 (0x306), region = 36 }
   0xc   : > { %234 = sbr.rel (!%p229_p4) target bundleno = 29 (0x1d), region = 40  ;;  %vm235_vm0 = vcmask (%p229_p4), 7168   ;;  %v3200_v0 = vmov (%p229_p4), 0.0  }
   0xd   : > { %236 = vst.msk [vmem:[#allocation3] sm:$0xff] (%p229_p4), %vm235_vm0, %v3200_v0 }
   0xe   : > { %237 = vst.msk [vmem:[#allocation3 + $0x8] sm:$0xff] (%p229_p4), %vm235_vm0, %v3200_v0 }
   0xf   : > { %238 = vst.msk [vmem:[#allocation3 + $0x10] sm:$0xff] (%p229_p4), %vm235_vm0, %v3200_v0 }
  0x10   : > { %239 = vst.msk [vmem:[#allocation3 + $0x18] sm:$0xff] (%p229_p4), %vm235_vm0, %v3200_v0 }
  0x11   : > { %240 = vst.msk [vmem:[#allocation3 + $0x20] sm:$0xff] %vm235_vm0, %v3200_v0 }
  0x12   : > { %241 = vst.msk [vmem:[#allocation3 + $0x28] sm:$0xff] %vm235_vm0, %v3200_v0 }
  0x13   : > { %242 = vst.msk [vmem:[#allocation3 + $0x30] sm:$0xff] %vm235_vm0, %v3200_v0 }
  0x14   : > { %243 = vst.msk [vmem:[#allocation3 + $0x38] sm:$0xff] %vm235_vm0, %v3200_v0 }
  0x15   : > { %244 = vst.msk [vmem:[#allocation4] sm:$0xff] %vm235_vm0, %v3200_v0 }
  0x16   : > { %245 = vst.msk [vmem:[#allocation4 + $0x8] sm:$0xff] %vm235_vm0, %v3200_v0 }
  0x17   : > { %246 = vst.msk [vmem:[#allocation4 + $0x10] sm:$0xff] %vm235_vm0, %v3200_v0 }
  0x18   : > { %247 = vst.msk [vmem:[#allocation4 + $0x18] sm:$0xff] %vm235_vm0, %v3200_v0 }
  0x19   : > { %248 = vst.msk [vmem:[#allocation4 + $0x20] sm:$0xff] %vm235_vm0, %v3200_v0 }
  0x1a   : > { %249 = vst.msk [vmem:[#allocation4 + $0x28] sm:$0xff] %vm235_vm0, %v3200_v0 }
  0x1b   : > { %250 = vst.msk [vmem:[#allocation4 + $0x30] sm:$0xff] %vm235_vm0, %v3200_v0 }
  0x1c   : > { %251 = vst.msk [vmem:[#allocation4 + $0x38] sm:$0xff] %vm235_vm0, %v3200_v0 }
  0x1d PF: > { %p2517_p5 = scmp.ne.s32.totalorder %s3190_s15, 0 }
  0x1f   : > { %254 = sbr.rel (%p2517_p5) target bundleno = 553 (0x229), region = 44 }
  0x24   : > { %v2551_v1 = vld [vmem:[%s4354_s0 + $0xc] sm:$0xff]   ;;  %vm277_vm1 = vcmask 64512   ;;  %v2543_v2 = vld [vmem:[%s4355_s1 + $0x80] sm:$0xff]  ;;  %v2546_v25 = vld [vmem:[%s4355_s1 + $0x98] sm:$0xff]  ;;  %vm1863_vm2 = vcmask 7168  }
  0x25   : > { %v2568_v3 = vld [vmem:[%s4354_s0 + $0x10] sm:$0xff]   ;;  %v419_v4 = vunpack.c.l.bf16 %v2551_v1  ;;  %v817_v5 = vunpack.c.h.bf16 %v2551_v1  ;;  %v2560_v7 = vld [vmem:[%s4355_s1 + $0xc0] sm:$0xff]  ;;  %v2544_v17 = vld [vmem:[%s4355_s1 + $0x88] sm:$0xff] }
  0x26   : > { %v504_v6 = vunpack.c.l.bf16 %v2568_v3  ;;  %v902_v8 = vunpack.c.h.bf16 %v2568_v3  ;;  %v2526_v9 = vld [vmem:[%s4354_s0 + $0x4] sm:$0xff]   ;;  %v2545_v21 = vld [vmem:[%s4355_s1 + $0x90] sm:$0xff]  ;;  %v2563_v26 = vld [vmem:[%s4355_s1 + $0xd8] sm:$0xff] }
  0x27   : > { %v263_v10 = vld [vmem:[%s4354_s0] sm:$0xff]   ;;  %v276_v11 = vunpack.c.l.bf16 %v2526_v9  ;;  %459 = vmatpush.msra.mxu2 %v419_v4  ;;  %v676_v15 = vunpack.c.h.bf16 %v2526_v9  ;;  %v2561_v18 = vld [vmem:[%s4355_s1 + $0xc8] sm:$0xff]  ;;  %v2562_v22 = vld [vmem:[%s4355_s1 + $0xd0] sm:$0xff] }
  0x28   : > { %v264_v12 = vunpack.c.l.bf16 %v263_v10  ;;  %544 = vmatpush.msra.mxu3 %v504_v6  ;;  %2552 = vmatmul.msk.f32.vlgmr.msra.gmra.mxu2 %vm277_vm1, %v2543_v2  ;;  %v2518_v13 = vld [vmem:[%s4355_s1 + $0x40] sm:$0xff]  ;;  %v664_v16 = vunpack.c.h.bf16 %v263_v10  ;;  %v2519_v19 = vld [vmem:[%s4355_s1 + $0x48] sm:$0xff]  ;;  %v2520_v23 = vld [vmem:[%s4355_s1 + $0x50] sm:$0xff] }
  0x29   : > { %2569 = vmatmul.msk.f32.vlgmr.msra.gmra.mxu3 %vm277_vm1, %v2560_v7  ;;  %v255_v14 = vld [vmem:[%s4355_s1] sm:$0xff]  ;;  %857 = vmatpush.msrb.mxu2 %v817_v5  ;;  %v256_v20 = vld [vmem:[%s4355_s1 + $0x8] sm:$0xff]  ;;  %v257_v24 = vld [vmem:[%s4355_s1 + $0x10] sm:$0xff] }
  0x2a   : > { %942 = vmatpush.msrb.mxu3 %v902_v8  ;;  %317 = vmatpush.msra.mxu0 %v276_v11  ;;  %v2521_v27 = vld [vmem:[%s4355_s1 + $0x58] sm:$0xff]  ;;  %v2547_v29 = vld [vmem:[%s4355_s1 + $0xa0] sm:$0xff]  ;;  %v3364_v36 = vld [vmem:[%s4354_s0 + $0x10] sm:$0xff]  }
  0x2b   : > { %382 = vmatpush.msra.mxu1 %v264_v12  ;;  %2527 = vmatmul.msk.f32.vlgmr.msra.gmra.mxu0 %vm277_vm1, %v2518_v13  ;;  %v258_v28 = vld [vmem:[%s4355_s1 + $0x18] sm:$0xff]  ;;  %v2564_v30 = vld [vmem:[%s4355_s1 + $0xe0] sm:$0xff]  ;;  %v3369_v37 = vld [vmem:[%s4354_s0 + $0xc] sm:$0xff]   ;;  %v1073_v38 = vunpack.c.l.bf16 %v3364_v36  ;;  %v1471_v11 = vunpack.c.h.bf16 %v3364_v36 }
  0x2c   : > { %2535 = vmatmul.msk.f32.vlgmr.msra.gmra.mxu1 %vm277_vm1, %v255_v14  ;;  %716 = vmatpush.msrb.mxu0 %v676_v15  ;;  %v2522_v31 = vld [vmem:[%s4355_s1 + $0x60] sm:$0xff]  ;;  %v2695_v33 = vld [vmem:[%s4354_s0 + $0x18] sm:$0xff]   ;;  %v1062_v39 = vunpack.c.l.bf16 %v3369_v37  ;;  %v2548_v40 = vld [vmem:[%s4355_s1 + $0xa8] sm:$0xff]  ;;  %v1460_v12 = vunpack.c.h.bf16 %v3369_v37 }
  0x2d   : > { %781 = vmatpush.msrb.mxu1 %v664_v16  ;;  %v259_v32 = vld [vmem:[%s4355_s1 + $0x20] sm:$0xff]  ;;  %v1215_v34 = vunpack.c.l.bf16 %v2695_v33  ;;  %v1300_v35 = vunpack.c.h.bf16 %v2695_v33  ;;  %v2565_v41 = vld [vmem:[%s4355_s1 + $0xe8] sm:$0xff]  ;;  %v2549_v44 = vld [vmem:[%s4355_s1 + $0xb0] sm:$0xff] }
  0x2e   : > { %1113 = vmatpush.msra.mxu0 %v1073_v38  ;;  %v2523_v42 = vld [vmem:[%s4355_s1 + $0x68] sm:$0xff]  ;;  %v2566_v45 = vld [vmem:[%s4355_s1 + $0xf0] sm:$0xff]  ;;  %v2550_v48 = vld [vmem:[%s4355_s1 + $0xb8] sm:$0xff] }
  0x2f   : > { %1255 = vmatpush.msra.mxu2 %v1215_v34  ;;  %1340 = vmatpush.msra.mxu3 %v1300_v35  ;;  %v260_v43 = vld [vmem:[%s4355_s1 + $0x28] sm:$0xff]  ;;  %v2524_v46 = vld [vmem:[%s4355_s1 + $0x70] sm:$0xff]  ;;  %v2567_v49 = vld [vmem:[%s4355_s1 + $0xf8] sm:$0xff] }
  0x30   : > { %2553 = vmatmul.msk.f32.gmra.mxu2 %vm277_vm1, %v2544_v17  ;;  %1178 = vmatpush.msra.mxu1 %v1062_v39  ;;  %v261_v47 = vld [vmem:[%s4355_s1 + $0x30] sm:$0xff]  ;;  %v2525_v50 = vld [vmem:[%s4355_s1 + $0x78] sm:$0xff]  ;;  %v2611_v52 = vld [vmem:[%s4355_s1 + $0x180] sm:$0xff] }
  0x31   : > { %2570 = vmatmul.msk.f32.gmra.mxu3 %vm277_vm1, %v2561_v18  ;;  %v262_v51 = vld [vmem:[%s4355_s1 + $0x38] sm:$0xff]  ;;  %v2628_v53 = vld [vmem:[%s4355_s1 + $0x1c0] sm:$0xff]  ;;  %v2612_v56 = vld [vmem:[%s4355_s1 + $0x188] sm:$0xff] }
  0x32   : > { %v2586_v54 = vld [vmem:[%s4355_s1 + $0x140] sm:$0xff]  ;;  %v2629_v57 = vld [vmem:[%s4355_s1 + $0x1c8] sm:$0xff]  ;;  %v2613_v60 = vld [vmem:[%s4355_s1 + $0x190] sm:$0xff] }
  0x33   : > { %2528 = vmatmul.msk.f32.gmra.mxu0 %vm277_vm1, %v2519_v19  ;;  %v2577_v55 = vld [vmem:[%s4355_s1 + $0x100] sm:$0xff]  ;;  %v2587_v58 = vld [vmem:[%s4355_s1 + $0x148] sm:$0xff]  ;;  %v2630_v61 = vld [vmem:[%s4355_s1 + $0x1d0] sm:$0xff] }
  0x34   : > { %2536 = vmatmul.msk.f32.gmra.mxu1 %vm277_vm1, %v256_v20  ;;  %v2578_v59 = vld [vmem:[%s4355_s1 + $0x108] sm:$0xff]  ;;  %v2588_v62 = vld [vmem:[%s4355_s1 + $0x150] sm:$0xff]  ;;  %v2614_v0 = vld [vmem:[%s4355_s1 + $0x198] sm:$0xff] }
  0x35   : > { %v2579_v63 = vld [vmem:[%s4355_s1 + $0x110] sm:$0xff]  ;;  %v2631_v1 = vld [vmem:[%s4355_s1 + $0x1d8] sm:$0xff]  ;;  %v2615_v4 = vld [vmem:[%s4355_s1 + $0x1a0] sm:$0xff] }
  0x36   : > { %v2589_v2 = vld [vmem:[%s4355_s1 + $0x158] sm:$0xff]  ;;  %v2632_v5 = vld [vmem:[%s4355_s1 + $0x1e0] sm:$0xff]  ;;  %v2616_v13 = vld [vmem:[%s4355_s1 + $0x1a8] sm:$0xff] }
  0x37   : > { %v2580_v3 = vld [vmem:[%s4355_s1 + $0x118] sm:$0xff]  ;;  %v2590_v6 = vld [vmem:[%s4355_s1 + $0x160] sm:$0xff]  ;;  %v2633_v14 = vld [vmem:[%s4355_s1 + $0x1e8] sm:$0xff] }
  0x38   : > { %2554 = vmatmul.msk.f32.gmra.mxu2 %vm277_vm1, %v2545_v21  ;;  %v2581_v7 = vld [vmem:[%s4355_s1 + $0x120] sm:$0xff]  ;;  %v2591_v15 = vld [vmem:[%s4355_s1 + $0x168] sm:$0xff]  ;;  %v2617_v17 = vld [vmem:[%s4355_s1 + $0x1b0] sm:$0xff] }
  0x39   : > { %2571 = vmatmul.msk.f32.gmra.mxu3 %vm277_vm1, %v2562_v22  ;;  %v2771_v8 = vld [vmem:[%s4354_s0 + $0x1c] sm:$0xff]   ;;  %v2582_v16 = vld [vmem:[%s4355_s1 + $0x128] sm:$0xff]  ;;  %v2634_v18 = vld [vmem:[%s4355_s1 + $0x1f0] sm:$0xff] }
  0x3a   : > { %v1612_v9 = vunpack.c.l.bf16 %v2771_v8  ;;  %v1697_v10 = vunpack.c.h.bf16 %v2771_v8  ;;  %v2592_v19 = vld [vmem:[%s4355_s1 + $0x170] sm:$0xff]  ;;  %v2618_v21 = vld [vmem:[%s4355_s1 + $0x1b8] sm:$0xff]  ;;  %v2688_v35 = vld [vmem:[%s4355_s1 + $0x288] sm:$0xff] }
  0x3b   : > { %2529 = vmatmul.msk.f32.gmra.mxu0 %vm277_vm1, %v2520_v23  ;;  %v2583_v20 = vld [vmem:[%s4355_s1 + $0x130] sm:$0xff]  ;;  %v2635_v22 = vld [vmem:[%s4355_s1 + $0x1f8] sm:$0xff]  ;;  %v2705_v37 = vld [vmem:[%s4355_s1 + $0x2c8] sm:$0xff] }
  0x3c   : > { %2537 = vmatmul.msk.f32.gmra.mxu1 %vm277_vm1, %v257_v24  ;;  %v2593_v23 = vld [vmem:[%s4355_s1 + $0x178] sm:$0xff] }
  0x3d   : > { %v2584_v24 = vld [vmem:[%s4355_s1 + $0x138] sm:$0xff] }
  0x40   : > { %2555 = vmatmul.msk.f32.gmra.mxu2 %vm277_vm1, %v2546_v25  ;;  %v2687_v25 = vld [vmem:[%s4355_s1 + $0x280] sm:$0xff] }
  0x41   : > { %2572 = vmatmul.msk.f32.gmra.mxu3 %vm277_vm1, %v2563_v26  ;;  %v2704_v26 = vld [vmem:[%s4355_s1 + $0x2c0] sm:$0xff] }
  0x43   : > { %2530 = vmatmul.msk.f32.gmra.mxu0 %vm277_vm1, %v2521_v27 }
  0x44   : > { %2538 = vmatmul.msk.f32.gmra.mxu1 %vm277_vm1, %v258_v28 }
  0x48   : > { %2556 = vmatmul.msk.f32.gmra.mxu2 %vm277_vm1, %v2547_v29  ;;  %v2662_v29 = vld [vmem:[%s4355_s1 + $0x240] sm:$0xff] }
  0x49   : > { %2573 = vmatmul.msk.f32.gmra.mxu3 %vm277_vm1, %v2564_v30  ;;  %v2653_v30 = vld [vmem:[%s4355_s1 + $0x200] sm:$0xff] }
  0x4b   : > { %2531 = vmatmul.msk.f32.gmra.mxu0 %vm277_vm1, %v2522_v31 }
  0x4c   : > { %2539 = vmatmul.msk.f32.gmra.mxu1 %vm277_vm1, %v259_v32 }
  0x50   : > { %2557 = vmatmul.msk.f32.gmra.mxu2 %vm277_vm1, %v2548_v40 }
  0x51   : > { %2574 = vmatmul.msk.f32.gmra.mxu3 %vm277_vm1, %v2565_v41  ;;  %v2663_v41 = vld [vmem:[%s4355_s1 + $0x248] sm:$0xff] }
  0x53   : > { %2532 = vmatmul.msk.f32.gmra.mxu0 %vm277_vm1, %v2523_v42  ;;  %v2654_v42 = vld [vmem:[%s4355_s1 + $0x208] sm:$0xff] }
  0x54   : > { %2540 = vmatmul.msk.f32.gmra.mxu1 %vm277_vm1, %v260_v43 }
  0x58   : > { %2558 = vmatmul.msk.f32.gmra.mxu2 %vm277_vm1, %v2549_v44 }
  0x59   : > { %2575 = vmatmul.msk.f32.gmra.mxu3 %vm277_vm1, %v2566_v45 }
  0x5b   : > { %2533 = vmatmul.msk.f32.gmra.mxu0 %vm277_vm1, %v2524_v46 }
  0x5c   : > { %2541 = vmatmul.msk.f32.gmra.mxu1 %vm277_vm1, %v261_v47  ;;  %v2689_v47 = vld [vmem:[%s4355_s1 + $0x290] sm:$0xff] }
  0x60   : > { %2559 = vmatmul.msk.f32.gmra.mxu2 %vm277_vm1, %v2550_v48 }
  0x61   : > { %2576 = vmatmul.msk.f32.gmra.mxu3 %vm277_vm1, %v2567_v49  ;;  %v2706_v49 = vld [vmem:[%s4355_s1 + $0x2d0] sm:$0xff] }
  0x63   : > { %2534 = vmatmul.msk.f32.gmra.mxu0 %vm277_vm1, %v2525_v50 }
  0x64   : > { %2542 = vmatmul.msk.f32.gmra.mxu1 %vm277_vm1, %v262_v51 }
  0x68   : > { %2620 = vmatmul.msk.f32.vlgmr.msrb.gmra.mxu2 %vm277_vm1, %v2611_v52 }
  0x69   : > { %2637 = vmatmul.msk.f32.vlgmr.msrb.gmra.mxu3 %vm277_vm1, %v2628_v53  ;;  %1652 = vmatpush.msrb.mxu2 %v1612_v9  ;;  %v2664_v53 = vld [vmem:[%s4355_s1 + $0x250] sm:$0xff] }
  0x6a   : > { %1737 = vmatpush.msrb.mxu3 %v1697_v10  ;;  %v2708_v10 = vld [vmem:[%s4355_s1 + $0x2e0] sm:$0xff] }
  0x6b   : > { %2595 = vmatmul.msk.f32.vlgmr.msrb.gmra.mxu0 %vm277_vm1, %v2586_v54  ;;  %v2655_v54 = vld [vmem:[%s4355_s1 + $0x210] sm:$0xff] }
  0x6c   : > { %2603 = vmatmul.msk.f32.vlgmr.msrb.gmra.mxu1 %vm277_vm1, %v2577_v55  ;;  %1511 = vmatpush.msrb.mxu0 %v1471_v11 }
  0x6d   : > { %1576 = vmatpush.msrb.mxu1 %v1460_v12 }
  0x70   : > { %2621 = vmatmul.msk.f32.gmra.mxu2 %vm277_vm1, %v2612_v56 }
  0x71   : > { %2638 = vmatmul.msk.f32.gmra.mxu3 %vm277_vm1, %v2629_v57 }
  0x73   : > { %2596 = vmatmul.msk.f32.gmra.mxu0 %vm277_vm1, %v2587_v58 }
  0x74   : > { %2604 = vmatmul.msk.f32.gmra.mxu1 %vm277_vm1, %v2578_v59  ;;  %v2690_v59 = vld [vmem:[%s4355_s1 + $0x298] sm:$0xff] }
  0x78   : > { %2622 = vmatmul.msk.f32.gmra.mxu2 %vm277_vm1, %v2613_v60 }
  0x79   : > { %2639 = vmatmul.msk.f32.gmra.mxu3 %vm277_vm1, %v2630_v61  ;;  %v2707_v61 = vld [vmem:[%s4355_s1 + $0x2d8] sm:$0xff] }
  0x7b   : > { %2597 = vmatmul.msk.f32.gmra.mxu0 %vm277_vm1, %v2588_v62 }
  0x7c   : > { %2605 = vmatmul.msk.f32.gmra.mxu1 %vm277_vm1, %v2579_v63 }
  0x80   : > { %2623 = vmatmul.msk.f32.gmra.mxu2 %vm277_vm1, %v2614_v0 }
  0x81   : > { %2640 = vmatmul.msk.f32.gmra.mxu3 %vm277_vm1, %v2631_v1  ;;  %v2665_v1 = vld [vmem:[%s4355_s1 + $0x258] sm:$0xff] }
  0x83   : > { %2598 = vmatmul.msk.f32.gmra.mxu0 %vm277_vm1, %v2589_v2  ;;  %v2656_v2 = vld [vmem:[%s4355_s1 + $0x218] sm:$0xff] }
  0x84   : > { %2606 = vmatmul.msk.f32.gmra.mxu1 %vm277_vm1, %v2580_v3 }
  0x88   : > { %2624 = vmatmul.msk.f32.gmra.mxu2 %vm277_vm1, %v2615_v4 }
  0x89   : > { %2641 = vmatmul.msk.f32.gmra.mxu3 %vm277_vm1, %v2632_v5 }
  0x8b   : > { %2599 = vmatmul.msk.f32.gmra.mxu0 %vm277_vm1, %v2590_v6 }
  0x8c   : > { %2607 = vmatmul.msk.f32.gmra.mxu1 %vm277_vm1, %v2581_v7  ;;  %v2691_v7 = vld [vmem:[%s4355_s1 + $0x2a0] sm:$0xff] }
  0x90   : > { %2625 = vmatmul.msk.f32.gmra.mxu2 %vm277_vm1, %v2616_v13 }
  0x91   : > { %2642 = vmatmul.msk.f32.gmra.mxu3 %vm277_vm1, %v2633_v14 }
  0x93   : > { %2600 = vmatmul.msk.f32.gmra.mxu0 %vm277_vm1, %v2591_v15  ;;  %v2666_v15 = vld [vmem:[%s4355_s1 + $0x260] sm:$0xff] }
  0x94   : > { %2608 = vmatmul.msk.f32.gmra.mxu1 %vm277_vm1, %v2582_v16  ;;  %v2657_v16 = vld [vmem:[%s4355_s1 + $0x220] sm:$0xff] }
  0x98   : > { %2626 = vmatmul.msk.f32.gmra.mxu2 %vm277_vm1, %v2617_v17 }
  0x99   : > { %2643 = vmatmul.msk.f32.gmra.mxu3 %vm277_vm1, %v2634_v18 }
  0x9b   : > { %2601 = vmatmul.msk.f32.gmra.mxu0 %vm277_vm1, %v2592_v19 }
  0x9c   : > { %2609 = vmatmul.msk.f32.gmra.mxu1 %vm277_vm1, %v2583_v20 }
  0xa0   : > { %2627 = vmatmul.msk.f32.gmra.mxu2 %vm277_vm1, %v2618_v21  ;;  %v2692_v21 = vld [vmem:[%s4355_s1 + $0x2a8] sm:$0xff] }
  0xa1   : > { %2644 = vmatmul.msk.f32.gmra.mxu3 %vm277_vm1, %v2635_v22 }
  0xa3   : > { %2602 = vmatmul.msk.f32.gmra.mxu0 %vm277_vm1, %v2593_v23  ;;  %v2709_v23 = vld [vmem:[%s4355_s1 + $0x2e8] sm:$0xff] }
  0xa4   : > { %2610 = vmatmul.msk.f32.gmra.mxu1 %vm277_vm1, %v2584_v24 }
  0xa8   : > { %2696 = vmatmul.msk.f32.vlgmr.msra.gmra.mxu2 %vm277_vm1, %v2687_v25  ;;  %v319_v27 = vpop.f32.mrf.mxu0 }
  0xa9   : > { %v384_v28 = vpop.f32.mrf.mxu1  ;;  %2713 = vmatmul.msk.f32.vlgmr.msra.gmra.mxu3 %vm277_vm1, %v2704_v26 }
  0xaa   : > { %v385_v31 = vadd.f32 %v384_v28, %v319_v27  ;;  %v2667_v27 = vld [vmem:[%s4355_s1 + $0x268] sm:$0xff] }
  0xab   : > { %v461_v32 = vpop.f32.mrf.mxu2  ;;  %2671 = vmatmul.msk.f32.vlgmr.msra.gmra.mxu0 %vm277_vm1, %v2662_v29  ;;  %v2658_v28 = vld [vmem:[%s4355_s1 + $0x228] sm:$0xff] }
  0xac   : > { %2679 = vmatmul.msk.f32.vlgmr.msra.gmra.mxu1 %vm277_vm1, %v2653_v30  ;;  %v546_v33 = vpop.f32.mrf.mxu3  ;;  %v485_v34 = vadd.f32 %v461_v32, %v385_v31 }
  0xae   : > { %v570_v36 = vadd.f32 %v546_v33, %v485_v34  ;;  %v2693_v33 = vld [vmem:[%s4355_s1 + $0x2b0] sm:$0xff] }
  0xb0   : > { %2697 = vmatmul.msk.f32.gmra.mxu2 %vm277_vm1, %v2688_v35  ;;  %578 = vadd.xlane.f32.xlu0 %v570_v36  ;;  %v322_v38 = vpop.f32.mrf.mxu0  ;;  %v602_v40 = vmul.f32 %v570_v36, %v570_v36  ;;  %v2710_v35 = vld [vmem:[%s4355_s1 + $0x2f0] sm:$0xff] }
  0xb1   : > { %v387_v39 = vpop.f32.mrf.mxu1  ;;  %2714 = vmatmul.msk.f32.gmra.mxu3 %vm277_vm1, %v2705_v37 }
  0xb2   : > { %v388_v43 = vadd.f32 %v387_v39, %v322_v38  ;;  %610 = vadd.xlane.f32.xlu2 %v602_v40  ;;  %v2668_v40 = vld [vmem:[%s4355_s1 + $0x270] sm:$0xff] }
  0xb3   : > { %v464_v44 = vpop.f32.mrf.mxu2  ;;  %2672 = vmatmul.msk.f32.gmra.mxu0 %vm277_vm1, %v2663_v41  ;;  %v2659_v41 = vld [vmem:[%s4355_s1 + $0x230] sm:$0xff] }
  0xb4   : > { %2680 = vmatmul.msk.f32.gmra.mxu1 %vm277_vm1, %v2654_v42  ;;  %v549_v45 = vpop.f32.mrf.mxu3  ;;  %v486_v46 = vadd.f32 %v464_v44, %v388_v43 }
  0xb6   : > { %v571_v48 = vadd.f32 %v549_v45, %v486_v46  ;;  %v2694_v46 = vld [vmem:[%s4355_s1 + $0x2b8] sm:$0xff] }
  0xb8   : > { %v2862_v50 = vpack.c.bf16 %v571_v48, %v570_v36  ;;  %2698 = vmatmul.msk.f32.gmra.mxu2 %vm277_vm1, %v2689_v47  ;;  %580 = vadd.xlane.f32.xlu0 %v571_v48  ;;  %v325_v51 = vpop.f32.mrf.mxu0  ;;  %v603_v62 = vmul.f32 %v571_v48, %v571_v48  ;;  %v2711_v48 = vld [vmem:[%s4355_s1 + $0x2f8] sm:$0xff] }
  0xb9   : > { %v390_v52 = vpop.f32.mrf.mxu1  ;;  %2715 = vmatmul.msk.f32.gmra.mxu3 %vm277_vm1, %v2706_v49 }
  0xba   : > { %v391_v55 = vadd.f32 %v390_v52, %v325_v51  ;;  %2863 = vst [vmem:[#allocation2 + $0x30] sm:$0xff] %v2862_v50   ;;  %v2669_v52 = vld [vmem:[%s4355_s1 + $0x278] sm:$0xff] }
  0xbb   : > { %v467_v56 = vpop.f32.mrf.mxu2  ;;  %2673 = vmatmul.msk.f32.gmra.mxu0 %vm277_vm1, %v2664_v53  ;;  %v2660_v53 = vld [vmem:[%s4355_s1 + $0x238] sm:$0xff] }
  0xbc   : > { %2681 = vmatmul.msk.f32.gmra.mxu1 %vm277_vm1, %v2655_v54  ;;  %v552_v57 = vpop.f32.mrf.mxu3  ;;  %v487_v58 = vadd.f32 %v467_v56, %v391_v55 }
  0xbe   : > { %v572_v60 = vadd.f32 %v552_v57, %v487_v58  ;;  %v2763_v58 = vld [vmem:[%s4355_s1 + $0x380] sm:$0xff] }
  0xc0   : > { %2699 = vmatmul.msk.f32.gmra.mxu2 %vm277_vm1, %v2690_v59  ;;  %582 = vadd.xlane.f32.xlu1 %v572_v60  ;;  %v328_v63 = vpop.f32.mrf.mxu0  ;;  %v604_v9 = vmul.f32 %v572_v60, %v572_v60 }
  0xc1   : > { %v393_v0 = vpop.f32.mrf.mxu1  ;;  %612 = vadd.xlane.f32.xlu0 %v603_v62  ;;  %2716 = vmatmul.msk.f32.gmra.mxu3 %vm277_vm1, %v2707_v61 }
  0xc2   : > { %v394_v3 = vadd.f32 %v393_v0, %v328_v63 }
  0xc3   : > { %v470_v4 = vpop.f32.mrf.mxu2  ;;  %2674 = vmatmul.msk.f32.gmra.mxu0 %vm277_vm1, %v2665_v1  ;;  %v2738_v1 = vld [vmem:[%s4355_s1 + $0x340] sm:$0xff] }
  0xc4   : > { %2682 = vmatmul.msk.f32.gmra.mxu1 %vm277_vm1, %v2656_v2  ;;  %v555_v5 = vpop.f32.mrf.mxu3  ;;  %v488_v6 = vadd.f32 %v470_v4, %v394_v3  ;;  %v2729_v2 = vld [vmem:[%s4355_s1 + $0x300] sm:$0xff] }
  0xc6   : > { %v573_v8 = vadd.f32 %v555_v5, %v488_v6 }
  0xc8   : > { %v2867_v11 = vpack.c.bf16 %v573_v8, %v572_v60  ;;  %2700 = vmatmul.msk.f32.gmra.mxu2 %vm277_vm1, %v2691_v7  ;;  %614 = vadd.xlane.f32.xlu1 %v604_v9  ;;  %v331_v12 = vpop.f32.mrf.mxu0  ;;  %v605_v14 = vmul.f32 %v573_v8, %v573_v8  ;;  %v2780_v60 = vld [vmem:[%s4355_s1 + $0x3c0] sm:$0xff]  ;;  %v2764_v7 = vld [vmem:[%s4355_s1 + $0x388] sm:$0xff] }
  0xc9   : > { %v396_v13 = vpop.f32.mrf.mxu1  ;;  %2717 = vmatmul.msk.f32.gmra.mxu3 %vm277_vm1, %v2708_v10  ;;  %v2781_v9 = vld [vmem:[%s4355_s1 + $0x3c8] sm:$0xff] }
  0xca   : > { %v397_v17 = vadd.f32 %v396_v13, %v331_v12  ;;  %3083 = vst [vmem:[#allocation2] sm:$0xff] %v2867_v11   ;;  %616 = vadd.xlane.f32.xlu2 %v605_v14  ;;  %v2739_v13 = vld [vmem:[%s4355_s1 + $0x348] sm:$0xff] }
  0xcb   : > { %v473_v18 = vpop.f32.mrf.mxu2  ;;  %2675 = vmatmul.msk.f32.gmra.mxu0 %vm277_vm1, %v2666_v15  ;;  %v2730_v14 = vld [vmem:[%s4355_s1 + $0x308] sm:$0xff] }
  0xcc   : > { %2683 = vmatmul.msk.f32.gmra.mxu1 %vm277_vm1, %v2657_v16  ;;  %v558_v19 = vpop.f32.mrf.mxu3  ;;  %v489_v20 = vadd.f32 %v473_v18, %v397_v17 }
  0xce   : > { %v574_v22 = vadd.f32 %v558_v19, %v489_v20  ;;  %v2765_v19 = vld [vmem:[%s4355_s1 + $0x390] sm:$0xff] }
  0xd0   : > { %2701 = vmatmul.msk.f32.gmra.mxu2 %vm277_vm1, %v2692_v21  ;;  %584 = vadd.xlane.f32.xlu1 %v573_v8  ;;  %v334_v24 = vpop.f32.mrf.mxu0  ;;  %v606_v26 = vmul.f32 %v574_v22, %v574_v22  ;;  %v2782_v21 = vld [vmem:[%s4355_s1 + $0x3d0] sm:$0xff] }
  0xd1   : > { %v399_v25 = vpop.f32.mrf.mxu1  ;;  %2718 = vmatmul.msk.f32.gmra.mxu3 %vm277_vm1, %v2709_v23 }
  0xd2   : > { %v400_v29 = vadd.f32 %v399_v25, %v334_v24  ;;  %618 = vadd.xlane.f32.xlu0 %v606_v26  ;;  %586 = vadd.xlane.f32.xlu2 %v574_v22  ;;  %v2740_v26 = vld [vmem:[%s4355_s1 + $0x350] sm:$0xff] }
  0xd3   : > { %v476_v30 = vpop.f32.mrf.mxu2  ;;  %2676 = vmatmul.msk.f32.gmra.mxu0 %vm277_vm1, %v2667_v27  ;;  %v2731_v27 = vld [vmem:[%s4355_s1 + $0x310] sm:$0xff] }
  0xd4   : > { %2684 = vmatmul.msk.f32.gmra.mxu1 %vm277_vm1, %v2658_v28  ;;  %v561_v31 = vpop.f32.mrf.mxu3  ;;  %v490_v32 = vadd.f32 %v476_v30, %v400_v29 }
  0xd6   : > { %v575_v34 = vadd.f32 %v561_v31, %v490_v32  ;;  %v2766_v32 = vld [vmem:[%s4355_s1 + $0x398] sm:$0xff] }
  0xd8   : > { %v2872_v36 = vpack.c.bf16 %v575_v34, %v574_v22  ;;  %2702 = vmatmul.msk.f32.gmra.mxu2 %vm277_vm1, %v2693_v33  ;;  %v337_v37 = vpop.f32.mrf.mxu0  ;;  %v607_v39 = vmul.f32 %v575_v34, %v575_v34 }
  0xd9   : > { %v402_v38 = vpop.f32.mrf.mxu1  ;;  %2719 = vmatmul.msk.f32.gmra.mxu3 %vm277_vm1, %v2710_v35 }
  0xda   : > { %v403_v42 = vadd.f32 %v402_v38, %v337_v37  ;;  %3084 = vst [vmem:[#allocation2 + $0x58] sm:$0xff] %v2872_v36   ;;  %620 = vadd.xlane.f32.xlu1 %v607_v39  ;;  %588 = vadd.xlane.f32.xlu2 %v575_v34  ;;  %v2783_v34 = vld [vmem:[%s4355_s1 + $0x3d8] sm:$0xff] }
  0xdb   : > { %v479_v43 = vpop.f32.mrf.mxu2  ;;  %2677 = vmatmul.msk.f32.gmra.mxu0 %vm277_vm1, %v2668_v40  ;;  %v2741_v38 = vld [vmem:[%s4355_s1 + $0x358] sm:$0xff] }
  0xdc   : > { %2685 = vmatmul.msk.f32.gmra.mxu1 %vm277_vm1, %v2659_v41  ;;  %v564_v44 = vpop.f32.mrf.mxu3  ;;  %v491_v45 = vadd.f32 %v479_v43, %v403_v42  ;;  %v2732_v39 = vld [vmem:[%s4355_s1 + $0x318] sm:$0xff] }
  0xde   : > { %v576_v47 = vadd.f32 %v564_v44, %v491_v45  ;;  %v2767_v44 = vld [vmem:[%s4355_s1 + $0x3a0] sm:$0xff] }
  0xe0   : > { %2703 = vmatmul.msk.f32.gmra.mxu2 %vm277_vm1, %v2694_v46  ;;  %590 = vadd.xlane.f32.xlu0 %v576_v47  ;;  %v340_v49 = vpop.f32.mrf.mxu0  ;;  %v608_v51 = vmul.f32 %v576_v47, %v576_v47  ;;  %v2784_v46 = vld [vmem:[%s4355_s1 + $0x3e0] sm:$0xff] }
  0xe1   : > { %v405_v50 = vpop.f32.mrf.mxu1  ;;  %2720 = vmatmul.msk.f32.gmra.mxu3 %vm277_vm1, %v2711_v48 }
  0xe2   : > { %v406_v54 = vadd.f32 %v405_v50, %v340_v49  ;;  %622 = vadd.xlane.f32.xlu2 %v608_v51  ;;  %v2742_v51 = vld [vmem:[%s4355_s1 + $0x360] sm:$0xff] }
  0xe3   : > { %v482_v55 = vpop.f32.mrf.mxu2  ;;  %2678 = vmatmul.msk.f32.gmra.mxu0 %vm277_vm1, %v2669_v52  ;;  %v2733_v52 = vld [vmem:[%s4355_s1 + $0x320] sm:$0xff] }
  0xe4   : > { %2686 = vmatmul.msk.f32.gmra.mxu1 %vm277_vm1, %v2660_v53  ;;  %v567_v56 = vpop.f32.mrf.mxu3  ;;  %v492_v57 = vadd.f32 %v482_v55, %v406_v54 }
  0xe6   : > { %v577_v59 = vadd.f32 %v567_v56, %v492_v57  ;;  %v2768_v57 = vld [vmem:[%s4355_s1 + $0x3a8] sm:$0xff] }
  0xe8   : > { %v2877_v61 = vpack.c.bf16 %v577_v59, %v576_v47  ;;  %2772 = vmatmul.msk.f32.vlgmr.msrb.gmra.mxu2 %vm277_vm1, %v2763_v58  ;;  %592 = vadd.xlane.f32.xlu1 %v577_v59  ;;  %v718_v62 = vpop.f32.mrf.mxu0  ;;  %v609_v0 = vmul.f32 %v577_v59, %v577_v59  ;;  %v2785_v59 = vld [vmem:[%s4355_s1 + $0x3e8] sm:$0xff] }
  0xe9   : > { %v783_v63 = vpop.f32.mrf.mxu1  ;;  %2789 = vmatmul.msk.f32.vlgmr.msrb.gmra.mxu3 %vm277_vm1, %v2780_v60 }
  0xea   : > { %v784_v3 = vadd.f32 %v783_v63, %v718_v62  ;;  %3085 = vst [vmem:[#allocation2 + $0x18] sm:$0xff] %v2877_v61   ;;  %624 = vadd.xlane.f32.xlu0 %v609_v0  ;;  %v2743_v63 = vld [vmem:[%s4355_s1 + $0x368] sm:$0xff] }
  0xeb   : > { %v859_v4 = vpop.f32.mrf.mxu2  ;;  %2747 = vmatmul.msk.f32.vlgmr.msrb.gmra.mxu0 %vm277_vm1, %v2738_v1  ;;  %v2734_v0 = vld [vmem:[%s4355_s1 + $0x328] sm:$0xff] }
  0xec   : > { %2755 = vmatmul.msk.f32.vlgmr.msrb.gmra.mxu1 %vm277_vm1, %v2729_v2  ;;  %v944_v5 = vpop.f32.mrf.mxu3  ;;  %v883_v6 = vadd.f32 %v859_v4, %v784_v3 }
  0xee   : > { %v968_v8 = vadd.f32 %v944_v5, %v883_v6  ;;  %v2769_v5 = vld [vmem:[%s4355_s1 + $0x3b0] sm:$0xff] }
  0xf0   : > { %2773 = vmatmul.msk.f32.gmra.mxu2 %vm277_vm1, %v2764_v7  ;;  %976 = vadd.xlane.f32.xlu1 %v968_v8  ;;  %v721_v10 = vpop.f32.mrf.mxu0  ;;  %v1000_v12 = vmul.f32 %v968_v8, %v968_v8  ;;  %v2786_v7 = vld [vmem:[%s4355_s1 + $0x3f0] sm:$0xff] }
  0xf1   : > { %v786_v11 = vpop.f32.mrf.mxu1  ;;  %2790 = vmatmul.msk.f32.gmra.mxu3 %vm277_vm1, %v2781_v9 }
  0xf2   : > { %v787_v15 = vadd.f32 %v786_v11, %v721_v10  ;;  %1008 = vadd.xlane.f32.xlu0 %v1000_v12  ;;  %v2744_v12 = vld [vmem:[%s4355_s1 + $0x370] sm:$0xff] }
  0xf3   : > { %v862_v16 = vpop.f32.mrf.mxu2  ;;  %2748 = vmatmul.msk.f32.gmra.mxu0 %vm277_vm1, %v2739_v13  ;;  %v2735_v13 = vld [vmem:[%s4355_s1 + $0x330] sm:$0xff] }
  0xf4   : > { %2756 = vmatmul.msk.f32.gmra.mxu1 %vm277_vm1, %v2730_v14  ;;  %v947_v17 = vpop.f32.mrf.mxu3  ;;  %v884_v18 = vadd.f32 %v862_v16, %v787_v15 }
  0xf6   : > { %v969_v20 = vadd.f32 %v947_v17, %v884_v18  ;;  %v2770_v18 = vld [vmem:[%s4355_s1 + $0x3b8] sm:$0xff] }
  0xf8   : > { %v2882_v22 = vpack.c.bf16 %v969_v20, %v968_v8  ;;  %2774 = vmatmul.msk.f32.gmra.mxu2 %vm277_vm1, %v2765_v19  ;;  %978 = vadd.xlane.f32.xlu2 %v969_v20  ;;  %v724_v23 = vpop.f32.mrf.mxu0  ;;  %v1001_v25 = vmul.f32 %v969_v20, %v969_v20  ;;  %v2787_v20 = vld [vmem:[%s4355_s1 + $0x3f8] sm:$0xff] }
  0xf9   : > { %v789_v24 = vpop.f32.mrf.mxu1  ;;  %2791 = vmatmul.msk.f32.gmra.mxu3 %vm277_vm1, %v2782_v21 }
  0xfa   : > { %v790_v28 = vadd.f32 %v789_v24, %v724_v23  ;;  %3086 = vst [vmem:[#allocation2 + $0x50] sm:$0xff] %v2882_v22   ;;  %1010 = vadd.xlane.f32.xlu1 %v1001_v25  ;;  %v2745_v24 = vld [vmem:[%s4355_s1 + $0x378] sm:$0xff] }
  0xfb   : > { %v865_v29 = vpop.f32.mrf.mxu2  ;;  %2749 = vmatmul.msk.f32.gmra.mxu0 %vm277_vm1, %v2740_v26  ;;  %v2736_v25 = vld [vmem:[%s4355_s1 + $0x338] sm:$0xff] }
  0xfc   : > { %2757 = vmatmul.msk.f32.gmra.mxu1 %vm277_vm1, %v2731_v27  ;;  %v950_v30 = vpop.f32.mrf.mxu3  ;;  %v885_v31 = vadd.f32 %v865_v29, %v790_v28 }
  0xfe   : > { %v970_v33 = vadd.f32 %v950_v30, %v885_v31 }
 0x100   : > { %2775 = vmatmul.msk.f32.gmra.mxu2 %vm277_vm1, %v2766_v32  ;;  %980 = vadd.xlane.f32.xlu0 %v970_v33  ;;  %v727_v35 = vpop.f32.mrf.mxu0  ;;  %v1002_v37 = vmul.f32 %v970_v33, %v970_v33 }
 0x101   : > { %v792_v36 = vpop.f32.mrf.mxu1  ;;  %2792 = vmatmul.msk.f32.gmra.mxu3 %vm277_vm1, %v2783_v34 }
 0x102   : > { %v793_v40 = vadd.f32 %v792_v36, %v727_v35  ;;  %1012 = vadd.xlane.f32.xlu2 %v1002_v37 }
 0x103   : > { %v868_v41 = vpop.f32.mrf.mxu2  ;;  %2750 = vmatmul.msk.f32.gmra.mxu0 %vm277_vm1, %v2741_v38 }
 0x104   : > { %2758 = vmatmul.msk.f32.gmra.mxu1 %vm277_vm1, %v2732_v39  ;;  %v953_v42 = vpop.f32.mrf.mxu3  ;;  %v886_v43 = vadd.f32 %v868_v41, %v793_v40 }
 0x106   : > { %v971_v45 = vadd.f32 %v953_v42, %v886_v43 }
 0x108   : > { %v2887_v47 = vpack.c.bf16 %v971_v45, %v970_v33  ;;  %2776 = vmatmul.msk.f32.gmra.mxu2 %vm277_vm1, %v2767_v44  ;;  %982 = vadd.xlane.f32.xlu1 %v971_v45  ;;  %v730_v48 = vpop.f32.mrf.mxu0  ;;  %v1003_v50 = vmul.f32 %v971_v45, %v971_v45 }
 0x109   : > { %v795_v49 = vpop.f32.mrf.mxu1  ;;  %2793 = vmatmul.msk.f32.gmra.mxu3 %vm277_vm1, %v2784_v46 }
 0x10a   : > { %v796_v53 = vadd.f32 %v795_v49, %v730_v48  ;;  %3087 = vst [vmem:[#allocation2 + $0x68] sm:$0xff] %v2887_v47   ;;  %1014 = vadd.xlane.f32.xlu0 %v1003_v50 }
 0x10b   : > { %v871_v54 = vpop.f32.mrf.mxu2  ;;  %2751 = vmatmul.msk.f32.gmra.mxu0 %vm277_vm1, %v2742_v51 }
 0x10c   : > { %2759 = vmatmul.msk.f32.gmra.mxu1 %vm277_vm1, %v2733_v52  ;;  %v956_v55 = vpop.f32.mrf.mxu3  ;;  %v887_v56 = vadd.f32 %v871_v54, %v796_v53 }
 0x10e   : > { %v972_v58 = vadd.f32 %v956_v55, %v887_v56 }
 0x110   : > { %2777 = vmatmul.msk.f32.gmra.mxu2 %vm277_vm1, %v2768_v57  ;;  %984 = vadd.xlane.f32.xlu2 %v972_v58  ;;  %v733_v60 = vpop.f32.mrf.mxu0  ;;  %v1004_v62 = vmul.f32 %v972_v58, %v972_v58 }
 0x111   : > { %v798_v61 = vpop.f32.mrf.mxu1  ;;  %2794 = vmatmul.msk.f32.gmra.mxu3 %vm277_vm1, %v2785_v59 }
 0x112   : > { %v799_v1 = vadd.f32 %v798_v61, %v733_v60  ;;  %1016 = vadd.xlane.f32.xlu1 %v1004_v62 }
 0x113   : > { %v874_v2 = vpop.f32.mrf.mxu2  ;;  %2752 = vmatmul.msk.f32.gmra.mxu0 %vm277_vm1, %v2743_v63 }
 0x114   : > { %2760 = vmatmul.msk.f32.gmra.mxu1 %vm277_vm1, %v2734_v0  ;;  %v959_v3 = vpop.f32.mrf.mxu3  ;;  %v888_v4 = vadd.f32 %v874_v2, %v799_v1 }
 0x116   : > { %v973_v6 = vadd.f32 %v959_v3, %v888_v4 }
 0x118   : > { %v2892_v8 = vpack.c.bf16 %v973_v6, %v972_v58  ;;  %2778 = vmatmul.msk.f32.gmra.mxu2 %vm277_vm1, %v2769_v5  ;;  %986 = vadd.xlane.f32.xlu0 %v973_v6  ;;  %v736_v9 = vpop.f32.mrf.mxu0  ;;  %v1005_v11 = vmul.f32 %v973_v6, %v973_v6 }
 0x119   : > { %v801_v10 = vpop.f32.mrf.mxu1  ;;  %2795 = vmatmul.msk.f32.gmra.mxu3 %vm277_vm1, %v2786_v7 }
 0x11a   : > { %v802_v14 = vadd.f32 %v801_v10, %v736_v9  ;;  %3088 = vst [vmem:[#allocation2 + $0x8] sm:$0xff] %v2892_v8   ;;  %1018 = vadd.xlane.f32.xlu2 %v1005_v11 }
 0x11b   : > { %v877_v15 = vpop.f32.mrf.mxu2  ;;  %2753 = vmatmul.msk.f32.gmra.mxu0 %vm277_vm1, %v2744_v12 }
 0x11c   : > { %2761 = vmatmul.msk.f32.gmra.mxu1 %vm277_vm1, %v2735_v13  ;;  %v962_v16 = vpop.f32.mrf.mxu3  ;;  %v889_v17 = vadd.f32 %v877_v15, %v802_v14 }
 0x11e   : > { %v974_v19 = vadd.f32 %v962_v16, %v889_v17 }
 0x120   : > { %2779 = vmatmul.msk.f32.gmra.mxu2 %vm277_vm1, %v2770_v18  ;;  %988 = vadd.xlane.f32.xlu1 %v974_v19  ;;  %v739_v21 = vpop.f32.mrf.mxu0  ;;  %v1006_v23 = vmul.f32 %v974_v19, %v974_v19 }
 0x121   : > { %v804_v22 = vpop.f32.mrf.mxu1  ;;  %2796 = vmatmul.msk.f32.gmra.mxu3 %vm277_vm1, %v2787_v20 }
 0x122   : > { %v805_v26 = vadd.f32 %v804_v22, %v739_v21  ;;  %1020 = vadd.xlane.f32.xlu0 %v1006_v23 }
 0x123   : > { %v880_v27 = vpop.f32.mrf.mxu2  ;;  %2754 = vmatmul.msk.f32.gmra.mxu0 %vm277_vm1, %v2745_v24  ;;  %v3810_v43 = vpop.xlane.xlu0 %578 }
 0x124   : > { %2762 = vmatmul.msk.f32.gmra.mxu1 %vm277_vm1, %v2736_v25  ;;  %v890_v28 = vadd.f32 %v880_v27, %v805_v26  ;;  %v965_v29 = vpop.f32.mrf.mxu3 }
 0x125   : > { %v3814_v55 = vpop.xlane.xlu2 %610 }
 0x126   : > { %v975_v30 = vadd.f32 %v965_v29, %v890_v28 }
 0x128   : > { %v2897_v31 = vpack.c.bf16 %v975_v30, %v974_v19  ;;  %990 = vadd.xlane.f32.xlu2 %v975_v30  ;;  %v1115_v32 = vpop.f32.mrf.mxu0  ;;  %v1007_v34 = vmul.f32 %v975_v30, %v975_v30 }
 0x129   : > { %v1180_v33 = vpop.f32.mrf.mxu1 }
 0x12a   : > { %v1181_v35 = vadd.f32 %v1180_v33, %v1115_v32  ;;  %3089 = vst [vmem:[#allocation2 + $0x48] sm:$0xff] %v2897_v31   ;;  %1022 = vadd.xlane.f32.xlu1 %v1007_v34 }
 0x12b   : > { %v1257_v36 = vpop.f32.mrf.mxu2  ;;  %v3816_v56 = vpop.xlane.xlu0 %580 }
 0x12c   : > { %v1281_v37 = vadd.f32 %v1257_v36, %v1181_v35  ;;  %v1342_v38 = vpop.f32.mrf.mxu3 }
 0x12e   : > { %v1366_v39 = vadd.f32 %v1342_v38, %v1281_v37 }
 0x130   : > { %1374 = vadd.xlane.f32.xlu2 %v1366_v39  ;;  %v1118_v40 = vpop.f32.mrf.mxu0  ;;  %v1398_v42 = vmul.f32 %v1366_v39, %v1366_v39 }
 0x131   : > { %v1183_v41 = vpop.f32.mrf.mxu1 }
 0x132   : > { %v1184_v44 = vadd.f32 %v1183_v41, %v1118_v40  ;;  %1406 = vadd.xlane.f32.xlu1 %v1398_v42 }
 0x133   : > { %v1260_v45 = vpop.f32.mrf.mxu2  ;;  %v3812_v49 = vpop.xlane.xlu1 %582 }
 0x134   : > { %v1282_v46 = vadd.f32 %v1260_v45, %v1184_v44  ;;  %v1345_v47 = vpop.f32.mrf.mxu3  ;;  %v3822_v6 = vpop.xlane.xlu0 %612 }
 0x136   : > { %v1367_v48 = vadd.f32 %v1345_v47, %v1282_v46 }
 0x138   : > { %v2902_v50 = vpack.c.bf16 %v1367_v48, %v1366_v39  ;;  %1376 = vadd.xlane.f32.xlu0 %v1367_v48  ;;  %v1121_v51 = vpop.f32.mrf.mxu0  ;;  %v1399_v53 = vmul.f32 %v1367_v48, %v1367_v48 }
 0x139   : > { %v1186_v52 = vpop.f32.mrf.mxu1 }
 0x13a   : > { %v1187_v54 = vadd.f32 %v1186_v52, %v1121_v51  ;;  %3090 = vst [vmem:[#allocation2 + $0x40] sm:$0xff] %v2902_v50   ;;  %1408 = vadd.xlane.f32.xlu2 %v1399_v53 }
 0x13b   : > { %v1263_v57 = vpop.f32.mrf.mxu2  ;;  %v3818_v0 = vpop.xlane.xlu1 %614 }
 0x13c   : > { %v1283_v58 = vadd.f32 %v1263_v57, %v1187_v54  ;;  %v1348_v59 = vpop.f32.mrf.mxu3 }
 0x13d   : > { %v3820_v2 = vpop.xlane.xlu2 %616 }
 0x13e   : > { %v1368_v60 = vadd.f32 %v1348_v59, %v1283_v58 }
 0x140   : > { %1378 = vadd.xlane.f32.xlu1 %v1368_v60  ;;  %v1124_v61 = vpop.f32.mrf.mxu0  ;;  %v1400_v63 = vmul.f32 %v1368_v60, %v1368_v60 }
 0x141   : > { %v1189_v62 = vpop.f32.mrf.mxu1 }
 0x142   : > { %v1190_v1 = vadd.f32 %v1189_v62, %v1124_v61  ;;  %1410 = vadd.xlane.f32.xlu0 %v1400_v63 }
 0x143   : > { %v1266_v3 = vpop.f32.mrf.mxu2  ;;  %v3824_v13 = vpop.xlane.xlu1 %584 }
 0x144   : > { %v1284_v4 = vadd.f32 %v1266_v3, %v1190_v1  ;;  %v1351_v5 = vpop.f32.mrf.mxu3 }
 0x145   : > { %v3826_v17 = vpop.xlane.xlu0 %618  ;;  %v3828_v18 = vpop.xlane.xlu2 %586 }
 0x146   : > { %v1369_v7 = vadd.f32 %v1351_v5, %v1284_v4 }
 0x148   : > { %v2907_v8 = vpack.c.bf16 %v1369_v7, %v1368_v60  ;;  %1380 = vadd.xlane.f32.xlu2 %v1369_v7  ;;  %v1127_v9 = vpop.f32.mrf.mxu0  ;;  %v1401_v11 = vmul.f32 %v1369_v7, %v1369_v7 }
 0x149   : > { %v1192_v10 = vpop.f32.mrf.mxu1 }
 0x14a   : > { %v1193_v12 = vadd.f32 %v1192_v10, %v1127_v9  ;;  %3091 = vst [vmem:[#allocation2 + $0x20] sm:$0xff] %v2907_v8   ;;  %1412 = vadd.xlane.f32.xlu1 %v1401_v11 }
 0x14b   : > { %v1269_v14 = vpop.f32.mrf.mxu2 }
 0x14c   : > { %v1285_v15 = vadd.f32 %v1269_v14, %v1193_v12  ;;  %v1354_v16 = vpop.f32.mrf.mxu3 }
 0x14d   : > { %v3830_v24 = vpop.xlane.xlu1 %620  ;;  %v3834_v30 = vpop.xlane.xlu2 %588 }
 0x14e   : > { %v1370_v19 = vadd.f32 %v1354_v16, %v1285_v15 }
 0x150   : > { %1382 = vadd.xlane.f32.xlu0 %v1370_v19  ;;  %v1130_v20 = vpop.f32.mrf.mxu0  ;;  %v1402_v22 = vmul.f32 %v1370_v19, %v1370_v19 }
 0x151   : > { %v1195_v21 = vpop.f32.mrf.mxu1 }
 0x152   : > { %v1196_v23 = vadd.f32 %v1195_v21, %v1130_v20  ;;  %1414 = vadd.xlane.f32.xlu2 %v1402_v22 }
 0x153   : > { %v1272_v25 = vpop.f32.mrf.mxu2  ;;  %v3832_v28 = vpop.xlane.xlu0 %590 }
 0x154   : > { %v1286_v26 = vadd.f32 %v1272_v25, %v1196_v23  ;;  %v1357_v27 = vpop.f32.mrf.mxu3 }
 0x155   : > { %v3840_v47 = vpop.xlane.xlu2 %622 }
 0x156   : > { %v1371_v29 = vadd.f32 %v1357_v27, %v1286_v26 }
 0x158   : > { %v2912_v31 = vpack.c.bf16 %v1371_v29, %v1370_v19  ;;  %1384 = vadd.xlane.f32.xlu1 %v1371_v29  ;;  %v1133_v32 = vpop.f32.mrf.mxu0  ;;  %v1403_v34 = vmul.f32 %v1371_v29, %v1371_v29 }
 0x159   : > { %v1198_v33 = vpop.f32.mrf.mxu1 }
 0x15a   : > { %v1199_v35 = vadd.f32 %v1198_v33, %v1133_v32  ;;  %3092 = vst [vmem:[#allocation2 + $0x10] sm:$0xff] %v2912_v31   ;;  %1416 = vadd.xlane.f32.xlu0 %v1403_v34 }
 0x15b   : > { %v1275_v36 = vpop.f32.mrf.mxu2  ;;  %v3836_v37 = vpop.xlane.xlu1 %592 }
 0x15c   : > { %v1287_v38 = vadd.f32 %v1275_v36, %v1199_v35  ;;  %v1360_v39 = vpop.f32.mrf.mxu3 }
 0x15d   : > { %v3838_v40 = vpop.xlane.xlu0 %624 }
 0x15e   : > { %v1372_v41 = vadd.f32 %v1360_v39, %v1287_v38 }
 0x160   : > { %1386 = vadd.xlane.f32.xlu2 %v1372_v41  ;;  %v1136_v42 = vpop.f32.mrf.mxu0  ;;  %v1404_v45 = vmul.f32 %v1372_v41, %v1372_v41 }
 0x161   : > { %v1201_v44 = vpop.f32.mrf.mxu1 }
 0x162   : > { %v1202_v46 = vadd.f32 %v1201_v44, %v1136_v42  ;;  %1418 = vadd.xlane.f32.xlu1 %v1404_v45 }
 0x163   : > { %v1278_v48 = vpop.f32.mrf.mxu2  ;;  %v977_v50 = vpop.xlane.xlu1 %976 }
 0x164   : > { %v1288_v51 = vadd.f32 %v1278_v48, %v1202_v46  ;;  %v3843_v52 = vadd.f32 %v977_v50, %v3810_v43  ;;  %v1363_v53 = vpop.f32.mrf.mxu3 }
 0x165   : > { %v1009_v54 = vpop.xlane.xlu0 %1008 }
 0x166   : > { %v1373_v57 = vadd.f32 %v1363_v53, %v1288_v51  ;;  %v3846_v58 = vadd.f32 %v1009_v54, %v3814_v55 }
 0x168   : > { %v2917_v59 = vpack.c.bf16 %v1373_v57, %v1372_v41  ;;  %1388 = vadd.xlane.f32.xlu0 %v1373_v57  ;;  %v1513_v60 = vpop.f32.mrf.mxu0  ;;  %v1405_v62 = vmul.f32 %v1373_v57, %v1373_v57 }
 0x169   : > { %v1578_v61 = vpop.f32.mrf.mxu1 }
 0x16a   : > { %v1579_v63 = vadd.f32 %v1578_v61, %v1513_v60  ;;  %3093 = vst [vmem:[#allocation2 + $0x38] sm:$0xff] %v2917_v59   ;;  %1420 = vadd.xlane.f32.xlu2 %v1405_v62 }
 0x16b   : > { %v1654_v1 = vpop.f32.mrf.mxu2  ;;  %v979_v3 = vpop.xlane.xlu2 %978 }
 0x16c   : > { %v1678_v4 = vadd.f32 %v1654_v1, %v1579_v63  ;;  %v3849_v43 = vadd.f32 %v979_v3, %v3816_v56  ;;  %v1739_v5 = vpop.f32.mrf.mxu3 }
 0x16d   : > { %v1011_v7 = vpop.xlane.xlu1 %1010 }
 0x16e   : > { %v1763_v8 = vadd.f32 %v1739_v5, %v1678_v4  ;;  %v3852_v55 = vadd.f32 %v1011_v7, %v3822_v6 }
 0x170   : > { %1771 = vadd.xlane.f32.xlu0 %v1763_v8  ;;  %v1516_v9 = vpop.f32.mrf.mxu0  ;;  %v1795_v11 = vmul.f32 %v1763_v8, %v1763_v8 }
 0x171   : > { %v1581_v10 = vpop.f32.mrf.mxu1 }
 0x172   : > { %v1582_v12 = vadd.f32 %v1581_v10, %v1516_v9  ;;  %1803 = vadd.xlane.f32.xlu2 %v1795_v11 }
 0x173   : > { %v1657_v14 = vpop.f32.mrf.mxu2  ;;  %v981_v15 = vpop.xlane.xlu0 %980 }
 0x174   : > { %v1679_v16 = vadd.f32 %v1657_v14, %v1582_v12  ;;  %v3855_v19 = vadd.f32 %v981_v15, %v3812_v49  ;;  %v1742_v56 = vpop.f32.mrf.mxu3 }
 0x175   : > { %v1013_v20 = vpop.xlane.xlu2 %1012 }
 0x176   : > { %v1764_v21 = vadd.f32 %v1742_v56, %v1679_v16  ;;  %v3858_v22 = vadd.f32 %v1013_v20, %v3818_v0 }
 0x178   : > { %v2922_v6 = vpack.c.bf16 %v1764_v21, %v1763_v8  ;;  %1773 = vadd.xlane.f32.xlu1 %v1764_v21  ;;  %v1519_v23 = vpop.f32.mrf.mxu0  ;;  %v1796_v26 = vmul.f32 %v1764_v21, %v1764_v21 }
 0x179   : > { %v1584_v25 = vpop.f32.mrf.mxu1 }
 0x17a   : > { %v1585_v27 = vadd.f32 %v1584_v25, %v1519_v23  ;;  %3094 = vst [vmem:[#allocation2 + $0x60] sm:$0xff] %v2922_v6   ;;  %1805 = vadd.xlane.f32.xlu0 %v1796_v26 }
 0x17b   : > { %v1660_v29 = vpop.f32.mrf.mxu2  ;;  %v983_v31 = vpop.xlane.xlu1 %982 }
 0x17c   : > { %v1680_v32 = vadd.f32 %v1660_v29, %v1585_v27  ;;  %v3861_v49 = vadd.f32 %v983_v31, %v3824_v13  ;;  %v1745_v33 = vpop.f32.mrf.mxu3 }
 0x17d   : > { %v1015_v34 = vpop.xlane.xlu0 %1014 }
 0x17e   : > { %v1765_v35 = vadd.f32 %v1745_v33, %v1680_v32  ;;  %v3864_v0 = vadd.f32 %v1015_v34, %v3820_v2 }
 0x180   : > { %1775 = vadd.xlane.f32.xlu2 %v1765_v35  ;;  %v1522_v36 = vpop.f32.mrf.mxu0  ;;  %v1797_v39 = vmul.f32 %v1765_v35, %v1765_v35 }
 0x181   : > { %v1587_v38 = vpop.f32.mrf.mxu1 }
 0x182   : > { %v1588_v41 = vadd.f32 %v1587_v38, %v1522_v36  ;;  %1807 = vadd.xlane.f32.xlu1 %v1797_v39 }
 0x183   : > { %v1663_v42 = vpop.f32.mrf.mxu2  ;;  %v985_v44 = vpop.xlane.xlu2 %984 }
 0x184   : > { %v1681_v45 = vadd.f32 %v1663_v42, %v1588_v41  ;;  %v3867_v46 = vadd.f32 %v985_v44, %v3828_v18  ;;  %v1748_v13 = vpop.f32.mrf.mxu3 }
 0x185   : > { %v1017_v48 = vpop.xlane.xlu1 %1016 }
 0x186   : > { %v1766_v50 = vadd.f32 %v1748_v13, %v1681_v45  ;;  %v3870_v51 = vadd.f32 %v1017_v48, %v3826_v17 }
 0x188   : > { %v2927_v2 = vpack.c.bf16 %v1766_v50, %v1765_v35  ;;  %1777 = vadd.xlane.f32.xlu0 %v1766_v50  ;;  %v1525_v53 = vpop.f32.mrf.mxu0  ;;  %v1798_v57 = vmul.f32 %v1766_v50, %v1766_v50 }
 0x189   : > { %v1590_v54 = vpop.f32.mrf.mxu1 }
 0x18a   : > { %v1591_v59 = vadd.f32 %v1590_v54, %v1525_v53  ;;  %3095 = vst [vmem:[#allocation2 + $0x70] sm:$0xff] %v2927_v2   ;;  %1809 = vadd.xlane.f32.xlu2 %v1798_v57 }
 0x18b   : > { %v1666_v60 = vpop.f32.mrf.mxu2  ;;  %v987_v61 = vpop.xlane.xlu0 %986 }
 0x18c   : > { %v1682_v62 = vadd.f32 %v1666_v60, %v1591_v59  ;;  %v3873_v18 = vadd.f32 %v987_v61, %v3834_v30  ;;  %v1751_v63 = vpop.f32.mrf.mxu3 }
 0x18d   : > { %v1019_v1 = vpop.xlane.xlu2 %1018 }
 0x18e   : > { %v1767_v3 = vadd.f32 %v1751_v63, %v1682_v62  ;;  %v1029_v17 = vadd.f32 %v1019_v1, %v3830_v24 }
 0x190   : > { %1779 = vadd.xlane.f32.xlu1 %v1767_v3  ;;  %v1528_v4 = vpop.f32.mrf.mxu0  ;;  %v1799_v7 = vmul.f32 %v1767_v3, %v1767_v3 }
 0x191   : > { %v1593_v5 = vpop.f32.mrf.mxu1 }
 0x192   : > { %v1594_v8 = vadd.f32 %v1593_v5, %v1528_v4  ;;  %1811 = vadd.xlane.f32.xlu0 %v1799_v7  ;;  %v1847_v5 = vld [vmem:[#allocation3] sm:$0xff] }
 0x193   : > { %v1669_v9 = vpop.f32.mrf.mxu2  ;;  %v989_v10 = vpop.xlane.xlu1 %988 }
 0x194   : > { %v1683_v11 = vadd.f32 %v1669_v9, %v1594_v8  ;;  %v3877_v12 = vadd.f32 %v989_v10, %v3832_v28  ;;  %v1754_v14 = vpop.f32.mrf.mxu3 }
 0x195   : > { %v1021_v30 = vpop.xlane.xlu0 %1020 }
 0x196   : > { %v1768_v15 = vadd.f32 %v1754_v14, %v1683_v11  ;;  %v3880_v16 = vadd.f32 %v1021_v30, %v3840_v47 }
 0x198   : > { %v2932_v56 = vpack.c.bf16 %v1768_v15, %v1767_v3  ;;  %1781 = vadd.xlane.f32.xlu2 %v1768_v15  ;;  %v1531_v24 = vpop.f32.mrf.mxu0  ;;  %v1800_v42 = vmul.f32 %v1768_v15, %v1768_v15 }
 0x199   : > { %v1596_v20 = vpop.f32.mrf.mxu1 }
 0x19a   : > { %v1597_v21 = vadd.f32 %v1596_v20, %v1531_v24  ;;  %3096 = vst [vmem:[#allocation2 + $0x78] sm:$0xff] %v2932_v56  }
 0x19b   : > { %v1672_v6 = vpop.f32.mrf.mxu2  ;;  %v991_v23 = vpop.xlane.xlu2 %990 }
 0x19c   : > { %v1684_v25 = vadd.f32 %v1672_v6, %v1597_v21  ;;  %v3883_v26 = vadd.f32 %v991_v23, %v3836_v37  ;;  %v1757_v28 = vpop.f32.mrf.mxu3  ;;  %v1873_v21 = vld [vmem:[#allocation4 + $0x8] sm:$0xff] }
 0x19d   : > { %v1023_v27 = vpop.xlane.xlu1 %1022 }
 0x19e   : > { %v1769_v29 = vadd.f32 %v1757_v28, %v1684_v25  ;;  %v3886_v31 = vadd.f32 %v1023_v27, %v3838_v40  ;;  %v1849_v27 = vld [vmem:[#allocation3 + $0x10] sm:$0xff] }
 0x1a0   : > { %1783 = vadd.xlane.f32.xlu0 %v1769_v29  ;;  %v1534_v47 = vpop.f32.mrf.mxu0  ;;  %v1801_v33 = vmul.f32 %v1769_v29, %v1769_v29 }
 0x1a1   : > { %v1599_v32 = vpop.f32.mrf.mxu1 }
 0x1a2   : > { %v1600_v34 = vadd.f32 %v1599_v32, %v1534_v47  ;;  %1815 = vadd.xlane.f32.xlu2 %v1801_v33  ;;  %v1874_v32 = vld [vmem:[#allocation4 + $0x10] sm:$0xff] }
 0x1a3   : > { %v1675_v35 = vpop.f32.mrf.mxu2  ;;  %v1375_v44 = vpop.xlane.xlu2 %1374 }
 0x1a4   : > { %v1685_v36 = vadd.f32 %v1675_v35, %v1600_v34  ;;  %v1760_v38 = vpop.f32.mrf.mxu3  ;;  %v1390_v3 = vadd.f32 %v1375_v44, %v3843_v52  ;;  %v1848_v52 = vld [vmem:[#allocation3 + $0x8] sm:$0xff] }
 0x1a5   : > { %v1407_v48 = vpop.xlane.xlu1 %1406 }
 0x1a6   : > { %v1770_v39 = vadd.f32 %v1760_v38, %v1685_v36  ;;  %v1422_v8 = vadd.f32 %v1407_v48, %v3846_v58  ;;  %v1850_v38 = vld [vmem:[#allocation3 + $0x18] sm:$0xff] }
 0x1a8   : > { %v2937_v41 = vpack.c.bf16 %v1770_v39, %v1769_v29  ;;  %1785 = vadd.xlane.f32.xlu1 %v1770_v39  ;;  %v1802_v37 = vmul.f32 %v1770_v39, %v1770_v39 }
 0x1aa   : > { %3097 = vst [vmem:[#allocation2 + $0x28] sm:$0xff] %v2937_v41   ;;  %1817 = vadd.xlane.f32.xlu0 %v1802_v37  ;;  %v1875_v37 = vld [vmem:[#allocation4 + $0x18] sm:$0xff] }
 0x1ab   : > { %v1377_v40 = vpop.xlane.xlu0 %1376 }
 0x1ac   : > { %v1391_v15 = vadd.f32 %v1377_v40, %v3849_v43 }
 0x1ad   : > { %v1409_v45 = vpop.xlane.xlu2 %1408 }
 0x1ae   : > { %v1423_v24 = vadd.f32 %v1409_v45, %v3852_v55 }
 0x1b0   : > { %1813 = vadd.xlane.f32.xlu1 %v1800_v42 }
 0x1b3   : > { %v1379_v53 = vpop.xlane.xlu1 %1378 }
 0x1b4   : > { %v1392_v28 = vadd.f32 %v1379_v53, %v3855_v19  ;;  %v1876_v53 = vld [vmem:[#allocation4 + $0x20] sm:$0xff] }
 0x1b5   : > { %v1411_v13 = vpop.xlane.xlu0 %1410 }
 0x1b6   : > { %v1424_v29 = vadd.f32 %v1411_v13, %v3858_v22  ;;  %v1851_v13 = vld [vmem:[#allocation3 + $0x20] sm:$0xff] }
 0x1bb   : > { %v1381_v50 = vpop.xlane.xlu2 %1380 }
 0x1bc   : > { %v1393_v36 = vadd.f32 %v1381_v50, %v3861_v49 }
 0x1bd   : > { %v1413_v60 = vpop.xlane.xlu1 %1412 }
 0x1be   : > { %v1425_v39 = vadd.f32 %v1413_v60, %v3864_v0 }
 0x1c3   : > { %v1383_v2 = vpop.xlane.xlu0 %1382 }
 0x1c4   : > { %v1394_v45 = vadd.f32 %v1383_v2, %v3867_v46  ;;  %v1852_v46 = vld [vmem:[#allocation3 + $0x28] sm:$0xff] }
 0x1c5   : > { %v1415_v54 = vpop.xlane.xlu2 %1414 }
 0x1c6   : > { %v1426_v48 = vadd.f32 %v1415_v54, %v3870_v51  ;;  %v1853_v54 = vld [vmem:[#allocation3 + $0x30] sm:$0xff] }
 0x1cb   : > { %v3892_v62 = vpop.xlane.xlu1 %1384 }
 0x1cd   : > { %v1417_v57 = vpop.xlane.xlu0 %1416 }
 0x1ce   : > { %v3888_v59 = vadd.f32 %v1417_v57, %v1029_v17  ;;  %v1872_v17 = vld [vmem:[#allocation4] sm:$0xff] }
 0x1d3   : > { %v3890_v61 = vpop.xlane.xlu2 %1386 }
 0x1d4   : > { %v1396_v51 = vadd.f32 %v3890_v61, %v3877_v12 }
 0x1d5   : > { %v3899_v4 = vpop.xlane.xlu1 %1418 }
 0x1db   : > { %v3894_v63 = vpop.xlane.xlu0 %1388 }
 0x1dd   : > { %v3896_v1 = vpop.xlane.xlu2 %1420 }
 0x1de   : > { %v1429_v61 = vadd.f32 %v3896_v1, %v3886_v31 }
 0x1e3   : > { %v1772_v7 = vpop.xlane.xlu0 %1771 }
 0x1e4   : > { %v1787_v9 = vadd.f32 %v1772_v7, %v1390_v3 }
 0x1e5   : > { %v1804_v10 = vpop.xlane.xlu2 %1803 }
 0x1e6   : > { %v1855_v11 = vadd.f32 %v1847_v5, %v1787_v9  ;;  %v1819_v14 = vadd.f32 %v1804_v10, %v1422_v8  ;;  %v1395_v5 = vadd.f32 %v3892_v62, %v3873_v18 }
 0x1e8   : > { %1864 = vst.msk [vmem:[#allocation3] sm:$0xff] %vm1863_vm2, %v1855_v11  ;;  %v1880_v30 = vadd.f32 %v1872_v17, %v1819_v14  ;;  %v1428_v17 = vadd.f32 %v3899_v4, %v3880_v16  ;;  %v1878_v11 = vld [vmem:[#allocation4 + $0x30] sm:$0xff]  ;;  %v1879_v16 = vld [vmem:[#allocation4 + $0x38] sm:$0xff] }
 0x1ea   : > { %1888 = vst.msk [vmem:[#allocation4] sm:$0xff] %vm1863_vm2, %v1880_v30 }
 0x1eb   : > { %v1774_v56 = vpop.xlane.xlu1 %1773 }
 0x1ec   : > { %v1788_v20 = vadd.f32 %v1774_v56, %v1391_v15  ;;  %v1397_v15 = vadd.f32 %v3894_v63, %v3883_v26 }
 0x1ed   : > { %v1806_v58 = vpop.xlane.xlu0 %1805 }
 0x1ee   : > { %v1856_v6 = vadd.f32 %v1848_v52, %v1788_v20  ;;  %v1820_v23 = vadd.f32 %v1806_v58, %v1423_v24  ;;  %v1854_v52 = vld [vmem:[#allocation3 + $0x38] sm:$0xff]  ;;  %v1877_v58 = vld [vmem:[#allocation4 + $0x28] sm:$0xff] }
 0x1f0   : > { %1865 = vst.msk [vmem:[#allocation3 + $0x8] sm:$0xff] %vm1863_vm2, %v1856_v6  ;;  %v1881_v25 = vadd.f32 %v1873_v21, %v1820_v23 }
 0x1f2   : > { %1889 = vst.msk [vmem:[#allocation4 + $0x8] sm:$0xff] %vm1863_vm2, %v1881_v25 }
 0x1f3   : > { %v1776_v43 = vpop.xlane.xlu2 %1775 }
 0x1f4   : > { %v1789_v47 = vadd.f32 %v1776_v43, %v1392_v28 }
 0x1f5   : > { %v1808_v33 = vpop.xlane.xlu1 %1807 }
 0x1f6   : > { %v1857_v55 = vadd.f32 %v1849_v27, %v1789_v47  ;;  %v1821_v34 = vadd.f32 %v1808_v33, %v1424_v29 }
 0x1f8   : > { %1866 = vst.msk [vmem:[#allocation3 + $0x10] sm:$0xff] %vm1863_vm2, %v1857_v55  ;;  %v1882_v35 = vadd.f32 %v1874_v32, %v1821_v34 }
 0x1fa   : > { %1890 = vst.msk [vmem:[#allocation4 + $0x10] sm:$0xff] %vm1863_vm2, %v1882_v35 }
 0x1fb   : > { %v1778_v19 = vpop.xlane.xlu0 %1777 }
 0x1fc   : > { %v1790_v41 = vadd.f32 %v1778_v19, %v1393_v36 }
 0x1fd   : > { %v1810_v42 = vpop.xlane.xlu2 %1809 }
 0x1fe   : > { %v1858_v22 = vadd.f32 %v1850_v38, %v1790_v41  ;;  %v1822_v44 = vadd.f32 %v1810_v42, %v1425_v39 }
 0x200   : > { %1867 = vst.msk [vmem:[#allocation3 + $0x18] sm:$0xff] %vm1863_vm2, %v1858_v22  ;;  %v1883_v40 = vadd.f32 %v1875_v37, %v1822_v44 }
 0x202   : > { %1891 = vst.msk [vmem:[#allocation4 + $0x18] sm:$0xff] %vm1863_vm2, %v1883_v40 }
 0x203   : > { %v1780_v49 = vpop.xlane.xlu1 %1779 }
 0x204   : > { %v1791_v50 = vadd.f32 %v1780_v49, %v1394_v45 }
 0x205   : > { %v1812_v57 = vpop.xlane.xlu0 %1811 }
 0x206   : > { %v1859_v0 = vadd.f32 %v1851_v13, %v1791_v50  ;;  %v1823_v60 = vadd.f32 %v1812_v57, %v1426_v48 }
 0x208   : > { %1868 = vst.msk [vmem:[#allocation3 + $0x20] sm:$0xff] %vm1863_vm2, %v1859_v0  ;;  %v1884_v3 = vadd.f32 %v1876_v53, %v1823_v60 }
 0x20a   : > { %1892 = vst.msk [vmem:[#allocation4 + $0x20] sm:$0xff] %vm1863_vm2, %v1884_v3 }
 0x20b   : > { %v1782_v2 = vpop.xlane.xlu2 %1781 }
 0x20c   : > { %v1792_v7 = vadd.f32 %v1782_v2, %v1395_v5 }
 0x20e   : > { %v1860_v8 = vadd.f32 %v1852_v46, %v1792_v7 }
 0x210   : > { %1869 = vst.msk [vmem:[#allocation3 + $0x28] sm:$0xff] %vm1863_vm2, %v1860_v8 }
 0x213   : > { %v1784_v9 = vpop.xlane.xlu0 %1783 }
 0x214   : > { %v1793_v10 = vadd.f32 %v1784_v9, %v1396_v51 }
 0x215   : > { %v1816_v14 = vpop.xlane.xlu2 %1815 }
 0x216   : > { %v1861_v18 = vadd.f32 %v1853_v54, %v1793_v10  ;;  %v1825_v62 = vadd.f32 %v1816_v14, %v1428_v17 }
 0x218   : > { %1870 = vst.msk [vmem:[#allocation3 + $0x30] sm:$0xff] %vm1863_vm2, %v1861_v18  ;;  %v1886_v30 = vadd.f32 %v1878_v11, %v1825_v62 }
 0x21a   : > { %1894 = vst.msk [vmem:[#allocation4 + $0x30] sm:$0xff] %vm1863_vm2, %v1886_v30 }
 0x21b   : > { %v1786_v12 = vpop.xlane.xlu1 %1785 }
 0x21c   : > { %v1794_v56 = vadd.f32 %v1786_v12, %v1397_v15 }
 0x21d   : > { %v1818_v4 = vpop.xlane.xlu0 %1817 }
 0x21e   : > { %v1862_v24 = vadd.f32 %v1854_v52, %v1794_v56  ;;  %v1826_v20 = vadd.f32 %v1818_v4, %v1429_v61 }
 0x220   : > { %1871 = vst.msk [vmem:[#allocation3 + $0x38] sm:$0xff] %vm1863_vm2, %v1862_v24  ;;  %v1887_v21 = vadd.f32 %v1879_v16, %v1826_v20 }
 0x222   : > { %1895 = vst.msk [vmem:[#allocation4 + $0x38] sm:$0xff] %vm1863_vm2, %v1887_v21 }
 0x223   : > { %v1814_v6 = vpop.xlane.xlu1 %1813 }
 0x224   : > { %v1824_v26 = vadd.f32 %v1814_v6, %v3888_v59 }
 0x226   : > { %v1885_v63 = vadd.f32 %v1877_v58, %v1824_v26 }
 0x228   : > { %1893 = vst.msk [vmem:[#allocation4 + $0x28] sm:$0xff] %vm1863_vm2, %v1885_v63 }
 0x229 PF: > { %p2805_p6 = scmp.ne.s32.totalorder %s3190_s15, 1 }
 0x22b   : > { %1899 = sbr.rel (%p2805_p6) target bundleno = 774 (0x306), region = 48 }
 0x230   : > { %v3201_v31 = vmov 0   ;;  %v3202_v1 = vmov 512.0   ;;  %v1904_v43 = vld [vmem:[#allocation3 + $0x20] sm:$0xff]  ;;  %v1902_v47 = vld [vmem:[#allocation3 + $0x10] sm:$0xff]  ;;  %v1905_v34 = vld [vmem:[#allocation3 + $0x28] sm:$0xff] }
 0x231   : > { %3157 = vset.pattern.permute.xlu2 %v3201_v31  ;;  %3156 = vset.pattern.permute.xlu1 %v3201_v31  ;;  %3158 = vrcp.f32 %v3202_v1  ;;  %v1927_v59 = vld [vmem:[#allocation4 + $0x20] sm:$0xff]  ;;  %v1925_v32 = vld [vmem:[#allocation4 + $0x10] sm:$0xff]  ;;  %v1928_v35 = vld [vmem:[#allocation4 + $0x28] sm:$0xff] }
 0x232   : > { %3155 = vset.pattern.permute.xlu0 %v3201_v31  ;;  %v1900_v33 = vld [vmem:[#allocation3] sm:$0xff]  ;;  %v1903_v38 = vld [vmem:[#allocation3 + $0x18] sm:$0xff]  ;;  %v1901_v22 = vld [vmem:[#allocation3 + $0x8] sm:$0xff] }
 0x233   : > { %v1923_v55 = vld [vmem:[#allocation4] sm:$0xff]  ;;  %v1926_v19 = vld [vmem:[#allocation4 + $0x18] sm:$0xff]  ;;  %v1924_v44 = vld [vmem:[#allocation4 + $0x8] sm:$0xff] }
 0x234   : > { %v1907_v48 = vld [vmem:[#allocation3 + $0x38] sm:$0xff]  ;;  %v1906_v9 = vld [vmem:[#allocation3 + $0x30] sm:$0xff] }
 0x235   : > { %v1930_v60 = vld [vmem:[#allocation4 + $0x38] sm:$0xff]  ;;  %v1929_v16 = vld [vmem:[#allocation4 + $0x30] sm:$0xff] }
 0x237   : > { %v3159_v23 = vpop.eup %3158 }
 0x238   : > { %v1909_v25 = vmul.f32 512.0, %v3159_v23  ;;  %vm1913_vm3 = vweird.f32 %v3159_v23 }
 0x23a   : > { %v1910_v28 = vsub.f32 1.0, %v1909_v25 }
 0x23c   : > { %v1911_v27 = vmul.f32 %v3159_v23, %v1910_v28 }
 0x23e   : > { %v1912_v29 = vadd.f32 %v3159_v23, %v1911_v27 }
 0x240   : > { %v1914_v36 = vsel %vm1913_vm3, %v3159_v23, %v1912_v29 }
 0x241   : > { %v3938_v39 = vmul.f32 %v1914_v36, %v1904_v43  ;;  %v1935_v41 = vmul.f32 %v1927_v59, %v1914_v36  ;;  %v3940_v37 = vmul.f32 %v1914_v36, %v1902_v47  ;;  %v1933_v42 = vmul.f32 %v1925_v32, %v1914_v36 }
 0x242   : > { %v3942_v40 = vmul.f32 %v1914_v36, %v1900_v33  ;;  %v1931_v45 = vmul.f32 %v1923_v55, %v1914_v36  ;;  %v3944_v13 = vmul.f32 %v1914_v36, %v1905_v34  ;;  %v1936_v49 = vmul.f32 %v1928_v35, %v1914_v36 }
 0x243   : > { %v1943_v50 = vmul.f32 %v3938_v39, %v3938_v39  ;;  %v1941_v53 = vmul.f32 %v3940_v37, %v3940_v37  ;;  %v3950_v57 = vmul.f32 %v1914_v36, %v1903_v38  ;;  %v1934_v0 = vmul.f32 %v1926_v19, %v1914_v36 }
 0x244   : > { %v1939_v3 = vmul.f32 %v3942_v40, %v3942_v40  ;;  %v1944_v5 = vmul.f32 %v3944_v13, %v3944_v13  ;;  %v3956_v46 = vmul.f32 %v1914_v36, %v1901_v22  ;;  %v1932_v2 = vmul.f32 %v1924_v44, %v1914_v36 }
 0x245   : > { %v1951_v7 = vsub.f32 %v1935_v41, %v1943_v50  ;;  %v1949_v8 = vsub.f32 %v1933_v42, %v1941_v53  ;;  %v1942_v51 = vmul.f32 %v3950_v57, %v3950_v57  ;;  %v3960_v54 = vmul.f32 %v1914_v36, %v1907_v48 }
 0x246   : > { %v1947_v17 = vsub.f32 %v1931_v45, %v1939_v3  ;;  %v1952_v10 = vsub.f32 %v1936_v49, %v1944_v5  ;;  %v1940_v11 = vmul.f32 %v3956_v46, %v3956_v46  ;;  %v1938_v14 = vmul.f32 %v1930_v60, %v1914_v36 }
 0x247   : > { %v1959_v18 = vmax.f32 %v1951_v7, 0.0  ;;  %v1957_v62 = vmax.f32 %v1949_v8, 0.0  ;;  %v1950_v30 = vsub.f32 %v1934_v0, %v1942_v51  ;;  %v1946_v15 = vmul.f32 %v3960_v54, %v3960_v54 }
 0x248   : > { %v1955_v52 = vmax.f32 %v1947_v17, 0.0  ;;  %v1960_v12 = vmax.f32 %v1952_v10, 0.0  ;;  %v1948_v61 = vsub.f32 %v1932_v2, %v1940_v11  ;;  %v3966_v56 = vmul.f32 %v1914_v36, %v1906_v9  ;;  %v1967_v9 = vld [vmem:[%s4356_s2 + $0x20] sm:$0xff]  ;;  %v2068_v10 = vld [vmem:[%s4357_s3 + $0x8] sm:$0xff] }
 0x249   : > { %v1975_v4 = vadd.f32 1e-05, %v1959_v18  ;;  %v3968_v24 = vadd.f32 1e-05, %v1957_v62  ;;  %v1958_v20 = vmax.f32 %v1950_v30, 0.0  ;;  %v1954_v21 = vsub.f32 %v1938_v14, %v1946_v15  ;;  %v1965_v62 = vld [vmem:[%s4356_s2 + $0x10] sm:$0xff] }
 0x24a   : > { %v3970_v58 = vadd.f32 1e-05, %v1955_v52  ;;  %v3972_v6 = vadd.f32 1e-05, %v1960_v12  ;;  %v1956_v26 = vmax.f32 %v1948_v61, 0.0  ;;  %v1937_v31 = vmul.f32 %v1929_v16, %v1914_v36  ;;  %v1963_v16 = vld [vmem:[%s4356_s2] sm:$0xff] }
 0x24b   : > { %3160 = vrsqrt.f32 %v1975_v4  ;;  %v3974_v63 = vadd.f32 1e-05, %v1958_v20  ;;  %v1962_v23 = vmax.f32 %v1954_v21, 0.0  ;;  %v1945_v25 = vmul.f32 %v3966_v56, %v3966_v56  ;;  %v2071_v15 = vld [vmem:[%s4357_s3 + $0x20] sm:$0xff] }
 0x24c   : > { %3162 = vrsqrt.f32 %v3968_v24  ;;  %v3977_v1 = vadd.f32 1e-05, %v1956_v26  ;;  %vm2025_vm4 = vweird.f32 %v1975_v4  ;;  %vm2005_vm5 = vweird.f32 %v3968_v24 }
 0x24d   : > { %3164 = vrsqrt.f32 %v3970_v58  ;;  %v3984_v28 = vadd.f32 1e-05, %v1962_v23  ;;  %v1953_v27 = vsub.f32 %v1937_v31, %v1945_v25  ;;  %vm1985_vm6 = vweird.f32 %v3970_v58  ;;  %v4173_v23 = vld [vmem:[#allocation2] sm:$0xff]  }
 0x24e   : > { %3166 = vrsqrt.f32 %v3972_v6  ;;  %vm2035_vm7 = vweird.f32 %v3972_v6  ;;  %vm2015_vm8 = vweird.f32 %v3974_v63  ;;  %vm1995_vm10 = vweird.f32 %v3977_v1 }
 0x24f   : > { %3168 = vrsqrt.f32 %v3974_v63  ;;  %v1961_v59 = vmax.f32 %v1953_v27, 0.0 }
 0x250   : > { %3170 = vrsqrt.f32 %v3977_v1 }
 0x251   : > { %v3161_v43 = vpop.eup %3160  ;;  %3172 = vrsqrt.f32 %v3984_v28  ;;  %v3998_v55 = vadd.f32 1e-05, %v1961_v59 }
 0x252   : > { %v3988_v29 = vpop.eup %3162  ;;  %v2020_v47 = vmul.f32 %v3161_v43, %v1975_v4  ;;  %vm2026_vm9 = vweird.f32 %v3161_v43 }
 0x253   : > { %v3992_v32 = vpop.eup %3164  ;;  %v2000_v33 = vmul.f32 %v3988_v29, %v3968_v24  ;;  %vm2006_vm11 = vweird.f32 %v3988_v29  ;;  %3174 = vrsqrt.f32 %v3998_v55  ;;  %vm4029_vm14 = vmor %vm2025_vm4, %vm2026_vm9 }
 0x254   : > { %v4000_v34 = vpop.eup %3166  ;;  %v2021_v35 = vmul.f32 %v3161_v43, %v2020_v47  ;;  %v1980_v36 = vmul.f32 %v3992_v32, %v3970_v58  ;;  %vm1986_vm12 = vweird.f32 %v3992_v32  ;;  %vm4042_vm0 = vmor %vm2005_vm5, %vm2006_vm11 }
 0x255   : > { %v4005_v38 = vpop.eup %3168  ;;  %v2001_v19 = vmul.f32 %v3988_v29, %v2000_v33  ;;  %v2030_v41 = vmul.f32 %v4000_v34, %v3972_v6  ;;  %vm2036_vm13 = vweird.f32 %v4000_v34  ;;  %vm4055_vm1 = vmor %vm1985_vm6, %vm1986_vm12  ;;  %vm2055_vm6 = vweird.f32 %v3984_v28 }
 0x256   : > { %v4012_v42 = vpop.eup %3170  ;;  %v2022_v22 = vmul.f32 0.5, %v2021_v35  ;;  %v1981_v44 = vmul.f32 %v3992_v32, %v1980_v36  ;;  %v2010_v45 = vmul.f32 %v4005_v38, %v3974_v63  ;;  %vm2016_vm15 = vweird.f32 %v4005_v38  ;;  %vm4076_vm3 = vmor %vm2035_vm7, %vm2036_vm13  ;;  %v1968_v63 = vld [vmem:[%s4356_s2 + $0x28] sm:$0xff]  ;;  %v1966_v35 = vld [vmem:[%s4356_s2 + $0x18] sm:$0xff] }
 0x257   : > { %v4018_v49 = vpop.eup %3172  ;;  %v2002_v48 = vmul.f32 0.5, %v2001_v19  ;;  %v2031_v50 = vmul.f32 %v4000_v34, %v2030_v41  ;;  %v1990_v53 = vmul.f32 %v4012_v42, %v3977_v1  ;;  %vm1996_vm2 = vweird.f32 %v4012_v42  ;;  %vm4088_vm4 = vmor %vm2015_vm8, %vm2016_vm15  ;;  %v1964_v41 = vld [vmem:[%s4356_s2 + $0x8] sm:$0xff] }
 0x258   : > { %v2023_v0 = vsub.f32 1.5, %v2022_v22  ;;  %v1982_v60 = vmul.f32 0.5, %v1981_v44  ;;  %v2011_v3 = vmul.f32 %v4005_v38, %v2010_v45  ;;  %v2050_v5 = vmul.f32 %v4018_v49, %v3984_v28  ;;  %vm4098_vm5 = vmor %vm1995_vm10, %vm1996_vm2  ;;  %v2067_v28 = vld [vmem:[%s4357_s3] sm:$0xff] }
 0x259   : > { %v2003_v7 = vsub.f32 1.5, %v2002_v48  ;;  %v2032_v8 = vmul.f32 0.5, %v2031_v50  ;;  %v1991_v51 = vmul.f32 %v4012_v42, %v1990_v53  ;;  %v3175_v21 = vpop.eup %3174  ;;  %vm2056_vm7 = vweird.f32 %v4018_v49 }
 0x25a   : > { %v2024_v17 = vmul.f32 %v3161_v43, %v2023_v0  ;;  %v1983_v11 = vsub.f32 1.5, %v1982_v60  ;;  %v2012_v14 = vmul.f32 0.5, %v2011_v3  ;;  %v2051_v18 = vmul.f32 %v4018_v49, %v2050_v5  ;;  %vm2057_vm10 = vmor %vm2055_vm6, %vm2056_vm7 }
 0x25b   : > { %v2004_v30 = vmul.f32 %v3988_v29, %v2003_v7  ;;  %v2033_v52 = vsub.f32 1.5, %v2032_v8  ;;  %v1992_v12 = vmul.f32 0.5, %v1991_v51  ;;  %v2040_v19 = vmul.f32 %v3175_v21, %v3998_v55 }
 0x25c   : > { %v2028_v61 = vsel %vm4029_vm14, %v3161_v43, %v2024_v17  ;;  %v1984_v4 = vmul.f32 %v3992_v32, %v1983_v11  ;;  %v2013_v24 = vsub.f32 1.5, %v2012_v14  ;;  %v2052_v20 = vmul.f32 0.5, %v2051_v18 }
 0x25d   : > { %v4066_v58 = vmul.f32 %v2028_v61, %v1967_v9  ;;  %v2008_v26 = vsel %vm4042_vm0, %v3988_v29, %v2004_v30  ;;  %v2034_v31 = vmul.f32 %v4000_v34, %v2033_v52  ;;  %v1993_v25 = vsub.f32 1.5, %v1992_v12  ;;  %v2070_v9 = vld [vmem:[%s4357_s3 + $0x18] sm:$0xff]  ;;  %v2072_v30 = vld [vmem:[%s4357_s3 + $0x28] sm:$0xff]  ;;  %v4185_v29 = vld [vmem:[#allocation2 + $0x40] sm:$0xff]  }
 0x25e   : > { %v2061_v27 = vmul.f32 %v2008_v26, %v1965_v62  ;;  %v1988_v43 = vsel %vm4055_vm1, %v3992_v32, %v1984_v4  ;;  %v2014_v59 = vmul.f32 %v4005_v38, %v2013_v24  ;;  %v2053_v36 = vsub.f32 1.5, %v2052_v20  ;;  %v2073_v62 = vld [vmem:[%s4357_s3 + $0x30] sm:$0xff] }
 0x25f   : > { %2113 = vperm.xlu2 %3157, %v4066_v58   ;;  %v2059_v6 = vmul.f32 %v1988_v43, %v1963_v16  ;;  %v1994_v47 = vmul.f32 %v4012_v42, %v1993_v25  ;;  %v2038_v33 = vsel %vm4076_vm3, %v4000_v34, %v2034_v31  ;;  %v2041_v44 = vmul.f32 %v3175_v21, %v2040_v19  ;;  %v3114_v26 = vld [vmem:[#allocation2 + $0x10] sm:$0xff]   ;;  %v4171_v31 = vld [vmem:[#allocation2 + $0x78] sm:$0xff]   ;;  %v4177_v25 = vld [vmem:[#allocation2 + $0x20] sm:$0xff]  }
 0x260   : > { %2103 = vperm.xlu1 %3156, %v2061_v27   ;;  %v2018_v1 = vsel %vm4088_vm4, %v4005_v38, %v2014_v59  ;;  %v2064_v22 = vmul.f32 %v2038_v33, %v1968_v63  ;;  %vm2045_vm8 = vweird.f32 %v3998_v55  ;;  %v2054_v48 = vmul.f32 %v4018_v49, %v2053_v36  ;;  %v1970_v55 = vld [vmem:[%s4356_s2 + $0x38] sm:$0xff]  ;;  %v4181_v43 = vld [vmem:[#allocation2 + $0x30] sm:$0xff]   ;;  %v4187_v63 = vld [vmem:[#allocation2 + $0x60] sm:$0xff]  }
 0x261   : > { %2093 = vperm.xlu0 %3155, %v2059_v6   ;;  %v1998_v34 = vsel %vm4098_vm5, %v4012_v42, %v1994_v47  ;;  %v2062_v45 = vmul.f32 %v2018_v1, %v1966_v35  ;;  %v2042_v50 = vmul.f32 0.5, %v2041_v44  ;;  %vm2046_vm9 = vweird.f32 %v3175_v21  ;;  %v4183_v59 = vld [vmem:[#allocation2 + $0x50] sm:$0xff]  }
 0x262   : > { %v2060_v38 = vmul.f32 %v1998_v34, %v1964_v41  ;;  %v2075_v53 = vmul.f32 %v2059_v6, %v3942_v40  ;;  %vm2047_vm11 = vmor %vm2045_vm8, %vm2046_vm9  ;;  %v2058_v42 = vsel %vm2057_vm10, %v4018_v49, %v2054_v48  ;;  %v1969_v40 = vld [vmem:[%s4356_s2 + $0x30] sm:$0xff]  ;;  %v2077_v51 = vmul.f32 %v2061_v27, %v3940_v37 }
 0x263   : > { %v2043_v0 = vsub.f32 1.5, %v2042_v50  ;;  %v2066_v2 = vmul.f32 %v2058_v42, %v1970_v55  ;;  %v2078_v8 = vmul.f32 %v2062_v45, %v3950_v57  ;;  %v2069_v49 = vld [vmem:[%s4357_s3 + $0x10] sm:$0xff]  ;;  %v2080_v18 = vmul.f32 %v2064_v22, %v3944_v13 }
 0x264   : > { %v2083_v5 = vsub.f32 %v2067_v28, %v2075_v53  ;;  %v2076_v17 = vmul.f32 %v2060_v38, %v3956_v46  ;;  %v2085_v57 = vsub.f32 %v2069_v49, %v2077_v51  ;;  %v2079_v46 = vmul.f32 %v4066_v58, %v3938_v39  ;;  %v2074_v39 = vld [vmem:[%s4357_s3 + $0x38] sm:$0xff]  ;;  %v3106_v58 = vld [vmem:[#allocation2 + $0x8] sm:$0xff]   ;;  %v4179_v27 = vld [vmem:[#allocation2 + $0x70] sm:$0xff]  }
 0x265   : > { %v2044_v60 = vmul.f32 %v3175_v21, %v2043_v0  ;;  %v2086_v11 = vsub.f32 %v2070_v9, %v2078_v8  ;;  %v2088_v52 = vsub.f32 %v2072_v30, %v2080_v18  ;;  %v2082_v13 = vmul.f32 %v2066_v2, %v3960_v54  ;;  %v4175_v54 = vld [vmem:[#allocation2 + $0x68] sm:$0xff]  }
 0x266   : > { %v2084_v14 = vsub.f32 %v2068_v10, %v2076_v17  ;;  %v2087_v12 = vsub.f32 %v2071_v15, %v2079_v46  ;;  %v2985_v47 = vunpack.c.l.bf16 %v3106_v58  ;;  %v3021_v32 = vunpack.c.l.bf16 %v3114_v26 }
 0x267   : > { %2118 = vperm.xlu2 %3157, %v2064_v22   ;;  %v2048_v3 = vsel %vm2047_vm11, %v3175_v21, %v2044_v60  ;;  %v2090_v61 = vsub.f32 %v2074_v39, %v2082_v13  ;;  %v3099_v21 = vld [vmem:[#allocation2 + $0x58] sm:$0xff]   ;;  %v3057_v35 = vunpack.c.l.bf16 %v4171_v31  ;;  %v2945_v36 = vunpack.c.l.bf16 %v4173_v23 }
 0x268   : > { %2108 = vperm.xlu1 %3156, %v2062_v45   ;;  %v2065_v7 = vmul.f32 %v2048_v3, %v1969_v40  ;;  %v2949_v6 = vunpack.c.l.bf16 %v3099_v21  ;;  %v2981_v19 = vunpack.c.l.bf16 %v4175_v54  ;;  %v3017_v41 = vunpack.c.l.bf16 %v4177_v25  ;;  %v4212_v40 = vld [vmem:[#allocation2 + $0x18] sm:$0xff]   ;;  %v4214_v3 = vld [vmem:[#allocation2 + $0x48] sm:$0xff]  }
 0x269   : > { %2098 = vperm.xlu0 %3155, %v2060_v38   ;;  %v3053_v22 = vunpack.c.l.bf16 %v4179_v27  ;;  %v2941_v44 = vunpack.c.l.bf16 %v4181_v43  ;;  %v2977_v45 = vunpack.c.l.bf16 %v4183_v59  ;;  %v3013_v38 = vunpack.c.l.bf16 %v4185_v29 }
 0x26a   : > { %v2081_v37 = vmul.f32 %v2065_v7, %v3966_v56  ;;  %v3049_v48 = vunpack.c.l.bf16 %v4187_v63  ;;  %v2946_v50 = vunpack.c.h.bf16 %v4173_v23  ;;  %v2982_v53 = vunpack.c.h.bf16 %v4175_v54 }
 0x26b   : > { %v3018_v0 = vunpack.c.h.bf16 %v4177_v25  ;;  %v3054_v60 = vunpack.c.h.bf16 %v4179_v27  ;;  %v2986_v8 = vunpack.c.h.bf16 %v3106_v58  ;;  %v3022_v51 = vunpack.c.h.bf16 %v3114_v26 }
 0x26c   : > { %v2089_v56 = vsub.f32 %v2073_v62, %v2081_v37  ;;  %v2942_v9 = vunpack.c.h.bf16 %v4181_v43  ;;  %v2978_v49 = vunpack.c.h.bf16 %v4183_v59  ;;  %v3014_v17 = vunpack.c.h.bf16 %v4185_v29 }
 0x26d   : > { %v3050_v10 = vunpack.c.h.bf16 %v4187_v63  ;;  %v3058_v18 = vunpack.c.h.bf16 %v4171_v31  ;;  %v2954_v54 = vunpack.c.h.bf16 %v4212_v40  ;;  %v2990_v25 = vunpack.c.h.bf16 %v4214_v3 }
 0x26f   : > { %2133 = vperm.xlu2 %3157, %v2083_v5   ;;  %v4216_v5 = vld [vmem:[#allocation2 + $0x38] sm:$0xff]  }
 0x270   : > { %2128 = vperm.xlu1 %3156, %v2066_v2   ;;  %v3025_v37 = vunpack.c.l.bf16 %v4216_v5  ;;  %v3026_v27 = vunpack.c.h.bf16 %v4216_v5 }
 0x271   : > { %2123 = vperm.xlu0 %3155, %v2065_v7   ;;  %v2950_v7 = vunpack.c.h.bf16 %v3099_v21 }
 0x277   : > { %2148 = vperm.xlu2 %3157, %v2086_v11   ;;  %v4224_v11 = vld [vmem:[#allocation2 + $0x28] sm:$0xff]  }
 0x278   : > { %2143 = vperm.xlu1 %3156, %v2085_v57   ;;  %v2953_v57 = vunpack.c.l.bf16 %v4212_v40 }
 0x279   : > { %2138 = vperm.xlu0 %3155, %v2084_v14   ;;  %v2989_v14 = vunpack.c.l.bf16 %v4214_v3 }
 0x27f   : > { %2163 = vperm.xlu2 %3157, %v2089_v56  }
 0x280   : > { %2158 = vperm.xlu1 %3156, %v2088_v52   ;;  %v3061_v52 = vunpack.c.l.bf16 %v4224_v11 }
 0x281   : > { %2153 = vperm.xlu0 %3155, %v2087_v12  }
 0x289   : > { %2168 = vperm.xlu0 %3155, %v2090_v61  }
 0x2b9   : > { %v2114_v16 = vpop.permute.xlu2 %2113 }
 0x2ba   : > { %v4205_v28 = vmul.f32 %v2949_v6, %v2114_v16  ;;  %v4207_v55 = vmul.f32 %v2985_v47, %v2114_v16  ;;  %v4209_v42 = vmul.f32 %v3021_v32, %v2114_v16  ;;  %v4218_v2 = vmul.f32 %v3057_v35, %v2114_v16 }
 0x2c1   : > { %v4165_v4 = vpop.permute.xlu2 %2118 }
 0x2c2   : > { %v4236_v13 = vmul.f32 %v2950_v7, %v4165_v4  ;;  %v4239_v39 = vmul.f32 %v2986_v8, %v4165_v4  ;;  %v4242_v61 = vmul.f32 %v3022_v51, %v4165_v4  ;;  %v4249_v23 = vmul.f32 %v3058_v18, %v4165_v4 }
 0x2c9   : > { %v4190_v1 = vpop.permute.xlu2 %2133 }
 0x2d1   : > { %v2149_v31 = vpop.permute.xlu2 %2148 }
 0x2d2   : > { %v4167_v24 = vpop.permute.xlu1 %2103 }
 0x2d3   : > { %v4169_v20 = vpop.permute.xlu0 %2093  ;;  %v2193_v47 = vmul.f32 %v2945_v36, %v4167_v24  ;;  %v2253_v32 = vmul.f32 %v2981_v19, %v4167_v24  ;;  %v2375_v63 = vmul.f32 %v3053_v22, %v4167_v24 }
 0x2d4   : > { %v2191_v16 = vmul.f32 %v2941_v44, %v4169_v20  ;;  %v2251_v21 = vmul.f32 %v2977_v45, %v4169_v20  ;;  %v2312_v58 = vmul.f32 %v3013_v38, %v4169_v20  ;;  %v2373_v26 = vmul.f32 %v3049_v48, %v4169_v20 }
 0x2d5   : > { %v2314_v20 = vmul.f32 %v3017_v41, %v4167_v24 }
 0x2d6   : > { %v2199_v4 = vadd.f32 %v2191_v16, %v4190_v1  ;;  %v2320_v35 = vadd.f32 %v2312_v58, %v4190_v1  ;;  %v2381_v44 = vadd.f32 %v2373_v26, %v4190_v1 }
 0x2d8   : > { %v2207_v16 = vmax.f32 %v2199_v4, 0.0 }
 0x2da   : > { %v2109_v33 = vpop.permute.xlu1 %2108 }
 0x2db   : > { %v4195_v34 = vpop.permute.xlu0 %2098  ;;  %v2194_v62 = vmul.f32 %v2946_v50, %v2109_v33  ;;  %v2254_v46 = vmul.f32 %v2982_v53, %v2109_v33  ;;  %v2315_v30 = vmul.f32 %v3018_v0, %v2109_v33  ;;  %v2376_v15 = vmul.f32 %v3054_v60, %v2109_v33 }
 0x2dc   : > { %v2259_v33 = vadd.f32 %v2251_v21, %v4190_v1  ;;  %v2192_v45 = vmul.f32 %v2942_v9, %v4195_v34  ;;  %v2252_v38 = vmul.f32 %v2978_v49, %v4195_v34  ;;  %v2313_v36 = vmul.f32 %v3014_v17, %v4195_v34 }
 0x2dd   : > { %v2202_v43 = vadd.f32 %v2194_v62, %v2149_v31  ;;  %v2262_v59 = vadd.f32 %v2254_v46, %v2149_v31  ;;  %v2323_v29 = vadd.f32 %v2315_v30, %v2149_v31  ;;  %v2384_v6 = vadd.f32 %v2376_v15, %v2149_v31 }
 0x2de   : > { %v2374_v19 = vmul.f32 %v3050_v10, %v4195_v34  ;;  %v2267_v31 = vmax.f32 %v2259_v33, 0.0 }
 0x2df   : > { %v2210_v48 = vmax.f32 %v2202_v43, 0.0  ;;  %v2270_v41 = vmax.f32 %v2262_v59, 0.0  ;;  %v2331_v50 = vmax.f32 %v2323_v29, 0.0  ;;  %v2392_v24 = vmax.f32 %v2384_v6, 0.0 }
 0x2e0   : > { %v2328_v43 = vmax.f32 %v2320_v35, 0.0  ;;  %v2389_v59 = vmax.f32 %v2381_v44, 0.0 }
 0x2e2   : > { %v4230_v56 = vpop.permute.xlu1 %2128 }
 0x2e3   : > { %v4233_v12 = vpop.permute.xlu0 %2123 }
 0x2e4   : > { %v2197_v6 = vmul.f32 %v2953_v57, %v4233_v12 }
 0x2ea   : > { %v2144_v22 = vpop.permute.xlu1 %2143 }
 0x2eb   : > { %v2201_v53 = vadd.f32 %v2193_v47, %v2144_v22  ;;  %v2261_v0 = vadd.f32 %v2253_v32, %v2144_v22  ;;  %v2322_v60 = vadd.f32 %v2314_v20, %v2144_v22  ;;  %v2383_v7 = vadd.f32 %v2375_v63, %v2144_v22  ;;  %v2139_v8 = vpop.permute.xlu0 %2138 }
 0x2ec   : > { %v2200_v51 = vadd.f32 %v2192_v45, %v2139_v8  ;;  %v2260_v1 = vadd.f32 %v2252_v38, %v2139_v8  ;;  %v2321_v18 = vadd.f32 %v2313_v36, %v2139_v8  ;;  %v2382_v9 = vadd.f32 %v2374_v19, %v2139_v8 }
 0x2ed   : > { %v2209_v62 = vmax.f32 %v2201_v53, 0.0  ;;  %v2269_v49 = vmax.f32 %v2261_v0, 0.0  ;;  %v2330_v46 = vmax.f32 %v2322_v60, 0.0  ;;  %v2391_v17 = vmax.f32 %v2383_v7, 0.0 }
 0x2ee   : > { %v2208_v30 = vmax.f32 %v2200_v51, 0.0  ;;  %v2268_v34 = vmax.f32 %v2260_v1, 0.0  ;;  %v2329_v10 = vmax.f32 %v2321_v18, 0.0  ;;  %v2390_v15 = vmax.f32 %v2382_v9, 0.0 }
 0x2ef   : > { %v2963_v21 = vpack.c.bf16 %v2210_v48, %v2209_v62  ;;  %v2999_v58 = vpack.c.bf16 %v2270_v41, %v2269_v49  ;;  %v3035_v26 = vpack.c.bf16 %v2331_v50, %v2330_v46  ;;  %v3071_v29 = vpack.c.bf16 %v2392_v24, %v2391_v17 }
 0x2f0   : > { %v2257_v47 = vmul.f32 %v2989_v14, %v4233_v12  ;;  %v2958_v32 = vpack.c.bf16 %v2208_v30, %v2207_v16  ;;  %v3062_v20 = vunpack.c.h.bf16 %v4224_v11  ;;  %v2318_v63 = vmul.f32 %v3025_v37, %v4233_v12 }
 0x2f1   : > { %3101 = vst [vmem:[%s4358_s4 + $0x8] sm:$0xff] %v2963_v21   ;;  %v2994_v57 = vpack.c.bf16 %v2268_v34, %v2267_v31  ;;  %v3030_v4 = vpack.c.bf16 %v2329_v10, %v2328_v43  ;;  %v3066_v33 = vpack.c.bf16 %v2390_v15, %v2389_v59  ;;  %v2198_v11 = vmul.f32 %v2954_v54, %v4230_v56 }
 0x2f2   : > { %3109 = vst [vmem:[%s4358_s4 + $0x28] sm:$0xff] %v2999_v58   ;;  %v2159_v35 = vpop.permute.xlu1 %2158  ;;  %v2380_v1 = vmul.f32 %v3062_v20, %v4230_v56 }
 0x2f3   : > { %3117 = vst [vmem:[%s4358_s4 + $0x48] sm:$0xff] %v3035_v26   ;;  %v2204_v14 = vadd.f32 %v4236_v13, %v2159_v35  ;;  %v2264_v44 = vadd.f32 %v4239_v39, %v2159_v35  ;;  %v2325_v45 = vadd.f32 %v4242_v61, %v2159_v35  ;;  %v2386_v37 = vadd.f32 %v4249_v23, %v2159_v35  ;;  %v2154_v38 = vpop.permute.xlu0 %2153 }
 0x2f4   : > { %3125 = vst [vmem:[%s4358_s4 + $0x68] sm:$0xff] %v3071_v29   ;;  %v2203_v36 = vadd.f32 %v4205_v28, %v2154_v38  ;;  %v2263_v19 = vadd.f32 %v4207_v55, %v2154_v38  ;;  %v2324_v48 = vadd.f32 %v4209_v42, %v2154_v38  ;;  %v2385_v41 = vadd.f32 %v4218_v2, %v2154_v38  ;;  %v2164_v2 = vpop.permute.xlu2 %2163 }
 0x2f5   : > { %2959 = vst [vmem:[%s4358_s4] sm:$0xff] %v2958_v32   ;;  %v2212_v13 = vmax.f32 %v2204_v14, 0.0  ;;  %v2272_v39 = vmax.f32 %v2264_v44, 0.0  ;;  %v2333_v61 = vmax.f32 %v2325_v45, 0.0  ;;  %v2394_v23 = vmax.f32 %v2386_v37, 0.0 }
 0x2f6   : > { %3108 = vst [vmem:[%s4358_s4 + $0x20] sm:$0xff] %v2994_v57   ;;  %v2211_v50 = vmax.f32 %v2203_v36, 0.0  ;;  %v2271_v28 = vmax.f32 %v2263_v19, 0.0  ;;  %v2332_v24 = vmax.f32 %v2324_v48, 0.0  ;;  %v2393_v55 = vmax.f32 %v2385_v41, 0.0 }
 0x2f7   : > { %v2379_v42 = vmul.f32 %v3061_v52, %v4233_v12  ;;  %3116 = vst [vmem:[%s4358_s4 + $0x40] sm:$0xff] %v3030_v4   ;;  %v2205_v60 = vadd.f32 %v2197_v6, %v2164_v2  ;;  %v2265_v7 = vadd.f32 %v2257_v47, %v2164_v2  ;;  %v2326_v8 = vadd.f32 %v2318_v63, %v2164_v2 }
 0x2f8   : > { %3124 = vst [vmem:[%s4358_s4 + $0x60] sm:$0xff] %v3066_v33   ;;  %v2968_v22 = vpack.c.bf16 %v2212_v13, %v2211_v50  ;;  %v3004_v53 = vpack.c.bf16 %v2272_v39, %v2271_v28  ;;  %v3040_v0 = vpack.c.bf16 %v2333_v61, %v2332_v24  ;;  %v3076_v51 = vpack.c.bf16 %v2394_v23, %v2393_v55 }
 0x2f9   : > { %v2258_v52 = vmul.f32 %v2990_v25, %v4230_v56  ;;  %v2319_v12 = vmul.f32 %v3026_v27, %v4230_v56  ;;  %v2387_v18 = vadd.f32 %v2379_v42, %v2164_v2  ;;  %v2213_v5 = vmax.f32 %v2205_v60, 0.0 }
 0x2fa   : > { %3102 = vst [vmem:[%s4358_s4 + $0x10] sm:$0xff] %v2968_v22   ;;  %v2273_v56 = vmax.f32 %v2265_v7, 0.0  ;;  %v2334_v27 = vmax.f32 %v2326_v8, 0.0 }
 0x2fb   : > { %3110 = vst [vmem:[%s4358_s4 + $0x30] sm:$0xff] %v3004_v53   ;;  %v2169_v9 = vpop.permute.xlu0 %2168  ;;  %v2395_v30 = vmax.f32 %v2387_v18, 0.0 }
 0x2fc   : > { %3118 = vst [vmem:[%s4358_s4 + $0x50] sm:$0xff] %v3040_v0   ;;  %v2206_v40 = vadd.f32 %v2198_v11, %v2169_v9  ;;  %v2266_v54 = vadd.f32 %v2258_v52, %v2169_v9  ;;  %v2327_v3 = vadd.f32 %v2319_v12, %v2169_v9  ;;  %v2388_v25 = vadd.f32 %v2380_v1, %v2169_v9 }
 0x2fd   : > { %3126 = vst [vmem:[%s4358_s4 + $0x70] sm:$0xff] %v3076_v51  }
 0x2fe   : > { %v2214_v62 = vmax.f32 %v2206_v40, 0.0  ;;  %v2274_v49 = vmax.f32 %v2266_v54, 0.0  ;;  %v2335_v46 = vmax.f32 %v2327_v3, 0.0  ;;  %v2396_v17 = vmax.f32 %v2388_v25, 0.0 }
 0x300   : > { %v2973_v34 = vpack.c.bf16 %v2214_v62, %v2213_v5  ;;  %v3009_v10 = vpack.c.bf16 %v2274_v49, %v2273_v56  ;;  %v3045_v15 = vpack.c.bf16 %v2335_v46, %v2334_v27  ;;  %v3081_v16 = vpack.c.bf16 %v2396_v17, %v2395_v30 }
 0x302   : > { %3103 = vst [vmem:[%s4358_s4 + $0x18] sm:$0xff] %v2973_v34  }
 0x303   : > { %3111 = vst [vmem:[%s4358_s4 + $0x38] sm:$0xff] %v3009_v10  }
 0x304   : > { %3119 = vst [vmem:[%s4358_s4 + $0x58] sm:$0xff] %v3045_v15  }
 0x305   : > { %3127 = vst [vmem:[%s4358_s4 + $0x78] sm:$0xff] %v3081_v16  }
 0x306 PF: > { %s14_s17 = sadd.s32 1, %s3198_s17   ;;  %s4371_s15 = smov %s3194_s16 }
 0x307   : > { %p11_p7 = scmp.ge.s32.totalorder %s14_s17, 4   ;;  %s4372_s16 = smov %s4374_s18 }
 0x309   :  { %13 = sbr.rel (!%p11_p7) target bundleno = 2 (0x2), region = 112 }

// kernel: generator_forward.5
= control target key start
LH: loop header
LB: loop body
LE: loop exit
PB: predicated region body
PF: predicated region fallthrough
CT: control target
= control target key end

     0   :  { %s1324_s27 = smov 0   ;;  %s1326_s28 = smov 0   ;;  %s1498_s0 = inlined_call_operand.vmem [shape: bf16[32,2048], index: 0, kind: input, shape index: {}]   ;;  %s1499_s1 = inlined_call_operand.vmem [shape: f32[16,32], index: 1, kind: input, shape index: {}]   ;;  %s1500_s2 = inlined_call_operand.vmem [shape: f32[16,1], index: 2, kind: input, shape index: {}]   ;;  %s1501_s3 = inlined_call_operand.vmem [shape: f32[16,1], index: 3, kind: input, shape index: {}]   ;;  %s1502_s4 = inlined_call_operand.vmem [shape: f32[8,16], index: 4, kind: input, shape index: {}]   ;;  %s1503_s5 = inlined_call_operand.vmem [shape: f32[8,1], index: 5, kind: input, shape index: {}]   ;;  %s1504_s6 = inlined_call_operand.vmem [shape: f32[8,1], index: 6, kind: input, shape index: {}]   ;;  %s1505_s7 = inlined_call_operand.vmem [shape: f32[3,8], index: 7, kind: input, shape index: {}]   ;;  %s1506_s8 = inlined_call_operand.vmem [shape: f32[3,2048], index: 8, kind: output, shape index: {}]  }
   0x1   :  { %s1328_s29 = smov 0   ;;  %s1330_s30 = smov 0  }
   0x2   :  { %s1332_s9 = smov 0   ;;  %s1334_s10 = smov 0  }
   0x3   :  { %s1336_s11 = smov 0  }
   0x4 LB: > { %s27_s12 = sadd.s32 1, %s1263_s9  ;;  %s30_s13 = sadd.s32 1, %s1267_s10  ;;  %s1271_s11 = sphi %s1336_s11, %s18_s11   ;;  %s1267_s10 = sphi %s1334_s10, %s1512_s10   ;;  %s1263_s9 = sphi %s1332_s9, %s1511_s9   ;;  %s1259_s30 = sphi %s1330_s30, %s1510_s30   ;;  %s1255_s29 = sphi %s1328_s29, %s1509_s29   ;;  %s1251_s28 = sphi %s1326_s28, %s1508_s28   ;;  %s1247_s27 = sphi %s1324_s27, %s1507_s27  }
   0x5   : > { %p28_p0 = scmp.ge.s32.totalorder %s27_s12, 4  ;;  %p34_p1 = scmp.eq.s32.totalorder %s1267_s10, 0 }
   0x6   : > { %p48_p2 = scmp.ne.s32.totalorder %s1251_s28, %s1247_s27  ;;  %p49_p4 = scmp.eq.s32.totalorder %s1271_s11, 0 }
   0x7   : > { %s1514_s13 = smov (!%p28_p0, %s30_s13), %s1267_s10  ;;  %s1516_s12 = smov (%p28_p0, %s27_s12), 0 }
   0x8   : > { %p32_p3 = scmp.ge.s32.totalorder %s1514_s13, 3  ;;  %p50_p5 = por %p49_p4, %p48_p2 }
   0x9   : > { %s35_s14 = scalar_select %p34_p1, %s1263_s9, 3 }
   0xa   : > { %s1518_s13 = smov (%p32_p3, %s1514_s13), 0  ;;  %s41_s17 = sadd.s32 1, %s1251_s28 }
   0xb   : > { %p36_p6 = scmp.eq.s32.totalorder %s1518_s13, 0  ;;  %p1087_p8 = scmp.ge.s32.totalorder %s1271_s11, 12 }
   0xd   : > { %s37_s15 = scalar_select %p36_p6, %s1516_s12, 3 }
   0xe   : > { %272 = sbr.rel (%p1087_p8) target bundleno = 31 (0x1f), region = 44 }
   0xf   : > { %s38_s16 = ssub.s32 %s35_s14, %s37_s15 }
  0x10   : > { %p39_p7 = scmp.eq.s32.totalorder %s38_s16, 0 }
  0x12   : > { %s1375_s18 = scalar_select %p39_p7, %s1251_s28, %s41_s17  }
  0x13   : > { %275 = sbr.rel (!%p50_p5) target bundleno = 31 (0x1f), region = 48  ;;  %s277_s19 = sand.u32 (%p50_p5), 1, %s1251_s28  }
  0x14   : > { %s1129_s20 = sshll.u32 (%p50_p5), %s35_s14, 4  ;;  %s1088_s21 = sshll.u32 (%p50_p5), %s277_s19, 6 }
  0x15   : > { %s284_s24 = scalar_lea.vmem (%p50_p5), %s1498_s0, %s1129_s20  ;;  %s279_s25 = scalar_lea.vmem (%p50_p5), [#allocation8], %s1088_s21 }
  0x16   : > { %v297_v0 = vld [vmem:[%s284_s24] sm:$0xff] (%p50_p5)  ;;  %v299_v1 = vld [vmem:[%s284_s24 + $0x8] sm:$0xff] (%p50_p5) }
  0x17   : > { %v301_v2 = vld [vmem:[%s284_s24 + $0x40] sm:$0xff] (%p50_p5)  ;;  %298 = vst [vmem:[%s279_s25] sm:$0xff] (%p50_p5), %v297_v0  ;;  %v303_v3 = vld [vmem:[%s284_s24 + $0x48] sm:$0xff] (%p50_p5) }
  0x18   : > { %300 = vst [vmem:[%s279_s25 + $0x8] sm:$0xff] %v299_v1  ;;  %v305_v4 = vld [vmem:[%s284_s24 + $0x80] sm:$0xff]  ;;  %v307_v5 = vld [vmem:[%s284_s24 + $0x88] sm:$0xff] }
  0x19   : > { %302 = vst [vmem:[%s279_s25 + $0x10] sm:$0xff] %v301_v2  ;;  %v309_v6 = vld [vmem:[%s284_s24 + $0xc0] sm:$0xff]  ;;  %v311_v7 = vld [vmem:[%s284_s24 + $0xc8] sm:$0xff] }
  0x1a   : > { %304 = vst [vmem:[%s279_s25 + $0x18] sm:$0xff] %v303_v3 }
  0x1b   : > { %306 = vst [vmem:[%s279_s25 + $0x20] sm:$0xff] %v305_v4 }
  0x1c   : > { %308 = vst [vmem:[%s279_s25 + $0x28] sm:$0xff] %v307_v5 }
  0x1d   : > { %310 = vst [vmem:[%s279_s25 + $0x30] sm:$0xff] %v309_v6 }
  0x1e   : > { %312 = vst [vmem:[%s279_s25 + $0x38] sm:$0xff] %v311_v7 }
  0x1f PF: > { %p1091_p9 = scmp.ge.s32.totalorder %s1271_s11, 1  ;;  %p317_p10 = scmp.lt.s32.totalorder %s1271_s11, 13 }
  0x21   : > { %p318_p11 = pnand %p1091_p9, %p317_p10 }
  0x22   : > { %s324_s26 = sand.u32 (!%p318_p11), 1, %s1247_s27   ;;  %p362_p12 = scmp.eq.s32.totalorder (!%p318_p11), %s1259_s30, 2 }
  0x23   : > { %321 = sbr.rel (%p318_p11) target bundleno = 1120 (0x460), region = 71  ;;  %s1386_s14 = sshll.u32 (!%p318_p11), %s324_s26, 6 }
  0x24   : > { %s1095_s15 = sshll.u32 (!%p318_p11), %s1255_s29, 9  ;;  %p395_p13 = scmp.eq.s32.totalorder (!%p318_p11), %s1259_s30, 0 }
  0x25   : > { %p396_p0 = scmp.eq.s32.totalorder (!%p318_p11), %s1255_s29, 0  ;;  %s1408_s22 = scalar_lea.vmem (!%p318_p11), [#allocation8], %s1386_s14 }
  0x27   : > { %p397_p2 = pnand (!%p318_p11), %p396_p0, %p395_p13 }
  0x28   : > { %v373_v8 = vlaneseq  ;;  %v378_v10 = vstv %s1095_s15  ;;  %s363_s16 = scalar_select %p362_p12, %s1255_s29, 0  ;;  %v1273_v18 = vmov 0.0  }
  0x2a   : > { %v374_v9 = vand.u32 127, %v373_v8  ;;  %s1093_s17 = sshll.u32 %s363_s16, 2 }
  0x2b   : > { %p365_p1 = scmp.lt.s32.totalorder %s1093_s17, 15 }
  0x2c   : > { %v375_v11 = vadd.s32 128, %v374_v9  ;;  %v376_v12 = vadd.s32 256, %v374_v9  ;;  %v377_v13 = vadd.s32 384, %v374_v9  ;;  %v379_v14 = vadd.s32 %v378_v10, %v374_v9 }
  0x2d   : > { %s1520_s17 = smov (!%p365_p1, %s1093_s17), 15  ;;  %400 = sbr.rel (%p397_p2) target bundleno = 57 (0x39), region = 79 }
  0x2e   : > { %v380_v15 = vadd.s32 %v378_v10, %v375_v11  ;;  %v381_v16 = vadd.s32 %v378_v10, %v376_v12  ;;  %v382_v17 = vadd.s32 %v378_v10, %v377_v13  ;;  %vm383_vm0 = vcmp.lt.s32.totalorder %v379_v14, 2048  ;;  %s1094_s27 = sshll.u32 %s1520_s17, 2 }
  0x2f   : > { %v1394_v19 = vsel %vm383_vm0, 1.0, %v1273_v18  ;;  %s1405_s21 = scalar_lea.vmem %s1506_s8, %s1094_s27 }
  0x30   : > { %vm384_vm1 = vcmp.lt.s32.totalorder %v380_v15, 2048  ;;  %vm385_vm2 = vcmp.lt.s32.totalorder %v381_v16, 2048  ;;  %vm386_vm3 = vcmp.lt.s32.totalorder %v382_v17, 2048 }
  0x31   : > { %v1396_v20 = vsel %vm384_vm1, 1.0, %v1273_v18  ;;  %v1398_v21 = vsel %vm385_vm2, 1.0, %v1273_v18  ;;  %v1400_v22 = vsel %vm386_vm3, 1.0, %v1273_v18 }
  0x32   : > { %vm401_vm4 = vcmask 7168   ;;  %v1274_v23 = vmov 0.0  }
  0x33   : > { %402 = vst.msk [vmem:[#allocation4] sm:$0xff] %vm401_vm4, %v1274_v23 }
  0x34   : > { %403 = vst.msk [vmem:[#allocation4 + $0x8] sm:$0xff] %vm401_vm4, %v1274_v23 }
  0x35   : > { %404 = vst.msk [vmem:[#allocation5] sm:$0xff] %vm401_vm4, %v1274_v23 }
  0x36   : > { %405 = vst.msk [vmem:[#allocation5 + $0x8] sm:$0xff] %vm401_vm4, %v1274_v23 }
  0x37   : > { %406 = vst.msk [vmem:[#allocation6] sm:$0xff] %vm401_vm4, %v1274_v23 }
  0x38   : > { %407 = vst.msk [vmem:[#allocation7] sm:$0xff] %vm401_vm4, %v1274_v23 }
  0x39 PF: > { %p1100_p3 = scmp.ne.s32.totalorder %s1259_s30, 0 }
  0x3a   : > { %s1130_s14 = sshll.u32 (!%p1100_p3), %s1255_s29, 5 }
  0x3b   : > { %410 = sbr.rel (%p1100_p3) target bundleno = 340 (0x154), region = 83  ;;  %s583_s15 = scalar_lea.vmem (!%p1100_p3), [#allocation2], %s1130_s14 }
  0x40   : > { %v420_v24 = vld [vmem:[%s1408_s22 + $0x38] sm:$0xff]  ;;  %v418_v25 = vld [vmem:[%s1408_s22 + $0x28] sm:$0xff]  ;;  %v419_v26 = vld [vmem:[%s1408_s22 + $0x30] sm:$0xff]  ;;  %vm437_vm5 = vcmask 261120   ;;  %vm550_vm6 = vcmask 7168  }
  0x41   : > { %v435_v27 = vunpack.c.l.bf16 %v420_v24  ;;  %v436_v28 = vunpack.c.h.bf16 %v420_v24  ;;  %v431_v29 = vunpack.c.l.bf16 %v418_v25  ;;  %v432_v30 = vunpack.c.h.bf16 %v418_v25  ;;  %v416_v31 = vld [vmem:[%s1408_s22 + $0x18] sm:$0xff]  ;;  %v417_v32 = vld [vmem:[%s1408_s22 + $0x20] sm:$0xff]  ;;  %v414_v35 = vld [vmem:[%s1408_s22 + $0x8] sm:$0xff] }
  0x42   : > { %v433_v33 = vunpack.c.l.bf16 %v419_v26  ;;  %v434_v34 = vunpack.c.h.bf16 %v419_v26  ;;  %v415_v36 = vld [vmem:[%s1408_s22 + $0x10] sm:$0xff]  ;;  %v427_v37 = vunpack.c.l.bf16 %v416_v31  ;;  %v428_v38 = vunpack.c.h.bf16 %v416_v31  ;;  %v413_v43 = vld [vmem:[%s1408_s22] sm:$0xff]  ;;  %v412_v49 = vld [vmem:[%s1499_s1 + $0x8] sm:$0xff] }
  0x43   : > { %502 = vmatpush.msra.mxu2 %v435_v27  ;;  %525 = vmatpush.msra.mxu3 %v436_v28  ;;  %v429_v39 = vunpack.c.l.bf16 %v417_v32  ;;  %v430_v40 = vunpack.c.h.bf16 %v417_v32  ;;  %v425_v41 = vunpack.c.l.bf16 %v415_v36  ;;  %v426_v42 = vunpack.c.h.bf16 %v415_v36  ;;  %v411_v46 = vld [vmem:[%s1499_s1] sm:$0xff]  ;;  %v553_v25 = vld [vmem:[#allocation5] sm:$0xff]  ;;  %v537_v28 = vld [vmem:[#allocation4 + $0x8] sm:$0xff] }
  0x44   : > { %456 = vmatpush.msra.mxu0 %v433_v33  ;;  %479 = vmatpush.msra.mxu1 %v434_v34  ;;  %v423_v44 = vunpack.c.l.bf16 %v414_v35  ;;  %v424_v45 = vunpack.c.h.bf16 %v414_v35  ;;  %v421_v47 = vunpack.c.l.bf16 %v413_v43  ;;  %v422_v48 = vunpack.c.h.bf16 %v413_v43  ;;  %v536_v18 = vld [vmem:[#allocation4] sm:$0xff]  ;;  %v554_v31 = vld [vmem:[#allocation5 + $0x8] sm:$0xff] }
  0x45   : > { %503 = vmatpush.msra.mxu2 %v431_v29  ;;  %526 = vmatpush.msra.mxu3 %v432_v30 }
  0x46   : > { %457 = vmatpush.msra.mxu0 %v429_v39  ;;  %480 = vmatpush.msra.mxu1 %v430_v40 }
  0x47   : > { %504 = vmatpush.msra.mxu2 %v427_v37  ;;  %527 = vmatpush.msra.mxu3 %v428_v38 }
  0x48   : > { %458 = vmatpush.msra.mxu0 %v425_v41  ;;  %481 = vmatpush.msra.mxu1 %v426_v42 }
  0x49   : > { %505 = vmatpush.msra.mxu2 %v423_v44  ;;  %528 = vmatpush.msra.mxu3 %v424_v45 }
  0x4a   : > { %1105 = vmatmul.msk.f32.vlgmr.msra.gmra.mxu2 %vm437_vm5, %v411_v46  ;;  %1107 = vmatmul.msk.f32.vlgmr.msra.gmra.mxu3 %vm437_vm5, %v411_v46 }
  0x4b   : > { %459 = vmatpush.msra.mxu0 %v421_v47  ;;  %482 = vmatpush.msra.mxu1 %v422_v48 }
  0x4c   : > { %1101 = vmatmul.msk.f32.vlgmr.msra.gmra.mxu0 %vm437_vm5, %v411_v46  ;;  %1103 = vmatmul.msk.f32.vlgmr.msra.gmra.mxu1 %vm437_vm5, %v411_v46 }
  0x52   : > { %1106 = vmatmul.msk.f32.gmra.mxu2 %vm437_vm5, %v412_v49  ;;  %1108 = vmatmul.msk.f32.gmra.mxu3 %vm437_vm5, %v412_v49 }
  0x54   : > { %1102 = vmatmul.msk.f32.gmra.mxu0 %vm437_vm5, %v412_v49  ;;  %1104 = vmatmul.msk.f32.gmra.mxu1 %vm437_vm5, %v412_v49 }
  0xc9   : > { %v461_v50 = vpop.f32.mrf.mxu0  ;;  %v484_v51 = vpop.f32.mrf.mxu1 }
  0xca   : > { %v555_v52 = vmul.f32 %v461_v50, %v461_v50  ;;  %v538_v53 = vadd.f32 %v484_v51, %v461_v50  ;;  %v556_v54 = vmul.f32 %v484_v51, %v484_v51  ;;  %v577_v55 = vpack.c.bf16 %v484_v51, %v461_v50 }
  0xcc   : > { %584 = vst [vmem:[%s583_s15] sm:$0xff] %v577_v55  ;;  %v563_v56 = vadd.f32 %v556_v54, %v555_v52 }
  0xcd   : > { %v507_v57 = vpop.f32.mrf.mxu2  ;;  %v530_v58 = vpop.f32.mrf.mxu3 }
  0xce   : > { %v557_v59 = vmul.f32 %v507_v57, %v507_v57  ;;  %v578_v60 = vpack.c.bf16 %v530_v58, %v507_v57  ;;  %v539_v61 = vadd.f32 %v538_v53, %v507_v57  ;;  %v558_v62 = vmul.f32 %v530_v58, %v530_v58 }
  0xd0   : > { %585 = vst [vmem:[%s583_s15 + $0x8] sm:$0xff] %v578_v60  ;;  %v540_v63 = vadd.f32 %v539_v61, %v530_v58  ;;  %v564_v0 = vadd.f32 %v563_v56, %v557_v59 }
  0xd1   : > { %v464_v1 = vpop.f32.mrf.mxu0  ;;  %v487_v2 = vpop.f32.mrf.mxu1 }
  0xd2   : > { %541 = vadd.xlane.f32.xlu0 %v540_v63  ;;  %v559_v3 = vmul.f32 %v464_v1, %v464_v1  ;;  %v543_v4 = vadd.f32 %v487_v2, %v464_v1  ;;  %v560_v5 = vmul.f32 %v487_v2, %v487_v2  ;;  %v579_v6 = vpack.c.bf16 %v487_v2, %v464_v1 }
  0xd3   : > { %v565_v7 = vadd.f32 %v564_v0, %v558_v62 }
  0xd4   : > { %v568_v8 = vadd.f32 %v560_v5, %v559_v3  ;;  %586 = vst [vmem:[%s583_s15 + $0x10] sm:$0xff] %v579_v6 }
  0xd5   : > { %566 = vadd.xlane.f32.xlu1 %v565_v7  ;;  %v510_v9 = vpop.f32.mrf.mxu2  ;;  %v533_v10 = vpop.f32.mrf.mxu3 }
  0xd6   : > { %v544_v11 = vadd.f32 %v543_v4, %v510_v9  ;;  %v561_v12 = vmul.f32 %v510_v9, %v510_v9  ;;  %v562_v13 = vmul.f32 %v533_v10, %v533_v10  ;;  %v580_v14 = vpack.c.bf16 %v533_v10, %v510_v9 }
  0xd8   : > { %587 = vst [vmem:[%s583_s15 + $0x18] sm:$0xff] %v580_v14  ;;  %v545_v15 = vadd.f32 %v544_v11, %v533_v10  ;;  %v569_v16 = vadd.f32 %v568_v8, %v561_v12 }
  0xda   : > { %546 = vadd.xlane.f32.xlu0 %v545_v15  ;;  %v570_v17 = vadd.f32 %v569_v16, %v562_v13 }
  0xdd   : > { %571 = vadd.xlane.f32.xlu1 %v570_v17 }
 0x145   : > { %v542_v23 = vpop.xlane.xlu0 %541 }
 0x146   : > { %v548_v24 = vadd.f32 %v542_v23, %v536_v18 }
 0x148   : > { %551 = vst.msk [vmem:[#allocation4] sm:$0xff] %vm550_vm6, %v548_v24  ;;  %v567_v26 = vpop.xlane.xlu1 %566 }
 0x149   : > { %v573_v27 = vadd.f32 %v567_v26, %v553_v25 }
 0x14b   : > { %575 = vst.msk [vmem:[#allocation5] sm:$0xff] %vm550_vm6, %v573_v27 }
 0x14d   : > { %v547_v29 = vpop.xlane.xlu0 %546 }
 0x14e   : > { %v549_v30 = vadd.f32 %v547_v29, %v537_v28 }
 0x150   : > { %552 = vst.msk [vmem:[#allocation4 + $0x8] sm:$0xff] %vm550_vm6, %v549_v30  ;;  %v572_v32 = vpop.xlane.xlu1 %571 }
 0x151   : > { %v574_v33 = vadd.f32 %v572_v32, %v554_v31 }
 0x153   : > { %576 = vst.msk [vmem:[#allocation5 + $0x8] sm:$0xff] %vm550_vm6, %v574_v33 }
 0x154 PF: > { %p1111_p4 = scmp.ne.s32.totalorder %s1259_s30, 1 }
 0x155   : > { %s1131_s25 = sshll.u32 (!%p1111_p4), %s1255_s29, 5  ;;  %s1132_s16 = sshll.u32 (!%p1111_p4), %s1255_s29, 4 }
 0x156   : > { %591 = sbr.rel (%p1111_p4) target bundleno = 792 (0x318), region = 87  ;;  %s647_s26 = scalar_lea.vmem (!%p1111_p4), [#allocation2], %s1131_s25 }
 0x157   : > { %s822_s17 = scalar_lea.vmem (!%p1111_p4), [#allocation3], %s1132_s16 }
 0x15b   : > { %v1275_v34 = vmov 0   ;;  %v1276_v35 = vmov 2048.0   ;;  %v593_v40 = vld [vmem:[#allocation4 + $0x8] sm:$0xff]  ;;  %v604_v42 = vld [vmem:[#allocation5 + $0x8] sm:$0xff]  ;;  %v592_v43 = vld [vmem:[#allocation4] sm:$0xff]  ;;  %vm713_vm14 = vcmask 130048  }
 0x15c   : > { %1196 = vset.pattern.permute.xlu0 %v1275_v34  ;;  %1198 = vrcp.f32 %v1276_v35  ;;  %1197 = vset.pattern.permute.xlu1 %v1275_v34  ;;  %v603_v44 = vld [vmem:[#allocation5] sm:$0xff]  ;;  %v614_v4 = vld [vmem:[%s1500_s2 + $0x8] sm:$0xff]  ;;  %v613_v8 = vld [vmem:[%s1500_s2] sm:$0xff]  ;;  %vm804_vm15 = vcmask 7168  }
 0x15d   : > { %v640_v11 = vld [vmem:[%s1501_s3 + $0x8] sm:$0xff]  ;;  %v639_v16 = vld [vmem:[%s1501_s3] sm:$0xff]  ;;  %v650_v18 = vld [vmem:[%s647_s26 + $0x10] sm:$0xff] }
 0x15e   : > { %v651_v23 = vld [vmem:[%s647_s26 + $0x18] sm:$0xff]  ;;  %v656_v24 = vunpack.c.l.bf16 %v650_v18  ;;  %v657_v25 = vunpack.c.h.bf16 %v650_v18  ;;  %v648_v33 = vld [vmem:[%s647_s26] sm:$0xff]  ;;  %v649_v34 = vld [vmem:[%s647_s26 + $0x8] sm:$0xff] }
 0x15f   : > { %v658_v26 = vunpack.c.l.bf16 %v651_v23  ;;  %v659_v27 = vunpack.c.h.bf16 %v651_v23 }
 0x162   : > { %v1199_v36 = vpop.eup %1198 }
 0x163   : > { %v595_v37 = vmul.f32 2048.0, %v1199_v36  ;;  %vm599_vm7 = vweird.f32 %v1199_v36 }
 0x165   : > { %v596_v38 = vsub.f32 1.0, %v595_v37 }
 0x167   : > { %v597_v39 = vmul.f32 %v1199_v36, %v596_v38 }
 0x169   : > { %v598_v41 = vadd.f32 %v1199_v36, %v597_v39 }
 0x16b   : > { %v600_v45 = vsel %vm599_vm7, %v1199_v36, %v598_v41  ;;  %v653_v41 = vunpack.c.h.bf16 %v648_v33 }
 0x16c   : > { %v602_v46 = vmul.f32 %v600_v45, %v593_v40  ;;  %v606_v47 = vmul.f32 %v604_v42, %v600_v45  ;;  %v601_v48 = vmul.f32 %v600_v45, %v592_v43  ;;  %v605_v49 = vmul.f32 %v603_v44, %v600_v45 }
 0x16d   : > { %v652_v40 = vunpack.c.l.bf16 %v648_v33  ;;  %v654_v42 = vunpack.c.l.bf16 %v649_v34 }
 0x16e   : > { %v608_v50 = vmul.f32 %v602_v46, %v602_v46  ;;  %v607_v51 = vmul.f32 %v601_v48, %v601_v48 }
 0x170   : > { %v610_v52 = vsub.f32 %v606_v47, %v608_v50  ;;  %v609_v53 = vsub.f32 %v605_v49, %v607_v51  ;;  %v655_v47 = vunpack.c.h.bf16 %v649_v34 }
 0x172   : > { %v612_v54 = vmax.f32 %v610_v52, 0.0  ;;  %v611_v55 = vmax.f32 %v609_v53, 0.0 }
 0x174   : > { %v616_v56 = vadd.f32 1e-05, %v612_v54  ;;  %v615_v57 = vadd.f32 1e-05, %v611_v55 }
 0x176   : > { %1200 = vrsqrt.f32 %v616_v56  ;;  %vm633_vm8 = vweird.f32 %v616_v56  ;;  %vm623_vm10 = vweird.f32 %v615_v57 }
 0x177   : > { %1202 = vrsqrt.f32 %v615_v57 }
 0x17c   : > { %v1201_v58 = vpop.eup %1200 }
 0x17d   : > { %v1203_v59 = vpop.eup %1202  ;;  %v628_v60 = vmul.f32 %v1201_v58, %v616_v56  ;;  %vm634_vm9 = vweird.f32 %v1201_v58 }
 0x17e   : > { %v618_v61 = vmul.f32 %v1203_v59, %v615_v57  ;;  %vm624_vm11 = vweird.f32 %v1203_v59  ;;  %vm635_vm12 = vmor %vm633_vm8, %vm634_vm9 }
 0x17f   : > { %v629_v62 = vmul.f32 %v1201_v58, %v628_v60  ;;  %vm625_vm13 = vmor %vm623_vm10, %vm624_vm11 }
 0x180   : > { %v619_v63 = vmul.f32 %v1203_v59, %v618_v61 }
 0x181   : > { %v630_v0 = vmul.f32 0.5, %v629_v62 }
 0x182   : > { %v620_v1 = vmul.f32 0.5, %v619_v63 }
 0x183   : > { %v631_v2 = vsub.f32 1.5, %v630_v0 }
 0x184   : > { %v621_v3 = vsub.f32 1.5, %v620_v1 }
 0x185   : > { %v632_v5 = vmul.f32 %v1201_v58, %v631_v2 }
 0x186   : > { %v622_v6 = vmul.f32 %v1203_v59, %v621_v3 }
 0x187   : > { %v636_v7 = vsel %vm635_vm12, %v1201_v58, %v632_v5 }
 0x188   : > { %v638_v9 = vmul.f32 %v636_v7, %v614_v4  ;;  %v626_v10 = vsel %vm625_vm13, %v1203_v59, %v622_v6  ;;  %v712_v6 = vld [vmem:[%s1502_s4] sm:$0xff] }
 0x189   : > { %v637_v13 = vmul.f32 %v626_v10, %v613_v8 }
 0x18a   : > { %667 = vperm.xlu0 %1196, %v638_v9   ;;  %v642_v12 = vmul.f32 %v638_v9, %v602_v46 }
 0x18b   : > { %v641_v15 = vmul.f32 %v637_v13, %v601_v48 }
 0x18c   : > { %v644_v14 = vsub.f32 %v640_v11, %v642_v12 }
 0x18d   : > { %v643_v17 = vsub.f32 %v639_v16, %v641_v15 }
 0x18e   : > { %685 = vperm.xlu1 %1197, %v644_v14  }
 0x192   : > { %662 = vperm.xlu0 %1196, %v637_v13  }
 0x196   : > { %680 = vperm.xlu1 %1197, %v643_v17  }
 0x1fc   : > { %v668_v28 = vpop.permute.xlu0 %667 }
 0x1fd   : > { %v674_v29 = vmul.f32 %v668_v28, %v656_v24  ;;  %v675_v30 = vmul.f32 %v668_v28, %v657_v25  ;;  %v676_v31 = vmul.f32 %v668_v28, %v658_v26  ;;  %v677_v32 = vmul.f32 %v668_v28, %v659_v27  ;;  %v797_v27 = vld [vmem:[#allocation6] sm:$0xff] }
 0x200   : > { %v686_v35 = vpop.permute.xlu1 %685 }
 0x201   : > { %v692_v36 = vadd.f32 %v686_v35, %v674_v29  ;;  %v693_v37 = vadd.f32 %v686_v35, %v675_v30  ;;  %v694_v38 = vadd.f32 %v686_v35, %v676_v31  ;;  %v695_v39 = vadd.f32 %v686_v35, %v677_v32  ;;  %v806_v30 = vld [vmem:[#allocation7] sm:$0xff] }
 0x203   : > { %v700_v43 = vmax.f32 %v692_v36, 0.0  ;;  %v701_v44 = vmax.f32 %v693_v37, 0.0  ;;  %v702_v45 = vmax.f32 %v694_v38, 0.0  ;;  %v703_v46 = vmax.f32 %v695_v39, 0.0 }
 0x204   : > { %v663_v48 = vpop.permute.xlu0 %662 }
 0x205   : > { %v708_v49 = vmul.f32 %v1394_v19, %v700_v43  ;;  %v709_v50 = vmul.f32 %v1396_v20, %v701_v44  ;;  %v710_v51 = vmul.f32 %v1398_v21, %v702_v45  ;;  %v711_v52 = vmul.f32 %v1400_v22, %v703_v46 }
 0x206   : > { %v670_v53 = vmul.f32 %v663_v48, %v652_v40  ;;  %v671_v54 = vmul.f32 %v663_v48, %v653_v41  ;;  %v672_v55 = vmul.f32 %v663_v48, %v654_v42  ;;  %v673_v56 = vmul.f32 %v663_v48, %v655_v47 }
 0x207   : > { %731 = vmatpush.msra.mxu0 %v708_v49  ;;  %751 = vmatpush.msra.mxu1 %v709_v50 }
 0x208   : > { %v681_v57 = vpop.permute.xlu1 %680  ;;  %771 = vmatpush.msra.mxu2 %v710_v51  ;;  %791 = vmatpush.msra.mxu3 %v711_v52 }
 0x209   : > { %v688_v58 = vadd.f32 %v681_v57, %v670_v53  ;;  %v689_v59 = vadd.f32 %v681_v57, %v671_v54  ;;  %v690_v60 = vadd.f32 %v681_v57, %v672_v55  ;;  %v691_v61 = vadd.f32 %v681_v57, %v673_v56 }
 0x20b   : > { %v696_v62 = vmax.f32 %v688_v58, 0.0  ;;  %v697_v63 = vmax.f32 %v689_v59, 0.0  ;;  %v698_v0 = vmax.f32 %v690_v60, 0.0  ;;  %v699_v1 = vmax.f32 %v691_v61, 0.0 }
 0x20d   : > { %v704_v2 = vmul.f32 %v1394_v19, %v696_v62  ;;  %v705_v3 = vmul.f32 %v1396_v20, %v697_v63  ;;  %v706_v4 = vmul.f32 %v1398_v21, %v698_v0  ;;  %v707_v5 = vmul.f32 %v1400_v22, %v699_v1 }
 0x20f   : > { %732 = vmatpush.msra.mxu0 %v704_v2  ;;  %752 = vmatpush.msra.mxu1 %v705_v3 }
 0x210   : > { %772 = vmatpush.msra.mxu2 %v706_v4  ;;  %792 = vmatpush.msra.mxu3 %v707_v5 }
 0x211   : > { %1116 = vmatmul.msk.f32.vlgmr.msra.gmra.mxu2 %vm713_vm14, %v712_v6  ;;  %1117 = vmatmul.msk.f32.vlgmr.msra.gmra.mxu3 %vm713_vm14, %v712_v6 }
 0x212   : > { %1114 = vmatmul.msk.f32.vlgmr.msra.gmra.mxu0 %vm713_vm14, %v712_v6  ;;  %1115 = vmatmul.msk.f32.vlgmr.msra.gmra.mxu1 %vm713_vm14, %v712_v6 }
 0x28f   : > { %v734_v7 = vpop.f32.mrf.mxu0  ;;  %v754_v8 = vpop.f32.mrf.mxu1 }
 0x290   : > { %v818_v9 = vpack.c.bf16 %v754_v8, %v734_v7  ;;  %v798_v10 = vadd.f32 %v754_v8, %v734_v7  ;;  %v807_v11 = vmul.f32 %v734_v7, %v734_v7  ;;  %v808_v12 = vmul.f32 %v754_v8, %v754_v8 }
 0x292   : > { %823 = vst [vmem:[%s822_s17] sm:$0xff] %v818_v9  ;;  %v811_v17 = vadd.f32 %v808_v12, %v807_v11 }
 0x294   : > { %v774_v13 = vpop.f32.mrf.mxu2  ;;  %v794_v14 = vpop.f32.mrf.mxu3 }
 0x295   : > { %v799_v15 = vadd.f32 %v798_v10, %v774_v13  ;;  %v819_v16 = vpack.c.bf16 %v794_v14, %v774_v13  ;;  %v809_v18 = vmul.f32 %v774_v13, %v774_v13  ;;  %v810_v24 = vmul.f32 %v794_v14, %v794_v14 }
 0x297   : > { %824 = vst [vmem:[%s822_s17 + $0x8] sm:$0xff] %v819_v16  ;;  %v800_v23 = vadd.f32 %v799_v15, %v794_v14  ;;  %v812_v25 = vadd.f32 %v811_v17, %v809_v18 }
 0x299   : > { %801 = vadd.xlane.f32.xlu2 %v800_v23  ;;  %v813_v26 = vadd.f32 %v812_v25, %v810_v24 }
 0x2a1   : > { %814 = vadd.xlane.f32.xlu2 %v813_v26 }
 0x30c   : > { %v802_v28 = vpop.xlane.xlu2 %801 }
 0x30d   : > { %v803_v29 = vadd.f32 %v802_v28, %v797_v27 }
 0x30f   : > { %805 = vst.msk [vmem:[#allocation6] sm:$0xff] %vm804_vm15, %v803_v29 }
 0x314   : > { %v815_v31 = vpop.xlane.xlu2 %814 }
 0x315   : > { %v816_v32 = vadd.f32 %v815_v31, %v806_v30 }
 0x317   : > { %817 = vst.msk [vmem:[#allocation7] sm:$0xff] %vm804_vm15, %v816_v32 }
 0x318 PF: > { %p1120_p5 = scmp.ne.s32.totalorder %s1259_s30, 2 }
 0x319   : > { %s1133_s22 = sshll.u32 (!%p1120_p5), %s1255_s29, 4 }
 0x31a   : > { %828 = sbr.rel (%p1120_p5) target bundleno = 1120 (0x460), region = 91  ;;  %s861_s23 = scalar_lea.vmem (!%p1120_p5), [#allocation3], %s1133_s22 }
 0x31f   : > { %v1277_v33 = vmov 0   ;;  %v1278_v34 = vmov 2048.0   ;;  %v829_v39 = vld [vmem:[#allocation6] sm:$0xff]  ;;  %v838_v41 = vld [vmem:[#allocation7] sm:$0xff]  ;;  %vm895_vm4 = vcmask 64512   ;;  %vm989_vm5 = vcmask 1043456  }
 0x320   : > { %1204 = vset.pattern.permute.xlu0 %v1277_v33  ;;  %1205 = vrcp.f32 %v1278_v34  ;;  %v843_v54 = vld [vmem:[%s1503_s5] sm:$0xff]  ;;  %v863_v63 = vld [vmem:[%s861_s23 + $0x8] sm:$0xff] }
 0x321   : > { %v856_v59 = vld [vmem:[%s1504_s6] sm:$0xff]  ;;  %v866_v2 = vunpack.c.l.bf16 %v863_v63  ;;  %v867_v3 = vunpack.c.h.bf16 %v863_v63 }
 0x322   : > { %v862_v62 = vld [vmem:[%s861_s23] sm:$0xff] }
 0x323   : > { %v864_v0 = vunpack.c.l.bf16 %v862_v62  ;;  %v865_v1 = vunpack.c.h.bf16 %v862_v62  ;;  %v894_v25 = vld [vmem:[%s1505_s7] sm:$0x7] }
 0x326   : > { %v1206_v35 = vpop.eup %1205 }
 0x327   : > { %v831_v36 = vmul.f32 2048.0, %v1206_v35  ;;  %vm835_vm0 = vweird.f32 %v1206_v35 }
 0x329   : > { %v832_v37 = vsub.f32 1.0, %v831_v36 }
 0x32b   : > { %v833_v38 = vmul.f32 %v1206_v35, %v832_v37 }
 0x32d   : > { %v834_v40 = vadd.f32 %v1206_v35, %v833_v38 }
 0x32f   : > { %v836_v42 = vsel %vm835_vm0, %v1206_v35, %v834_v40 }
 0x330   : > { %v837_v43 = vmul.f32 %v836_v42, %v829_v39  ;;  %v839_v44 = vmul.f32 %v838_v41, %v836_v42 }
 0x332   : > { %v840_v45 = vmul.f32 %v837_v43, %v837_v43 }
 0x334   : > { %v841_v46 = vsub.f32 %v839_v44, %v840_v45 }
 0x336   : > { %v842_v47 = vmax.f32 %v841_v46, 0.0 }
 0x338   : > { %v844_v48 = vadd.f32 1e-05, %v842_v47 }
 0x33a   : > { %1207 = vrsqrt.f32 %v844_v48  ;;  %vm851_vm1 = vweird.f32 %v844_v48 }
 0x340   : > { %v1208_v49 = vpop.eup %1207 }
 0x341   : > { %v846_v50 = vmul.f32 %v1208_v49, %v844_v48  ;;  %vm852_vm2 = vweird.f32 %v1208_v49 }
 0x342   : > { %vm853_vm3 = vmor %vm851_vm1, %vm852_vm2 }
 0x343   : > { %v847_v51 = vmul.f32 %v1208_v49, %v846_v50 }
 0x345   : > { %v848_v52 = vmul.f32 0.5, %v847_v51 }
 0x347   : > { %v849_v53 = vsub.f32 1.5, %v848_v52 }
 0x349   : > { %v850_v55 = vmul.f32 %v1208_v49, %v849_v53 }
 0x34b   : > { %v854_v56 = vsel %vm853_vm3, %v1208_v49, %v850_v55 }
 0x34c   : > { %v855_v57 = vmul.f32 %v854_v56, %v843_v54 }
 0x34e   : > { %870 = vperm.xlu0 %1204, %v855_v57   ;;  %v857_v58 = vmul.f32 %v855_v57, %v837_v43 }
 0x350   : > { %v858_v60 = vsub.f32 %v856_v59, %v857_v58 }
 0x356   : > { %879 = vperm.xlu0 %1204, %v858_v60  }
 0x3c0   : > { %v871_v61 = vpop.permute.xlu0 %870 }
 0x3c1   : > { %v873_v4 = vmul.f32 %v871_v61, %v864_v0  ;;  %v874_v5 = vmul.f32 %v871_v61, %v865_v1  ;;  %v875_v6 = vmul.f32 %v871_v61, %v866_v2  ;;  %v876_v7 = vmul.f32 %v871_v61, %v867_v3 }
 0x3c8   : > { %v880_v8 = vpop.permute.xlu0 %879 }
 0x3c9   : > { %v882_v9 = vadd.f32 %v880_v8, %v873_v4  ;;  %v883_v10 = vadd.f32 %v880_v8, %v874_v5  ;;  %v884_v11 = vadd.f32 %v880_v8, %v875_v6  ;;  %v885_v12 = vadd.f32 %v880_v8, %v876_v7 }
 0x3cb   : > { %v886_v13 = vmax.f32 %v882_v9, 0.0  ;;  %v887_v14 = vmax.f32 %v883_v10, 0.0  ;;  %v888_v15 = vmax.f32 %v884_v11, 0.0  ;;  %v889_v16 = vmax.f32 %v885_v12, 0.0 }
 0x3cd   : > { %v890_v17 = vmul.f32 %v1394_v19, %v886_v13  ;;  %v891_v18 = vmul.f32 %v1396_v20, %v887_v14  ;;  %v892_v23 = vmul.f32 %v1398_v21, %v888_v15  ;;  %v893_v24 = vmul.f32 %v1400_v22, %v889_v16 }
 0x3cf   : > { %914 = vmatpush.msra.mxu0 %v890_v17  ;;  %934 = vmatpush.msra.mxu1 %v891_v18 }
 0x3d0   : > { %954 = vmatpush.msra.mxu2 %v892_v23  ;;  %974 = vmatpush.msra.mxu3 %v893_v24 }
 0x3d1   : > { %1126 = vmatmul.msk.f32.vlgmr.msra.gmra.mxu3 %vm895_vm4, %v894_v25  ;;  %1125 = vmatmul.msk.f32.vlgmr.msra.gmra.mxu2 %vm895_vm4, %v894_v25 }
 0x3d2   : > { %1124 = vmatmul.msk.f32.vlgmr.msra.gmra.mxu1 %vm895_vm4, %v894_v25  ;;  %1123 = vmatmul.msk.f32.vlgmr.msra.gmra.mxu0 %vm895_vm4, %v894_v25 }
 0x44f   : > { %v936_v19 = vpop.f32.mrf.mxu1  ;;  %v916_v20 = vpop.f32.mrf.mxu0 }
 0x450   : > { %1209 = vtanh.f32 %v936_v19 }
 0x451   : > { %1211 = vtanh.f32 %v916_v20 }
 0x454   : > { %v976_v21 = vpop.f32.mrf.mxu3  ;;  %v956_v22 = vpop.f32.mrf.mxu2 }
 0x455   : > { %1213 = vtanh.f32 %v976_v21 }
 0x456   : > { %v1210_v26 = vpop.eup %1209  ;;  %1215 = vtanh.f32 %v956_v22 }
 0x457   : > { %v1212_v27 = vpop.eup %1211  ;;  %v987_v28 = vrot.slane %v1210_v26, 4 }
 0x459   : > { %v990_v29 = vsel %vm989_vm5, %v1212_v27, %v987_v28 }
 0x45a   : > { %994 = vst [vmem:[%s1405_s21] sm:$0x77] %v990_v29 }
 0x45b   : > { %v1214_v30 = vpop.eup %1213 }
 0x45c   : > { %v1216_v31 = vpop.eup %1215  ;;  %v988_v32 = vrot.slane %v1214_v30, 4 }
 0x45e   : > { %v991_v33 = vsel %vm989_vm5, %v1216_v31, %v988_v32 }
 0x45f   : > { %995 = vst [vmem:[%s1405_s21 + $0x8] sm:$0x77] %v991_v33 }
 0x460 PF: > { %s18_s11 = sadd.s32 1, %s1271_s11   ;;  %s1507_s27 = smov %s1251_s28 }
 0x461   : > { %p15_p6 = scmp.ge.s32.totalorder %s18_s11, 14   ;;  %s1508_s28 = smov %s1375_s18 }
 0x462   : > { %s1509_s29 = smov %s1263_s9  ;;  %s1510_s30 = smov %s1267_s10 }
 0x463   : > { %s1511_s9 = smov %s1516_s12  ;;  %s1512_s10 = smov %s1518_s13 }
 0x464   :  { %17 = sbr.rel (!%p15_p6) target bundleno = 4 (0x4), region = 130 }

// kernel: generator_forward.4
= control target key start
LH: loop header
LB: loop body
LE: loop exit
PB: predicated region body
PF: predicated region fallthrough
CT: control target
= control target key end

     0   :  { %s4995_s15 = smov 0   ;;  %s4997_s16 = smov 0   ;;  %s7577_s0 = inlined_call_operand.vmem [shape: bf16[9,64,512], index: 0, kind: input, shape index: {}]   ;;  %s7578_s1 = inlined_call_operand.vmem [shape: f32[4,4,32,64], index: 1, kind: input, shape index: {}]   ;;  %s7579_s2 = inlined_call_operand.vmem [shape: f32[32,1], index: 2, kind: input, shape index: {}]   ;;  %s7580_s3 = inlined_call_operand.vmem [shape: f32[32,1], index: 3, kind: input, shape index: {}]   ;;  %s7581_s4 = inlined_call_operand.vmem [shape: bf16[4,32,512], index: 4, kind: output, shape index: {}]  }
   0x1   :  { %s4999_s17 = smov 0  }
   0x2 LB: > { %s26_s18 = sadd.s32 1, %s4961_s16  ;;  %p4266_p0 = scmp.ge.s32.totalorder %s4965_s17, 1  ;;  %s4965_s17 = sphi %s4999_s17, %s14_s17   ;;  %s4961_s16 = sphi %s4997_s16, %s7791_s16   ;;  %s4957_s15 = sphi %s4995_s15, %s7790_s15  }
   0x3   : > { %p28_p1 = scmp.ge.s32.totalorder %s26_s18, 2  ;;  %p187_p2 = scmp.lt.s32.totalorder %s4965_s17, 3 }
   0x5   : > { %s7793_s18 = smov (%p28_p1, %s26_s18), 0  ;;  %p188_p3 = pnand %p4266_p0, %p187_p2 }
   0x6   : > { %p237_p4 = scmp.eq.s32.totalorder (!%p188_p3), %s4957_s15, 0 }
   0x7   : > { %191 = sbr.rel (%p188_p3) target bundleno = 1058 (0x422), region = 36 }
   0xc   : > { %242 = sbr.rel (!%p237_p4) target bundleno = 21 (0x15), region = 40  ;;  %vm243_vm0 = vcmask (%p237_p4), 7168   ;;  %v4967_v0 = vmov (%p237_p4), 0.0  }
   0xd   : > { %244 = vst.msk [vmem:[#allocation3] sm:$0xff] (%p237_p4), %vm243_vm0, %v4967_v0 }
   0xe   : > { %245 = vst.msk [vmem:[#allocation3 + $0x8] sm:$0xff] (%p237_p4), %vm243_vm0, %v4967_v0 }
   0xf   : > { %246 = vst.msk [vmem:[#allocation3 + $0x10] sm:$0xff] (%p237_p4), %vm243_vm0, %v4967_v0 }
  0x10   : > { %247 = vst.msk [vmem:[#allocation3 + $0x18] sm:$0xff] (%p237_p4), %vm243_vm0, %v4967_v0 }
  0x11   : > { %248 = vst.msk [vmem:[#allocation4] sm:$0xff] %vm243_vm0, %v4967_v0 }
  0x12   : > { %249 = vst.msk [vmem:[#allocation4 + $0x8] sm:$0xff] %vm243_vm0, %v4967_v0 }
  0x13   : > { %250 = vst.msk [vmem:[#allocation4 + $0x10] sm:$0xff] %vm243_vm0, %v4967_v0 }
  0x14   : > { %251 = vst.msk [vmem:[#allocation4 + $0x18] sm:$0xff] %vm243_vm0, %v4967_v0 }
  0x15 PF: > { %p4268_p5 = scmp.ne.s32.totalorder %s4957_s15, 0 }
  0x17   : > { %254 = sbr.rel (%p4268_p5) target bundleno = 819 (0x333), region = 44 }
  0x1c   : > { %v5020_v1 = vld [vmem:[%s7577_s0 + $0xf0] sm:$0xff]  ;;  %v5025_v2 = vld [vmem:[%s7577_s0 + $0xf8] sm:$0xff]  ;;  %v5030_v3 = vld [vmem:[%s7577_s0 + $0xe0] sm:$0xff]  ;;  %vm361_vm1 = vcmask 523264   ;;  %vm3631_vm2 = vcmask 7168  }
  0x1d   : > { %v357_v4 = vunpack.c.l.bf16 %v5020_v1  ;;  %v358_v5 = vunpack.c.h.bf16 %v5020_v1  ;;  %v359_v6 = vunpack.c.l.bf16 %v5025_v2  ;;  %v360_v7 = vunpack.c.h.bf16 %v5025_v2  ;;  %v5039_v8 = vld [vmem:[%s7577_s0 + $0xe8] sm:$0xff]  ;;  %v5044_v9 = vld [vmem:[%s7577_s0 + $0xd0] sm:$0xff]  ;;  %v5049_v10 = vld [vmem:[%s7577_s0 + $0xd8] sm:$0xff] }
  0x1e   : > { %v353_v11 = vunpack.c.l.bf16 %v5030_v3  ;;  %v354_v12 = vunpack.c.h.bf16 %v5030_v3  ;;  %v355_v13 = vunpack.c.l.bf16 %v5039_v8  ;;  %v356_v14 = vunpack.c.h.bf16 %v5039_v8  ;;  %v5058_v15 = vld [vmem:[%s7577_s0 + $0xc0] sm:$0xff]  ;;  %v5069_v18 = vld [vmem:[%s7577_s0 + $0xc8] sm:$0xff]  ;;  %v4279_v21 = vld [vmem:[%s7577_s0 + $0xb0] sm:$0xff] }
  0x1f   : > { %382 = vmatpush.msra.mxu0 %v357_v4  ;;  %411 = vmatpush.msra.mxu1 %v358_v5  ;;  %v349_v16 = vunpack.c.l.bf16 %v5044_v9  ;;  %v350_v17 = vunpack.c.h.bf16 %v5044_v9  ;;  %v351_v19 = vunpack.c.l.bf16 %v5049_v10  ;;  %v352_v20 = vunpack.c.h.bf16 %v5049_v10  ;;  %v5089_v24 = vld [vmem:[%s7577_s0 + $0xb8] sm:$0xff]  ;;  %v4277_v27 = vld [vmem:[%s7577_s0 + $0xa0] sm:$0xff]  ;;  %v5107_v30 = vld [vmem:[%s7577_s0 + $0xa8] sm:$0xff] }
  0x20   : > { %440 = vmatpush.msra.mxu2 %v359_v6  ;;  %469 = vmatpush.msra.mxu3 %v360_v7  ;;  %v345_v22 = vunpack.c.l.bf16 %v5058_v15  ;;  %v346_v23 = vunpack.c.h.bf16 %v5058_v15  ;;  %v347_v25 = vunpack.c.l.bf16 %v5069_v18  ;;  %v348_v26 = vunpack.c.h.bf16 %v5069_v18  ;;  %v4275_v33 = vld [vmem:[%s7577_s0 + $0x90] sm:$0xff]  ;;  %v5125_v36 = vld [vmem:[%s7577_s0 + $0x98] sm:$0xff]  ;;  %v4273_v39 = vld [vmem:[%s7577_s0 + $0x80] sm:$0xff] }
  0x21   : > { %383 = vmatpush.msra.mxu0 %v353_v11  ;;  %412 = vmatpush.msra.mxu1 %v354_v12  ;;  %v341_v28 = vunpack.c.l.bf16 %v4279_v21  ;;  %v342_v29 = vunpack.c.h.bf16 %v4279_v21  ;;  %v343_v31 = vunpack.c.l.bf16 %v5089_v24  ;;  %v344_v32 = vunpack.c.h.bf16 %v5089_v24  ;;  %v5139_v42 = vld [vmem:[%s7577_s0 + $0x88] sm:$0xff]  ;;  %v274_v49 = vld [vmem:[%s7577_s0 + $0x78] sm:$0xff]  ;;  %v273_v50 = vld [vmem:[%s7577_s0 + $0x70] sm:$0xff] }
  0x22   : > { %441 = vmatpush.msra.mxu2 %v355_v13  ;;  %470 = vmatpush.msra.mxu3 %v356_v14  ;;  %v337_v34 = vunpack.c.l.bf16 %v4277_v27  ;;  %v338_v35 = vunpack.c.h.bf16 %v4277_v27  ;;  %v339_v37 = vunpack.c.l.bf16 %v5107_v30  ;;  %v340_v38 = vunpack.c.h.bf16 %v5107_v30  ;;  %v4269_v51 = vld [vmem:[%s7578_s1 + $0x20] sm:$0xff]  ;;  %v272_v52 = vld [vmem:[%s7577_s0 + $0x68] sm:$0xff]  ;;  %v270_v58 = vld [vmem:[%s7577_s0 + $0x58] sm:$0xff] }
  0x23   : > { %384 = vmatpush.msra.mxu0 %v349_v16  ;;  %413 = vmatpush.msra.mxu1 %v350_v17  ;;  %v333_v40 = vunpack.c.l.bf16 %v4275_v33  ;;  %v334_v41 = vunpack.c.h.bf16 %v4275_v33  ;;  %v335_v43 = vunpack.c.l.bf16 %v5125_v36  ;;  %v336_v44 = vunpack.c.h.bf16 %v5125_v36  ;;  %v271_v55 = vld [vmem:[%s7577_s0 + $0x60] sm:$0xff]  ;;  %v269_v61 = vld [vmem:[%s7577_s0 + $0x50] sm:$0xff] }
  0x24   : > { %442 = vmatpush.msra.mxu2 %v351_v19  ;;  %471 = vmatpush.msra.mxu3 %v352_v20  ;;  %v329_v45 = vunpack.c.l.bf16 %v4273_v39  ;;  %v330_v46 = vunpack.c.h.bf16 %v4273_v39  ;;  %v7615_v47 = vunpack.c.l.bf16 %v5139_v42  ;;  %v7614_v48 = vunpack.c.h.bf16 %v5139_v42  ;;  %v267_v33 = vld [vmem:[%s7577_s0 + $0x40] sm:$0xff]  ;;  %v4359_v1 = vld [vmem:[%s7578_s1 + $0x70] sm:$0xff] }
  0x25   : > { %385 = vmatpush.msra.mxu0 %v345_v22  ;;  %414 = vmatpush.msra.mxu1 %v346_v23  ;;  %v305_v53 = vunpack.c.l.bf16 %v274_v49  ;;  %v306_v54 = vunpack.c.h.bf16 %v274_v49  ;;  %v303_v56 = vunpack.c.l.bf16 %v273_v50  ;;  %v304_v57 = vunpack.c.h.bf16 %v273_v50  ;;  %v264_v49 = vld [vmem:[%s7577_s0 + $0x28] sm:$0xff]  ;;  %v4403_v2 = vld [vmem:[%s7577_s0 + $0xb0] sm:$0xff]  ;;  %v4413_v15 = vld [vmem:[%s7578_s1 + $0xa0] sm:$0xff] }
  0x26   : > { %443 = vmatpush.msra.mxu2 %v347_v25  ;;  %472 = vmatpush.msra.mxu3 %v348_v26  ;;  %v301_v59 = vunpack.c.l.bf16 %v272_v52  ;;  %v302_v60 = vunpack.c.h.bf16 %v272_v52  ;;  %v299_v62 = vunpack.c.l.bf16 %v271_v55  ;;  %v300_v63 = vunpack.c.h.bf16 %v271_v55  ;;  %v263_v52 = vld [vmem:[%s7577_s0 + $0x20] sm:$0xff]  ;;  %v4399_v10 = vld [vmem:[%s7577_s0 + $0x90] sm:$0xff] }
  0x27   : > { %386 = vmatpush.msra.mxu0 %v341_v28  ;;  %415 = vmatpush.msra.mxu1 %v342_v29  ;;  %v297_v0 = vunpack.c.l.bf16 %v270_v58  ;;  %v298_v21 = vunpack.c.h.bf16 %v270_v58  ;;  %v295_v27 = vunpack.c.l.bf16 %v269_v61  ;;  %v296_v28 = vunpack.c.h.bf16 %v269_v61  ;;  %v268_v29 = vld [vmem:[%s7577_s0 + $0x48] sm:$0xff]  ;;  %v4271_v61 = vld [vmem:[%s7578_s1 + $0x30] sm:$0xff] }
  0x28   : > { %444 = vmatpush.msra.mxu2 %v343_v31  ;;  %473 = vmatpush.msra.mxu3 %v344_v32  ;;  %v293_v39 = vunpack.c.l.bf16 %v268_v29  ;;  %v285_v55 = vunpack.c.l.bf16 %v264_v49  ;;  %v284_v58 = vunpack.c.h.bf16 %v263_v52  ;;  %v7668_v3 = vunpack.c.l.bf16 %v5139_v42 }
  0x29   : > { %387 = vmatpush.msra.mxu0 %v337_v34  ;;  %416 = vmatpush.msra.mxu1 %v338_v35  ;;  %v4270_v34 = vld [vmem:[%s7578_s1 + $0x28] sm:$0xff]  ;;  %v266_v35 = vld [vmem:[%s7577_s0 + $0x38] sm:$0xff] }
  0x2a   : > { %445 = vmatpush.msra.mxu2 %v339_v37  ;;  %474 = vmatpush.msra.mxu3 %v340_v38  ;;  %v289_v50 = vunpack.c.l.bf16 %v266_v35 }
  0x2b   : > { %388 = vmatpush.msra.mxu0 %v333_v40  ;;  %417 = vmatpush.msra.mxu1 %v334_v41  ;;  %v294_v40 = vunpack.c.h.bf16 %v268_v29  ;;  %v265_v41 = vld [vmem:[%s7577_s0 + $0x30] sm:$0xff]  ;;  %v4340_v29 = vld [vmem:[%s7577_s0 + $0x1f8] sm:$0xff] }
  0x2c   : > { %446 = vmatpush.msra.mxu2 %v335_v43  ;;  %475 = vmatpush.msra.mxu3 %v336_v44 }
  0x2d   : > { %389 = vmatpush.msra.mxu0 %v329_v45  ;;  %418 = vmatpush.msra.mxu1 %v330_v46  ;;  %v291_v45 = vunpack.c.l.bf16 %v267_v33  ;;  %v292_v46 = vunpack.c.h.bf16 %v267_v33 }
  0x2e   : > { %447 = vmatpush.msra.mxu2 %v7615_v47  ;;  %476 = vmatpush.msra.mxu3 %v7614_v48  ;;  %v4323_v48 = vld [vmem:[%s7578_s1 + $0x50] sm:$0xff] }
  0x2f   : > { %4289 = vmatmul.msk.f32.vlgmr.msra.gmra.mxu0 %vm361_vm1, %v4269_v51  ;;  %4293 = vmatmul.msk.f32.vlgmr.msra.gmra.mxu1 %vm361_vm1, %v4269_v51 }
  0x30   : > { %4297 = vmatmul.msk.f32.vlgmr.msra.gmra.mxu2 %vm361_vm1, %v4269_v51  ;;  %4301 = vmatmul.msk.f32.vlgmr.msra.gmra.mxu3 %vm361_vm1, %v4269_v51  ;;  %v290_v51 = vunpack.c.h.bf16 %v266_v35  ;;  %v4339_v35 = vld [vmem:[%s7577_s0 + $0x1f0] sm:$0xff] }
  0x31   : > { %568 = vmatpush.msrb.mxu2 %v305_v53  ;;  %597 = vmatpush.msrb.mxu3 %v306_v54  ;;  %v287_v53 = vunpack.c.l.bf16 %v265_v41  ;;  %v288_v54 = vunpack.c.h.bf16 %v265_v41  ;;  %v670_v41 = vunpack.c.l.bf16 %v4340_v29 }
  0x32   : > { %510 = vmatpush.msrb.mxu0 %v303_v56  ;;  %539 = vmatpush.msrb.mxu1 %v304_v57  ;;  %v286_v56 = vunpack.c.h.bf16 %v264_v49  ;;  %v283_v57 = vunpack.c.l.bf16 %v263_v52  ;;  %v669_v49 = vunpack.c.h.bf16 %v4339_v35  ;;  %v4272_v52 = vld [vmem:[%s7578_s1 + $0x38] sm:$0xff] }
  0x33   : > { %569 = vmatpush.msrb.mxu2 %v301_v59  ;;  %598 = vmatpush.msrb.mxu3 %v302_v60  ;;  %v262_v59 = vld [vmem:[%s7577_s0 + $0x18] sm:$0xff]  ;;  %v261_v60 = vld [vmem:[%s7577_s0 + $0x10] sm:$0xff] }
  0x34   : > { %511 = vmatpush.msrb.mxu0 %v299_v62  ;;  %540 = vmatpush.msrb.mxu1 %v300_v63  ;;  %v260_v62 = vld [vmem:[%s7577_s0 + $0x8] sm:$0xff]  ;;  %v281_v63 = vunpack.c.l.bf16 %v262_v59 }
  0x35   : > { %570 = vmatpush.msrb.mxu2 %v297_v0  ;;  %599 = vmatpush.msrb.mxu3 %v298_v21  ;;  %v282_v0 = vunpack.c.h.bf16 %v262_v59  ;;  %v259_v21 = vld [vmem:[%s7577_s0] sm:$0xff]  ;;  %v277_v33 = vunpack.c.l.bf16 %v260_v62  ;;  %v4334_v59 = vld [vmem:[%s7577_s0 + $0x1c8] sm:$0xff] }
  0x36   : > { %512 = vmatpush.msrb.mxu0 %v295_v27  ;;  %541 = vmatpush.msrb.mxu1 %v296_v28  ;;  %v279_v27 = vunpack.c.l.bf16 %v261_v60  ;;  %v280_v28 = vunpack.c.h.bf16 %v261_v60 }
  0x37   : > { %4290 = vmatmul.msk.f32.gmra.mxu0 %vm361_vm1, %v4270_v34  ;;  %4294 = vmatmul.msk.f32.gmra.mxu1 %vm361_vm1, %v4270_v34 }
  0x38   : > { %4298 = vmatmul.msk.f32.gmra.mxu2 %vm361_vm1, %v4270_v34  ;;  %4302 = vmatmul.msk.f32.gmra.mxu3 %vm361_vm1, %v4270_v34  ;;  %v278_v34 = vunpack.c.h.bf16 %v260_v62  ;;  %v4333_v62 = vld [vmem:[%s7577_s0 + $0x1c0] sm:$0xff] }
  0x39   : > { %571 = vmatpush.msrb.mxu2 %v293_v39  ;;  %600 = vmatpush.msrb.mxu3 %v294_v40  ;;  %v275_v39 = vunpack.c.l.bf16 %v259_v21  ;;  %v276_v40 = vunpack.c.h.bf16 %v259_v21  ;;  %v658_v21 = vunpack.c.l.bf16 %v4334_v59 }
  0x3a   : > { %513 = vmatpush.msrb.mxu0 %v291_v45  ;;  %542 = vmatpush.msrb.mxu1 %v292_v46  ;;  %v671_v45 = vunpack.c.h.bf16 %v4340_v29  ;;  %v668_v46 = vunpack.c.l.bf16 %v4339_v35  ;;  %v657_v29 = vunpack.c.h.bf16 %v4333_v62  ;;  %v255_v35 = vld [vmem:[%s7578_s1] sm:$0xff] }
  0x3b   : > { %572 = vmatpush.msrb.mxu2 %v289_v50  ;;  %601 = vmatpush.msrb.mxu3 %v290_v51  ;;  %v4338_v50 = vld [vmem:[%s7577_s0 + $0x1e8] sm:$0xff]  ;;  %v4337_v51 = vld [vmem:[%s7577_s0 + $0x1e0] sm:$0xff] }
  0x3c   : > { %514 = vmatpush.msrb.mxu0 %v287_v53  ;;  %543 = vmatpush.msrb.mxu1 %v288_v54  ;;  %v4336_v53 = vld [vmem:[%s7577_s0 + $0x1d8] sm:$0xff]  ;;  %v666_v54 = vunpack.c.l.bf16 %v4338_v50 }
  0x3d   : > { %573 = vmatpush.msrb.mxu2 %v285_v55  ;;  %602 = vmatpush.msrb.mxu3 %v286_v56  ;;  %v667_v55 = vunpack.c.h.bf16 %v4338_v50  ;;  %v4335_v56 = vld [vmem:[%s7577_s0 + $0x1d0] sm:$0xff]  ;;  %v662_v60 = vunpack.c.l.bf16 %v4336_v53  ;;  %v4328_v50 = vld [vmem:[%s7577_s0 + $0x198] sm:$0xff] }
  0x3e   : > { %515 = vmatpush.msrb.mxu0 %v283_v57  ;;  %544 = vmatpush.msrb.mxu1 %v284_v58  ;;  %v664_v57 = vunpack.c.l.bf16 %v4337_v51  ;;  %v665_v58 = vunpack.c.h.bf16 %v4337_v51 }
  0x3f   : > { %4291 = vmatmul.msk.f32.gmra.mxu0 %vm361_vm1, %v4271_v61  ;;  %4295 = vmatmul.msk.f32.gmra.mxu1 %vm361_vm1, %v4271_v61 }
  0x40   : > { %4299 = vmatmul.msk.f32.gmra.mxu2 %vm361_vm1, %v4271_v61  ;;  %4303 = vmatmul.msk.f32.gmra.mxu3 %vm361_vm1, %v4271_v61  ;;  %v663_v61 = vunpack.c.h.bf16 %v4336_v53  ;;  %v4327_v53 = vld [vmem:[%s7577_s0 + $0x190] sm:$0xff] }
  0x41   : > { %574 = vmatpush.msrb.mxu2 %v281_v63  ;;  %603 = vmatpush.msrb.mxu3 %v282_v0  ;;  %v660_v63 = vunpack.c.l.bf16 %v4335_v56  ;;  %v661_v0 = vunpack.c.h.bf16 %v4335_v56  ;;  %v646_v56 = vunpack.c.l.bf16 %v4328_v50 }
  0x42   : > { %516 = vmatpush.msrb.mxu0 %v279_v27  ;;  %545 = vmatpush.msrb.mxu1 %v280_v28  ;;  %v659_v27 = vunpack.c.h.bf16 %v4334_v59  ;;  %v656_v28 = vunpack.c.l.bf16 %v4333_v62  ;;  %v645_v59 = vunpack.c.h.bf16 %v4327_v53  ;;  %v256_v62 = vld [vmem:[%s7578_s1 + $0x8] sm:$0xff] }
  0x43   : > { %575 = vmatpush.msrb.mxu2 %v277_v33  ;;  %604 = vmatpush.msrb.mxu3 %v278_v34  ;;  %v4332_v33 = vld [vmem:[%s7577_s0 + $0x1b8] sm:$0xff]  ;;  %v4331_v34 = vld [vmem:[%s7577_s0 + $0x1b0] sm:$0xff] }
  0x44   : > { %517 = vmatpush.msrb.mxu0 %v275_v39  ;;  %546 = vmatpush.msrb.mxu1 %v276_v40  ;;  %v4330_v39 = vld [vmem:[%s7577_s0 + $0x1a8] sm:$0xff]  ;;  %v654_v40 = vunpack.c.l.bf16 %v4332_v33 }
  0x45   : > { %750 = vmatpush.msra.mxu2 %v670_v41  ;;  %779 = vmatpush.msra.mxu3 %v671_v45  ;;  %v655_v41 = vunpack.c.h.bf16 %v4332_v33  ;;  %v4329_v45 = vld [vmem:[%s7577_s0 + $0x1a0] sm:$0xff]  ;;  %v650_v51 = vunpack.c.l.bf16 %v4330_v39  ;;  %v5308_v33 = vld [vmem:[%s7577_s0 + $0x268] sm:$0xff] }
  0x46   : > { %692 = vmatpush.msra.mxu0 %v668_v46  ;;  %721 = vmatpush.msra.mxu1 %v669_v49  ;;  %v652_v46 = vunpack.c.l.bf16 %v4331_v34  ;;  %v653_v49 = vunpack.c.h.bf16 %v4331_v34  ;;  %v7674_v36 = vunpack.c.l.bf16 %v5308_v33 }
  0x47   : > { %4292 = vmatmul.msk.f32.gmra.mxu0 %vm361_vm1, %v4272_v52  ;;  %4296 = vmatmul.msk.f32.gmra.mxu1 %vm361_vm1, %v4272_v52 }
  0x48   : > { %4300 = vmatmul.msk.f32.gmra.mxu2 %vm361_vm1, %v4272_v52  ;;  %4304 = vmatmul.msk.f32.gmra.mxu3 %vm361_vm1, %v4272_v52  ;;  %v651_v52 = vunpack.c.h.bf16 %v4330_v39 }
  0x49   : > { %751 = vmatpush.msra.mxu2 %v666_v54  ;;  %780 = vmatpush.msra.mxu3 %v667_v55  ;;  %v648_v54 = vunpack.c.l.bf16 %v4329_v45  ;;  %v649_v55 = vunpack.c.h.bf16 %v4329_v45  ;;  %v7599_v45 = vunpack.c.l.bf16 %v5308_v33 }
  0x4a   : > { %693 = vmatpush.msra.mxu0 %v664_v57  ;;  %722 = vmatpush.msra.mxu1 %v665_v58  ;;  %v647_v57 = vunpack.c.h.bf16 %v4328_v50  ;;  %v644_v58 = vunpack.c.l.bf16 %v4327_v53  ;;  %v257_v53 = vld [vmem:[%s7578_s1 + $0x10] sm:$0xff] }
  0x4b   : > { %752 = vmatpush.msra.mxu2 %v662_v60  ;;  %781 = vmatpush.msra.mxu3 %v663_v61  ;;  %v4326_v60 = vld [vmem:[%s7577_s0 + $0x188] sm:$0xff]  ;;  %v4325_v61 = vld [vmem:[%s7577_s0 + $0x180] sm:$0xff] }
  0x4c   : > { %694 = vmatpush.msra.mxu0 %v660_v63  ;;  %723 = vmatpush.msra.mxu1 %v661_v0  ;;  %v5298_v63 = vld [vmem:[%s7577_s0 + $0x278] sm:$0xff]  ;;  %v642_v0 = vunpack.c.l.bf16 %v4326_v60 }
  0x4d   : > { %753 = vmatpush.msra.mxu2 %v658_v21  ;;  %782 = vmatpush.msra.mxu3 %v659_v27  ;;  %v643_v21 = vunpack.c.h.bf16 %v4326_v60  ;;  %v5303_v27 = vld [vmem:[%s7577_s0 + $0x270] sm:$0xff]  ;;  %v7611_v34 = vunpack.c.l.bf16 %v5298_v63  ;;  %v7671_v24 = vunpack.c.h.bf16 %v5298_v63 }
  0x4e   : > { %695 = vmatpush.msra.mxu0 %v656_v28  ;;  %724 = vmatpush.msra.mxu1 %v657_v29  ;;  %v640_v28 = vunpack.c.l.bf16 %v4325_v61  ;;  %v641_v29 = vunpack.c.h.bf16 %v4325_v61  ;;  %v7609_v39 = vunpack.c.l.bf16 %v5303_v27  ;;  %v5374_v61 = vld [vmem:[%s7577_s0 + $0x240] sm:$0xff] }
  0x4f   : > { %4305 = vmatmul.msk.f32.vlgmr.msrb.gmra.mxu0 %vm361_vm1, %v255_v35  ;;  %4309 = vmatmul.msk.f32.vlgmr.msrb.gmra.mxu1 %vm361_vm1, %v255_v35 }
  0x50   : > { %4313 = vmatmul.msk.f32.vlgmr.msrb.gmra.mxu2 %vm361_vm1, %v255_v35  ;;  %4317 = vmatmul.msk.f32.vlgmr.msrb.gmra.mxu3 %vm361_vm1, %v255_v35  ;;  %v7610_v35 = vunpack.c.h.bf16 %v5298_v63 }
  0x51   : > { %754 = vmatpush.msra.mxu2 %v654_v40  ;;  %783 = vmatpush.msra.mxu3 %v655_v41  ;;  %v7600_v40 = vunpack.c.h.bf16 %v5303_v27  ;;  %v5321_v41 = vld [vmem:[%s7577_s0 + $0x260] sm:$0xff] }
  0x52   : > { %696 = vmatpush.msra.mxu0 %v652_v46  ;;  %725 = vmatpush.msra.mxu1 %v653_v49  ;;  %v7597_v46 = vunpack.c.h.bf16 %v5308_v33  ;;  %v7595_v49 = vunpack.c.l.bf16 %v5321_v41  ;;  %v7582_v50 = vunpack.c.h.bf16 %v5321_v41 }
  0x53   : > { %755 = vmatpush.msra.mxu2 %v650_v51  ;;  %784 = vmatpush.msra.mxu3 %v651_v52  ;;  %v5330_v51 = vld [vmem:[%s7577_s0 + $0x258] sm:$0xff]  ;;  %v5339_v52 = vld [vmem:[%s7577_s0 + $0x250] sm:$0xff] }
  0x54   : > { %697 = vmatpush.msra.mxu0 %v648_v54  ;;  %726 = vmatpush.msra.mxu1 %v649_v55  ;;  %v5351_v54 = vld [vmem:[%s7577_s0 + $0x248] sm:$0xff]  ;;  %v7583_v55 = vunpack.c.l.bf16 %v5330_v51 }
  0x55   : > { %756 = vmatpush.msra.mxu2 %v646_v56  ;;  %785 = vmatpush.msra.mxu3 %v647_v57  ;;  %v7584_v56 = vunpack.c.h.bf16 %v5330_v51  ;;  %v7585_v57 = vunpack.c.l.bf16 %v5339_v52  ;;  %v7587_v60 = vunpack.c.h.bf16 %v5351_v54 }
  0x56   : > { %698 = vmatpush.msra.mxu0 %v644_v58  ;;  %727 = vmatpush.msra.mxu1 %v645_v59  ;;  %v7594_v58 = vunpack.c.h.bf16 %v5339_v52  ;;  %v7586_v59 = vunpack.c.l.bf16 %v5351_v54 }
  0x57   : > { %4306 = vmatmul.msk.f32.gmra.mxu0 %vm361_vm1, %v256_v62  ;;  %4310 = vmatmul.msk.f32.gmra.mxu1 %vm361_vm1, %v256_v62 }
  0x58   : > { %4314 = vmatmul.msk.f32.gmra.mxu2 %vm361_vm1, %v256_v62  ;;  %4318 = vmatmul.msk.f32.gmra.mxu3 %vm361_vm1, %v256_v62  ;;  %v5379_v62 = vld [vmem:[%s7577_s0 + $0x238] sm:$0xff] }
  0x59   : > { %757 = vmatpush.msra.mxu2 %v642_v0  ;;  %786 = vmatpush.msra.mxu3 %v643_v21  ;;  %v5384_v0 = vld [vmem:[%s7577_s0 + $0x230] sm:$0xff]  ;;  %v7593_v21 = vunpack.c.l.bf16 %v5374_v61 }
  0x5a   : > { %699 = vmatpush.msra.mxu0 %v640_v28  ;;  %728 = vmatpush.msra.mxu1 %v641_v29  ;;  %v7592_v28 = vunpack.c.h.bf16 %v5374_v61  ;;  %v7591_v29 = vunpack.c.l.bf16 %v5379_v62 }
  0x5b   : > { %948 = vmatpush.msrb.mxu2 %v7611_v34  ;;  %977 = vmatpush.msrb.mxu3 %v7610_v35  ;;  %v4322_v34 = vld [vmem:[%s7578_s1 + $0x48] sm:$0xff] }
  0x5c   : > { %890 = vmatpush.msrb.mxu0 %v7609_v39  ;;  %919 = vmatpush.msrb.mxu1 %v7600_v40  ;;  %v4321_v40 = vld [vmem:[%s7578_s1 + $0x40] sm:$0xff] }
  0x5d   : > { %949 = vmatpush.msrb.mxu2 %v7599_v45  ;;  %978 = vmatpush.msrb.mxu3 %v7597_v46  ;;  %v5465_v45 = vld [vmem:[%s7577_s0 + $0x200] sm:$0xff] }
  0x5e   : > { %891 = vmatpush.msrb.mxu0 %v7595_v49  ;;  %920 = vmatpush.msrb.mxu1 %v7582_v50  ;;  %v7589_v50 = vunpack.c.l.bf16 %v5384_v0 }
  0x5f   : > { %4307 = vmatmul.msk.f32.gmra.mxu0 %vm361_vm1, %v257_v53  ;;  %4311 = vmatmul.msk.f32.gmra.mxu1 %vm361_vm1, %v257_v53 }
  0x60   : > { %4315 = vmatmul.msk.f32.gmra.mxu2 %vm361_vm1, %v257_v53  ;;  %4319 = vmatmul.msk.f32.gmra.mxu3 %vm361_vm1, %v257_v53  ;;  %v7588_v53 = vunpack.c.h.bf16 %v5379_v62 }
  0x61   : > { %950 = vmatpush.msrb.mxu2 %v7583_v55  ;;  %979 = vmatpush.msrb.mxu3 %v7584_v56  ;;  %v7590_v55 = vunpack.c.h.bf16 %v5384_v0  ;;  %v5403_v56 = vld [vmem:[%s7577_s0 + $0x228] sm:$0xff] }
  0x62   : > { %892 = vmatpush.msrb.mxu0 %v7585_v57  ;;  %921 = vmatpush.msrb.mxu1 %v7594_v58  ;;  %v258_v57 = vld [vmem:[%s7578_s1 + $0x18] sm:$0xff]  ;;  %v5456_v58 = vld [vmem:[%s7577_s0 + $0x208] sm:$0xff] }
  0x63   : > { %951 = vmatpush.msrb.mxu2 %v7586_v59  ;;  %980 = vmatpush.msrb.mxu3 %v7587_v60  ;;  %v7596_v59 = vunpack.c.l.bf16 %v5403_v56  ;;  %v7598_v60 = vunpack.c.h.bf16 %v5403_v56  ;;  %v7606_v46 = vunpack.c.l.bf16 %v5456_v58 }
  0x64   : > { %893 = vmatpush.msrb.mxu0 %v7593_v21  ;;  %922 = vmatpush.msrb.mxu1 %v7592_v28 }
  0x65   : > { %952 = vmatpush.msrb.mxu2 %v7591_v29  ;;  %981 = vmatpush.msrb.mxu3 %v7588_v53  ;;  %v5433_v53 = vld [vmem:[%s7577_s0 + $0x220] sm:$0xff] }
  0x66   : > { %894 = vmatpush.msrb.mxu0 %v7589_v50  ;;  %923 = vmatpush.msrb.mxu1 %v7590_v55  ;;  %v5438_v50 = vld [vmem:[%s7577_s0 + $0x218] sm:$0xff]  ;;  %v5443_v55 = vld [vmem:[%s7577_s0 + $0x210] sm:$0xff]  ;;  %v7602_v29 = vunpack.c.h.bf16 %v5433_v53 }
  0x67   : > { %4308 = vmatmul.msk.f32.gmra.mxu0 %vm361_vm1, %v258_v57  ;;  %4312 = vmatmul.msk.f32.gmra.mxu1 %vm361_vm1, %v258_v57  ;;  %v7608_v28 = vunpack.c.l.bf16 %v5438_v50  ;;  %v7607_v21 = vunpack.c.h.bf16 %v5438_v50  ;;  %v7604_v49 = vunpack.c.l.bf16 %v5443_v55 }
  0x68   : > { %4316 = vmatmul.msk.f32.gmra.mxu2 %vm361_vm1, %v258_v57  ;;  %4320 = vmatmul.msk.f32.gmra.mxu3 %vm361_vm1, %v258_v57  ;;  %v7601_v57 = vunpack.c.l.bf16 %v5433_v53 }
  0x69   : > { %953 = vmatpush.msrb.mxu2 %v7596_v59  ;;  %982 = vmatpush.msrb.mxu3 %v7598_v60  ;;  %v7603_v59 = vunpack.c.h.bf16 %v5443_v55  ;;  %v7605_v60 = vunpack.c.h.bf16 %v5456_v58 }
  0x6a   : > { %895 = vmatpush.msrb.mxu0 %v7601_v57  ;;  %924 = vmatpush.msrb.mxu1 %v7602_v29  ;;  %v7613_v57 = vunpack.c.l.bf16 %v5465_v45  ;;  %v7612_v29 = vunpack.c.h.bf16 %v5465_v45 }
  0x6b   : > { %954 = vmatpush.msrb.mxu2 %v7608_v28  ;;  %983 = vmatpush.msrb.mxu3 %v7607_v21 }
  0x6c   : > { %896 = vmatpush.msrb.mxu0 %v7604_v49  ;;  %925 = vmatpush.msrb.mxu1 %v7603_v59  ;;  %v4432_v59 = vld [vmem:[%s7577_s0 + $0x178] sm:$0xff]  ;;  %v4431_v49 = vld [vmem:[%s7577_s0 + $0x170] sm:$0xff] }
  0x6d   : > { %955 = vmatpush.msrb.mxu2 %v7606_v46  ;;  %984 = vmatpush.msrb.mxu3 %v7605_v60  ;;  %v4430_v60 = vld [vmem:[%s7577_s0 + $0x168] sm:$0xff]  ;;  %v1203_v46 = vunpack.c.l.bf16 %v4432_v59  ;;  %v1201_v21 = vunpack.c.l.bf16 %v4431_v49  ;;  %v1202_v28 = vunpack.c.h.bf16 %v4431_v49  ;;  %v4428_v49 = vld [vmem:[%s7577_s0 + $0x158] sm:$0xff] }
  0x6e   : > { %897 = vmatpush.msrb.mxu0 %v7613_v57  ;;  %926 = vmatpush.msrb.mxu1 %v7612_v29  ;;  %v1199_v39 = vunpack.c.l.bf16 %v4430_v60  ;;  %v1200_v35 = vunpack.c.h.bf16 %v4430_v60  ;;  %v1195_v60 = vunpack.c.l.bf16 %v4428_v49 }
  0x6f   : > { %4341 = vmatmul.msk.f32.vlgmr.msra.gmra.mxu0 %vm361_vm1, %v4321_v40  ;;  %4345 = vmatmul.msk.f32.vlgmr.msra.gmra.mxu1 %vm361_vm1, %v4321_v40 }
  0x70   : > { %4349 = vmatmul.msk.f32.vlgmr.msra.gmra.mxu2 %vm361_vm1, %v4321_v40  ;;  %4353 = vmatmul.msk.f32.vlgmr.msra.gmra.mxu3 %vm361_vm1, %v4321_v40  ;;  %v1204_v40 = vunpack.c.h.bf16 %v4432_v59 }
  0x71   : > { %1283 = vmatpush.msra.mxu2 %v1203_v46  ;;  %1225 = vmatpush.msra.mxu0 %v1201_v21  ;;  %v4429_v46 = vld [vmem:[%s7577_s0 + $0x160] sm:$0xff]  ;;  %v1196_v21 = vunpack.c.h.bf16 %v4428_v49  ;;  %v4424_v49 = vld [vmem:[%s7577_s0 + $0x138] sm:$0xff] }
  0x72   : > { %1312 = vmatpush.msra.mxu3 %v1204_v40  ;;  %1254 = vmatpush.msra.mxu1 %v1202_v28  ;;  %v1198_v59 = vunpack.c.h.bf16 %v4429_v46 }
  0x73   : > { %1284 = vmatpush.msra.mxu2 %v1199_v39  ;;  %v1197_v39 = vunpack.c.l.bf16 %v4429_v46  ;;  %v4425_v46 = vld [vmem:[%s7577_s0 + $0x140] sm:$0xff] }
  0x74   : > { %1313 = vmatpush.msra.mxu3 %v1200_v35  ;;  %v4427_v35 = vld [vmem:[%s7577_s0 + $0x150] sm:$0xff]  ;;  %1255 = vmatpush.msra.mxu1 %v1198_v59  ;;  %v1188_v59 = vunpack.c.h.bf16 %v4424_v49 }
  0x75   : > { %v1193_v28 = vunpack.c.l.bf16 %v4427_v35  ;;  %v1194_v40 = vunpack.c.h.bf16 %v4427_v35  ;;  %1226 = vmatpush.msra.mxu0 %v1197_v39  ;;  %1285 = vmatpush.msra.mxu2 %v1195_v60  ;;  %v1190_v35 = vunpack.c.h.bf16 %v4425_v46  ;;  %v1187_v39 = vunpack.c.l.bf16 %v4424_v49  ;;  %v4420_v49 = vld [vmem:[%s7577_s0 + $0x118] sm:$0xff] }
  0x76   : > { %1314 = vmatpush.msra.mxu3 %v1196_v21 }
  0x77   : > { %4342 = vmatmul.msk.f32.gmra.mxu0 %vm361_vm1, %v4322_v34  ;;  %4346 = vmatmul.msk.f32.gmra.mxu1 %vm361_vm1, %v4322_v34 }
  0x78   : > { %4350 = vmatmul.msk.f32.gmra.mxu2 %vm361_vm1, %v4322_v34  ;;  %4354 = vmatmul.msk.f32.gmra.mxu3 %vm361_vm1, %v4322_v34  ;;  %v4426_v34 = vld [vmem:[%s7577_s0 + $0x148] sm:$0xff] }
  0x79   : > { %v1191_v29 = vunpack.c.l.bf16 %v4426_v34  ;;  %v1192_v57 = vunpack.c.h.bf16 %v4426_v34  ;;  %1227 = vmatpush.msra.mxu0 %v1193_v28  ;;  %1256 = vmatpush.msra.mxu1 %v1194_v40  ;;  %v4324_v40 = vld [vmem:[%s7578_s1 + $0x58] sm:$0xff] }
  0x7b   : > { %1286 = vmatpush.msra.mxu2 %v1191_v29  ;;  %1315 = vmatpush.msra.mxu3 %v1192_v57  ;;  %v4423_v29 = vld [vmem:[%s7577_s0 + $0x130] sm:$0xff]  ;;  %v1189_v57 = vunpack.c.l.bf16 %v4425_v46  ;;  %v4421_v46 = vld [vmem:[%s7577_s0 + $0x120] sm:$0xff] }
  0x7c   : > { %v1185_v60 = vunpack.c.l.bf16 %v4423_v29  ;;  %v1186_v21 = vunpack.c.h.bf16 %v4423_v29  ;;  %1257 = vmatpush.msra.mxu1 %v1190_v35  ;;  %v4419_v29 = vld [vmem:[%s7577_s0 + $0x110] sm:$0xff]  ;;  %v1182_v35 = vunpack.c.h.bf16 %v4421_v46 }
  0x7d   : > { %1228 = vmatpush.msra.mxu0 %v1189_v57  ;;  %1287 = vmatpush.msra.mxu2 %v1187_v39  ;;  %v1181_v57 = vunpack.c.l.bf16 %v4421_v46  ;;  %v1179_v39 = vunpack.c.l.bf16 %v4420_v49  ;;  %v4417_v46 = vld [vmem:[%s7577_s0 + $0x100] sm:$0xff] }
  0x7e   : > { %1316 = vmatpush.msra.mxu3 %v1188_v59  ;;  %1258 = vmatpush.msra.mxu1 %v1186_v21  ;;  %v1180_v59 = vunpack.c.h.bf16 %v4420_v49  ;;  %v1178_v21 = vunpack.c.h.bf16 %v4419_v29  ;;  %v1173_v49 = vunpack.c.l.bf16 %v4417_v46  ;;  %v1174_v47 = vunpack.c.h.bf16 %v4417_v46 }
  0x7f   : > { %4343 = vmatmul.msk.f32.gmra.mxu0 %vm361_vm1, %v4323_v48  ;;  %4347 = vmatmul.msk.f32.gmra.mxu1 %vm361_vm1, %v4323_v48 }
  0x80   : > { %4351 = vmatmul.msk.f32.gmra.mxu2 %vm361_vm1, %v4323_v48  ;;  %4355 = vmatmul.msk.f32.gmra.mxu3 %vm361_vm1, %v4323_v48  ;;  %v4422_v48 = vld [vmem:[%s7577_s0 + $0x128] sm:$0xff] }
  0x81   : > { %v1183_v34 = vunpack.c.l.bf16 %v4422_v48  ;;  %v1184_v28 = vunpack.c.h.bf16 %v4422_v48  ;;  %1229 = vmatpush.msra.mxu0 %v1185_v60  ;;  %v4418_v48 = vld [vmem:[%s7577_s0 + $0x108] sm:$0xff]  ;;  %v1177_v60 = vunpack.c.l.bf16 %v4419_v29  ;;  %1259 = vmatpush.msra.mxu1 %v1182_v35  ;;  %v7684_v35 = vunpack.c.l.bf16 %v5374_v61 }
  0x82   : > { %v4358_v29 = vld [vmem:[%s7578_s1 + $0x68] sm:$0xff] }
  0x83   : > { %1288 = vmatpush.msra.mxu2 %v1183_v34  ;;  %1317 = vmatpush.msra.mxu3 %v1184_v28  ;;  %v1175_v34 = vunpack.c.l.bf16 %v4418_v48  ;;  %v4357_v28 = vld [vmem:[%s7578_s1 + $0x60] sm:$0xff] }
  0x84   : > { %1230 = vmatpush.msra.mxu0 %v1181_v57  ;;  %1260 = vmatpush.msra.mxu1 %v1178_v21  ;;  %v7683_v57 = vunpack.c.h.bf16 %v5351_v54  ;;  %v7689_v21 = vunpack.c.h.bf16 %v5384_v0 }
  0x85   : > { %1289 = vmatpush.msra.mxu2 %v1179_v39  ;;  %1318 = vmatpush.msra.mxu3 %v1180_v59  ;;  %v7685_v59 = vunpack.c.h.bf16 %v5374_v61  ;;  %v7691_v61 = vunpack.c.h.bf16 %v5403_v56 }
  0x86   : > { %1231 = vmatpush.msra.mxu0 %v1177_v60  ;;  %1261 = vmatpush.msra.mxu1 %v1174_v47  ;;  %v7680_v47 = vunpack.c.l.bf16 %v5339_v52  ;;  %v7688_v60 = vunpack.c.l.bf16 %v5384_v0  ;;  %v7693_v0 = vunpack.c.h.bf16 %v5433_v53 }
  0x87   : > { %4344 = vmatmul.msk.f32.gmra.mxu0 %vm361_vm1, %v4324_v40  ;;  %4348 = vmatmul.msk.f32.gmra.mxu1 %vm361_vm1, %v4324_v40 }
  0x88   : > { %4352 = vmatmul.msk.f32.gmra.mxu2 %vm361_vm1, %v4324_v40  ;;  %4356 = vmatmul.msk.f32.gmra.mxu3 %vm361_vm1, %v4324_v40  ;;  %v1176_v40 = vunpack.c.h.bf16 %v4418_v48  ;;  %v7686_v48 = vunpack.c.l.bf16 %v5379_v62 }
  0x89   : > { %1290 = vmatpush.msra.mxu2 %v1175_v34  ;;  %1232 = vmatpush.msra.mxu0 %v1173_v49  ;;  %v7690_v34 = vunpack.c.l.bf16 %v5403_v56  ;;  %v7695_v49 = vunpack.c.h.bf16 %v5438_v50 }
  0x8a   : > { %1319 = vmatpush.msra.mxu3 %v1176_v40 }
  0x8f   : > { %4377 = vmatmul.msk.f32.vlgmr.msrb.gmra.mxu0 %vm361_vm1, %v4357_v28  ;;  %4381 = vmatmul.msk.f32.vlgmr.msrb.gmra.mxu1 %vm361_vm1, %v4357_v28 }
  0x90   : > { %4385 = vmatmul.msk.f32.vlgmr.msrb.gmra.mxu2 %vm361_vm1, %v4357_v28  ;;  %4389 = vmatmul.msk.f32.vlgmr.msrb.gmra.mxu3 %vm361_vm1, %v4357_v28  ;;  %v7694_v28 = vunpack.c.l.bf16 %v5438_v50  ;;  %v7699_v50 = vunpack.c.h.bf16 %v5456_v58 }
  0x91   : > { %1411 = vmatpush.msrb.mxu2 %v359_v6  ;;  %1440 = vmatpush.msrb.mxu3 %v360_v7  ;;  %v1132_v6 = vunpack.c.h.bf16 %v4403_v2  ;;  %v4401_v7 = vld [vmem:[%s7577_s0 + $0xa0] sm:$0xff] }
  0x92   : > { %1353 = vmatpush.msrb.mxu0 %v357_v4  ;;  %1382 = vmatpush.msrb.mxu1 %v358_v5  ;;  %v4360_v4 = vld [vmem:[%s7578_s1 + $0x78] sm:$0xff]  ;;  %v1131_v5 = vunpack.c.l.bf16 %v4403_v2  ;;  %v1127_v8 = vunpack.c.l.bf16 %v4401_v7  ;;  %v1128_v9 = vunpack.c.h.bf16 %v4401_v7  ;;  %v7697_v2 = vunpack.c.h.bf16 %v5443_v55 }
  0x93   : > { %1412 = vmatpush.msrb.mxu2 %v355_v13  ;;  %1441 = vmatpush.msrb.mxu3 %v356_v14 }
  0x94   : > { %1354 = vmatpush.msrb.mxu0 %v353_v11  ;;  %1383 = vmatpush.msrb.mxu1 %v354_v12  ;;  %v1123_v11 = vunpack.c.l.bf16 %v4399_v10  ;;  %v1124_v12 = vunpack.c.h.bf16 %v4399_v10 }
  0x95   : > { %1413 = vmatpush.msrb.mxu2 %v351_v19  ;;  %1442 = vmatpush.msrb.mxu3 %v352_v20  ;;  %v7669_v19 = vunpack.c.h.bf16 %v5139_v42  ;;  %v7670_v20 = vunpack.c.l.bf16 %v5298_v63  ;;  %v7677_v42 = vunpack.c.h.bf16 %v5321_v41  ;;  %v7681_v63 = vunpack.c.h.bf16 %v5339_v52  ;;  %v4415_v52 = vld [vmem:[%s7578_s1 + $0xb0] sm:$0xff] }
  0x96   : > { %1355 = vmatpush.msrb.mxu0 %v349_v16  ;;  %1384 = vmatpush.msrb.mxu1 %v350_v17  ;;  %v4397_v16 = vld [vmem:[%s7577_s0 + $0x80] sm:$0xff] }
  0x97   : > { %4378 = vmatmul.msk.f32.gmra.mxu0 %vm361_vm1, %v4358_v29  ;;  %4382 = vmatmul.msk.f32.gmra.mxu1 %vm361_vm1, %v4358_v29  ;;  %v1119_v17 = vunpack.c.l.bf16 %v4397_v16  ;;  %v1120_v18 = vunpack.c.h.bf16 %v4397_v16 }
  0x98   : > { %4386 = vmatmul.msk.f32.gmra.mxu2 %vm361_vm1, %v4358_v29  ;;  %4390 = vmatmul.msk.f32.gmra.mxu3 %vm361_vm1, %v4358_v29  ;;  %v7696_v29 = vunpack.c.l.bf16 %v5443_v55 }
  0x99   : > { %1414 = vmatpush.msrb.mxu2 %v347_v25  ;;  %1443 = vmatpush.msrb.mxu3 %v348_v26  ;;  %v7672_v25 = vunpack.c.l.bf16 %v5303_v27 }
  0x9a   : > { %1356 = vmatpush.msrb.mxu0 %v345_v22  ;;  %1385 = vmatpush.msrb.mxu1 %v346_v23 }
  0x9b   : > { %1415 = vmatpush.msrb.mxu2 %v343_v31  ;;  %1444 = vmatpush.msrb.mxu3 %v344_v32  ;;  %v4414_v31 = vld [vmem:[%s7578_s1 + $0xa8] sm:$0xff]  ;;  %v7673_v32 = vunpack.c.h.bf16 %v5303_v27  ;;  %v7682_v27 = vunpack.c.l.bf16 %v5351_v54  ;;  %v7687_v54 = vunpack.c.h.bf16 %v5379_v62  ;;  %v7692_v62 = vunpack.c.l.bf16 %v5433_v53  ;;  %v4416_v53 = vld [vmem:[%s7578_s1 + $0xb8] sm:$0xff] }
  0x9c   : > { %1357 = vmatpush.msrb.mxu0 %v1131_v5  ;;  %1386 = vmatpush.msrb.mxu1 %v1132_v6  ;;  %v7701_v5 = vunpack.c.h.bf16 %v5465_v45 }
  0x9d   : > { %1416 = vmatpush.msrb.mxu2 %v339_v37  ;;  %1445 = vmatpush.msrb.mxu3 %v340_v38  ;;  %v7675_v37 = vunpack.c.h.bf16 %v5308_v33  ;;  %v7676_v38 = vunpack.c.l.bf16 %v5321_v41 }
  0x9e   : > { %1358 = vmatpush.msrb.mxu0 %v1127_v8  ;;  %1387 = vmatpush.msrb.mxu1 %v1128_v9  ;;  %v4520_v8 = vld [vmem:[%s7577_s0 + $0x2f8] sm:$0xff] }
  0x9f   : > { %4379 = vmatmul.msk.f32.gmra.mxu0 %vm361_vm1, %v4359_v1  ;;  %4383 = vmatmul.msk.f32.gmra.mxu1 %vm361_vm1, %v4359_v1  ;;  %v1710_v9 = vunpack.c.l.bf16 %v4520_v8  ;;  %v1711_v10 = vunpack.c.h.bf16 %v4520_v8 }
  0xa0   : > { %4387 = vmatmul.msk.f32.gmra.mxu2 %vm361_vm1, %v4359_v1  ;;  %4391 = vmatmul.msk.f32.gmra.mxu3 %vm361_vm1, %v4359_v1 }
  0xa1   : > { %1417 = vmatpush.msrb.mxu2 %v335_v43  ;;  %1446 = vmatpush.msrb.mxu3 %v336_v44  ;;  %v7678_v43 = vunpack.c.l.bf16 %v5330_v51  ;;  %v7679_v44 = vunpack.c.h.bf16 %v5330_v51 }
  0xa2   : > { %1359 = vmatpush.msrb.mxu0 %v1123_v11  ;;  %1388 = vmatpush.msrb.mxu1 %v1124_v12 }
  0xa3   : > { %1418 = vmatpush.msrb.mxu2 %v7668_v3  ;;  %1447 = vmatpush.msrb.mxu3 %v7669_v19  ;;  %v7698_v3 = vunpack.c.l.bf16 %v5456_v58  ;;  %v4518_v19 = vld [vmem:[%s7577_s0 + $0x2e8] sm:$0xff] }
  0xa4   : > { %1360 = vmatpush.msrb.mxu0 %v1119_v17  ;;  %1389 = vmatpush.msrb.mxu1 %v1120_v18  ;;  %v4394_v17 = vld [vmem:[%s7578_s1 + $0x88] sm:$0xff]  ;;  %v4519_v18 = vld [vmem:[%s7577_s0 + $0x2f0] sm:$0xff] }
  0xa7   : > { %4380 = vmatmul.msk.f32.gmra.mxu0 %vm361_vm1, %v4360_v4  ;;  %4384 = vmatmul.msk.f32.gmra.mxu1 %vm361_vm1, %v4360_v4 }
  0xa8   : > { %4388 = vmatmul.msk.f32.gmra.mxu2 %vm361_vm1, %v4360_v4  ;;  %4392 = vmatmul.msk.f32.gmra.mxu3 %vm361_vm1, %v4360_v4  ;;  %v7700_v4 = vunpack.c.l.bf16 %v5465_v45  ;;  %v4393_v45 = vld [vmem:[%s7578_s1 + $0x80] sm:$0xff] }
  0xac   : > { %v5648_v13 = vpop.f32.mrf.mxu0  ;;  %v5650_v14 = vpop.f32.mrf.mxu1 }
  0xaf   : > { %4433 = vmatmul.msk.f32.vlgmr.msra.gmra.mxu0 %vm361_vm1, %v4413_v15  ;;  %4437 = vmatmul.msk.f32.vlgmr.msra.gmra.mxu1 %vm361_vm1, %v4413_v15 }
  0xb0   : > { %4441 = vmatmul.msk.f32.vlgmr.msra.gmra.mxu2 %vm361_vm1, %v4413_v15  ;;  %4445 = vmatmul.msk.f32.vlgmr.msra.gmra.mxu3 %vm361_vm1, %v4413_v15 }
  0xb1   : > { %1592 = vmatpush.msra.mxu2 %v7670_v20  ;;  %1621 = vmatpush.msra.mxu3 %v7671_v24  ;;  %v1708_v20 = vunpack.c.l.bf16 %v4519_v18  ;;  %v1709_v24 = vunpack.c.h.bf16 %v4519_v18 }
  0xb2   : > { %1534 = vmatpush.msra.mxu0 %v7672_v25  ;;  %1563 = vmatpush.msra.mxu1 %v7673_v32  ;;  %v1706_v25 = vunpack.c.l.bf16 %v4518_v19  ;;  %v4517_v32 = vld [vmem:[%s7577_s0 + $0x2e0] sm:$0xff] }
  0xb3   : > { %v5666_v22 = vpop.f32.mrf.mxu2  ;;  %v5668_v23 = vpop.f32.mrf.mxu3  ;;  %1593 = vmatpush.msra.mxu2 %v7674_v36  ;;  %1622 = vmatpush.msra.mxu3 %v7675_v37  ;;  %v4516_v36 = vld [vmem:[%s7577_s0 + $0x2d8] sm:$0xff]  ;;  %v1704_v37 = vunpack.c.l.bf16 %v4517_v32 }
  0xb4   : > { %v5674_v26 = vpop.f32.mrf.mxu0  ;;  %v5676_v30 = vpop.f32.mrf.mxu1  ;;  %1535 = vmatpush.msra.mxu0 %v7676_v38  ;;  %1564 = vmatpush.msra.mxu1 %v7677_v42  ;;  %v1705_v38 = vunpack.c.h.bf16 %v4517_v32  ;;  %v1702_v42 = vunpack.c.l.bf16 %v4516_v36 }
  0xb5   : > { %1594 = vmatpush.msra.mxu2 %v7678_v43  ;;  %1623 = vmatpush.msra.mxu3 %v7679_v44  ;;  %v1703_v43 = vunpack.c.h.bf16 %v4516_v36 }
  0xb6   : > { %1536 = vmatpush.msra.mxu0 %v7680_v47  ;;  %1565 = vmatpush.msra.mxu1 %v7681_v63 }
  0xb7   : > { %4434 = vmatmul.msk.f32.gmra.mxu0 %vm361_vm1, %v4414_v31  ;;  %4438 = vmatmul.msk.f32.gmra.mxu1 %vm361_vm1, %v4414_v31 }
  0xb8   : > { %4442 = vmatmul.msk.f32.gmra.mxu2 %vm361_vm1, %v4414_v31  ;;  %4446 = vmatmul.msk.f32.gmra.mxu3 %vm361_vm1, %v4414_v31  ;;  %v1707_v31 = vunpack.c.h.bf16 %v4518_v19 }
  0xb9   : > { %1595 = vmatpush.msra.mxu2 %v7682_v27  ;;  %1624 = vmatpush.msra.mxu3 %v7683_v57  ;;  %v4395_v57 = vld [vmem:[%s7578_s1 + $0x90] sm:$0xff] }
  0xba   : > { %1537 = vmatpush.msra.mxu0 %v7684_v35  ;;  %1566 = vmatpush.msra.mxu1 %v7685_v59  ;;  %v4515_v35 = vld [vmem:[%s7577_s0 + $0x2d0] sm:$0xff] }
  0xbb   : > { %v5705_v33 = vpop.f32.mrf.mxu2  ;;  %v5707_v41 = vpop.f32.mrf.mxu3  ;;  %1596 = vmatpush.msra.mxu2 %v7686_v48  ;;  %1625 = vmatpush.msra.mxu3 %v7687_v54  ;;  %v1700_v59 = vunpack.c.l.bf16 %v4515_v35  ;;  %v1701_v48 = vunpack.c.h.bf16 %v4515_v35  ;;  %v4505_v35 = vld [vmem:[%s7577_s0 + $0x280] sm:$0xff] }
  0xbc   : > { %v5713_v51 = vpop.f32.mrf.mxu0  ;;  %v5715_v39 = vpop.f32.mrf.mxu1  ;;  %1538 = vmatpush.msra.mxu0 %v7688_v60  ;;  %1567 = vmatpush.msra.mxu1 %v7689_v21  ;;  %v4513_v21 = vld [vmem:[%s7577_s0 + $0x2c0] sm:$0xff] }
  0xbd   : > { %1597 = vmatpush.msra.mxu2 %v7690_v34  ;;  %1626 = vmatpush.msra.mxu3 %v7691_v61  ;;  %v4512_v34 = vld [vmem:[%s7577_s0 + $0x2b8] sm:$0xff]  ;;  %v1696_v61 = vunpack.c.l.bf16 %v4513_v21 }
  0xbe   : > { %1539 = vmatpush.msra.mxu0 %v7692_v62  ;;  %1568 = vmatpush.msra.mxu1 %v7693_v0  ;;  %v1697_v62 = vunpack.c.h.bf16 %v4513_v21  ;;  %v1694_v0 = vunpack.c.l.bf16 %v4512_v34 }
  0xbf   : > { %4435 = vmatmul.msk.f32.gmra.mxu0 %vm361_vm1, %v4415_v52  ;;  %4439 = vmatmul.msk.f32.gmra.mxu1 %vm361_vm1, %v4415_v52 }
  0xc0   : > { %4443 = vmatmul.msk.f32.gmra.mxu2 %vm361_vm1, %v4415_v52  ;;  %4447 = vmatmul.msk.f32.gmra.mxu3 %vm361_vm1, %v4415_v52  ;;  %v4514_v52 = vld [vmem:[%s7577_s0 + $0x2c8] sm:$0xff] }
  0xc1   : > { %1598 = vmatpush.msra.mxu2 %v7694_v28  ;;  %1627 = vmatpush.msra.mxu3 %v7695_v49  ;;  %v1698_v54 = vunpack.c.l.bf16 %v4514_v52  ;;  %v1699_v60 = vunpack.c.h.bf16 %v4514_v52  ;;  %v1695_v28 = vunpack.c.h.bf16 %v4512_v34 }
  0xc2   : > { %1540 = vmatpush.msra.mxu0 %v7696_v29  ;;  %1569 = vmatpush.msra.mxu1 %v7697_v2 }
  0xc3   : > { %v5744_v40 = vpop.f32.mrf.mxu2  ;;  %v5746_v46 = vpop.f32.mrf.mxu3  ;;  %1599 = vmatpush.msra.mxu2 %v7698_v3  ;;  %1628 = vmatpush.msra.mxu3 %v7699_v50  ;;  %v4396_v3 = vld [vmem:[%s7578_s1 + $0x98] sm:$0xff]  ;;  %v4511_v50 = vld [vmem:[%s7577_s0 + $0x2b0] sm:$0xff] }
  0xc4   : > { %v5752_v56 = vpop.f32.mrf.mxu0  ;;  %v5754_v1 = vpop.f32.mrf.mxu1  ;;  %1541 = vmatpush.msra.mxu0 %v7700_v4  ;;  %1570 = vmatpush.msra.mxu1 %v7701_v5  ;;  %v4510_v4 = vld [vmem:[%s7577_s0 + $0x2a8] sm:$0xff]  ;;  %v1692_v5 = vunpack.c.l.bf16 %v4511_v50 }
  0xc5   : > { %v1690_v8 = vunpack.c.l.bf16 %v4510_v4 }
  0xc7   : > { %4436 = vmatmul.msk.f32.gmra.mxu0 %vm361_vm1, %v4416_v53  ;;  %4440 = vmatmul.msk.f32.gmra.mxu1 %vm361_vm1, %v4416_v53 }
  0xc8   : > { %4444 = vmatmul.msk.f32.gmra.mxu2 %vm361_vm1, %v4416_v53  ;;  %4448 = vmatmul.msk.f32.gmra.mxu3 %vm361_vm1, %v4416_v53 }
  0xcb   : > { %v5773_v55 = vpop.f32.mrf.mxu2  ;;  %v5775_v6 = vpop.f32.mrf.mxu3 }
  0xcc   : > { %v5777_v58 = vpop.f32.mrf.mxu0  ;;  %v5779_v7 = vpop.f32.mrf.mxu1 }
  0xcf   : > { %4449 = vmatmul.msk.f32.vlgmr.msrb.gmra.mxu0 %vm361_vm1, %v4393_v45  ;;  %4453 = vmatmul.msk.f32.vlgmr.msrb.gmra.mxu1 %vm361_vm1, %v4393_v45 }
  0xd0   : > { %4457 = vmatmul.msk.f32.vlgmr.msrb.gmra.mxu2 %vm361_vm1, %v4393_v45  ;;  %4461 = vmatmul.msk.f32.vlgmr.msrb.gmra.mxu3 %vm361_vm1, %v4393_v45  ;;  %v1693_v45 = vunpack.c.h.bf16 %v4511_v50  ;;  %v4583_v50 = vld [vmem:[%s7577_s0 + $0x270] sm:$0xff] }
  0xd1   : > { %1790 = vmatpush.msrb.mxu2 %v1710_v9  ;;  %1819 = vmatpush.msrb.mxu3 %v1711_v10  ;;  %v1691_v9 = vunpack.c.h.bf16 %v4510_v4  ;;  %v4509_v10 = vld [vmem:[%s7577_s0 + $0x2a0] sm:$0xff]  ;;  %v4582_v4 = vld [vmem:[%s7577_s0 + $0x268] sm:$0xff] }
  0xd2   : > { %1732 = vmatpush.msrb.mxu0 %v1708_v20  ;;  %1761 = vmatpush.msrb.mxu1 %v1709_v24  ;;  %v1688_v18 = vunpack.c.l.bf16 %v4509_v10  ;;  %v1689_v19 = vunpack.c.h.bf16 %v4509_v10  ;;  %v4581_v10 = vld [vmem:[%s7577_s0 + $0x260] sm:$0xff] }
  0xd3   : > { %v5791_v11 = vpop.f32.mrf.mxu2  ;;  %v5793_v12 = vpop.f32.mrf.mxu3  ;;  %1791 = vmatpush.msrb.mxu2 %v1706_v25  ;;  %1820 = vmatpush.msrb.mxu3 %v1707_v31  ;;  %v4507_v25 = vld [vmem:[%s7577_s0 + $0x290] sm:$0xff] }
  0xd4   : > { %v5795_v15 = vpop.f32.mrf.mxu0  ;;  %v5797_v16 = vpop.f32.mrf.mxu1  ;;  %1733 = vmatpush.msrb.mxu0 %v1704_v37  ;;  %1762 = vmatpush.msrb.mxu1 %v1705_v38  ;;  %v1684_v36 = vunpack.c.l.bf16 %v4507_v25  ;;  %v1685_v37 = vunpack.c.h.bf16 %v4507_v25 }
  0xd5   : > { %1792 = vmatpush.msrb.mxu2 %v1702_v42  ;;  %1821 = vmatpush.msrb.mxu3 %v1703_v43  ;;  %v4465_v43 = vld [vmem:[%s7578_s1 + $0xc0] sm:$0xff] }
  0xd6   : > { %1734 = vmatpush.msrb.mxu0 %v1700_v59  ;;  %1763 = vmatpush.msrb.mxu1 %v1701_v48  ;;  %v1680_v48 = vunpack.c.l.bf16 %v4505_v35 }
  0xd7   : > { %4450 = vmatmul.msk.f32.gmra.mxu0 %vm361_vm1, %v4394_v17  ;;  %4454 = vmatmul.msk.f32.gmra.mxu1 %vm361_vm1, %v4394_v17 }
  0xd8   : > { %4458 = vmatmul.msk.f32.gmra.mxu2 %vm361_vm1, %v4394_v17  ;;  %4462 = vmatmul.msk.f32.gmra.mxu3 %vm361_vm1, %v4394_v17  ;;  %v4508_v17 = vld [vmem:[%s7577_s0 + $0x298] sm:$0xff] }
  0xd9   : > { %1793 = vmatpush.msrb.mxu2 %v1698_v54  ;;  %1822 = vmatpush.msrb.mxu3 %v1699_v60  ;;  %v1686_v20 = vunpack.c.l.bf16 %v4508_v17  ;;  %v1687_v24 = vunpack.c.h.bf16 %v4508_v17  ;;  %v1681_v54 = vunpack.c.h.bf16 %v4505_v35  ;;  %v4584_v60 = vld [vmem:[%s7577_s0 + $0x278] sm:$0xff]  ;;  %v4579_v35 = vld [vmem:[%s7577_s0 + $0x250] sm:$0xff] }
  0xda   : > { %1735 = vmatpush.msrb.mxu0 %v1696_v61  ;;  %1764 = vmatpush.msrb.mxu1 %v1697_v62  ;;  %v2044_v21 = vunpack.c.l.bf16 %v4584_v60  ;;  %v2045_v34 = vunpack.c.h.bf16 %v4584_v60  ;;  %v4580_v17 = vld [vmem:[%s7577_s0 + $0x258] sm:$0xff] }
  0xdb   : > { %v5818_v44 = vpop.f32.mrf.mxu2  ;;  %v5820_v47 = vpop.f32.mrf.mxu3  ;;  %1794 = vmatpush.msrb.mxu2 %v1694_v0  ;;  %1823 = vmatpush.msrb.mxu3 %v1695_v28 }
  0xdc   : > { %v5822_v63 = vpop.f32.mrf.mxu0  ;;  %v5824_v27 = vpop.f32.mrf.mxu1  ;;  %1736 = vmatpush.msrb.mxu0 %v1692_v5  ;;  %1765 = vmatpush.msrb.mxu1 %v1693_v45  ;;  %v2042_v5 = vunpack.c.l.bf16 %v4583_v50  ;;  %v2043_v45 = vunpack.c.h.bf16 %v4583_v50 }
  0xdd   : > { %1795 = vmatpush.msrb.mxu2 %v1690_v8  ;;  %1824 = vmatpush.msrb.mxu3 %v1691_v9  ;;  %v2040_v8 = vunpack.c.l.bf16 %v4582_v4  ;;  %v2041_v9 = vunpack.c.h.bf16 %v4582_v4 }
  0xde   : > { %1737 = vmatpush.msrb.mxu0 %v1688_v18  ;;  %1766 = vmatpush.msrb.mxu1 %v1689_v19  ;;  %v2038_v18 = vunpack.c.l.bf16 %v4581_v10  ;;  %v2039_v19 = vunpack.c.h.bf16 %v4581_v10 }
  0xdf   : > { %4451 = vmatmul.msk.f32.gmra.mxu0 %vm361_vm1, %v4395_v57  ;;  %4455 = vmatmul.msk.f32.gmra.mxu1 %vm361_vm1, %v4395_v57 }
  0xe0   : > { %4459 = vmatmul.msk.f32.gmra.mxu2 %vm361_vm1, %v4395_v57  ;;  %4463 = vmatmul.msk.f32.gmra.mxu3 %vm361_vm1, %v4395_v57  ;;  %v4506_v57 = vld [vmem:[%s7577_s0 + $0x288] sm:$0xff] }
  0xe1   : > { %1796 = vmatpush.msrb.mxu2 %v1686_v20  ;;  %1825 = vmatpush.msrb.mxu3 %v1687_v24  ;;  %v1682_v52 = vunpack.c.l.bf16 %v4506_v57  ;;  %v1683_v59 = vunpack.c.h.bf16 %v4506_v57  ;;  %v2036_v20 = vunpack.c.l.bf16 %v4580_v17  ;;  %v2037_v24 = vunpack.c.h.bf16 %v4580_v17  ;;  %v4467_v57 = vld [vmem:[%s7578_s1 + $0xd0] sm:$0xff]  ;;  %v4468_v17 = vld [vmem:[%s7578_s1 + $0xd8] sm:$0xff] }
  0xe2   : > { %1738 = vmatpush.msrb.mxu0 %v1684_v36  ;;  %1767 = vmatpush.msrb.mxu1 %v1685_v37 }
  0xe3   : > { %v5845_v49 = vpop.f32.mrf.mxu2  ;;  %v5847_v29 = vpop.f32.mrf.mxu3  ;;  %1797 = vmatpush.msrb.mxu2 %v1682_v52  ;;  %1826 = vmatpush.msrb.mxu3 %v1683_v59  ;;  %v4578_v52 = vld [vmem:[%s7577_s0 + $0x248] sm:$0xff]  ;;  %v2034_v59 = vunpack.c.l.bf16 %v4579_v35 }
  0xe4   : > { %v5849_v53 = vpop.f32.mrf.mxu0  ;;  %v5851_v2 = vpop.f32.mrf.mxu1  ;;  %1739 = vmatpush.msrb.mxu0 %v1680_v48  ;;  %1768 = vmatpush.msrb.mxu1 %v1681_v54  ;;  %v2035_v48 = vunpack.c.h.bf16 %v4579_v35  ;;  %v2032_v54 = vunpack.c.l.bf16 %v4578_v52  ;;  %v2033_v60 = vunpack.c.h.bf16 %v4578_v52  ;;  %v4574_v35 = vld [vmem:[%s7577_s0 + $0x228] sm:$0xff]  ;;  %v4573_v52 = vld [vmem:[%s7577_s0 + $0x220] sm:$0xff] }
  0xe7   : > { %4452 = vmatmul.msk.f32.gmra.mxu0 %vm361_vm1, %v4396_v3  ;;  %4456 = vmatmul.msk.f32.gmra.mxu1 %vm361_vm1, %v4396_v3 }
  0xe8   : > { %4460 = vmatmul.msk.f32.gmra.mxu2 %vm361_vm1, %v4396_v3  ;;  %4464 = vmatmul.msk.f32.gmra.mxu3 %vm361_vm1, %v4396_v3  ;;  %v4466_v3 = vld [vmem:[%s7578_s1 + $0xc8] sm:$0xff] }
  0xeb   : > { %v5875_v31 = vpop.f32.mrf.mxu2  ;;  %v5877_v32 = vpop.f32.mrf.mxu3 }
  0xec   : > { %v5879_v38 = vpop.f32.mrf.mxu0  ;;  %v5881_v42 = vpop.f32.mrf.mxu1 }
  0xef   : > { %4485 = vmatmul.msk.f32.vlgmr.msra.gmra.mxu0 %vm361_vm1, %v4465_v43  ;;  %4489 = vmatmul.msk.f32.vlgmr.msra.gmra.mxu1 %vm361_vm1, %v4465_v43 }
  0xf0   : > { %4493 = vmatmul.msk.f32.vlgmr.msra.gmra.mxu2 %vm361_vm1, %v4465_v43  ;;  %4497 = vmatmul.msk.f32.vlgmr.msra.gmra.mxu3 %vm361_vm1, %v4465_v43 }
  0xf1   : > { %2124 = vmatpush.msra.mxu2 %v2044_v21  ;;  %2153 = vmatpush.msra.mxu3 %v2045_v34  ;;  %v4577_v21 = vld [vmem:[%s7577_s0 + $0x240] sm:$0xff]  ;;  %v4576_v34 = vld [vmem:[%s7577_s0 + $0x238] sm:$0xff] }
  0xf2   : > { %2066 = vmatpush.msra.mxu0 %v2042_v5  ;;  %2095 = vmatpush.msra.mxu1 %v2043_v45  ;;  %v2031_v50 = vunpack.c.h.bf16 %v4577_v21  ;;  %v2028_v4 = vunpack.c.l.bf16 %v4576_v34  ;;  %v2029_v5 = vunpack.c.h.bf16 %v4576_v34  ;;  %v4571_v34 = vld [vmem:[%s7577_s0 + $0x210] sm:$0xff] }
  0xf3   : > { %v5899_v61 = vpop.f32.mrf.mxu2  ;;  %v5901_v62 = vpop.f32.mrf.mxu3  ;;  %2125 = vmatpush.msra.mxu2 %v2040_v8  ;;  %2154 = vmatpush.msra.mxu3 %v2041_v9 }
  0xf4   : > { %v5903_v0 = vpop.f32.mrf.mxu0  ;;  %v5905_v28 = vpop.f32.mrf.mxu1  ;;  %2067 = vmatpush.msra.mxu0 %v2038_v18  ;;  %2096 = vmatpush.msra.mxu1 %v2039_v19  ;;  %v4575_v18 = vld [vmem:[%s7577_s0 + $0x230] sm:$0xff] }
  0xf5   : > { %2126 = vmatpush.msra.mxu2 %v2036_v20  ;;  %2155 = vmatpush.msra.mxu3 %v2037_v24  ;;  %v2026_v19 = vunpack.c.l.bf16 %v4575_v18  ;;  %v2027_v20 = vunpack.c.h.bf16 %v4575_v18  ;;  %v520_v24 = vadd.f32 %v5777_v58, %v5648_v13  ;;  %v2022_v13 = vunpack.c.l.bf16 %v4573_v52  ;;  %v4501_v18 = vld [vmem:[%s7578_s1 + $0xe0] sm:$0xff] }
  0xf6   : > { %2068 = vmatpush.msra.mxu0 %v2034_v59  ;;  %2097 = vmatpush.msra.mxu1 %v2035_v48  ;;  %v2024_v59 = vunpack.c.l.bf16 %v4574_v35  ;;  %v2025_v48 = vunpack.c.h.bf16 %v4574_v35  ;;  %v2023_v58 = vunpack.c.h.bf16 %v4573_v52 }
  0xf7   : > { %4486 = vmatmul.msk.f32.gmra.mxu0 %vm361_vm1, %v4466_v3  ;;  %4490 = vmatmul.msk.f32.gmra.mxu1 %vm361_vm1, %v4466_v3 }
  0xf8   : > { %4494 = vmatmul.msk.f32.gmra.mxu2 %vm361_vm1, %v4466_v3  ;;  %4498 = vmatmul.msk.f32.gmra.mxu3 %vm361_vm1, %v4466_v3  ;;  %v2030_v3 = vunpack.c.l.bf16 %v4577_v21 }
  0xf9   : > { %2127 = vmatpush.msra.mxu2 %v2032_v54  ;;  %2156 = vmatpush.msra.mxu3 %v2033_v60  ;;  %v607_v54 = vadd.f32 %v5793_v12, %v5668_v23  ;;  %v523_v23 = vadd.f32 %v5795_v15, %v5674_v26  ;;  %v552_v12 = vadd.f32 %v5797_v16, %v5676_v30  ;;  %v4569_v26 = vld [vmem:[%s7577_s0 + $0x200] sm:$0xff] }
  0xfa   : > { %2069 = vmatpush.msra.mxu0 %v2030_v3  ;;  %2098 = vmatpush.msra.mxu1 %v2031_v50  ;;  %v800_v3 = vadd.f32 %v5879_v38, %v520_v24  ;;  %v2014_v24 = vunpack.c.l.bf16 %v4569_v26 }
  0xfb   : > { %v5926_v25 = vpop.f32.mrf.mxu2  ;;  %v5928_v36 = vpop.f32.mrf.mxu3  ;;  %2128 = vmatpush.msra.mxu2 %v2028_v4  ;;  %2157 = vmatpush.msra.mxu3 %v2029_v5 }
  0xfc   : > { %v5930_v37 = vpop.f32.mrf.mxu0  ;;  %v5932_v43 = vpop.f32.mrf.mxu1  ;;  %2070 = vmatpush.msra.mxu0 %v2026_v19  ;;  %2099 = vmatpush.msra.mxu1 %v2027_v20  ;;  %v4570_v19 = vld [vmem:[%s7577_s0 + $0x208] sm:$0xff]  ;;  %v6020_v20 = vadd.f32 %v5822_v63, %v5713_v51  ;;  %v6039_v63 = vadd.f32 %v5847_v29, %v5746_v46  ;;  %v6049_v46 = vadd.f32 %v5851_v2, %v5754_v1 }
  0xfd   : > { %2129 = vmatpush.msra.mxu2 %v2024_v59  ;;  %2158 = vmatpush.msra.mxu3 %v2025_v48  ;;  %v2017_v16 = vunpack.c.h.bf16 %v4570_v19  ;;  %v6026_v48 = vadd.f32 %v5824_v27, %v5715_v39  ;;  %v6043_v39 = vadd.f32 %v5849_v53, %v5752_v56  ;;  %v804_v29 = vadd.f32 %v5903_v0, %v523_v23  ;;  %v4502_v0 = vld [vmem:[%s7578_s1 + $0xe8] sm:$0xff] }
  0xfe   : > { %2071 = vmatpush.msra.mxu0 %v2022_v13  ;;  %2100 = vmatpush.msra.mxu1 %v2023_v58  ;;  %v803_v13 = vadd.f32 %v5901_v62, %v607_v54  ;;  %v805_v56 = vadd.f32 %v5905_v28, %v552_v12  ;;  %v4562_v62 = vld [vmem:[%s7577_s0 + $0x1e8] sm:$0xff] }
  0xff   : > { %4487 = vmatmul.msk.f32.gmra.mxu0 %vm361_vm1, %v4467_v57  ;;  %4491 = vmatmul.msk.f32.gmra.mxu1 %vm361_vm1, %v4467_v57 }
 0x100   : > { %4495 = vmatmul.msk.f32.gmra.mxu2 %vm361_vm1, %v4467_v57  ;;  %4499 = vmatmul.msk.f32.gmra.mxu3 %vm361_vm1, %v4467_v57  ;;  %v549_v57 = vadd.f32 %v5779_v7, %v5650_v14  ;;  %v4572_v14 = vld [vmem:[%s7577_s0 + $0x218] sm:$0xff]  ;;  %v578_v7 = vadd.f32 %v5791_v11, %v5666_v22  ;;  %v2018_v22 = vunpack.c.l.bf16 %v4571_v34  ;;  %v2019_v11 = vunpack.c.h.bf16 %v4571_v34 }
 0x101   : > { %v2020_v60 = vunpack.c.l.bf16 %v4572_v14  ;;  %v2021_v21 = vunpack.c.h.bf16 %v4572_v14 }
 0x102   : > { %v801_v50 = vadd.f32 %v5881_v42, %v549_v57  ;;  %2072 = vmatpush.msra.mxu0 %v2018_v22  ;;  %2101 = vmatpush.msra.mxu1 %v2019_v11  ;;  %v2015_v57 = vunpack.c.h.bf16 %v4569_v26 }
 0x103   : > { %v5953_v45 = vpop.f32.mrf.mxu2  ;;  %v5955_v8 = vpop.f32.mrf.mxu3  ;;  %2130 = vmatpush.msra.mxu2 %v2020_v60  ;;  %2159 = vmatpush.msra.mxu3 %v2021_v21 }
 0x104   : > { %v5957_v9 = vpop.f32.mrf.mxu0  ;;  %v5959_v10 = vpop.f32.mrf.mxu1  ;;  %2073 = vmatpush.msra.mxu0 %v2014_v24  ;;  %2102 = vmatpush.msra.mxu1 %v2015_v57 }
 0x105   : > { %2160 = vmatpush.msra.mxu3 %v2017_v16 }
 0x107   : > { %4488 = vmatmul.msk.f32.gmra.mxu0 %vm361_vm1, %v4468_v17  ;;  %4492 = vmatmul.msk.f32.gmra.mxu1 %vm361_vm1, %v4468_v17 }
 0x108   : > { %4496 = vmatmul.msk.f32.gmra.mxu2 %vm361_vm1, %v4468_v17  ;;  %4500 = vmatmul.msk.f32.gmra.mxu3 %vm361_vm1, %v4468_v17  ;;  %v6003_v17 = vadd.f32 %v5818_v44, %v5705_v33  ;;  %v2016_v33 = vunpack.c.l.bf16 %v4570_v19  ;;  %v6016_v44 = vadd.f32 %v5820_v47, %v5707_v41  ;;  %v6030_v41 = vadd.f32 %v5845_v49, %v5744_v40  ;;  %v4564_v47 = vld [vmem:[%s7577_s0 + $0x1f8] sm:$0xff] }
 0x109   : > { %v1991_v40 = vunpack.c.l.bf16 %v4564_v47  ;;  %v1992_v27 = vunpack.c.h.bf16 %v4564_v47  ;;  %v802_v49 = vadd.f32 %v5899_v61, %v578_v7  ;;  %v4563_v61 = vld [vmem:[%s7577_s0 + $0x1f0] sm:$0xff] }
 0x10a   : > { %2131 = vmatpush.msra.mxu2 %v2016_v33  ;;  %v1989_v28 = vunpack.c.l.bf16 %v4563_v61  ;;  %v1990_v60 = vunpack.c.h.bf16 %v4563_v61  ;;  %v4560_v33 = vld [vmem:[%s7577_s0 + $0x1d8] sm:$0xff] }
 0x10b   : > { %v5993_v4 = vpop.f32.mrf.mxu2  ;;  %v5995_v5 = vpop.f32.mrf.mxu3  ;;  %v1984_v47 = vunpack.c.h.bf16 %v4560_v33 }
 0x10c   : > { %v899_v38 = vpop.f32.mrf.mxu0  ;;  %v928_v42 = vpop.f32.mrf.mxu1 }
 0x10d   : > { %v998_v30 = vadd.f32 %v899_v38, %v800_v3  ;;  %v999_v15 = vadd.f32 %v928_v42, %v801_v50  ;;  %v1987_v3 = vunpack.c.l.bf16 %v4562_v62  ;;  %v1988_v50 = vunpack.c.h.bf16 %v4562_v62 }
 0x10f   : > { %v1078_v35 = vpack.c.bf16 %v999_v15, %v998_v30  ;;  %4521 = vmatmul.msk.f32.vlgmr.msrb.gmra.mxu0 %vm361_vm1, %v4501_v18  ;;  %4525 = vmatmul.msk.f32.vlgmr.msrb.gmra.mxu1 %vm361_vm1, %v4501_v18  ;;  %v1014_v52 = vadd.f32 %v999_v15, %v998_v30  ;;  %v1038_v59 = vmul.f32 %v998_v30, %v998_v30 }
 0x110   : > { %4529 = vmatmul.msk.f32.vlgmr.msrb.gmra.mxu2 %vm361_vm1, %v4501_v18  ;;  %4533 = vmatmul.msk.f32.vlgmr.msrb.gmra.mxu3 %vm361_vm1, %v4501_v18  ;;  %v1039_v51 = vmul.f32 %v999_v15, %v999_v15  ;;  %v4561_v15 = vld [vmem:[%s7577_s0 + $0x1e0] sm:$0xff] }
 0x111   : > { %1090 = vst [vmem:[#allocation2 + $0xb0] sm:$0xff] %v1078_v35  ;;  %2252 = vmatpush.msrb.mxu2 %v1991_v40  ;;  %2281 = vmatpush.msrb.mxu3 %v1992_v27  ;;  %v1985_v24 = vunpack.c.l.bf16 %v4561_v15  ;;  %v1986_v57 = vunpack.c.h.bf16 %v4561_v15  ;;  %v1983_v35 = vunpack.c.l.bf16 %v4560_v33  ;;  %v6078_v40 = vadd.f32 %v5875_v31, %v5773_v55 }
 0x112   : > { %v1054_v58 = vadd.f32 %v1039_v51, %v1038_v59  ;;  %2194 = vmatpush.msrb.mxu0 %v1989_v28  ;;  %2223 = vmatpush.msrb.mxu1 %v1990_v60  ;;  %v807_v59 = vadd.f32 %v5928_v36, %v6016_v44  ;;  %v808_v27 = vadd.f32 %v5930_v37, %v6020_v20  ;;  %v4558_v36 = vld [vmem:[%s7577_s0 + $0x1c8] sm:$0xff] }
 0x113   : > { %v957_v53 = vpop.f32.mrf.mxu2  ;;  %v986_v14 = vpop.f32.mrf.mxu3  ;;  %2253 = vmatpush.msrb.mxu2 %v1987_v3  ;;  %2282 = vmatpush.msrb.mxu3 %v1988_v50 }
 0x114   : > { %v1000_v7 = vadd.f32 %v957_v53, %v802_v49  ;;  %v1001_v54 = vadd.f32 %v986_v14, %v803_v13  ;;  %v902_v1 = vpop.f32.mrf.mxu0  ;;  %v931_v2 = vpop.f32.mrf.mxu1  ;;  %v809_v49 = vadd.f32 %v5932_v43, %v6026_v48  ;;  %2195 = vmatpush.msrb.mxu0 %v1985_v24  ;;  %2224 = vmatpush.msrb.mxu1 %v1986_v57  ;;  %v4503_v43 = vld [vmem:[%s7578_s1 + $0xf0] sm:$0xff]  ;;  %v1980_v53 = vunpack.c.h.bf16 %v4558_v36 }
 0x115   : > { %v1002_v21 = vadd.f32 %v902_v1, %v804_v29  ;;  %v1003_v34 = vadd.f32 %v931_v2, %v805_v56  ;;  %2254 = vmatpush.msrb.mxu2 %v1983_v35  ;;  %2283 = vmatpush.msrb.mxu3 %v1984_v47  ;;  %v1979_v56 = vunpack.c.l.bf16 %v4558_v36  ;;  %v4552_v36 = vld [vmem:[%s7577_s0 + $0x198] sm:$0xff] }
 0x116   : > { %v1079_v22 = vpack.c.bf16 %v1001_v54, %v1000_v7  ;;  %v1015_v11 = vadd.f32 %v1014_v52, %v1000_v7  ;;  %v1040_v23 = vmul.f32 %v1000_v7, %v1000_v7  ;;  %v1041_v12 = vmul.f32 %v1001_v54, %v1001_v54 }
 0x117   : > { %v1042_v38 = vmul.f32 %v1002_v21, %v1002_v21  ;;  %v1043_v42 = vmul.f32 %v1003_v34, %v1003_v34  ;;  %v1080_v18 = vpack.c.bf16 %v1003_v34, %v1002_v21  ;;  %4522 = vmatmul.msk.f32.gmra.mxu0 %vm361_vm1, %v4502_v0  ;;  %4526 = vmatmul.msk.f32.gmra.mxu1 %vm361_vm1, %v4502_v0 }
 0x118   : > { %1091 = vst [vmem:[#allocation2] sm:$0xff] %v1079_v22  ;;  %4530 = vmatmul.msk.f32.gmra.mxu2 %vm361_vm1, %v4502_v0  ;;  %4534 = vmatmul.msk.f32.gmra.mxu3 %vm361_vm1, %v4502_v0  ;;  %v1016_v19 = vadd.f32 %v1015_v11, %v1001_v54  ;;  %v1055_v26 = vadd.f32 %v1054_v58, %v1040_v23 }
 0x119   : > { %v1019_v30 = vadd.f32 %v1003_v34, %v1002_v21  ;;  %1092 = vst [vmem:[#allocation2 + $0xd8] sm:$0xff] %v1080_v18  ;;  %v1059_v16 = vadd.f32 %v1043_v42, %v1042_v38  ;;  %v806_v52 = vadd.f32 %v5926_v25, %v6003_v17  ;;  %v4559_v25 = vld [vmem:[%s7577_s0 + $0x1d0] sm:$0xff]  ;;  %v4557_v21 = vld [vmem:[%s7577_s0 + $0x1c0] sm:$0xff]  ;;  %v4556_v34 = vld [vmem:[%s7577_s0 + $0x1b8] sm:$0xff]  ;;  %2255 = vmatpush.msrb.mxu2 %v1979_v56 }
 0x11a   : > { %1017 = vadd.xlane.f32.xlu0 %v1016_v19  ;;  %v1056_v51 = vadd.f32 %v1055_v26, %v1041_v12  ;;  %v1981_v44 = vunpack.c.l.bf16 %v4559_v25  ;;  %v1982_v20 = vunpack.c.h.bf16 %v4559_v25  ;;  %v1977_v50 = vunpack.c.l.bf16 %v4557_v21  ;;  %2284 = vmatpush.msrb.mxu3 %v1980_v53  ;;  %v4553_v25 = vld [vmem:[%s7577_s0 + $0x1a0] sm:$0xff] }
 0x11b   : > { %v960_v13 = vpop.f32.mrf.mxu2  ;;  %v989_v58 = vpop.f32.mrf.mxu3  ;;  %v1978_v22 = vunpack.c.h.bf16 %v4557_v21  ;;  %v1975_v11 = vunpack.c.l.bf16 %v4556_v34  ;;  %v810_v23 = vadd.f32 %v5953_v45, %v6030_v41  ;;  %v811_v12 = vadd.f32 %v5955_v8, %v6039_v63  ;;  %v4555_v45 = vld [vmem:[%s7577_s0 + $0x1b0] sm:$0xff]  ;;  %v4554_v8 = vld [vmem:[%s7577_s0 + $0x1a8] sm:$0xff] }
 0x11c   : > { %v1004_v55 = vadd.f32 %v960_v13, %v806_v52  ;;  %v1005_v31 = vadd.f32 %v989_v58, %v807_v59  ;;  %1057 = vadd.xlane.f32.xlu2 %v1056_v51  ;;  %v905_v17 = vpop.f32.mrf.mxu0  ;;  %v934_v37 = vpop.f32.mrf.mxu1  ;;  %2196 = vmatpush.msrb.mxu0 %v1981_v44  ;;  %v1976_v42 = vunpack.c.h.bf16 %v4556_v34  ;;  %v616_v18 = vadd.f32 %v5877_v32, %v5775_v6 }
 0x11d   : > { %v1006_v48 = vadd.f32 %v905_v17, %v808_v27  ;;  %v1007_v29 = vadd.f32 %v934_v37, %v809_v49  ;;  %2225 = vmatpush.msrb.mxu1 %v1982_v20  ;;  %v812_v19 = vadd.f32 %v5957_v9, %v6043_v39  ;;  %v813_v26 = vadd.f32 %v5959_v10, %v6049_v46  ;;  %v4504_v10 = vld [vmem:[%s7578_s1 + $0xf8] sm:$0xff] }
 0x11e   : > { %v1081_v14 = vpack.c.bf16 %v1005_v31, %v1004_v55  ;;  %v1020_v61 = vadd.f32 %v1019_v30, %v1004_v55  ;;  %v1044_v62 = vmul.f32 %v1004_v55, %v1004_v55  ;;  %v1045_v7 = vmul.f32 %v1005_v31, %v1005_v31  ;;  %2197 = vmatpush.msrb.mxu0 %v1977_v50 }
 0x11f   : > { %v1046_v54 = vmul.f32 %v1006_v48, %v1006_v48  ;;  %v1047_v1 = vmul.f32 %v1007_v29, %v1007_v29  ;;  %v1082_v2 = vpack.c.bf16 %v1007_v29, %v1006_v48  ;;  %4523 = vmatmul.msk.f32.gmra.mxu0 %vm361_vm1, %v4503_v43  ;;  %4527 = vmatmul.msk.f32.gmra.mxu1 %vm361_vm1, %v4503_v43  ;;  %v1973_v63 = vunpack.c.l.bf16 %v4555_v45 }
 0x120   : > { %1093 = vst [vmem:[#allocation2 + $0x18] sm:$0xff] %v1081_v14  ;;  %4531 = vmatmul.msk.f32.gmra.mxu2 %vm361_vm1, %v4503_v43  ;;  %4535 = vmatmul.msk.f32.gmra.mxu3 %vm361_vm1, %v4503_v43  ;;  %v1021_v0 = vadd.f32 %v1020_v61, %v1005_v31  ;;  %v1060_v28 = vadd.f32 %v1059_v16, %v1044_v62  ;;  %v1974_v39 = vunpack.c.h.bf16 %v4555_v45  ;;  %v1971_v16 = vunpack.c.l.bf16 %v4554_v8  ;;  %v4635_v45 = vld [vmem:[%s7577_s0 + $0x370] sm:$0xff] }
 0x121   : > { %v1024_v60 = vadd.f32 %v1007_v29, %v1006_v48  ;;  %1094 = vst [vmem:[#allocation2 + $0x50] sm:$0xff] %v1082_v2  ;;  %v1064_v3 = vadd.f32 %v1047_v1, %v1046_v54  ;;  %2226 = vmatpush.msrb.mxu1 %v1978_v22  ;;  %2256 = vmatpush.msrb.mxu2 %v1975_v11  ;;  %v1972_v24 = vunpack.c.h.bf16 %v4554_v8  ;;  %v1969_v31 = vunpack.c.l.bf16 %v4553_v25  ;;  %v4551_v29 = vld [vmem:[%s7577_s0 + $0x190] sm:$0xff]  ;;  %v4565_v54 = vld [vmem:[%s7578_s1 + $0x120] sm:$0xff]  ;;  %v4634_v8 = vld [vmem:[%s7577_s0 + $0x368] sm:$0xff] }
 0x122   : > { %1022 = vadd.xlane.f32.xlu0 %v1021_v0  ;;  %v1061_v38 = vadd.f32 %v1060_v28, %v1045_v7  ;;  %2285 = vmatpush.msrb.mxu3 %v1976_v42  ;;  %v1970_v17 = vunpack.c.h.bf16 %v4553_v25  ;;  %v1967_v37 = vunpack.c.l.bf16 %v4552_v36  ;;  %v814_v43 = vadd.f32 %v5993_v4, %v6078_v40  ;;  %v4550_v4 = vld [vmem:[%s7577_s0 + $0x188] sm:$0xff]  ;;  %v4549_v1 = vld [vmem:[%s7577_s0 + $0x180] sm:$0xff] }
 0x123   : > { %v963_v30 = vpop.f32.mrf.mxu2  ;;  %v992_v15 = vpop.f32.mrf.mxu3  ;;  %2198 = vmatpush.msrb.mxu0 %v1973_v63  ;;  %2227 = vmatpush.msrb.mxu1 %v1974_v39  ;;  %v815_v44 = vadd.f32 %v5995_v5, %v616_v18  ;;  %v1968_v48 = vunpack.c.h.bf16 %v4552_v36  ;;  %v1965_v14 = vunpack.c.l.bf16 %v4551_v29  ;;  %v1966_v61 = vunpack.c.h.bf16 %v4551_v29  ;;  %v4632_v63 = vld [vmem:[%s7577_s0 + $0x358] sm:$0xff]  ;;  %v4629_v25 = vld [vmem:[%s7577_s0 + $0x340] sm:$0xff] }
 0x124   : > { %v1008_v41 = vadd.f32 %v963_v30, %v810_v23  ;;  %v1009_v6 = vadd.f32 %v992_v15, %v811_v12  ;;  %1062 = vadd.xlane.f32.xlu2 %v1061_v38  ;;  %v908_v32 = vpop.f32.mrf.mxu0  ;;  %v937_v9 = vpop.f32.mrf.mxu1  ;;  %2257 = vmatpush.msrb.mxu2 %v1971_v16  ;;  %v1963_v2 = vunpack.c.l.bf16 %v4550_v4  ;;  %v1964_v0 = vunpack.c.h.bf16 %v4550_v4  ;;  %v4636_v23 = vld [vmem:[%s7577_s0 + $0x378] sm:$0xff]  ;;  %v4566_v15 = vld [vmem:[%s7578_s1 + $0x128] sm:$0xff] }
 0x125   : > { %v1010_v46 = vadd.f32 %v908_v32, %v812_v19  ;;  %v1011_v33 = vadd.f32 %v937_v9, %v813_v26  ;;  %2286 = vmatpush.msrb.mxu3 %v1972_v24  ;;  %2199 = vmatpush.msrb.mxu0 %v1969_v31  ;;  %v1961_v34 = vunpack.c.l.bf16 %v4549_v1  ;;  %v2354_v12 = vunpack.c.l.bf16 %v4636_v23  ;;  %v4628_v36 = vld [vmem:[%s7577_s0 + $0x338] sm:$0xff] }
 0x126   : > { %v1083_v57 = vpack.c.bf16 %v1009_v6, %v1008_v41  ;;  %v1025_v35 = vadd.f32 %v1024_v60, %v1008_v41  ;;  %v1048_v52 = vmul.f32 %v1008_v41, %v1008_v41  ;;  %v1049_v59 = vmul.f32 %v1009_v6, %v1009_v6  ;;  %2228 = vmatpush.msrb.mxu1 %v1970_v17  ;;  %v4568_v29 = vld [vmem:[%s7578_s1 + $0x138] sm:$0xff] }
 0x127   : > { %v1050_v51 = vmul.f32 %v1010_v46, %v1010_v46  ;;  %v1051_v47 = vmul.f32 %v1011_v33, %v1011_v33  ;;  %v1084_v27 = vpack.c.bf16 %v1011_v33, %v1010_v46  ;;  %4524 = vmatmul.msk.f32.gmra.mxu0 %vm361_vm1, %v4504_v10  ;;  %4528 = vmatmul.msk.f32.gmra.mxu1 %vm361_vm1, %v4504_v10  ;;  %v2355_v38 = vunpack.c.h.bf16 %v4636_v23  ;;  %v4545_v23 = vld [vmem:[%s7578_s1 + $0x100] sm:$0xff] }
 0x128   : > { %1095 = vst [vmem:[#allocation2 + $0x68] sm:$0xff] %v1083_v57  ;;  %4532 = vmatmul.msk.f32.gmra.mxu2 %vm361_vm1, %v4504_v10  ;;  %4536 = vmatmul.msk.f32.gmra.mxu3 %vm361_vm1, %v4504_v10  ;;  %v1026_v49 = vadd.f32 %v1025_v35, %v1009_v6  ;;  %v1065_v13 = vadd.f32 %v1064_v3, %v1048_v52  ;;  %v1962_v3 = vunpack.c.h.bf16 %v4549_v1  ;;  %v2352_v41 = vunpack.c.l.bf16 %v4635_v45  ;;  %v4633_v10 = vld [vmem:[%s7577_s0 + $0x360] sm:$0xff] }
 0x129   : > { %v1029_v58 = vadd.f32 %v1011_v33, %v1010_v46  ;;  %1096 = vst [vmem:[#allocation2 + $0x30] sm:$0xff] %v1084_v27  ;;  %v1069_v55 = vadd.f32 %v1051_v47, %v1050_v51  ;;  %2258 = vmatpush.msrb.mxu2 %v1967_v37  ;;  %2287 = vmatpush.msrb.mxu3 %v1968_v48  ;;  %v2353_v6 = vunpack.c.h.bf16 %v4635_v45  ;;  %v2350_v32 = vunpack.c.l.bf16 %v4634_v8  ;;  %v4631_v51 = vld [vmem:[%s7577_s0 + $0x350] sm:$0xff]  ;;  %v4630_v47 = vld [vmem:[%s7577_s0 + $0x348] sm:$0xff] }
 0x12a   : > { %1027 = vadd.xlane.f32.xlu1 %v1026_v49  ;;  %v1066_v20 = vadd.f32 %v1065_v13, %v1049_v59  ;;  %2200 = vmatpush.msrb.mxu0 %v1965_v14  ;;  %v2351_v9 = vunpack.c.h.bf16 %v4634_v8  ;;  %v2348_v39 = vunpack.c.l.bf16 %v4633_v10  ;;  %v2349_v46 = vunpack.c.h.bf16 %v4633_v10  ;;  %v4567_v59 = vld [vmem:[%s7578_s1 + $0x130] sm:$0xff] }
 0x12b   : > { %v966_v56 = vpop.f32.mrf.mxu2  ;;  %v995_v53 = vpop.f32.mrf.mxu3  ;;  %2229 = vmatpush.msrb.mxu1 %v1966_v61  ;;  %2259 = vmatpush.msrb.mxu2 %v1963_v2  ;;  %v2346_v33 = vunpack.c.l.bf16 %v4632_v63  ;;  %v2347_v16 = vunpack.c.h.bf16 %v4632_v63  ;;  %v2344_v27 = vunpack.c.l.bf16 %v4631_v51  ;;  %v2345_v49 = vunpack.c.h.bf16 %v4631_v51 }
 0x12c   : > { %v1012_v40 = vadd.f32 %v966_v56, %v814_v43  ;;  %v1013_v5 = vadd.f32 %v995_v53, %v815_v44  ;;  %1067 = vadd.xlane.f32.xlu0 %v1066_v20  ;;  %v6141_v62 = vpop.f32.mrf.mxu0  ;;  %v6143_v7 = vpop.f32.mrf.mxu1  ;;  %2288 = vmatpush.msrb.mxu3 %v1964_v0  ;;  %v2342_v13 = vunpack.c.l.bf16 %v4630_v47  ;;  %v2341_v31 = vunpack.c.h.bf16 %v4629_v25  ;;  %v4627_v56 = vld [vmem:[%s7577_s0 + $0x330] sm:$0xff]  ;;  %v4626_v53 = vld [vmem:[%s7577_s0 + $0x328] sm:$0xff] }
 0x12d   : > { %2201 = vmatpush.msrb.mxu0 %v1961_v34  ;;  %2230 = vmatpush.msrb.mxu1 %v1962_v3  ;;  %v2338_v17 = vunpack.c.l.bf16 %v4628_v36  ;;  %v2339_v37 = vunpack.c.h.bf16 %v4628_v36  ;;  %v2336_v14 = vunpack.c.l.bf16 %v4627_v56  ;;  %v2337_v61 = vunpack.c.h.bf16 %v4627_v56  ;;  %v4547_v56 = vld [vmem:[%s7578_s1 + $0x110] sm:$0xff] }
 0x12e   : > { %v1085_v28 = vpack.c.bf16 %v1013_v5, %v1012_v40  ;;  %v1030_v60 = vadd.f32 %v1029_v58, %v1012_v40  ;;  %v1052_v21 = vmul.f32 %v1012_v40, %v1012_v40  ;;  %v1053_v22 = vmul.f32 %v1013_v5, %v1013_v5 }
 0x12f   : > { %4585 = vmatmul.msk.f32.vlgmr.msra.gmra.mxu0 %vm361_vm1, %v4565_v54  ;;  %4589 = vmatmul.msk.f32.vlgmr.msra.gmra.mxu1 %vm361_vm1, %v4565_v54  ;;  %v2343_v58 = vunpack.c.h.bf16 %v4630_v47  ;;  %v2334_v4 = vunpack.c.l.bf16 %v4626_v53  ;;  %v2335_v40 = vunpack.c.h.bf16 %v4626_v53  ;;  %v6347_v53 = vld [vmem:[%s7577_s0 + $0x3d0] sm:$0xff] }
 0x130   : > { %1097 = vst [vmem:[#allocation2 + $0x48] sm:$0xff] %v1085_v28  ;;  %4593 = vmatmul.msk.f32.vlgmr.msra.gmra.mxu2 %vm361_vm1, %v4565_v54  ;;  %4597 = vmatmul.msk.f32.vlgmr.msra.gmra.mxu3 %vm361_vm1, %v4565_v54  ;;  %v1031_v50 = vadd.f32 %v1030_v60, %v1013_v5  ;;  %v1070_v11 = vadd.f32 %v1069_v55, %v1052_v21  ;;  %v2340_v55 = vunpack.c.l.bf16 %v4629_v25  ;;  %v4625_v5 = vld [vmem:[%s7577_s0 + $0x320] sm:$0xff]  ;;  %v4624_v54 = vld [vmem:[%s7577_s0 + $0x318] sm:$0xff]  ;;  %v4623_v60 = vld [vmem:[%s7577_s0 + $0x310] sm:$0xff] }
 0x131   : > { %2434 = vmatpush.msra.mxu2 %v2354_v12  ;;  %2463 = vmatpush.msra.mxu3 %v2355_v38  ;;  %v2332_v1 = vunpack.c.l.bf16 %v4625_v5  ;;  %v2333_v2 = vunpack.c.h.bf16 %v4625_v5  ;;  %v2330_v0 = vunpack.c.l.bf16 %v4624_v54  ;;  %v2331_v28 = vunpack.c.h.bf16 %v4624_v54  ;;  %v4622_v12 = vld [vmem:[%s7577_s0 + $0x308] sm:$0xff]  ;;  %v4621_v38 = vld [vmem:[%s7577_s0 + $0x300] sm:$0xff] }
 0x132   : > { %1032 = vadd.xlane.f32.xlu1 %v1031_v50  ;;  %v1071_v42 = vadd.f32 %v1070_v11, %v1053_v22  ;;  %2376 = vmatpush.msra.mxu0 %v2352_v41  ;;  %v2328_v3 = vunpack.c.l.bf16 %v4623_v60  ;;  %v2329_v50 = vunpack.c.h.bf16 %v4623_v60  ;;  %v2324_v45 = vunpack.c.l.bf16 %v4621_v38  ;;  %v6266_v41 = vld [vmem:[%s7577_s0 + $0x3f8] sm:$0xff]  ;;  %v6365_v54 = vld [vmem:[%s7577_s0 + $0x3c0] sm:$0xff] }
 0x133   : > { %v6158_v18 = vpop.f32.mrf.mxu2  ;;  %v6160_v19 = vpop.f32.mrf.mxu3  ;;  %2405 = vmatpush.msra.mxu1 %v2353_v6  ;;  %2435 = vmatpush.msra.mxu2 %v2350_v32  ;;  %v2325_v8 = vunpack.c.h.bf16 %v4621_v38  ;;  %v7647_v6 = vunpack.c.l.bf16 %v6266_v41  ;;  %v7646_v32 = vunpack.c.h.bf16 %v6266_v41  ;;  %7703 = vst [vmem:[#allocation6_spill] sm:$0xff] %v6365_v54  ;;  %v4548_v38 = vld [vmem:[%s7578_s1 + $0x118] sm:$0xff] }
 0x134   : > { %v6162_v26 = vpop.f32.mrf.mxu0  ;;  %v6164_v30 = vpop.f32.mrf.mxu1  ;;  %2464 = vmatpush.msra.mxu3 %v2351_v9  ;;  %2377 = vmatpush.msra.mxu0 %v2348_v39 }
 0x135   : > { %2406 = vmatpush.msra.mxu1 %v2349_v46  ;;  %2436 = vmatpush.msra.mxu2 %v2346_v33  ;;  %v4546_v46 = vld [vmem:[%s7578_s1 + $0x108] sm:$0xff]  ;;  %v6288_v33 = vld [vmem:[%s7577_s0 + $0x3f0] sm:$0xff] }
 0x136   : > { %2465 = vmatpush.msra.mxu3 %v2347_v16  ;;  %2378 = vmatpush.msra.mxu0 %v2344_v27  ;;  %v6293_v16 = vld [vmem:[%s7577_s0 + $0x3e8] sm:$0xff]  ;;  %v7644_v51 = vunpack.c.h.bf16 %v6288_v33 }
 0x137   : > { %4586 = vmatmul.msk.f32.gmra.mxu0 %vm361_vm1, %v4566_v15  ;;  %4590 = vmatmul.msk.f32.gmra.mxu1 %vm361_vm1, %v4566_v15  ;;  %v7640_v47 = vunpack.c.l.bf16 %v6293_v16  ;;  %v7638_v27 = vunpack.c.h.bf16 %v6293_v16 }
 0x138   : > { %4594 = vmatmul.msk.f32.gmra.mxu2 %vm361_vm1, %v4566_v15  ;;  %4598 = vmatmul.msk.f32.gmra.mxu3 %vm361_vm1, %v4566_v15  ;;  %v2327_v15 = vunpack.c.h.bf16 %v4622_v12 }
 0x139   : > { %2407 = vmatpush.msra.mxu1 %v2345_v49  ;;  %2437 = vmatpush.msra.mxu2 %v2342_v13  ;;  %v6306_v49 = vld [vmem:[%s7577_s0 + $0x3e0] sm:$0xff]  ;;  %v6311_v13 = vld [vmem:[%s7577_s0 + $0x3d8] sm:$0xff] }
 0x13a   : > { %1072 = vadd.xlane.f32.xlu1 %v1071_v42  ;;  %2466 = vmatpush.msra.mxu3 %v2343_v58  ;;  %v2326_v42 = vunpack.c.l.bf16 %v4622_v12  ;;  %v7637_v58 = vunpack.c.l.bf16 %v6306_v49  ;;  %v7634_v25 = vunpack.c.h.bf16 %v6306_v49  ;;  %v7633_v36 = vunpack.c.l.bf16 %v6311_v13 }
 0x13b   : > { %v6185_v24 = vpop.f32.mrf.mxu2  ;;  %v6187_v57 = vpop.f32.mrf.mxu3  ;;  %2379 = vmatpush.msra.mxu0 %v2340_v55  ;;  %2408 = vmatpush.msra.mxu1 %v2341_v31  ;;  %v7628_v55 = vunpack.c.h.bf16 %v6311_v13 }
 0x13c   : > { %v6189_v35 = vpop.f32.mrf.mxu0  ;;  %v6191_v52 = vpop.f32.mrf.mxu1  ;;  %2438 = vmatpush.msra.mxu2 %v2338_v17  ;;  %2467 = vmatpush.msra.mxu3 %v2339_v37 }
 0x13d   : > { %2380 = vmatpush.msra.mxu0 %v2336_v14  ;;  %2409 = vmatpush.msra.mxu1 %v2337_v61  ;;  %v6352_v14 = vld [vmem:[%s7577_s0 + $0x3c8] sm:$0xff]  ;;  %v7627_v61 = vunpack.c.l.bf16 %v6347_v53 }
 0x13e   : > { %2439 = vmatpush.msra.mxu2 %v2334_v4  ;;  %2468 = vmatpush.msra.mxu3 %v2335_v40  ;;  %7702 = vst [vmem:[#allocation5_spill] sm:$0xff] %v6352_v14  ;;  %v7625_v4 = vunpack.c.h.bf16 %v6347_v53  ;;  %v7623_v40 = vunpack.c.l.bf16 %v6352_v14  ;;  %v7620_v5 = vunpack.c.h.bf16 %v6352_v14 }
 0x13f   : > { %4587 = vmatmul.msk.f32.gmra.mxu0 %vm361_vm1, %v4567_v59  ;;  %4591 = vmatmul.msk.f32.gmra.mxu1 %vm361_vm1, %v4567_v59 }
 0x140   : > { %4595 = vmatmul.msk.f32.gmra.mxu2 %vm361_vm1, %v4567_v59  ;;  %4599 = vmatmul.msk.f32.gmra.mxu3 %vm361_vm1, %v4567_v59  ;;  %v7645_v59 = vunpack.c.l.bf16 %v6288_v33 }
 0x141   : > { %2381 = vmatpush.msra.mxu0 %v2332_v1  ;;  %2410 = vmatpush.msra.mxu1 %v2333_v2  ;;  %v6370_v1 = vld [vmem:[%s7577_s0 + $0x3b8] sm:$0xff]  ;;  %v7619_v2 = vunpack.c.l.bf16 %v6365_v54 }
 0x142   : > { %2440 = vmatpush.msra.mxu2 %v2330_v0  ;;  %2469 = vmatpush.msra.mxu3 %v2331_v28  ;;  %7704 = vst [vmem:[#allocation7_spill] sm:$0xff] %v6370_v1  ;;  %v7618_v0 = vunpack.c.h.bf16 %v6365_v54  ;;  %v7617_v28 = vunpack.c.l.bf16 %v6370_v1  ;;  %v7616_v60 = vunpack.c.h.bf16 %v6370_v1  ;;  %v4620_v54 = vld [vmem:[%s7578_s1 + $0x158] sm:$0xff] }
 0x143   : > { %v6212_v43 = vpop.f32.mrf.mxu2  ;;  %v6214_v44 = vpop.f32.mrf.mxu3  ;;  %2382 = vmatpush.msra.mxu0 %v2328_v3  ;;  %2411 = vmatpush.msra.mxu1 %v2329_v50 }
 0x144   : > { %v6216_v20 = vpop.f32.mrf.mxu0  ;;  %v6218_v48 = vpop.f32.mrf.mxu1  ;;  %2441 = vmatpush.msra.mxu2 %v2326_v42  ;;  %2470 = vmatpush.msra.mxu3 %v2327_v15  ;;  %v6406_v42 = vld [vmem:[%s7577_s0 + $0x3b0] sm:$0xff]  ;;  %v6411_v15 = vld [vmem:[%s7577_s0 + $0x3a8] sm:$0xff] }
 0x145   : > { %2383 = vmatpush.msra.mxu0 %v2324_v45  ;;  %2412 = vmatpush.msra.mxu1 %v2325_v8  ;;  %7705 = vst [vmem:[#allocation8_spill] sm:$0xff] %v6406_v42  ;;  %v7621_v45 = vunpack.c.l.bf16 %v6406_v42  ;;  %v7622_v8 = vunpack.c.h.bf16 %v6406_v42 }
 0x146   : > { %7706 = vst [vmem:[#allocation9_spill] sm:$0xff] %v6411_v15 }
 0x147   : > { %4588 = vmatmul.msk.f32.gmra.mxu0 %vm361_vm1, %v4568_v29  ;;  %4592 = vmatmul.msk.f32.gmra.mxu1 %vm361_vm1, %v4568_v29 }
 0x148   : > { %4596 = vmatmul.msk.f32.gmra.mxu2 %vm361_vm1, %v4568_v29  ;;  %4600 = vmatmul.msk.f32.gmra.mxu3 %vm361_vm1, %v4568_v29 }
 0x14b   : > { %v6242_v21 = vpop.f32.mrf.mxu2  ;;  %v6244_v34 = vpop.f32.mrf.mxu3 }
 0x14c   : > { %v6246_v22 = vpop.f32.mrf.mxu0  ;;  %v6248_v11 = vpop.f32.mrf.mxu1 }
 0x14f   : > { %4601 = vmatmul.msk.f32.vlgmr.msrb.gmra.mxu0 %vm361_vm1, %v4545_v23  ;;  %4605 = vmatmul.msk.f32.vlgmr.msrb.gmra.mxu1 %vm361_vm1, %v4545_v23 }
 0x150   : > { %4609 = vmatmul.msk.f32.vlgmr.msrb.gmra.mxu2 %vm361_vm1, %v4545_v23  ;;  %4613 = vmatmul.msk.f32.vlgmr.msrb.gmra.mxu3 %vm361_vm1, %v4545_v23 }
 0x151   : > { %2632 = vmatpush.msrb.mxu2 %v7647_v6  ;;  %2661 = vmatpush.msrb.mxu3 %v7646_v32 }
 0x152   : > { %2574 = vmatpush.msrb.mxu0 %v7645_v59  ;;  %2603 = vmatpush.msrb.mxu1 %v7644_v51  ;;  %v4733_v59 = vld [vmem:[%s7577_s0 + $0x2e0] sm:$0xff] }
 0x153   : > { %v6270_v9 = vpop.f32.mrf.mxu2  ;;  %v6272_v10 = vpop.f32.mrf.mxu3  ;;  %2633 = vmatpush.msrb.mxu2 %v7640_v47  ;;  %2662 = vmatpush.msrb.mxu3 %v7638_v27  ;;  %v2880_v32 = vunpack.c.l.bf16 %v4733_v59  ;;  %v2881_v6 = vunpack.c.h.bf16 %v4733_v59  ;;  %v4731_v59 = vld [vmem:[%s7577_s0 + $0x2d0] sm:$0xff] }
 0x154   : > { %v6278_v63 = vpop.f32.mrf.mxu0  ;;  %v6280_v39 = vpop.f32.mrf.mxu1  ;;  %2575 = vmatpush.msrb.mxu0 %v7637_v58  ;;  %2604 = vmatpush.msrb.mxu1 %v7634_v25 }
 0x155   : > { %2634 = vmatpush.msrb.mxu2 %v7633_v36  ;;  %2663 = vmatpush.msrb.mxu3 %v7628_v55  ;;  %v4617_v55 = vld [vmem:[%s7578_s1 + $0x140] sm:$0xff] }
 0x156   : > { %2576 = vmatpush.msrb.mxu0 %v7627_v61  ;;  %2605 = vmatpush.msrb.mxu1 %v7625_v4 }
 0x157   : > { %4602 = vmatmul.msk.f32.gmra.mxu0 %vm361_vm1, %v4546_v46  ;;  %4606 = vmatmul.msk.f32.gmra.mxu1 %vm361_vm1, %v4546_v46 }
 0x158   : > { %4610 = vmatmul.msk.f32.gmra.mxu2 %vm361_vm1, %v4546_v46  ;;  %4614 = vmatmul.msk.f32.gmra.mxu3 %vm361_vm1, %v4546_v46  ;;  %v7624_v46 = vunpack.c.l.bf16 %v6411_v15 }
 0x159   : > { %2635 = vmatpush.msrb.mxu2 %v7623_v40  ;;  %2664 = vmatpush.msrb.mxu3 %v7620_v5 }
 0x15a   : > { %2577 = vmatpush.msrb.mxu0 %v7619_v2  ;;  %2606 = vmatpush.msrb.mxu1 %v7618_v0 }
 0x15b   : > { %v6325_v31 = vpop.f32.mrf.mxu2  ;;  %v6327_v17 = vpop.f32.mrf.mxu3  ;;  %2636 = vmatpush.msrb.mxu2 %v7617_v28  ;;  %2665 = vmatpush.msrb.mxu3 %v7616_v60  ;;  %v6424_v60 = vld [vmem:[%s7577_s0 + $0x3a0] sm:$0xff]  ;;  %v6429_v28 = vld [vmem:[%s7577_s0 + $0x398] sm:$0xff] }
 0x15c   : > { %v6333_v37 = vpop.f32.mrf.mxu0  ;;  %v6335_v29 = vpop.f32.mrf.mxu1  ;;  %7707 = vst [vmem:[#allocation10_spill] sm:$0xff] %v6424_v60  ;;  %2578 = vmatpush.msrb.mxu0 %v7621_v45  ;;  %2607 = vmatpush.msrb.mxu1 %v7622_v8  ;;  %v7630_v0 = vunpack.c.l.bf16 %v6424_v60  ;;  %v7631_v2 = vunpack.c.l.bf16 %v6429_v28  ;;  %v7632_v5 = vunpack.c.h.bf16 %v6429_v28  ;;  %v6446_v45 = vld [vmem:[%s7577_s0 + $0x390] sm:$0xff] }
 0x15d   : > { %7708 = vst [vmem:[#allocation11_spill] sm:$0xff] %v6429_v28  ;;  %2637 = vmatpush.msrb.mxu2 %v7624_v46  ;;  %v7636_v46 = vunpack.c.l.bf16 %v6446_v45  ;;  %v7635_v4 = vunpack.c.h.bf16 %v6446_v45 }
 0x15e   : > { %7709 = vst [vmem:[#allocation12_spill] sm:$0xff] %v6446_v45  ;;  %2579 = vmatpush.msrb.mxu0 %v7630_v0  ;;  %v6477_v0 = vld [vmem:[%s7577_s0 + $0x380] sm:$0xff] }
 0x15f   : > { %4603 = vmatmul.msk.f32.gmra.mxu0 %vm361_vm1, %v4547_v56  ;;  %4607 = vmatmul.msk.f32.gmra.mxu1 %vm361_vm1, %v4547_v56  ;;  %7711 = vst [vmem:[#allocation14_spill] sm:$0xff] %v6477_v0  ;;  %v7643_v36 = vunpack.c.l.bf16 %v6477_v0  ;;  %v7642_v25 = vunpack.c.h.bf16 %v6477_v0 }
 0x160   : > { %4611 = vmatmul.msk.f32.gmra.mxu2 %vm361_vm1, %v4547_v56  ;;  %4615 = vmatmul.msk.f32.gmra.mxu3 %vm361_vm1, %v4547_v56  ;;  %v7626_v56 = vunpack.c.h.bf16 %v6411_v15 }
 0x161   : > { %2638 = vmatpush.msrb.mxu2 %v7631_v2  ;;  %2580 = vmatpush.msrb.mxu0 %v7636_v46 }
 0x162   : > { %2666 = vmatpush.msrb.mxu3 %v7626_v56 }
 0x163   : > { %v6384_v3 = vpop.f32.mrf.mxu2  ;;  %v6386_v50 = vpop.f32.mrf.mxu3  ;;  %2581 = vmatpush.msrb.mxu0 %v7643_v36 }
 0x164   : > { %v6392_v23 = vpop.f32.mrf.mxu0  ;;  %v6394_v12 = vpop.f32.mrf.mxu1  ;;  %2667 = vmatpush.msrb.mxu3 %v7632_v5 }
 0x167   : > { %4604 = vmatmul.msk.f32.gmra.mxu0 %vm361_vm1, %v4548_v38  ;;  %4608 = vmatmul.msk.f32.gmra.mxu1 %vm361_vm1, %v4548_v38 }
 0x168   : > { %4612 = vmatmul.msk.f32.gmra.mxu2 %vm361_vm1, %v4548_v38  ;;  %4616 = vmatmul.msk.f32.gmra.mxu3 %vm361_vm1, %v4548_v38  ;;  %v7629_v38 = vunpack.c.h.bf16 %v6424_v60  ;;  %v4619_v60 = vld [vmem:[%s7578_s1 + $0x150] sm:$0xff] }
 0x16a   : > { %2608 = vmatpush.msrb.mxu1 %v7629_v38  ;;  %v6472_v38 = vld [vmem:[%s7577_s0 + $0x388] sm:$0xff] }
 0x16b   : > { %v6448_v8 = vpop.f32.mrf.mxu2  ;;  %v6450_v40 = vpop.f32.mrf.mxu3  ;;  %7710 = vst [vmem:[#allocation13_spill] sm:$0xff] %v6472_v38  ;;  %v7639_v2 = vunpack.c.l.bf16 %v6472_v38  ;;  %v7641_v5 = vunpack.c.h.bf16 %v6472_v38 }
 0x16c   : > { %v6458_v56 = vpop.f32.mrf.mxu0  ;;  %v6460_v61 = vpop.f32.mrf.mxu1  ;;  %2609 = vmatpush.msrb.mxu1 %v7635_v4  ;;  %v4736_v4 = vld [vmem:[%s7577_s0 + $0x2f8] sm:$0xff] }
 0x16d   : > { %2639 = vmatpush.msrb.mxu2 %v7639_v2  ;;  %2668 = vmatpush.msrb.mxu3 %v7641_v5  ;;  %v2886_v46 = vunpack.c.l.bf16 %v4736_v4  ;;  %v2887_v58 = vunpack.c.h.bf16 %v4736_v4  ;;  %v4618_v5 = vld [vmem:[%s7578_s1 + $0x148] sm:$0xff]  ;;  %v4735_v4 = vld [vmem:[%s7577_s0 + $0x2f0] sm:$0xff] }
 0x16e   : > { %2610 = vmatpush.msrb.mxu1 %v7642_v25  ;;  %v4734_v25 = vld [vmem:[%s7577_s0 + $0x2e8] sm:$0xff]  ;;  %v2884_v36 = vunpack.c.l.bf16 %v4735_v4  ;;  %v2885_v51 = vunpack.c.h.bf16 %v4735_v4 }
 0x16f   : > { %4637 = vmatmul.msk.f32.vlgmr.msra.gmra.mxu0 %vm361_vm1, %v4617_v55  ;;  %4641 = vmatmul.msk.f32.vlgmr.msra.gmra.mxu1 %vm361_vm1, %v4617_v55 }
 0x170   : > { %4645 = vmatmul.msk.f32.vlgmr.msra.gmra.mxu2 %vm361_vm1, %v4617_v55  ;;  %4649 = vmatmul.msk.f32.vlgmr.msra.gmra.mxu3 %vm361_vm1, %v4617_v55 }
 0x171   : > { %2966 = vmatpush.msra.mxu2 %v2886_v46  ;;  %2995 = vmatpush.msra.mxu3 %v2887_v58  ;;  %v2882_v46 = vunpack.c.l.bf16 %v4734_v25  ;;  %v2883_v58 = vunpack.c.h.bf16 %v4734_v25 }
 0x172   : > { %2908 = vmatpush.msra.mxu0 %v2884_v36  ;;  %2937 = vmatpush.msra.mxu1 %v2885_v51  ;;  %v4730_v51 = vld [vmem:[%s7577_s0 + $0x2c8] sm:$0xff] }
 0x173   : > { %v6502_v27 = vpop.f32.mrf.mxu2  ;;  %v6504_v55 = vpop.f32.mrf.mxu3  ;;  %2967 = vmatpush.msra.mxu2 %v2882_v46  ;;  %2996 = vmatpush.msra.mxu3 %v2883_v58  ;;  %v2874_v36 = vunpack.c.l.bf16 %v4730_v51 }
 0x174   : > { %v6506_v2 = vpop.f32.mrf.mxu0  ;;  %v6508_v47 = vpop.f32.mrf.mxu1  ;;  %2909 = vmatpush.msra.mxu0 %v2880_v32  ;;  %2938 = vmatpush.msra.mxu1 %v2881_v6  ;;  %v2876_v32 = vunpack.c.l.bf16 %v4731_v59  ;;  %v2877_v6 = vunpack.c.h.bf16 %v4731_v59 }
 0x176   : > { %2910 = vmatpush.msra.mxu0 %v2876_v32  ;;  %2939 = vmatpush.msra.mxu1 %v2877_v6 }
 0x177   : > { %4638 = vmatmul.msk.f32.gmra.mxu0 %vm361_vm1, %v4618_v5  ;;  %4642 = vmatmul.msk.f32.gmra.mxu1 %vm361_vm1, %v4618_v5 }
 0x178   : > { %4646 = vmatmul.msk.f32.gmra.mxu2 %vm361_vm1, %v4618_v5  ;;  %4650 = vmatmul.msk.f32.gmra.mxu3 %vm361_vm1, %v4618_v5  ;;  %v4732_v5 = vld [vmem:[%s7577_s0 + $0x2d8] sm:$0xff] }
 0x179   : > { %v2878_v0 = vunpack.c.l.bf16 %v4732_v5  ;;  %v2879_v38 = vunpack.c.h.bf16 %v4732_v5 }
 0x17b   : > { %v6529_v45 = vpop.f32.mrf.mxu2  ;;  %v6531_v28 = vpop.f32.mrf.mxu3  ;;  %2968 = vmatpush.msra.mxu2 %v2878_v0  ;;  %2997 = vmatpush.msra.mxu3 %v2879_v38  ;;  %v2875_v0 = vunpack.c.h.bf16 %v4730_v51  ;;  %v4729_v38 = vld [vmem:[%s7577_s0 + $0x2c0] sm:$0xff] }
 0x17c   : > { %v6533_v4 = vpop.f32.mrf.mxu0  ;;  %v6535_v25 = vpop.f32.mrf.mxu1  ;;  %v2872_v46 = vunpack.c.l.bf16 %v4729_v38  ;;  %v2873_v58 = vunpack.c.h.bf16 %v4729_v38  ;;  %v4727_v38 = vld [vmem:[%s7577_s0 + $0x2b0] sm:$0xff] }
 0x17d   : > { %2969 = vmatpush.msra.mxu2 %v2874_v36  ;;  %2998 = vmatpush.msra.mxu3 %v2875_v0  ;;  %v2868_v32 = vunpack.c.l.bf16 %v4727_v38  ;;  %v2869_v6 = vunpack.c.h.bf16 %v4727_v38  ;;  %v1392_v36 = vadd.f32 %v6248_v11, %v6143_v7  ;;  %v4725_v0 = vld [vmem:[%s7577_s0 + $0x2a0] sm:$0xff]  ;;  %v4724_v7 = vld [vmem:[%s7577_s0 + $0x298] sm:$0xff]  ;;  %v1421_v11 = vadd.f32 %v6270_v9, %v6158_v18 }
 0x17e   : > { %2911 = vmatpush.msra.mxu0 %v2872_v46  ;;  %2940 = vmatpush.msra.mxu1 %v2873_v58  ;;  %v2863_v38 = vunpack.c.h.bf16 %v4724_v7 }
 0x17f   : > { %4639 = vmatmul.msk.f32.gmra.mxu0 %vm361_vm1, %v4619_v60  ;;  %4643 = vmatmul.msk.f32.gmra.mxu1 %vm361_vm1, %v4619_v60 }
 0x180   : > { %4647 = vmatmul.msk.f32.gmra.mxu2 %vm361_vm1, %v4619_v60  ;;  %4651 = vmatmul.msk.f32.gmra.mxu3 %vm361_vm1, %v4619_v60  ;;  %v4728_v60 = vld [vmem:[%s7577_s0 + $0x2b8] sm:$0xff] }
 0x181   : > { %v2870_v5 = vunpack.c.l.bf16 %v4728_v60  ;;  %v2871_v15 = vunpack.c.h.bf16 %v4728_v60  ;;  %v1363_v60 = vadd.f32 %v6246_v22, %v6141_v62  ;;  %2912 = vmatpush.msra.mxu0 %v2868_v32  ;;  %2941 = vmatpush.msra.mxu1 %v2869_v6  ;;  %v2864_v62 = vunpack.c.l.bf16 %v4725_v0  ;;  %v4723_v32 = vld [vmem:[%s7577_s0 + $0x290] sm:$0xff] }
 0x182   : > { %v2865_v22 = vunpack.c.h.bf16 %v4725_v0  ;;  %v2860_v18 = vunpack.c.l.bf16 %v4723_v32  ;;  %v2861_v9 = vunpack.c.h.bf16 %v4723_v32 }
 0x183   : > { %v6556_v42 = vpop.f32.mrf.mxu2  ;;  %v6558_v1 = vpop.f32.mrf.mxu3  ;;  %2970 = vmatpush.msra.mxu2 %v2870_v5  ;;  %2999 = vmatpush.msra.mxu3 %v2871_v15  ;;  %v4726_v15 = vld [vmem:[%s7577_s0 + $0x2a8] sm:$0xff]  ;;  %v2862_v5 = vunpack.c.l.bf16 %v4724_v7  ;;  %v1642_v6 = vadd.f32 %v6458_v56, %v1363_v60  ;;  %v6606_v7 = vadd.f32 %v6325_v31, %v6185_v24  ;;  %v4653_v60 = vld [vmem:[%s7578_s1 + $0x160] sm:$0xff]  ;;  %v6619_v31 = vadd.f32 %v6327_v17, %v6187_v57  ;;  %v4716_v17 = vld [vmem:[%s7577_s0 + $0x278] sm:$0xff] }
 0x184   : > { %v6560_v59 = vpop.f32.mrf.mxu0  ;;  %v6562_v51 = vpop.f32.mrf.mxu1  ;;  %v2866_v46 = vunpack.c.l.bf16 %v4726_v15  ;;  %v2867_v58 = vunpack.c.h.bf16 %v4726_v15  ;;  %v1643_v15 = vadd.f32 %v6460_v61, %v1392_v36  ;;  %2913 = vmatpush.msra.mxu0 %v2864_v62  ;;  %2942 = vmatpush.msra.mxu1 %v2865_v22  ;;  %v4722_v36 = vld [vmem:[%s7577_s0 + $0x288] sm:$0xff]  ;;  %v6633_v57 = vadd.f32 %v6384_v3, %v6212_v43 }
 0x185   : > { %v2858_v24 = vunpack.c.l.bf16 %v4722_v36  ;;  %v2834_v43 = vunpack.c.h.bf16 %v4716_v17  ;;  %v6646_v3 = vadd.f32 %v6392_v23, %v6216_v20  ;;  %v4715_v20 = vld [vmem:[%s7577_s0 + $0x270] sm:$0xff] }
 0x186   : > { %2971 = vmatpush.msra.mxu2 %v2866_v46  ;;  %3000 = vmatpush.msra.mxu3 %v2867_v58  ;;  %v6623_v46 = vadd.f32 %v6333_v37, %v6189_v35  ;;  %v6642_v37 = vadd.f32 %v6386_v50, %v6214_v44  ;;  %v6652_v44 = vadd.f32 %v6394_v12, %v6218_v48 }
 0x187   : > { %4640 = vmatmul.msk.f32.gmra.mxu0 %vm361_vm1, %v4620_v54  ;;  %4644 = vmatmul.msk.f32.gmra.mxu1 %vm361_vm1, %v4620_v54 }
 0x188   : > { %4648 = vmatmul.msk.f32.gmra.mxu2 %vm361_vm1, %v4620_v54  ;;  %4652 = vmatmul.msk.f32.gmra.mxu3 %vm361_vm1, %v4620_v54  ;;  %v1450_v54 = vadd.f32 %v6272_v10, %v6160_v19  ;;  %v1366_v19 = vadd.f32 %v6278_v63, %v6162_v26  ;;  %v1395_v10 = vadd.f32 %v6280_v39, %v6164_v30  ;;  %v4721_v26 = vld [vmem:[%s7577_s0 + $0x280] sm:$0xff]  ;;  %v2859_v39 = vunpack.c.h.bf16 %v4722_v36 }
 0x189   : > { %2972 = vmatpush.msra.mxu2 %v2862_v5  ;;  %3001 = vmatpush.msra.mxu3 %v2863_v38  ;;  %v2856_v58 = vunpack.c.l.bf16 %v4721_v26  ;;  %v2857_v62 = vunpack.c.h.bf16 %v4721_v26  ;;  %v6629_v5 = vadd.f32 %v6335_v29, %v6191_v52  ;;  %v2833_v29 = vunpack.c.l.bf16 %v4716_v17 }
 0x18a   : > { %2914 = vmatpush.msra.mxu0 %v2860_v18  ;;  %2943 = vmatpush.msra.mxu1 %v2861_v9  ;;  %v1644_v38 = vadd.f32 %v6502_v27, %v1421_v11  ;;  %v1646_v50 = vadd.f32 %v6506_v2, %v1366_v19  ;;  %v1647_v18 = vadd.f32 %v6508_v47, %v1395_v10  ;;  %v4714_v27 = vld [vmem:[%s7577_s0 + $0x268] sm:$0xff]  ;;  %v2831_v2 = vunpack.c.l.bf16 %v4715_v20 }
 0x18b   : > { %v6596_v0 = vpop.f32.mrf.mxu2  ;;  %v6598_v14 = vpop.f32.mrf.mxu3  ;;  %2973 = vmatpush.msra.mxu2 %v2858_v24  ;;  %3002 = vmatpush.msra.mxu3 %v2859_v39  ;;  %v4654_v47 = vld [vmem:[%s7578_s1 + $0x168] sm:$0xff]  ;;  %v2832_v11 = vunpack.c.h.bf16 %v4715_v20  ;;  %v2829_v10 = vunpack.c.l.bf16 %v4714_v27 }
 0x18c   : > { %v1741_v56 = vpop.f32.mrf.mxu0  ;;  %v1770_v61 = vpop.f32.mrf.mxu1  ;;  %2915 = vmatpush.msra.mxu0 %v2856_v58  ;;  %2944 = vmatpush.msra.mxu1 %v2857_v62 }
 0x18d   : > { %v1840_v30 = vadd.f32 %v1741_v56, %v1642_v6  ;;  %v1841_v63 = vadd.f32 %v1770_v61, %v1643_v15  ;;  %v1645_v15 = vadd.f32 %v6504_v55, %v1450_v54  ;;  %v2830_v61 = vunpack.c.h.bf16 %v4714_v27 }
 0x18f   : > { %v1880_v22 = vmul.f32 %v1840_v30, %v1840_v30  ;;  %v1881_v32 = vmul.f32 %v1841_v63, %v1841_v63  ;;  %v1920_v6 = vpack.c.bf16 %v1841_v63, %v1840_v30  ;;  %4673 = vmatmul.msk.f32.vlgmr.msrb.gmra.mxu0 %vm361_vm1, %v4653_v60  ;;  %4677 = vmatmul.msk.f32.vlgmr.msrb.gmra.mxu1 %vm361_vm1, %v4653_v60 }
 0x190   : > { %4681 = vmatmul.msk.f32.vlgmr.msrb.gmra.mxu2 %vm361_vm1, %v4653_v60  ;;  %4685 = vmatmul.msk.f32.vlgmr.msrb.gmra.mxu3 %vm361_vm1, %v4653_v60  ;;  %v1856_v35 = vadd.f32 %v1841_v63, %v1840_v30 }
 0x191   : > { %4537 = vst [vmem:[#allocation2 + $0x80] sm:$0xff] %v1920_v6  ;;  %v1896_v52 = vadd.f32 %v1881_v32, %v1880_v22  ;;  %3094 = vmatpush.msrb.mxu2 %v2833_v29  ;;  %3123 = vmatpush.msrb.mxu3 %v2834_v43  ;;  %v4713_v32 = vld [vmem:[%s7577_s0 + $0x260] sm:$0xff]  ;;  %v4712_v6 = vld [vmem:[%s7577_s0 + $0x258] sm:$0xff] }
 0x192   : > { %3036 = vmatpush.msrb.mxu0 %v2831_v2  ;;  %3065 = vmatpush.msrb.mxu1 %v2832_v11  ;;  %v2827_v17 = vunpack.c.l.bf16 %v4713_v32  ;;  %v2828_v29 = vunpack.c.h.bf16 %v4713_v32  ;;  %v2825_v43 = vunpack.c.l.bf16 %v4712_v6 }
 0x193   : > { %v1799_v9 = vpop.f32.mrf.mxu2  ;;  %v1828_v56 = vpop.f32.mrf.mxu3  ;;  %3095 = vmatpush.msrb.mxu2 %v2829_v10  ;;  %3124 = vmatpush.msrb.mxu3 %v2830_v61 }
 0x194   : > { %v1842_v23 = vadd.f32 %v1799_v9, %v1644_v38  ;;  %v1843_v55 = vadd.f32 %v1828_v56, %v1645_v15  ;;  %v1744_v48 = vpop.f32.mrf.mxu0  ;;  %v1773_v12 = vpop.f32.mrf.mxu1  ;;  %v1648_v38 = vadd.f32 %v6529_v45, %v6606_v7  ;;  %v1650_v9 = vadd.f32 %v6533_v4, %v6623_v46  ;;  %3037 = vmatpush.msrb.mxu0 %v2827_v17  ;;  %v4710_v45 = vld [vmem:[%s7577_s0 + $0x248] sm:$0xff] }
 0x195   : > { %v1844_v54 = vadd.f32 %v1744_v48, %v1646_v50  ;;  %v1845_v19 = vadd.f32 %v1773_v12, %v1647_v18  ;;  %v2826_v50 = vunpack.c.h.bf16 %v4712_v6  ;;  %v6681_v18 = vadd.f32 %v6448_v8, %v6242_v21  ;;  %3066 = vmatpush.msrb.mxu1 %v2828_v29  ;;  %3096 = vmatpush.msrb.mxu2 %v2825_v43 }
 0x196   : > { %v1921_v60 = vpack.c.bf16 %v1843_v55, %v1842_v23  ;;  %v1857_v36 = vadd.f32 %v1856_v35, %v1842_v23  ;;  %v1882_v26 = vmul.f32 %v1842_v23, %v1842_v23  ;;  %v1883_v30 = vmul.f32 %v1843_v55, %v1843_v55 }
 0x197   : > { %v1884_v63 = vmul.f32 %v1844_v54, %v1844_v54  ;;  %v1885_v24 = vmul.f32 %v1845_v19, %v1845_v19  ;;  %v1922_v39 = vpack.c.bf16 %v1845_v19, %v1844_v54  ;;  %4674 = vmatmul.msk.f32.gmra.mxu0 %vm361_vm1, %v4654_v47  ;;  %4678 = vmatmul.msk.f32.gmra.mxu1 %vm361_vm1, %v4654_v47  ;;  %v2822_v48 = vunpack.c.h.bf16 %v4710_v45 }
 0x198   : > { %4538 = vst [vmem:[#allocation2 + $0x88] sm:$0xff] %v1921_v60  ;;  %4682 = vmatmul.msk.f32.gmra.mxu2 %vm361_vm1, %v4654_v47  ;;  %4686 = vmatmul.msk.f32.gmra.mxu3 %vm361_vm1, %v4654_v47  ;;  %v1858_v58 = vadd.f32 %v1857_v36, %v1843_v55  ;;  %v1897_v62 = vadd.f32 %v1896_v52, %v1882_v26  ;;  %v2821_v55 = vunpack.c.l.bf16 %v4710_v45  ;;  %v4709_v26 = vld [vmem:[%s7577_s0 + $0x240] sm:$0xff] }
 0x199   : > { %v1861_v22 = vadd.f32 %v1845_v19, %v1844_v54  ;;  %4539 = vst [vmem:[#allocation2 + $0xe8] sm:$0xff] %v1922_v39  ;;  %v1901_v35 = vadd.f32 %v1885_v24, %v1884_v63  ;;  %v1649_v52 = vadd.f32 %v6531_v28, %v6619_v31  ;;  %v1651_v56 = vadd.f32 %v6535_v25, %v6629_v5  ;;  %v4711_v28 = vld [vmem:[%s7577_s0 + $0x250] sm:$0xff] }
 0x19a   : > { %1859 = vadd.xlane.f32.xlu2 %v1858_v58  ;;  %v1898_v15 = vadd.f32 %v1897_v62, %v1883_v30  ;;  %v4655_v25 = vld [vmem:[%s7578_s1 + $0x170] sm:$0xff]  ;;  %v2823_v31 = vunpack.c.l.bf16 %v4711_v28  ;;  %v2824_v46 = vunpack.c.h.bf16 %v4711_v28  ;;  %3125 = vmatpush.msrb.mxu3 %v2826_v50  ;;  %v4708_v30 = vld [vmem:[%s7577_s0 + $0x238] sm:$0xff]  ;;  %v2819_v24 = vunpack.c.l.bf16 %v4709_v26 }
 0x19b   : > { %v1802_v20 = vpop.f32.mrf.mxu2  ;;  %v1831_v27 = vpop.f32.mrf.mxu3  ;;  %3097 = vmatpush.msrb.mxu2 %v2821_v55  ;;  %v2820_v39 = vunpack.c.h.bf16 %v4709_v26  ;;  %v2817_v58 = vunpack.c.l.bf16 %v4708_v30  ;;  %v1652_v62 = vadd.f32 %v6556_v42, %v6633_v57  ;;  %v2818_v6 = vunpack.c.h.bf16 %v4708_v30  ;;  %v4706_v42 = vld [vmem:[%s7577_s0 + $0x228] sm:$0xff]  ;;  %v4701_v26 = vld [vmem:[%s7577_s0 + $0x200] sm:$0xff] }
 0x19c   : > { %v1846_v21 = vadd.f32 %v1802_v20, %v1648_v38  ;;  %v1847_v8 = vadd.f32 %v1831_v27, %v1649_v52  ;;  %1899 = vadd.xlane.f32.xlu0 %v1898_v15  ;;  %v1747_v7 = vpop.f32.mrf.mxu0  ;;  %v1776_v4 = vpop.f32.mrf.mxu1  ;;  %3038 = vmatpush.msrb.mxu0 %v2823_v31  ;;  %v1654_v17 = vadd.f32 %v6560_v59, %v6646_v3  ;;  %v2813_v15 = vunpack.c.l.bf16 %v4706_v42  ;;  %v4704_v31 = vld [vmem:[%s7577_s0 + $0x218] sm:$0xff] }
 0x19d   : > { %v1848_v5 = vadd.f32 %v1747_v7, %v1650_v9  ;;  %v1849_v23 = vadd.f32 %v1776_v4, %v1651_v56  ;;  %3067 = vmatpush.msrb.mxu1 %v2824_v46  ;;  %3126 = vmatpush.msrb.mxu3 %v2822_v48  ;;  %v1655_v29 = vadd.f32 %v6562_v51, %v6652_v44  ;;  %v4656_v51 = vld [vmem:[%s7578_s1 + $0x178] sm:$0xff]  ;;  %v2814_v50 = vunpack.c.h.bf16 %v4706_v42 }
 0x19e   : > { %v1923_v12 = vpack.c.bf16 %v1847_v8, %v1846_v21  ;;  %v1886_v47 = vmul.f32 %v1846_v21, %v1846_v21  ;;  %v1887_v2 = vmul.f32 %v1847_v8, %v1847_v8  ;;  %v1862_v11 = vadd.f32 %v1861_v22, %v1846_v21  ;;  %3039 = vmatpush.msrb.mxu0 %v2819_v24 }
 0x19f   : > { %v1888_v54 = vmul.f32 %v1848_v5, %v1848_v5  ;;  %v1889_v19 = vmul.f32 %v1849_v23, %v1849_v23  ;;  %v1924_v10 = vpack.c.bf16 %v1849_v23, %v1848_v5  ;;  %4675 = vmatmul.msk.f32.gmra.mxu0 %vm361_vm1, %v4655_v25  ;;  %4679 = vmatmul.msk.f32.gmra.mxu1 %vm361_vm1, %v4655_v25  ;;  %v2809_v55 = vunpack.c.l.bf16 %v4704_v31 }
 0x1a0   : > { %4540 = vst [vmem:[#allocation2 + $0xb8] sm:$0xff] %v1923_v12  ;;  %4683 = vmatmul.msk.f32.gmra.mxu2 %vm361_vm1, %v4655_v25  ;;  %4687 = vmatmul.msk.f32.gmra.mxu3 %vm361_vm1, %v4655_v25  ;;  %v1902_v61 = vadd.f32 %v1901_v35, %v1886_v47  ;;  %v1863_v60 = vadd.f32 %v1862_v11, %v1847_v8  ;;  %v4705_v25 = vld [vmem:[%s7577_s0 + $0x220] sm:$0xff]  ;;  %v4703_v11 = vld [vmem:[%s7577_s0 + $0x210] sm:$0xff] }
 0x1a1   : > { %v1866_v36 = vadd.f32 %v1849_v23, %v1848_v5  ;;  %4541 = vst [vmem:[#allocation2 + $0x60] sm:$0xff] %v1924_v10  ;;  %v1906_v63 = vadd.f32 %v1889_v19, %v1888_v54  ;;  %v1653_v22 = vadd.f32 %v6558_v1, %v6642_v37  ;;  %v1459_v35 = vadd.f32 %v6450_v40, %v6244_v34  ;;  %v4707_v1 = vld [vmem:[%s7577_s0 + $0x230] sm:$0xff] }
 0x1a2   : > { %v1903_v32 = vadd.f32 %v1902_v61, %v1887_v2  ;;  %3068 = vmatpush.msrb.mxu1 %v2820_v39  ;;  %v2815_v37 = vunpack.c.l.bf16 %v4707_v1  ;;  %v2816_v3 = vunpack.c.h.bf16 %v4707_v1  ;;  %3098 = vmatpush.msrb.mxu2 %v2817_v58  ;;  %v2811_v5 = vunpack.c.l.bf16 %v4705_v25  ;;  %v4702_v61 = vld [vmem:[%s7577_s0 + $0x208] sm:$0xff] }
 0x1a3   : > { %v1805_v43 = vpop.f32.mrf.mxu2  ;;  %v1834_v38 = vpop.f32.mrf.mxu3  ;;  %3127 = vmatpush.msrb.mxu3 %v2818_v6  ;;  %v2812_v23 = vunpack.c.h.bf16 %v4705_v25  ;;  %v1656_v48 = vadd.f32 %v6596_v0, %v6681_v18  ;;  %v1657_v12 = vadd.f32 %v6598_v14, %v1459_v35  ;;  %v2810_v2 = vunpack.c.h.bf16 %v4704_v31  ;;  %v7733_v25 = vld [vmem:[#allocation8_spill] sm:$0xff] }
 0x1a4   : > { %v1850_v57 = vadd.f32 %v1805_v43, %v1652_v62  ;;  %v1851_v34 = vadd.f32 %v1834_v38, %v1653_v22  ;;  %1904 = vadd.xlane.f32.xlu1 %v1903_v32  ;;  %1864 = vadd.xlane.f32.xlu0 %v1863_v60  ;;  %v1750_v40 = vpop.f32.mrf.mxu0  ;;  %v1779_v59 = vpop.f32.mrf.mxu1  ;;  %v2807_v10 = vunpack.c.l.bf16 %v4703_v11  ;;  %v2808_v30 = vunpack.c.h.bf16 %v4703_v11 }
 0x1a5   : > { %v1852_v44 = vadd.f32 %v1750_v40, %v1654_v17  ;;  %v1853_v52 = vadd.f32 %v1779_v59, %v1655_v29  ;;  %3040 = vmatpush.msrb.mxu0 %v2815_v37  ;;  %3069 = vmatpush.msrb.mxu1 %v2816_v3  ;;  %v2806_v24 = vunpack.c.h.bf16 %v4702_v61  ;;  %v2803_v22 = vunpack.c.l.bf16 %v4701_v26 }
 0x1a6   : > { %v1925_v9 = vpack.c.bf16 %v1851_v34, %v1850_v57  ;;  %v1867_v56 = vadd.f32 %v1866_v36, %v1850_v57  ;;  %v1890_v20 = vmul.f32 %v1850_v57, %v1850_v57  ;;  %v1891_v27 = vmul.f32 %v1851_v34, %v1851_v34  ;;  %3099 = vmatpush.msrb.mxu2 %v2813_v15  ;;  %v4717_v36 = vld [vmem:[%s7578_s1 + $0x1a0] sm:$0xff] }
 0x1a7   : > { %v1892_v28 = vmul.f32 %v1852_v44, %v1852_v44  ;;  %v1893_v45 = vmul.f32 %v1853_v52, %v1853_v52  ;;  %v1926_v21 = vpack.c.bf16 %v1853_v52, %v1852_v44  ;;  %4676 = vmatmul.msk.f32.gmra.mxu0 %vm361_vm1, %v4656_v51  ;;  %4680 = vmatmul.msk.f32.gmra.mxu1 %vm361_vm1, %v4656_v51  ;;  %v2804_v32 = vunpack.c.h.bf16 %v4701_v26 }
 0x1a8   : > { %4542 = vst [vmem:[#allocation2 + $0xf0] sm:$0xff] %v1925_v9  ;;  %4684 = vmatmul.msk.f32.gmra.mxu2 %vm361_vm1, %v4656_v51  ;;  %4688 = vmatmul.msk.f32.gmra.mxu3 %vm361_vm1, %v4656_v51  ;;  %v1868_v8 = vadd.f32 %v1867_v56, %v1851_v34  ;;  %v1907_v7 = vadd.f32 %v1906_v63, %v1890_v20  ;;  %v2805_v63 = vunpack.c.l.bf16 %v4702_v61  ;;  %v7712_v1 = vunpack.c.l.bf16 %v6266_v41  ;;  %v4718_v34 = vld [vmem:[%s7578_s1 + $0x1a8] sm:$0xff]  ;;  %v7742_v61 = vld [vmem:[#allocation11_spill] sm:$0xff] }
 0x1a9   : > { %v1871_v4 = vadd.f32 %v1853_v52, %v1852_v44  ;;  %4543 = vst [vmem:[#allocation2 + $0x8] sm:$0xff] %v1926_v21  ;;  %v1911_v46 = vadd.f32 %v1893_v45, %v1892_v28  ;;  %3128 = vmatpush.msrb.mxu3 %v2814_v50  ;;  %3041 = vmatpush.msrb.mxu0 %v2811_v5  ;;  %v7713_v40 = vunpack.c.h.bf16 %v6266_v41  ;;  %v7714_v59 = vunpack.c.l.bf16 %v6288_v33  ;;  %v7727_v45 = vld [vmem:[#allocation6_spill] sm:$0xff]  ;;  %v7736_v5 = vld [vmem:[#allocation9_spill] sm:$0xff] }
 0x1aa   : > { %v1908_v47 = vadd.f32 %v1907_v7, %v1891_v27  ;;  %3070 = vmatpush.msrb.mxu1 %v2812_v23  ;;  %3100 = vmatpush.msrb.mxu2 %v2809_v55  ;;  %v7715_v51 = vunpack.c.h.bf16 %v6288_v33  ;;  %v7716_v37 = vunpack.c.l.bf16 %v6293_v16  ;;  %v7717_v41 = vunpack.c.h.bf16 %v6293_v16  ;;  %v7724_v27 = vld [vmem:[#allocation5_spill] sm:$0xff]  ;;  %v7730_v7 = vld [vmem:[#allocation7_spill] sm:$0xff] }
 0x1ab   : > { %v1808_v54 = vpop.f32.mrf.mxu2  ;;  %v1837_v19 = vpop.f32.mrf.mxu3  ;;  %3129 = vmatpush.msrb.mxu3 %v2810_v2  ;;  %3042 = vmatpush.msrb.mxu0 %v2807_v10  ;;  %v7718_v3 = vunpack.c.l.bf16 %v6306_v49  ;;  %v7719_v33 = vunpack.c.h.bf16 %v6306_v49  ;;  %v7720_v44 = vunpack.c.l.bf16 %v6311_v13  ;;  %v7721_v50 = vunpack.c.h.bf16 %v6311_v13  ;;  %v4719_v49 = vld [vmem:[%s7578_s1 + $0x1b0] sm:$0xff] }
 0x1ac   : > { %v1854_v60 = vadd.f32 %v1808_v54, %v1656_v48  ;;  %v1855_v0 = vadd.f32 %v1837_v19, %v1657_v12  ;;  %1869 = vadd.xlane.f32.xlu1 %v1868_v8  ;;  %1909 = vadd.xlane.f32.xlu2 %v1908_v47  ;;  %v6744_v14 = vpop.f32.mrf.mxu0  ;;  %v6746_v18 = vpop.f32.mrf.mxu1  ;;  %v7722_v9 = vunpack.c.l.bf16 %v6347_v53  ;;  %v7723_v20 = vunpack.c.h.bf16 %v6347_v53  ;;  %v7739_v47 = vld [vmem:[#allocation10_spill] sm:$0xff]  ;;  %v4720_v19 = vld [vmem:[%s7578_s1 + $0x1b8] sm:$0xff] }
 0x1ad   : > { %3071 = vmatpush.msrb.mxu1 %v2808_v30  ;;  %3101 = vmatpush.msrb.mxu2 %v2805_v63  ;;  %v7725_v28 = vunpack.c.l.bf16 %v7724_v27  ;;  %v7726_v13 = vunpack.c.h.bf16 %v7724_v27  ;;  %v7728_v21 = vunpack.c.l.bf16 %v7727_v45  ;;  %v7729_v8 = vunpack.c.h.bf16 %v7727_v45  ;;  %v7748_v63 = vld [vmem:[#allocation13_spill] sm:$0xff] }
 0x1ae   : > { %v1927_v39 = vpack.c.bf16 %v1855_v0, %v1854_v60  ;;  %v1872_v58 = vadd.f32 %v1871_v4, %v1854_v60  ;;  %v1894_v62 = vmul.f32 %v1854_v60, %v1854_v60  ;;  %v1895_v35 = vmul.f32 %v1855_v0, %v1855_v0  ;;  %3130 = vmatpush.msrb.mxu3 %v2806_v24  ;;  %v4821_v27 = vld [vmem:[%s7577_s0 + $0x460] sm:$0xff] }
 0x1af   : > { %4737 = vmatmul.msk.f32.vlgmr.msra.gmra.mxu0 %vm361_vm1, %v4717_v36  ;;  %4741 = vmatmul.msk.f32.vlgmr.msra.gmra.mxu1 %vm361_vm1, %v4717_v36  ;;  %v7731_v4 = vunpack.c.l.bf16 %v7730_v7  ;;  %v7732_v53 = vunpack.c.h.bf16 %v7730_v7  ;;  %v7734_v31 = vunpack.c.l.bf16 %v7733_v25  ;;  %v7737_v23 = vunpack.c.l.bf16 %v7736_v5 }
 0x1b0   : > { %4544 = vst [vmem:[#allocation2 + $0x78] sm:$0xff] %v1927_v39  ;;  %4745 = vmatmul.msk.f32.vlgmr.msra.gmra.mxu2 %vm361_vm1, %v4717_v36  ;;  %4749 = vmatmul.msk.f32.vlgmr.msra.gmra.mxu3 %vm361_vm1, %v4717_v36  ;;  %v1873_v6 = vadd.f32 %v1872_v58, %v1855_v0  ;;  %v1912_v17 = vadd.f32 %v1911_v46, %v1894_v62  ;;  %v7735_v46 = vunpack.c.h.bf16 %v7733_v25  ;;  %v7738_v12 = vunpack.c.h.bf16 %v7736_v5  ;;  %v7745_v36 = vld [vmem:[#allocation12_spill] sm:$0xff]  ;;  %v7751_v58 = vld [vmem:[#allocation14_spill] sm:$0xff] }
 0x1b1   : > { %3043 = vmatpush.msrb.mxu0 %v2803_v22  ;;  %3072 = vmatpush.msrb.mxu1 %v2804_v32  ;;  %v7740_v2 = vunpack.c.l.bf16 %v7739_v47  ;;  %v7741_v10 = vunpack.c.h.bf16 %v7739_v47  ;;  %v7743_v60 = vunpack.c.l.bf16 %v7742_v61  ;;  %v7744_v0 = vunpack.c.h.bf16 %v7742_v61  ;;  %v4818_v5 = vld [vmem:[%s7577_s0 + $0x448] sm:$0xff] }
 0x1b2   : > { %v1913_v29 = vadd.f32 %v1912_v17, %v1895_v35  ;;  %3275 = vmatpush.msra.mxu2 %v7712_v1  ;;  %3304 = vmatpush.msra.mxu3 %v7713_v40  ;;  %v7746_v26 = vunpack.c.l.bf16 %v7745_v36  ;;  %v7747_v30 = vunpack.c.h.bf16 %v7745_v36  ;;  %v7749_v24 = vunpack.c.l.bf16 %v7748_v63  ;;  %v4824_v1 = vld [vmem:[%s7577_s0 + $0x478] sm:$0xff] }
 0x1b3   : > { %v6758_v43 = vpop.f32.mrf.mxu2  ;;  %v6760_v38 = vpop.f32.mrf.mxu3  ;;  %3217 = vmatpush.msra.mxu0 %v7714_v59  ;;  %3246 = vmatpush.msra.mxu1 %v7715_v51  ;;  %v7750_v39 = vunpack.c.h.bf16 %v7748_v63  ;;  %v7752_v62 = vunpack.c.l.bf16 %v7751_v58  ;;  %v7753_v22 = vunpack.c.h.bf16 %v7751_v58  ;;  %v3394_v40 = vunpack.c.h.bf16 %v4824_v1  ;;  %v4815_v58 = vld [vmem:[%s7577_s0 + $0x430] sm:$0xff] }
 0x1b4   : > { %1874 = vadd.xlane.f32.xlu2 %v1873_v6  ;;  %1914 = vadd.xlane.f32.xlu0 %v1913_v29  ;;  %v6764_v42 = vpop.f32.mrf.mxu0  ;;  %v6766_v57 = vpop.f32.mrf.mxu1  ;;  %v4697_v29 = vld [vmem:[%s7578_s1 + $0x180] sm:$0xff]  ;;  %v3388_v45 = vunpack.c.h.bf16 %v4821_v27  ;;  %v3381_v47 = vunpack.c.l.bf16 %v4818_v5 }
 0x1b5   : > { %3276 = vmatpush.msra.mxu2 %v7716_v37  ;;  %3305 = vmatpush.msra.mxu3 %v7717_v41 }
 0x1b6   : > { %3218 = vmatpush.msra.mxu0 %v7718_v3  ;;  %3247 = vmatpush.msra.mxu1 %v7719_v33  ;;  %v4698_v3 = vld [vmem:[%s7578_s1 + $0x188] sm:$0xff]  ;;  %v4823_v33 = vld [vmem:[%s7577_s0 + $0x470] sm:$0xff] }
 0x1b7   : > { %4738 = vmatmul.msk.f32.gmra.mxu0 %vm361_vm1, %v4718_v34  ;;  %4742 = vmatmul.msk.f32.gmra.mxu1 %vm361_vm1, %v4718_v34 }
 0x1b8   : > { %4746 = vmatmul.msk.f32.gmra.mxu2 %vm361_vm1, %v4718_v34  ;;  %4750 = vmatmul.msk.f32.gmra.mxu3 %vm361_vm1, %v4718_v34  ;;  %v3393_v34 = vunpack.c.l.bf16 %v4824_v1 }
 0x1b9   : > { %3277 = vmatpush.msra.mxu2 %v7720_v44  ;;  %3306 = vmatpush.msra.mxu3 %v7721_v50  ;;  %v4822_v44 = vld [vmem:[%s7577_s0 + $0x468] sm:$0xff]  ;;  %v3391_v50 = vunpack.c.l.bf16 %v4823_v33 }
 0x1ba   : > { %3219 = vmatpush.msra.mxu0 %v7722_v9  ;;  %3248 = vmatpush.msra.mxu1 %v7723_v20  ;;  %v3392_v9 = vunpack.c.h.bf16 %v4823_v33  ;;  %v3390_v20 = vunpack.c.h.bf16 %v4822_v44 }
 0x1bb   : > { %v6791_v52 = vpop.f32.mrf.mxu2  ;;  %v6793_v15 = vpop.f32.mrf.mxu3  ;;  %3278 = vmatpush.msra.mxu2 %v7725_v28  ;;  %3307 = vmatpush.msra.mxu3 %v7726_v13  ;;  %v4820_v28 = vld [vmem:[%s7577_s0 + $0x458] sm:$0xff]  ;;  %v3387_v13 = vunpack.c.l.bf16 %v4821_v27 }
 0x1bc   : > { %v6799_v16 = vpop.f32.mrf.mxu0  ;;  %v6801_v56 = vpop.f32.mrf.mxu1  ;;  %3220 = vmatpush.msra.mxu0 %v7728_v21  ;;  %3249 = vmatpush.msra.mxu1 %v7729_v8  ;;  %v3385_v21 = vunpack.c.l.bf16 %v4820_v28  ;;  %v3386_v8 = vunpack.c.h.bf16 %v4820_v28 }
 0x1bd   : > { %3279 = vmatpush.msra.mxu2 %v7731_v4  ;;  %3308 = vmatpush.msra.mxu3 %v7732_v53 }
 0x1be   : > { %3221 = vmatpush.msra.mxu0 %v7734_v31  ;;  %3250 = vmatpush.msra.mxu1 %v7735_v46  ;;  %v4699_v31 = vld [vmem:[%s7578_s1 + $0x190] sm:$0xff] }
 0x1bf   : > { %4739 = vmatmul.msk.f32.gmra.mxu0 %vm361_vm1, %v4719_v49  ;;  %4743 = vmatmul.msk.f32.gmra.mxu1 %vm361_vm1, %v4719_v49  ;;  %v4819_v46 = vld [vmem:[%s7577_s0 + $0x450] sm:$0xff] }
 0x1c0   : > { %4747 = vmatmul.msk.f32.gmra.mxu2 %vm361_vm1, %v4719_v49  ;;  %4751 = vmatmul.msk.f32.gmra.mxu3 %vm361_vm1, %v4719_v49  ;;  %v3389_v49 = vunpack.c.l.bf16 %v4822_v44 }
 0x1c1   : > { %3280 = vmatpush.msra.mxu2 %v7737_v23  ;;  %3309 = vmatpush.msra.mxu3 %v7738_v12  ;;  %v3383_v23 = vunpack.c.l.bf16 %v4819_v46  ;;  %v3384_v12 = vunpack.c.h.bf16 %v4819_v46  ;;  %v4809_v46 = vld [vmem:[%s7577_s0 + $0x400] sm:$0xff] }
 0x1c2   : > { %3222 = vmatpush.msra.mxu0 %v7740_v2  ;;  %3251 = vmatpush.msra.mxu1 %v7741_v10  ;;  %v3382_v2 = vunpack.c.h.bf16 %v4818_v5  ;;  %v4816_v10 = vld [vmem:[%s7577_s0 + $0x438] sm:$0xff] }
 0x1c3   : > { %v6830_v55 = vpop.f32.mrf.mxu2  ;;  %v6832_v48 = vpop.f32.mrf.mxu3  ;;  %3281 = vmatpush.msra.mxu2 %v7743_v60  ;;  %3310 = vmatpush.msra.mxu3 %v7744_v0  ;;  %v3377_v0 = vunpack.c.l.bf16 %v4816_v10  ;;  %v3378_v36 = vunpack.c.h.bf16 %v4816_v10 }
 0x1c4   : > { %v6838_v11 = vpop.f32.mrf.mxu0  ;;  %v6840_v54 = vpop.f32.mrf.mxu1  ;;  %3223 = vmatpush.msra.mxu0 %v7746_v26  ;;  %3252 = vmatpush.msra.mxu1 %v7747_v30 }
 0x1c5   : > { %3282 = vmatpush.msra.mxu2 %v7749_v24  ;;  %3311 = vmatpush.msra.mxu3 %v7750_v39  ;;  %v4700_v39 = vld [vmem:[%s7578_s1 + $0x198] sm:$0xff] }
 0x1c6   : > { %3224 = vmatpush.msra.mxu0 %v7752_v62  ;;  %3253 = vmatpush.msra.mxu1 %v7753_v22  ;;  %v4814_v62 = vld [vmem:[%s7577_s0 + $0x428] sm:$0xff]  ;;  %v3375_v22 = vunpack.c.l.bf16 %v4815_v58 }
 0x1c7   : > { %4740 = vmatmul.msk.f32.gmra.mxu0 %vm361_vm1, %v4720_v19  ;;  %4744 = vmatmul.msk.f32.gmra.mxu1 %vm361_vm1, %v4720_v19  ;;  %v3373_v1 = vunpack.c.l.bf16 %v4814_v62 }
 0x1c8   : > { %4748 = vmatmul.msk.f32.gmra.mxu2 %vm361_vm1, %v4720_v19  ;;  %4752 = vmatmul.msk.f32.gmra.mxu3 %vm361_vm1, %v4720_v19  ;;  %v4817_v19 = vld [vmem:[%s7577_s0 + $0x440] sm:$0xff] }
 0x1c9   : > { %v3379_v61 = vunpack.c.l.bf16 %v4817_v19  ;;  %v3380_v60 = vunpack.c.h.bf16 %v4817_v19 }
 0x1cb   : > { %v6867_v32 = vpop.f32.mrf.mxu2  ;;  %v6869_v6 = vpop.f32.mrf.mxu3 }
 0x1cc   : > { %v6871_v35 = vpop.f32.mrf.mxu0  ;;  %v6873_v17 = vpop.f32.mrf.mxu1 }
 0x1cf   : > { %4753 = vmatmul.msk.f32.vlgmr.msrb.gmra.mxu0 %vm361_vm1, %v4697_v29  ;;  %4757 = vmatmul.msk.f32.vlgmr.msrb.gmra.mxu1 %vm361_vm1, %v4697_v29 }
 0x1d0   : > { %4761 = vmatmul.msk.f32.vlgmr.msrb.gmra.mxu2 %vm361_vm1, %v4697_v29  ;;  %4765 = vmatmul.msk.f32.vlgmr.msrb.gmra.mxu3 %vm361_vm1, %v4697_v29  ;;  %v3376_v29 = vunpack.c.h.bf16 %v4815_v58 }
 0x1d1   : > { %3473 = vmatpush.msrb.mxu2 %v3393_v34  ;;  %3502 = vmatpush.msrb.mxu3 %v3394_v40  ;;  %v3374_v34 = vunpack.c.h.bf16 %v4814_v62  ;;  %v4813_v40 = vld [vmem:[%s7577_s0 + $0x420] sm:$0xff]  ;;  %v4771_v62 = vld [vmem:[%s7578_s1 + $0x1d0] sm:$0xff] }
 0x1d2   : > { %3415 = vmatpush.msrb.mxu0 %v3391_v50  ;;  %3444 = vmatpush.msrb.mxu1 %v3392_v9  ;;  %v3371_v33 = vunpack.c.l.bf16 %v4813_v40  ;;  %v3372_v44 = vunpack.c.h.bf16 %v4813_v40  ;;  %v4772_v40 = vld [vmem:[%s7578_s1 + $0x1d8] sm:$0xff] }
 0x1d3   : > { %v6885_v59 = vpop.f32.mrf.mxu2  ;;  %v6887_v51 = vpop.f32.mrf.mxu3  ;;  %3474 = vmatpush.msrb.mxu2 %v3389_v49  ;;  %3503 = vmatpush.msrb.mxu3 %v3390_v20  ;;  %v4811_v49 = vld [vmem:[%s7577_s0 + $0x410] sm:$0xff] }
 0x1d4   : > { %v6889_v37 = vpop.f32.mrf.mxu0  ;;  %v6891_v41 = vpop.f32.mrf.mxu1  ;;  %3416 = vmatpush.msrb.mxu0 %v3387_v13  ;;  %3445 = vmatpush.msrb.mxu1 %v3388_v45  ;;  %v3367_v28 = vunpack.c.l.bf16 %v4811_v49  ;;  %v3368_v13 = vunpack.c.h.bf16 %v4811_v49 }
 0x1d5   : > { %3475 = vmatpush.msrb.mxu2 %v3385_v21  ;;  %3504 = vmatpush.msrb.mxu3 %v3386_v8  ;;  %v4769_v8 = vld [vmem:[%s7578_s1 + $0x1c0] sm:$0xff] }
 0x1d6   : > { %3417 = vmatpush.msrb.mxu0 %v3383_v23  ;;  %3446 = vmatpush.msrb.mxu1 %v3384_v12  ;;  %v3363_v12 = vunpack.c.l.bf16 %v4809_v46 }
 0x1d7   : > { %4754 = vmatmul.msk.f32.gmra.mxu0 %vm361_vm1, %v4698_v3  ;;  %4758 = vmatmul.msk.f32.gmra.mxu1 %vm361_vm1, %v4698_v3 }
 0x1d8   : > { %4762 = vmatmul.msk.f32.gmra.mxu2 %vm361_vm1, %v4698_v3  ;;  %4766 = vmatmul.msk.f32.gmra.mxu3 %vm361_vm1, %v4698_v3  ;;  %v4812_v3 = vld [vmem:[%s7577_s0 + $0x418] sm:$0xff] }
 0x1d9   : > { %3476 = vmatpush.msrb.mxu2 %v3381_v47  ;;  %3505 = vmatpush.msrb.mxu3 %v3382_v2  ;;  %v3369_v50 = vunpack.c.l.bf16 %v4812_v3  ;;  %v3370_v9 = vunpack.c.h.bf16 %v4812_v3  ;;  %v3364_v47 = vunpack.c.h.bf16 %v4809_v46  ;;  %v2204_v3 = vadd.f32 %v6871_v35, %v6744_v14 }
 0x1da   : > { %3418 = vmatpush.msrb.mxu0 %v3379_v61  ;;  %3447 = vmatpush.msrb.mxu1 %v3380_v60  ;;  %v4770_v60 = vld [vmem:[%s7578_s1 + $0x1c8] sm:$0xff] }
 0x1db   : > { %v6912_v7 = vpop.f32.mrf.mxu2  ;;  %v6914_v4 = vpop.f32.mrf.mxu3  ;;  %3477 = vmatpush.msrb.mxu2 %v3377_v0  ;;  %3506 = vmatpush.msrb.mxu3 %v3378_v36 }
 0x1dc   : > { %v6916_v53 = vpop.f32.mrf.mxu0  ;;  %v6918_v25 = vpop.f32.mrf.mxu1  ;;  %3419 = vmatpush.msrb.mxu0 %v3375_v22  ;;  %3448 = vmatpush.msrb.mxu1 %v3376_v29 }
 0x1dd   : > { %3478 = vmatpush.msrb.mxu2 %v3373_v1  ;;  %3507 = vmatpush.msrb.mxu3 %v3374_v34 }
 0x1de   : > { %3420 = vmatpush.msrb.mxu0 %v3371_v33  ;;  %3449 = vmatpush.msrb.mxu1 %v3372_v44  ;;  %v2233_v33 = vadd.f32 %v6873_v17, %v6746_v18  ;;  %v2262_v18 = vadd.f32 %v6885_v59, %v6758_v43  ;;  %v2291_v17 = vadd.f32 %v6887_v51, %v6760_v38 }
 0x1df   : > { %4755 = vmatmul.msk.f32.gmra.mxu0 %vm361_vm1, %v4699_v31  ;;  %4759 = vmatmul.msk.f32.gmra.mxu1 %vm361_vm1, %v4699_v31 }
 0x1e0   : > { %4763 = vmatmul.msk.f32.gmra.mxu2 %vm361_vm1, %v4699_v31  ;;  %4767 = vmatmul.msk.f32.gmra.mxu3 %vm361_vm1, %v4699_v31  ;;  %v4810_v31 = vld [vmem:[%s7577_s0 + $0x408] sm:$0xff] }
 0x1e1   : > { %3479 = vmatpush.msrb.mxu2 %v3369_v50  ;;  %3508 = vmatpush.msrb.mxu3 %v3370_v9  ;;  %v3365_v5 = vunpack.c.l.bf16 %v4810_v31  ;;  %v3366_v23 = vunpack.c.h.bf16 %v4810_v31 }
 0x1e2   : > { %3421 = vmatpush.msrb.mxu0 %v3367_v28  ;;  %3450 = vmatpush.msrb.mxu1 %v3368_v13 }
 0x1e3   : > { %v6939_v26 = vpop.f32.mrf.mxu2  ;;  %v6941_v30 = vpop.f32.mrf.mxu3  ;;  %3480 = vmatpush.msrb.mxu2 %v3365_v5  ;;  %3509 = vmatpush.msrb.mxu3 %v3366_v23 }
 0x1e4   : > { %v6943_v63 = vpop.f32.mrf.mxu0  ;;  %v6945_v24 = vpop.f32.mrf.mxu1  ;;  %3422 = vmatpush.msrb.mxu0 %v3363_v12  ;;  %3451 = vmatpush.msrb.mxu1 %v3364_v47 }
 0x1e7   : > { %4756 = vmatmul.msk.f32.gmra.mxu0 %vm361_vm1, %v4700_v39  ;;  %4760 = vmatmul.msk.f32.gmra.mxu1 %vm361_vm1, %v4700_v39 }
 0x1e8   : > { %4764 = vmatmul.msk.f32.gmra.mxu2 %vm361_vm1, %v4700_v39  ;;  %4768 = vmatmul.msk.f32.gmra.mxu3 %vm361_vm1, %v4700_v39 }
 0x1eb   : > { %v6969_v20 = vpop.f32.mrf.mxu2  ;;  %v6971_v27 = vpop.f32.mrf.mxu3 }
 0x1ec   : > { %v2385_v45 = vpop.f32.mrf.mxu0  ;;  %v2414_v21 = vpop.f32.mrf.mxu1 }
 0x1ed   : > { %v2484_v44 = vadd.f32 %v2385_v45, %v2204_v3  ;;  %v2485_v50 = vadd.f32 %v2414_v21, %v2233_v33  ;;  %v2207_v45 = vadd.f32 %v6889_v37, %v6764_v42  ;;  %v2236_v21 = vadd.f32 %v6891_v41, %v6766_v57  ;;  %v4806_v42 = vld [vmem:[%s7578_s1 + $0x1e8] sm:$0xff] }
 0x1ee   : > { %v2265_v57 = vadd.f32 %v6912_v7, %v6791_v52  ;;  %v2239_v52 = vadd.f32 %v6918_v25, %v6801_v56 }
 0x1ef   : > { %4789 = vmatmul.msk.f32.vlgmr.msra.gmra.mxu0 %vm361_vm1, %v4769_v8  ;;  %4793 = vmatmul.msk.f32.vlgmr.msra.gmra.mxu1 %vm361_vm1, %v4769_v8 }
 0x1f0   : > { %4797 = vmatmul.msk.f32.vlgmr.msra.gmra.mxu2 %vm361_vm1, %v4769_v8  ;;  %4801 = vmatmul.msk.f32.vlgmr.msra.gmra.mxu3 %vm361_vm1, %v4769_v8  ;;  %v4805_v8 = vld [vmem:[%s7578_s1 + $0x1e0] sm:$0xff] }
 0x1f3   : > { %v2443_v2 = vpop.f32.mrf.mxu2  ;;  %v2472_v19 = vpop.f32.mrf.mxu3 }
 0x1f4   : > { %v2388_v10 = vpop.f32.mrf.mxu0  ;;  %v2417_v61 = vpop.f32.mrf.mxu1  ;;  %v2486_v47 = vadd.f32 %v2443_v2, %v2262_v18  ;;  %v2294_v2 = vadd.f32 %v6914_v4, %v6793_v15 }
 0x1f5   : > { %v2488_v43 = vadd.f32 %v2388_v10, %v2207_v45  ;;  %v2489_v59 = vadd.f32 %v2417_v61, %v2236_v21  ;;  %v4807_v45 = vld [vmem:[%s7578_s1 + $0x1f0] sm:$0xff] }
 0x1f7   : > { %4790 = vmatmul.msk.f32.gmra.mxu0 %vm361_vm1, %v4770_v60  ;;  %4794 = vmatmul.msk.f32.gmra.mxu1 %vm361_vm1, %v4770_v60 }
 0x1f8   : > { %4798 = vmatmul.msk.f32.gmra.mxu2 %vm361_vm1, %v4770_v60  ;;  %4802 = vmatmul.msk.f32.gmra.mxu3 %vm361_vm1, %v4770_v60  ;;  %v2487_v60 = vadd.f32 %v2472_v19, %v2291_v17 }
 0x1fb   : > { %v6993_v0 = vpop.f32.mrf.mxu2  ;;  %v6995_v36 = vpop.f32.mrf.mxu3 }
 0x1fc   : > { %v6997_v39 = vpop.f32.mrf.mxu0  ;;  %v6999_v58 = vpop.f32.mrf.mxu1 }
 0x1fd   : > { %v2493_v56 = vadd.f32 %v6999_v58, %v2239_v52 }
 0x1ff   : > { %4791 = vmatmul.msk.f32.gmra.mxu0 %vm361_vm1, %v4771_v62  ;;  %4795 = vmatmul.msk.f32.gmra.mxu1 %vm361_vm1, %v4771_v62 }
 0x200   : > { %4799 = vmatmul.msk.f32.gmra.mxu2 %vm361_vm1, %v4771_v62  ;;  %4803 = vmatmul.msk.f32.gmra.mxu3 %vm361_vm1, %v4771_v62 }
 0x203   : > { %v7008_v22 = vpop.f32.mrf.mxu2  ;;  %v7010_v29 = vpop.f32.mrf.mxu3 }
 0x204   : > { %v7012_v1 = vpop.f32.mrf.mxu0  ;;  %v7014_v34 = vpop.f32.mrf.mxu1 }
 0x207   : > { %4792 = vmatmul.msk.f32.gmra.mxu0 %vm361_vm1, %v4772_v40  ;;  %4796 = vmatmul.msk.f32.gmra.mxu1 %vm361_vm1, %v4772_v40 }
 0x208   : > { %4800 = vmatmul.msk.f32.gmra.mxu2 %vm361_vm1, %v4772_v40  ;;  %4804 = vmatmul.msk.f32.gmra.mxu3 %vm361_vm1, %v4772_v40 }
 0x20b   : > { %v7027_v9 = vpop.f32.mrf.mxu2  ;;  %v7029_v49 = vpop.f32.mrf.mxu3 }
 0x20c   : > { %v2583_v28 = vpop.f32.mrf.mxu0  ;;  %v2612_v13 = vpop.f32.mrf.mxu1 }
 0x20d   : > { %v2682_v31 = vadd.f32 %v2583_v28, %v2484_v44  ;;  %v2683_v46 = vadd.f32 %v2612_v13, %v2485_v50 }
 0x20f   : > { %v2722_v5 = vmul.f32 %v2682_v31, %v2682_v31  ;;  %v2698_v23 = vadd.f32 %v2683_v46, %v2682_v31  ;;  %v2723_v14 = vmul.f32 %v2683_v46, %v2683_v46  ;;  %v2762_v35 = vpack.c.bf16 %v2683_v46, %v2682_v31  ;;  %4825 = vmatmul.msk.f32.vlgmr.msrb.gmra.mxu0 %vm361_vm1, %v4805_v8 }
 0x210   : > { %4829 = vmatmul.msk.f32.vlgmr.msrb.gmra.mxu1 %vm361_vm1, %v4805_v8  ;;  %4833 = vmatmul.msk.f32.vlgmr.msrb.gmra.mxu2 %vm361_vm1, %v4805_v8  ;;  %v2490_v46 = vadd.f32 %v6993_v0, %v2265_v57  ;;  %v2268_v0 = vadd.f32 %v6939_v26, %v6830_v55  ;;  %v2242_v55 = vadd.f32 %v6945_v24, %v6840_v54 }
 0x211   : > { %4689 = vst [vmem:[#allocation2 + $0x38] sm:$0xff] %v2762_v35  ;;  %4837 = vmatmul.msk.f32.vlgmr.msrb.gmra.mxu3 %vm361_vm1, %v4805_v8  ;;  %v2738_v12 = vadd.f32 %v2723_v14, %v2722_v5  ;;  %v2210_v8 = vadd.f32 %v6916_v53, %v6799_v16  ;;  %v2491_v5 = vadd.f32 %v6995_v36, %v2294_v2  ;;  %v4808_v2 = vld [vmem:[%s7578_s1 + $0x1f8] sm:$0xff] }
 0x212   : > { %v2497_v54 = vadd.f32 %v7014_v34, %v2242_v55 }
 0x213   : > { %v2641_v62 = vpop.f32.mrf.mxu2  ;;  %v2670_v38 = vpop.f32.mrf.mxu3  ;;  %v2492_v16 = vadd.f32 %v6997_v39, %v2210_v8  ;;  %v2297_v39 = vadd.f32 %v6941_v30, %v6832_v48 }
 0x214   : > { %v2684_v51 = vadd.f32 %v2641_v62, %v2486_v47  ;;  %v2685_v40 = vadd.f32 %v2670_v38, %v2487_v60  ;;  %v2586_v3 = vpop.f32.mrf.mxu0  ;;  %v2615_v33 = vpop.f32.mrf.mxu1  ;;  %v2213_v38 = vadd.f32 %v6943_v63, %v6838_v11 }
 0x215   : > { %v2686_v37 = vadd.f32 %v2586_v3, %v2488_v43  ;;  %v2687_v41 = vadd.f32 %v2615_v33, %v2489_v59  ;;  %v2495_v3 = vadd.f32 %v7010_v29, %v2297_v39  ;;  %v2271_v29 = vadd.f32 %v6969_v20, %v6867_v32 }
 0x216   : > { %v2724_v19 = vmul.f32 %v2684_v51, %v2684_v51  ;;  %v2763_v10 = vpack.c.bf16 %v2685_v40, %v2684_v51  ;;  %v2699_v61 = vadd.f32 %v2698_v23, %v2684_v51  ;;  %v2725_v7 = vmul.f32 %v2685_v40, %v2685_v40 }
 0x217   : > { %v2726_v44 = vmul.f32 %v2686_v37, %v2686_v37  ;;  %v2703_v50 = vadd.f32 %v2687_v41, %v2686_v37  ;;  %v2727_v28 = vmul.f32 %v2687_v41, %v2687_v41  ;;  %v2764_v13 = vpack.c.bf16 %v2687_v41, %v2686_v37  ;;  %4826 = vmatmul.msk.f32.gmra.mxu0 %vm361_vm1, %v4806_v42 }
 0x218   : > { %4690 = vst [vmem:[#allocation2 + $0x58] sm:$0xff] %v2763_v10  ;;  %4830 = vmatmul.msk.f32.gmra.mxu1 %vm361_vm1, %v4806_v42  ;;  %4834 = vmatmul.msk.f32.gmra.mxu2 %vm361_vm1, %v4806_v42  ;;  %v2700_v15 = vadd.f32 %v2699_v61, %v2685_v40  ;;  %v2739_v4 = vadd.f32 %v2738_v12, %v2724_v19 }
 0x219   : > { %4691 = vst [vmem:[#allocation2 + $0x40] sm:$0xff] %v2764_v13  ;;  %4838 = vmatmul.msk.f32.gmra.mxu3 %vm361_vm1, %v4806_v42  ;;  %v2743_v31 = vadd.f32 %v2727_v28, %v2726_v44  ;;  %v2494_v40 = vadd.f32 %v7008_v22, %v2268_v0  ;;  %v2496_v11 = vadd.f32 %v7012_v1, %v2213_v38 }
 0x21a   : > { %2701 = vadd.xlane.f32.xlu1 %v2700_v15  ;;  %v2740_v23 = vadd.f32 %v2739_v4, %v2725_v7  ;;  %v2300_v13 = vadd.f32 %v6971_v27, %v6869_v6  ;;  %v2498_v15 = vadd.f32 %v7027_v9, %v2271_v29 }
 0x21b   : > { %v2644_v53 = vpop.f32.mrf.mxu2  ;;  %v2673_v25 = vpop.f32.mrf.mxu3 }
 0x21c   : > { %v2688_v14 = vadd.f32 %v2644_v53, %v2490_v46  ;;  %v2689_v35 = vadd.f32 %v2673_v25, %v2491_v5  ;;  %v2589_v18 = vpop.f32.mrf.mxu0  ;;  %v2618_v17 = vpop.f32.mrf.mxu1  ;;  %2741 = vadd.xlane.f32.xlu2 %v2740_v23  ;;  %v2499_v7 = vadd.f32 %v7029_v49, %v2300_v13 }
 0x21d   : > { %v2690_v36 = vadd.f32 %v2589_v18, %v2492_v16  ;;  %v2691_v21 = vadd.f32 %v2618_v17, %v2493_v56 }
 0x21e   : > { %v2728_v58 = vmul.f32 %v2688_v14, %v2688_v14  ;;  %v2765_v12 = vpack.c.bf16 %v2689_v35, %v2688_v14  ;;  %v2704_v47 = vadd.f32 %v2703_v50, %v2688_v14  ;;  %v2729_v26 = vmul.f32 %v2689_v35, %v2689_v35 }
 0x21f   : > { %v2730_v60 = vmul.f32 %v2690_v36, %v2690_v36  ;;  %v2708_v43 = vadd.f32 %v2691_v21, %v2690_v36  ;;  %v2731_v59 = vmul.f32 %v2691_v21, %v2691_v21  ;;  %v2766_v62 = vpack.c.bf16 %v2691_v21, %v2690_v36  ;;  %4827 = vmatmul.msk.f32.gmra.mxu0 %vm361_vm1, %v4807_v45 }
 0x220   : > { %4692 = vst [vmem:[#allocation2 + $0xc8] sm:$0xff] %v2765_v12  ;;  %4831 = vmatmul.msk.f32.gmra.mxu1 %vm361_vm1, %v4807_v45  ;;  %4835 = vmatmul.msk.f32.gmra.mxu2 %vm361_vm1, %v4807_v45  ;;  %v2705_v48 = vadd.f32 %v2704_v47, %v2689_v35  ;;  %v2744_v30 = vadd.f32 %v2743_v31, %v2728_v58 }
 0x221   : > { %4693 = vst [vmem:[#allocation2 + $0xe0] sm:$0xff] %v2766_v62  ;;  %4839 = vmatmul.msk.f32.gmra.mxu3 %vm361_vm1, %v4807_v45  ;;  %v2748_v51 = vadd.f32 %v2731_v59, %v2730_v60 }
 0x222   : > { %v2745_v33 = vadd.f32 %v2744_v30, %v2729_v26 }
 0x223   : > { %v2647_v63 = vpop.f32.mrf.mxu2  ;;  %v2676_v24 = vpop.f32.mrf.mxu3 }
 0x224   : > { %v2692_v42 = vadd.f32 %v2647_v63, %v2494_v40  ;;  %v2693_v57 = vadd.f32 %v2676_v24, %v2495_v3  ;;  %v2592_v37 = vpop.f32.mrf.mxu0  ;;  %v2621_v41 = vpop.f32.mrf.mxu1  ;;  %2706 = vadd.xlane.f32.xlu2 %v2705_v48  ;;  %2746 = vadd.xlane.f32.xlu0 %v2745_v33 }
 0x225   : > { %v2694_v22 = vadd.f32 %v2592_v37, %v2496_v11  ;;  %v2695_v19 = vadd.f32 %v2621_v41, %v2497_v54 }
 0x226   : > { %v2732_v1 = vmul.f32 %v2692_v42, %v2692_v42  ;;  %v2767_v34 = vpack.c.bf16 %v2693_v57, %v2692_v42  ;;  %v2709_v10 = vadd.f32 %v2708_v43, %v2692_v42  ;;  %v2733_v8 = vmul.f32 %v2693_v57, %v2693_v57 }
 0x227   : > { %v2734_v61 = vmul.f32 %v2694_v22, %v2694_v22  ;;  %v2713_v44 = vadd.f32 %v2695_v19, %v2694_v22  ;;  %v2735_v50 = vmul.f32 %v2695_v19, %v2695_v19  ;;  %v2768_v28 = vpack.c.bf16 %v2695_v19, %v2694_v22  ;;  %4828 = vmatmul.msk.f32.gmra.mxu0 %vm361_vm1, %v4808_v2 }
 0x228   : > { %4694 = vst [vmem:[#allocation2 + $0x90] sm:$0xff] %v2767_v34  ;;  %4832 = vmatmul.msk.f32.gmra.mxu1 %vm361_vm1, %v4808_v2  ;;  %4836 = vmatmul.msk.f32.gmra.mxu2 %vm361_vm1, %v4808_v2  ;;  %v2749_v52 = vadd.f32 %v2748_v51, %v2732_v1  ;;  %v2710_v32 = vadd.f32 %v2709_v10, %v2693_v57 }
 0x229   : > { %4695 = vst [vmem:[#allocation2 + $0x70] sm:$0xff] %v2768_v28  ;;  %4840 = vmatmul.msk.f32.gmra.mxu3 %vm361_vm1, %v4808_v2  ;;  %v2753_v20 = vadd.f32 %v2735_v50, %v2734_v61 }
 0x22a   : > { %v2750_v4 = vadd.f32 %v2749_v52, %v2733_v8 }
 0x22b   : > { %v2650_v31 = vpop.f32.mrf.mxu2  ;;  %v2679_v46 = vpop.f32.mrf.mxu3 }
 0x22c   : > { %v2696_v6 = vadd.f32 %v2650_v31, %v2498_v15  ;;  %v2697_v27 = vadd.f32 %v2679_v46, %v2499_v7  ;;  %2751 = vadd.xlane.f32.xlu1 %v2750_v4  ;;  %v2917_v5 = vpop.f32.mrf.mxu0  ;;  %v2946_v16 = vpop.f32.mrf.mxu1  ;;  %2711 = vadd.xlane.f32.xlu0 %v2710_v32 }
 0x22e   : > { %v2736_v56 = vmul.f32 %v2696_v6, %v2696_v6  ;;  %v2769_v53 = vpack.c.bf16 %v2697_v27, %v2696_v6  ;;  %v2714_v25 = vadd.f32 %v2713_v44, %v2696_v6  ;;  %v2737_v14 = vmul.f32 %v2697_v27, %v2697_v27 }
 0x230   : > { %4696 = vst [vmem:[#allocation2 + $0xc0] sm:$0xff] %v2769_v53  ;;  %v2715_v23 = vadd.f32 %v2714_v25, %v2697_v27  ;;  %v2754_v35 = vadd.f32 %v2753_v20, %v2736_v56 }
 0x232   : > { %v2755_v18 = vadd.f32 %v2754_v35, %v2737_v14 }
 0x233   : > { %v2975_v9 = vpop.f32.mrf.mxu2  ;;  %v3004_v17 = vpop.f32.mrf.mxu3 }
 0x234   : > { %2716 = vadd.xlane.f32.xlu1 %v2715_v23  ;;  %2756 = vadd.xlane.f32.xlu2 %v2755_v18  ;;  %v2920_v49 = vpop.f32.mrf.mxu0  ;;  %v2949_v45 = vpop.f32.mrf.mxu1 }
 0x23b   : > { %v7097_v0 = vpop.f32.mrf.mxu2  ;;  %v7099_v36 = vpop.f32.mrf.mxu3 }
 0x23c   : > { %v7101_v21 = vpop.f32.mrf.mxu0  ;;  %v7103_v39 = vpop.f32.mrf.mxu1 }
 0x243   : > { %v7105_v58 = vpop.f32.mrf.mxu2  ;;  %v7107_v12 = vpop.f32.mrf.mxu3 }
 0x244   : > { %v7109_v47 = vpop.f32.mrf.mxu0  ;;  %v7111_v60 = vpop.f32.mrf.mxu1 }
 0x24b   : > { %v7113_v43 = vpop.f32.mrf.mxu2  ;;  %v7115_v59 = vpop.f32.mrf.mxu3 }
 0x24c   : > { %v3045_v62 = vpop.f32.mrf.mxu0  ;;  %v3074_v38 = vpop.f32.mrf.mxu1 }
 0x24d   : > { %v3046_v8 = vadd.f32 %v3045_v62, %v2917_v5  ;;  %v3075_v52 = vadd.f32 %v3074_v38, %v2946_v16 }
 0x253   : > { %v3103_v55 = vpop.f32.mrf.mxu2  ;;  %v3132_v48 = vpop.f32.mrf.mxu3 }
 0x254   : > { %v3048_v26 = vpop.f32.mrf.mxu0  ;;  %v3077_v30 = vpop.f32.mrf.mxu1  ;;  %v3104_v56 = vadd.f32 %v3103_v55, %v2975_v9  ;;  %v3133_v14 = vadd.f32 %v3132_v48, %v3004_v17 }
 0x255   : > { %v3049_v35 = vadd.f32 %v3048_v26, %v2920_v49  ;;  %v3078_v18 = vadd.f32 %v3077_v30, %v2949_v45 }
 0x25b   : > { %v3106_v51 = vpop.f32.mrf.mxu2  ;;  %v7117_v40 = vpop.f32.mrf.mxu3 }
 0x25c   : > { %v7119_v3 = vpop.f32.mrf.mxu0  ;;  %v7121_v11 = vpop.f32.mrf.mxu1  ;;  %v3107_v17 = vadd.f32 %v3106_v51, %v7097_v0 }
 0x263   : > { %v7123_v54 = vpop.f32.mrf.mxu2  ;;  %v7125_v63 = vpop.f32.mrf.mxu3 }
 0x264   : > { %v7127_v24 = vpop.f32.mrf.mxu0  ;;  %v7129_v33 = vpop.f32.mrf.mxu1 }
 0x26b   : > { %v7131_v42 = vpop.f32.mrf.mxu2  ;;  %v7133_v57 = vpop.f32.mrf.mxu3 }
 0x26c   : > { %v3226_v37 = vpop.f32.mrf.mxu0  ;;  %v3255_v41 = vpop.f32.mrf.mxu1 }
 0x26d   : > { %v3325_v32 = vadd.f32 %v3226_v37, %v3046_v8  ;;  %v3326_v7 = vadd.f32 %v3255_v41, %v3075_v52 }
 0x273   : > { %v3284_v2 = vpop.f32.mrf.mxu2  ;;  %v3313_v22 = vpop.f32.mrf.mxu3 }
 0x274   : > { %v3229_v19 = vpop.f32.mrf.mxu0  ;;  %v3258_v29 = vpop.f32.mrf.mxu1  ;;  %v3327_v5 = vadd.f32 %v3284_v2, %v3104_v56  ;;  %v3328_v62 = vadd.f32 %v3313_v22, %v3133_v14  ;;  %v3136_v22 = vadd.f32 %v7117_v40, %v7099_v36 }
 0x275   : > { %v3329_v38 = vadd.f32 %v3229_v19, %v3049_v35  ;;  %v3330_v8 = vadd.f32 %v3258_v29, %v3078_v18  ;;  %v3052_v19 = vadd.f32 %v7119_v3, %v7101_v21 }
 0x27b   : > { %v3287_v1 = vpop.f32.mrf.mxu2  ;;  %v3316_v34 = vpop.f32.mrf.mxu3 }
 0x27c   : > { %v3232_v10 = vpop.f32.mrf.mxu0  ;;  %v3261_v61 = vpop.f32.mrf.mxu1  ;;  %v3332_v51 = vadd.f32 %v3316_v34, %v3136_v22  ;;  %v3139_v34 = vadd.f32 %v7125_v63, %v7107_v12 }
 0x27d   : > { %v3333_v56 = vadd.f32 %v3232_v10, %v3052_v19 }
 0x283   : > { %v7135_v44 = vpop.f32.mrf.mxu2  ;;  %v7137_v50 = vpop.f32.mrf.mxu3 }
 0x284   : > { %v7139_v28 = vpop.f32.mrf.mxu0  ;;  %v7141_v13 = vpop.f32.mrf.mxu1 }
 0x28b   : > { %v7143_v20 = vpop.f32.mrf.mxu2  ;;  %v7145_v15 = vpop.f32.mrf.mxu3 }
 0x28c   : > { %7754 = vst [vmem:[#allocation5_spill] sm:$0xff] %v7145_v15  ;;  %v3424_v4 = vpop.f32.mrf.mxu0 }
 0x28d   : > { %v3523_v31 = vadd.f32 %v3424_v4, %v3325_v32  ;;  %v3453_v46 = vpop.f32.mrf.mxu1 }
 0x28e   : > { %v3524_v6 = vadd.f32 %v3453_v46, %v3326_v7 }
 0x28f   : > { %v3563_v27 = vmul.f32 %v3523_v31, %v3523_v31 }
 0x290   : > { %v3539_v53 = vadd.f32 %v3524_v6, %v3523_v31  ;;  %v3564_v25 = vmul.f32 %v3524_v6, %v3524_v6  ;;  %v3603_v23 = vpack.c.bf16 %v3524_v6, %v3523_v31  ;;  %v3081_v6 = vadd.f32 %v7121_v11, %v7103_v39 }
 0x291   : > { %v3110_v39 = vadd.f32 %v7123_v54, %v7105_v58 }
 0x292   : > { %4841 = vst [vmem:[#allocation2 + $0xa8] sm:$0xff] %v3603_v23  ;;  %v3579_v16 = vadd.f32 %v3564_v25, %v3563_v27  ;;  %v3331_v27 = vadd.f32 %v3287_v1, %v3107_v17  ;;  %v3334_v25 = vadd.f32 %v3261_v61, %v3081_v6 }
 0x293   : > { %v3482_v37 = vpop.f32.mrf.mxu2  ;;  %v3335_v58 = vadd.f32 %v7135_v44, %v3110_v39 }
 0x294   : > { %v3525_v41 = vadd.f32 %v3482_v37, %v3327_v5  ;;  %v3511_v52 = vpop.f32.mrf.mxu3  ;;  %v3427_v32 = vpop.f32.mrf.mxu0 }
 0x295   : > { %v3526_v4 = vadd.f32 %v3511_v52, %v3328_v62  ;;  %v3527_v7 = vadd.f32 %v3427_v32, %v3329_v38  ;;  %v3456_v46 = vpop.f32.mrf.mxu1  ;;  %v3055_v62 = vadd.f32 %v7127_v24, %v7109_v47  ;;  %v3336_v52 = vadd.f32 %v7137_v50, %v3139_v34 }
 0x296   : > { %v3565_v9 = vmul.f32 %v3525_v41, %v3525_v41  ;;  %v3528_v55 = vadd.f32 %v3456_v46, %v3330_v8  ;;  %v3540_v15 = vadd.f32 %v3539_v53, %v3525_v41  ;;  %v3113_v50 = vadd.f32 %v7131_v42, %v7113_v43 }
 0x297   : > { %v3604_v49 = vpack.c.bf16 %v3526_v4, %v3525_v41  ;;  %v3567_v45 = vmul.f32 %v3527_v7, %v3527_v7  ;;  %v3566_v29 = vmul.f32 %v3526_v4, %v3526_v4  ;;  %v3084_v41 = vadd.f32 %v7129_v33, %v7111_v60 }
 0x298   : > { %v3544_v48 = vadd.f32 %v3528_v55, %v3527_v7  ;;  %v3568_v26 = vmul.f32 %v3528_v55, %v3528_v55  ;;  %v3605_v30 = vpack.c.bf16 %v3528_v55, %v3527_v7  ;;  %v3541_v2 = vadd.f32 %v3540_v15, %v3526_v4 }
 0x299   : > { %4842 = vst [vmem:[#allocation2 + $0xd0] sm:$0xff] %v3604_v49  ;;  %v3580_v31 = vadd.f32 %v3579_v16, %v3565_v9  ;;  %v3337_v12 = vadd.f32 %v7139_v28, %v3055_v62  ;;  %v3338_v4 = vadd.f32 %v7141_v13, %v3084_v41  ;;  %v3142_v13 = vadd.f32 %v7133_v57, %v7115_v59 }
 0x29a   : > { %4843 = vst [vmem:[#allocation2 + $0x10] sm:$0xff] %v3605_v30  ;;  %3542 = vadd.xlane.f32.xlu0 %v3541_v2  ;;  %v3584_v0 = vadd.f32 %v3568_v26, %v3567_v45  ;;  %v3339_v22 = vadd.f32 %v7143_v20, %v3113_v50  ;;  %v1018_v20 = vpop.xlane.xlu0 %1017 }
 0x29b   : > { %v3485_v53 = vpop.f32.mrf.mxu2  ;;  %v3581_v15 = vadd.f32 %v3580_v31, %v3566_v29  ;;  %v7755_v29 = vld [vmem:[#allocation5_spill] sm:$0xff] }
 0x29c   : > { %v3529_v23 = vadd.f32 %v3485_v53, %v3331_v27  ;;  %v3514_v36 = vpop.f32.mrf.mxu3  ;;  %v3430_v40 = vpop.f32.mrf.mxu0  ;;  %v3340_v31 = vadd.f32 %v7755_v29, %v3142_v13  ;;  %v3625_v13 = vld [vmem:[#allocation3 + $0x10] sm:$0xff] }
 0x29d   : > { %v3530_v14 = vadd.f32 %v3514_v36, %v3332_v51  ;;  %3582 = vadd.xlane.f32.xlu1 %v3581_v15  ;;  %v3531_v21 = vadd.f32 %v3430_v40, %v3333_v56  ;;  %v3459_v3 = vpop.f32.mrf.mxu1 }
 0x29e   : > { %v3569_v35 = vmul.f32 %v3529_v23, %v3529_v23  ;;  %v3532_v18 = vadd.f32 %v3459_v3, %v3334_v25  ;;  %v3545_v5 = vadd.f32 %v3544_v48, %v3529_v23 }
 0x29f   : > { %v3606_v11 = vpack.c.bf16 %v3530_v14, %v3529_v23  ;;  %v3571_v1 = vmul.f32 %v3531_v21, %v3531_v21  ;;  %v3570_v37 = vmul.f32 %v3530_v14, %v3530_v14  ;;  %v1028_v23 = vpop.xlane.xlu1 %1027 }
 0x2a0   : > { %v3549_v10 = vadd.f32 %v3532_v18, %v3531_v21  ;;  %v3572_v61 = vmul.f32 %v3532_v18, %v3532_v18  ;;  %v3607_v16 = vpack.c.bf16 %v3532_v18, %v3531_v21  ;;  %v3546_v38 = vadd.f32 %v3545_v5, %v3530_v14  ;;  %v1058_v14 = vpop.xlane.xlu2 %1057 }
 0x2a1   : > { %4844 = vst [vmem:[#allocation2 + $0x28] sm:$0xff] %v3606_v11  ;;  %v3585_v8 = vadd.f32 %v3584_v0, %v3569_v35 }
 0x2a2   : > { %4845 = vst [vmem:[#allocation2 + $0xa0] sm:$0xff] %v3607_v16  ;;  %v3589_v54 = vadd.f32 %v3572_v61, %v3571_v1  ;;  %v1023_v36 = vpop.xlane.xlu0 %1022 }
 0x2a3   : > { %v3488_v63 = vpop.f32.mrf.mxu2  ;;  %v3586_v32 = vadd.f32 %v3585_v8, %v3570_v37 }
 0x2a4   : > { %v3533_v47 = vadd.f32 %v3488_v63, %v3335_v58  ;;  %v3517_v24 = vpop.f32.mrf.mxu3  ;;  %v3433_v7 = vpop.f32.mrf.mxu0 }
 0x2a5   : > { %v3534_v46 = vadd.f32 %v3517_v24, %v3336_v52  ;;  %3547 = vadd.xlane.f32.xlu1 %v3546_v38  ;;  %v3535_v9 = vadd.f32 %v3433_v7, %v3337_v12  ;;  %v3462_v55 = vpop.f32.mrf.mxu1  ;;  %v3623_v12 = vld [vmem:[#allocation3] sm:$0xff] }
 0x2a6   : > { %v3573_v60 = vmul.f32 %v3533_v47, %v3533_v47  ;;  %v3536_v33 = vadd.f32 %v3462_v55, %v3338_v4  ;;  %v3550_v44 = vadd.f32 %v3549_v10, %v3533_v47  ;;  %v3636_v7 = vld [vmem:[#allocation4] sm:$0xff] }
 0x2a7   : > { %v3608_v17 = vpack.c.bf16 %v3534_v46, %v3533_v47  ;;  %v3575_v49 = vmul.f32 %v3535_v9, %v3535_v9  ;;  %v3574_v30 = vmul.f32 %v3534_v46, %v3534_v46  ;;  %v1033_v40 = vpop.xlane.xlu1 %1032 }
 0x2a8   : > { %v3554_v28 = vadd.f32 %v3536_v33, %v3535_v9  ;;  %v3576_v45 = vmul.f32 %v3536_v33, %v3536_v33  ;;  %v3609_v48 = vpack.c.bf16 %v3536_v33, %v3535_v9  ;;  %v3551_v26 = vadd.f32 %v3550_v44, %v3534_v46  ;;  %v1063_v18 = vpop.xlane.xlu2 %1062 }
 0x2a9   : > { %4846 = vst [vmem:[#allocation2 + $0xf8] sm:$0xff] %v3608_v17  ;;  %v3590_v2 = vadd.f32 %v3589_v54, %v3573_v60  ;;  %v3624_v17 = vld [vmem:[#allocation3 + $0x8] sm:$0xff] }
 0x2aa   : > { %4847 = vst [vmem:[#allocation2 + $0x20] sm:$0xff] %v3609_v48  ;;  %v3594_v19 = vadd.f32 %v3576_v45, %v3575_v49  ;;  %3552 = vadd.xlane.f32.xlu2 %v3551_v26  ;;  %v7172_v21 = vpop.xlane.xlu0 %1067 }
 0x2ab   : > { %v3491_v6 = vpop.f32.mrf.mxu2  ;;  %v3591_v27 = vadd.f32 %v3590_v2, %v3574_v30 }
 0x2ac   : > { %v3537_v43 = vadd.f32 %v3491_v6, %v3339_v22  ;;  %v3520_v42 = vpop.f32.mrf.mxu3 }
 0x2ad   : > { %v3538_v0 = vadd.f32 %v3520_v42, %v3340_v31 }
 0x2ae   : > { %v3577_v51 = vmul.f32 %v3537_v43, %v3537_v43  ;;  %v3555_v56 = vadd.f32 %v3554_v28, %v3537_v43 }
 0x2af   : > { %v3610_v53 = vpack.c.bf16 %v3538_v0, %v3537_v43  ;;  %v3578_v57 = vmul.f32 %v3538_v0, %v3538_v0  ;;  %v1073_v3 = vpop.xlane.xlu1 %1072 }
 0x2b0   : > { %v3556_v59 = vadd.f32 %v3555_v56, %v3538_v0  ;;  %v3595_v15 = vadd.f32 %v3594_v19, %v3577_v51  ;;  %v1860_v39 = vpop.xlane.xlu2 %1859  ;;  %v3637_v0 = vld [vmem:[#allocation4 + $0x8] sm:$0xff] }
 0x2b1   : > { %4848 = vst [vmem:[#allocation2 + $0x98] sm:$0xff] %v3610_v53  ;;  %v1876_v58 = vadd.f32 %v1860_v39, %v1018_v20 }
 0x2b2   : > { %3557 = vadd.xlane.f32.xlu0 %v3556_v59  ;;  %v3596_v25 = vadd.f32 %v3595_v15, %v3578_v57  ;;  %3587 = vadd.xlane.f32.xlu2 %v3586_v32  ;;  %v1900_v35 = vpop.xlane.xlu0 %1899  ;;  %v3639_v59 = vld [vmem:[#allocation4 + $0x18] sm:$0xff] }
 0x2b3   : > { %v1916_v52 = vadd.f32 %v1900_v35, %v1058_v14  ;;  %v3638_v14 = vld [vmem:[#allocation4 + $0x10] sm:$0xff] }
 0x2b4   : > { %3597 = vadd.xlane.f32.xlu1 %v3596_v25 }
 0x2b7   : > { %v1905_v5 = vpop.xlane.xlu1 %1904 }
 0x2b8   : > { %v1910_v34 = vpop.xlane.xlu2 %1909  ;;  %v1917_v19 = vadd.f32 %v1905_v5, %v1063_v18 }
 0x2ba   : > { %3592 = vadd.xlane.f32.xlu0 %v3591_v27  ;;  %v1865_v11 = vpop.xlane.xlu0 %1864  ;;  %v3626_v27 = vld [vmem:[#allocation3 + $0x18] sm:$0xff] }
 0x2bb   : > { %v1877_v60 = vadd.f32 %v1865_v11, %v1023_v36 }
 0x2bf   : > { %v1870_v1 = vpop.xlane.xlu1 %1869 }
 0x2c0   : > { %v1875_v62 = vpop.xlane.xlu2 %1874  ;;  %v1878_v28 = vadd.f32 %v1870_v1, %v1028_v23  ;;  %v1918_v23 = vadd.f32 %v1910_v34, %v7172_v21 }
 0x2c1   : > { %v1879_v22 = vadd.f32 %v1875_v62, %v1033_v40 }
 0x2c2   : > { %v1915_v10 = vpop.xlane.xlu0 %1914 }
 0x2c3   : > { %v1919_v29 = vadd.f32 %v1915_v10, %v1073_v3 }
 0x2c7   : > { %v2702_v61 = vpop.xlane.xlu1 %2701 }
 0x2c8   : > { %v2742_v37 = vpop.xlane.xlu2 %2741  ;;  %v2718_v54 = vadd.f32 %v2702_v61, %v1876_v58 }
 0x2c9   : > { %v2758_v47 = vadd.f32 %v2742_v37, %v1916_v52 }
 0x2ca   : > { %v2747_v16 = vpop.xlane.xlu0 %2746 }
 0x2cb   : > { %v2759_v6 = vadd.f32 %v2747_v16, %v1917_v19 }
 0x2cf   : > { %v2752_v38 = vpop.xlane.xlu1 %2751 }
 0x2d0   : > { %v2707_v32 = vpop.xlane.xlu2 %2706  ;;  %v2760_v40 = vadd.f32 %v2752_v38, %v1918_v23 }
 0x2d1   : > { %v2719_v44 = vadd.f32 %v2707_v32, %v1877_v60 }
 0x2d2   : > { %v2712_v8 = vpop.xlane.xlu0 %2711 }
 0x2d3   : > { %v2720_v48 = vadd.f32 %v2712_v8, %v1878_v28 }
 0x2d7   : > { %v2717_v41 = vpop.xlane.xlu1 %2716 }
 0x2d8   : > { %v2757_v33 = vpop.xlane.xlu2 %2756  ;;  %v2721_v31 = vadd.f32 %v2717_v41, %v1879_v22 }
 0x2d9   : > { %v2761_v42 = vadd.f32 %v2757_v33, %v1919_v29 }
 0x30d   : > { %v3543_v63 = vpop.xlane.xlu0 %3542 }
 0x30e   : > { %v3559_v4 = vadd.f32 %v3543_v63, %v2718_v54 }
 0x310   : > { %v3627_v24 = vadd.f32 %v3623_v12, %v3559_v4  ;;  %v3583_v46 = vpop.xlane.xlu1 %3582 }
 0x311   : > { %v3599_v9 = vadd.f32 %v3583_v46, %v2758_v47 }
 0x312   : > { %3632 = vst.msk [vmem:[#allocation3] sm:$0xff] %vm3631_vm2, %v3627_v24 }
 0x313   : > { %v3640_v55 = vadd.f32 %v3636_v7, %v3599_v9 }
 0x315   : > { %3644 = vst.msk [vmem:[#allocation4] sm:$0xff] %vm3631_vm2, %v3640_v55 }
 0x318   : > { %v3548_v49 = vpop.xlane.xlu1 %3547 }
 0x319   : > { %v3560_v50 = vadd.f32 %v3548_v49, %v2719_v44 }
 0x31b   : > { %v3628_v45 = vadd.f32 %v3624_v17, %v3560_v50 }
 0x31d   : > { %3633 = vst.msk [vmem:[#allocation3 + $0x8] sm:$0xff] %vm3631_vm2, %v3628_v45  ;;  %v3553_v26 = vpop.xlane.xlu2 %3552 }
 0x31e   : > { %v3561_v30 = vadd.f32 %v3553_v26, %v2720_v48 }
 0x320   : > { %v3629_v2 = vadd.f32 %v3625_v13, %v3561_v30 }
 0x322   : > { %3634 = vst.msk [vmem:[#allocation3 + $0x10] sm:$0xff] %vm3631_vm2, %v3629_v2 }
 0x325   : > { %v3558_v43 = vpop.xlane.xlu0 %3557  ;;  %v3588_v51 = vpop.xlane.xlu2 %3587 }
 0x326   : > { %v3562_v56 = vadd.f32 %v3558_v43, %v2721_v31  ;;  %v3600_v53 = vadd.f32 %v3588_v51, %v2759_v6 }
 0x327   : > { %v3598_v57 = vpop.xlane.xlu1 %3597 }
 0x328   : > { %v3630_v15 = vadd.f32 %v3626_v27, %v3562_v56  ;;  %v3602_v25 = vadd.f32 %v3598_v57, %v2761_v42  ;;  %v3641_v20 = vadd.f32 %v3637_v0, %v3600_v53 }
 0x32a   : > { %3635 = vst.msk [vmem:[#allocation3 + $0x18] sm:$0xff] %vm3631_vm2, %v3630_v15  ;;  %v3643_v36 = vadd.f32 %v3639_v59, %v3602_v25 }
 0x32b   : > { %3645 = vst.msk [vmem:[#allocation4 + $0x8] sm:$0xff] %vm3631_vm2, %v3641_v20 }
 0x32c   : > { %3647 = vst.msk [vmem:[#allocation4 + $0x18] sm:$0xff] %vm3631_vm2, %v3643_v36 }
 0x32d   : > { %v3593_v3 = vpop.xlane.xlu0 %3592 }
 0x32e   : > { %v3601_v35 = vadd.f32 %v3593_v3, %v2760_v40 }
 0x330   : > { %v3642_v18 = vadd.f32 %v3638_v14, %v3601_v35 }
 0x332   : > { %3646 = vst.msk [vmem:[#allocation4 + $0x10] sm:$0xff] %vm3631_vm2, %v3642_v18 }
 0x333 PF: > { %p4849_p6 = scmp.ne.s32.totalorder %s4957_s15, 1 }
 0x335   : > { %3651 = sbr.rel (%p4849_p6) target bundleno = 1058 (0x422), region = 48 }
 0x33a   : > { %v4968_v5 = vmov 0   ;;  %v4969_v21 = vmov 2048.0   ;;  %v3654_v10 = vld [vmem:[#allocation3 + $0x10] sm:$0xff]  ;;  %v3652_v62 = vld [vmem:[#allocation3] sm:$0xff]  ;;  %v3655_v37 = vld [vmem:[#allocation3 + $0x18] sm:$0xff] }
 0x33b   : > { %4931 = vset.pattern.permute.xlu1 %v4968_v5  ;;  %4930 = vset.pattern.permute.xlu0 %v4968_v5  ;;  %4933 = vrcp.f32 %v4969_v21  ;;  %v3669_v61 = vld [vmem:[#allocation4 + $0x10] sm:$0xff]  ;;  %v3667_v38 = vld [vmem:[#allocation4] sm:$0xff]  ;;  %v3670_v8 = vld [vmem:[#allocation4 + $0x18] sm:$0xff] }
 0x33c   : > { %4932 = vset.pattern.permute.xlu2 %v4968_v5  ;;  %v3653_v41 = vld [vmem:[#allocation3 + $0x8] sm:$0xff]  ;;  %v3689_v40 = vld [vmem:[%s7579_s2 + $0x10] sm:$0xff]  ;;  %v3687_v35 = vld [vmem:[%s7579_s2] sm:$0xff] }
 0x33d   : > { %v3668_v58 = vld [vmem:[#allocation4 + $0x8] sm:$0xff] }
 0x341   : > { %v4934_v39 = vpop.eup %4933 }
 0x342   : > { %v3657_v11 = vmul.f32 2048.0, %v4934_v39  ;;  %vm3661_vm3 = vweird.f32 %v4934_v39 }
 0x344   : > { %v3658_v1 = vsub.f32 1.0, %v3657_v11 }
 0x346   : > { %v3659_v34 = vmul.f32 %v4934_v39, %v3658_v1 }
 0x348   : > { %v3660_v16 = vadd.f32 %v4934_v39, %v3659_v34 }
 0x34a   : > { %v3662_v54 = vsel %vm3661_vm3, %v4934_v39, %v3660_v16 }
 0x34b   : > { %v7184_v52 = vmul.f32 %v3662_v54, %v3654_v10  ;;  %v3673_v12 = vmul.f32 %v3669_v61, %v3662_v54  ;;  %v7186_v63 = vmul.f32 %v3662_v54, %v3652_v62  ;;  %v3671_v32 = vmul.f32 %v3667_v38, %v3662_v54  ;;  %v3688_v61 = vld [vmem:[%s7579_s2 + $0x8] sm:$0xff]  ;;  %v3739_v62 = vld [vmem:[%s7580_s3] sm:$0xff]  ;;  %v3690_v38 = vld [vmem:[%s7579_s2 + $0x18] sm:$0xff] }
 0x34c   : > { %v7188_v4 = vmul.f32 %v3662_v54, %v3655_v37  ;;  %v3674_v47 = vmul.f32 %v3670_v8, %v3662_v54  ;;  %v7190_v24 = vmul.f32 %v3662_v54, %v3653_v41  ;;  %v3672_v7 = vmul.f32 %v3668_v58, %v3662_v54 }
 0x34d   : > { %v3677_v46 = vmul.f32 %v7184_v52, %v7184_v52  ;;  %v3675_v9 = vmul.f32 %v7186_v63, %v7186_v63 }
 0x34e   : > { %v3678_v55 = vmul.f32 %v7188_v4, %v7188_v4  ;;  %v3676_v60 = vmul.f32 %v7190_v24, %v7190_v24 }
 0x34f   : > { %v3681_v33 = vsub.f32 %v3673_v12, %v3677_v46  ;;  %v3679_v44 = vsub.f32 %v3671_v32, %v3675_v9  ;;  %v3740_v32 = vld [vmem:[%s7580_s3 + $0x8] sm:$0xff]  ;;  %v3741_v9 = vld [vmem:[%s7580_s3 + $0x10] sm:$0xff] }
 0x350   : > { %v3682_v17 = vsub.f32 %v3674_v47, %v3678_v55  ;;  %v3680_v49 = vsub.f32 %v3672_v7, %v3676_v60  ;;  %v7234_v60 = vld [vmem:[#allocation2 + $0xb0] sm:$0xff] }
 0x351   : > { %v3685_v50 = vmax.f32 %v3681_v33, 0.0  ;;  %v3683_v28 = vmax.f32 %v3679_v44, 0.0  ;;  %v7240_v33 = vld [vmem:[#allocation2 + $0x88] sm:$0xff]  ;;  %v7242_v44 = vld [vmem:[#allocation2 + $0x38] sm:$0xff] }
 0x352   : > { %v3686_v45 = vmax.f32 %v3682_v17, 0.0  ;;  %v3684_v48 = vmax.f32 %v3680_v49, 0.0  ;;  %v7244_v17 = vld [vmem:[#allocation2 + $0x58] sm:$0xff]  ;;  %v3803_v49 = vunpack.c.l.bf16 %v7234_v60 }
 0x353   : > { %v3693_v13 = vadd.f32 1e-05, %v3685_v50  ;;  %v3691_v26 = vadd.f32 1e-05, %v3683_v28  ;;  %v3804_v50 = vunpack.c.h.bf16 %v7234_v60 }
 0x354   : > { %v3694_v30 = vadd.f32 1e-05, %v3686_v45  ;;  %v3692_v2 = vadd.f32 1e-05, %v3684_v48  ;;  %v7250_v48 = vld [vmem:[#allocation2 + $0xa8] sm:$0xff] }
 0x355   : > { %4935 = vrsqrt.f32 %v3693_v13  ;;  %vm3721_vm4 = vweird.f32 %v3693_v13  ;;  %vm3701_vm6 = vweird.f32 %v3691_v26 }
 0x356   : > { %4937 = vrsqrt.f32 %v3691_v26  ;;  %vm3711_vm9 = vweird.f32 %v3692_v2  ;;  %vm3731_vm12 = vweird.f32 %v3694_v30 }
 0x357   : > { %4939 = vrsqrt.f32 %v3694_v30 }
 0x358   : > { %4941 = vrsqrt.f32 %v3692_v2 }
 0x35b   : > { %v4936_v22 = vpop.eup %4935 }
 0x35c   : > { %v4938_v19 = vpop.eup %4937  ;;  %v3716_v29 = vmul.f32 %v4936_v22, %v3693_v13  ;;  %vm3722_vm5 = vweird.f32 %v4936_v22  ;;  %v7252_v13 = vld [vmem:[#allocation2 + $0xd0] sm:$0xff] }
 0x35d   : > { %v4940_v31 = vpop.eup %4939  ;;  %v3696_v6 = vmul.f32 %v4938_v19, %v3691_v26  ;;  %vm3702_vm7 = vweird.f32 %v4938_v19  ;;  %vm7200_vm8 = vmor %vm3721_vm4, %vm3722_vm5 }
 0x35e   : > { %v4942_v27 = vpop.eup %4941  ;;  %v3717_v43 = vmul.f32 %v4936_v22, %v3716_v29  ;;  %v3726_v42 = vmul.f32 %v4940_v31, %v3694_v30  ;;  %vm3703_vm11 = vmor %vm3701_vm6, %vm3702_vm7  ;;  %vm3732_vm13 = vweird.f32 %v4940_v31  ;;  %v7260_v29 = vld [vmem:[#allocation2 + $0x18] sm:$0xff] }
 0x35f   : > { %v3697_v0 = vmul.f32 %v4938_v19, %v3696_v6  ;;  %v3706_v51 = vmul.f32 %v4942_v27, %v3692_v2  ;;  %vm3712_vm10 = vweird.f32 %v4942_v27  ;;  %vm3733_vm15 = vmor %vm3731_vm12, %vm3732_vm13  ;;  %v3897_v2 = vunpack.c.l.bf16 %v7240_v33 }
 0x360   : > { %v3718_v56 = vmul.f32 0.5, %v3717_v43  ;;  %v3727_v53 = vmul.f32 %v4940_v31, %v3726_v42  ;;  %vm3713_vm14 = vmor %vm3711_vm9, %vm3712_vm10  ;;  %v3989_v6 = vunpack.c.h.bf16 %v7242_v44  ;;  %v3991_v43 = vunpack.c.h.bf16 %v7244_v17  ;;  %v7266_v42 = vld [vmem:[#allocation2 + $0xe8] sm:$0xff] }
 0x361   : > { %v3698_v59 = vmul.f32 0.5, %v3697_v0  ;;  %v3707_v57 = vmul.f32 %v4942_v27, %v3706_v51  ;;  %v7268_v0 = vld [vmem:[#allocation2 + $0xb8] sm:$0xff]  ;;  %v4081_v51 = vunpack.c.l.bf16 %v7250_v48 }
 0x362   : > { %v3719_v15 = vsub.f32 1.5, %v3718_v56  ;;  %v3728_v25 = vmul.f32 0.5, %v3727_v53  ;;  %v4082_v56 = vunpack.c.h.bf16 %v7250_v48  ;;  %v4083_v53 = vunpack.c.l.bf16 %v7252_v13 }
 0x363   : > { %v3699_v23 = vsub.f32 1.5, %v3698_v59  ;;  %v3708_v36 = vmul.f32 0.5, %v3707_v57  ;;  %v4084_v59 = vunpack.c.h.bf16 %v7252_v13  ;;  %v7274_v57 = vld [vmem:[#allocation2 + $0x40] sm:$0xff] }
 0x364   : > { %v3720_v14 = vmul.f32 %v4936_v22, %v3719_v15  ;;  %v3729_v3 = vsub.f32 1.5, %v3728_v25  ;;  %v7276_v15 = vld [vmem:[#allocation2 + $0xc8] sm:$0xff] }
 0x365   : > { %v3700_v18 = vmul.f32 %v4938_v19, %v3699_v23  ;;  %v3709_v5 = vsub.f32 1.5, %v3708_v36  ;;  %v3809_v23 = vunpack.c.l.bf16 %v7260_v29  ;;  %v3810_v36 = vunpack.c.h.bf16 %v7260_v29 }
 0x366   : > { %v3724_v21 = vsel %vm7200_vm8, %v4936_v22, %v3720_v14  ;;  %v3730_v39 = vmul.f32 %v4940_v31, %v3729_v3  ;;  %v3898_v22 = vunpack.c.h.bf16 %v7240_v33  ;;  %v7284_v14 = vld [vmem:[#allocation2 + $0x28] sm:$0xff]  ;;  %v7762_v29 = vunpack.c.l.bf16 %v7274_v57 }
 0x367   : > { %v3737_v11 = vmul.f32 %v3724_v21, %v3689_v40  ;;  %v3704_v1 = vsel %vm3703_vm11, %v4938_v19, %v3700_v18  ;;  %v3710_v34 = vmul.f32 %v4942_v27, %v3709_v5  ;;  %v7258_v19 = vld [vmem:[#allocation2 + $0xd8] sm:$0xff]  ;;  %v7282_v40 = vld [vmem:[#allocation2 + $0x10] sm:$0xff] }
 0x368   : > { %v3735_v10 = vmul.f32 %v3704_v1, %v3687_v35  ;;  %v3734_v37 = vsel %vm3733_vm15, %v4940_v31, %v3730_v39  ;;  %v3988_v31 = vunpack.c.l.bf16 %v7242_v44  ;;  %v3807_v25 = vunpack.c.l.bf16 %v7258_v19  ;;  %v7290_v21 = vld [vmem:[#allocation2 + $0x30] sm:$0xff]  ;;  %v7292_v39 = vld [vmem:[#allocation2 + $0x48] sm:$0xff] }
 0x369   : > { %3763 = vperm.xlu1 %4931, %v3737_v11   ;;  %v3714_v16 = vsel %vm3713_vm14, %v4942_v27, %v3710_v34  ;;  %v3738_v54 = vmul.f32 %v3734_v37, %v3690_v38  ;;  %v3745_v7 = vmul.f32 %v3737_v11, %v7184_v52  ;;  %v7238_v52 = vld [vmem:[#allocation2 + $0x80] sm:$0xff]  ;;  %v3990_v27 = vunpack.c.l.bf16 %v7244_v17 }
 0x36a   : > { %3753 = vperm.xlu0 %4930, %v3735_v10   ;;  %v3743_v8 = vmul.f32 %v3735_v10, %v7186_v63  ;;  %v3736_v41 = vmul.f32 %v3714_v16, %v3688_v61  ;;  %v3742_v63 = vld [vmem:[%s7580_s3 + $0x18] sm:$0xff]  ;;  %v3895_v26 = vunpack.c.l.bf16 %v7238_v52  ;;  %v3896_v30 = vunpack.c.h.bf16 %v7238_v52  ;;  %v3799_v61 = vld [vmem:[#allocation2 + $0x50] sm:$0xff]  ;;  %v3800_v16 = vld [vmem:[#allocation2 + $0x68] sm:$0xff] }
 0x36b   : > { %v3746_v47 = vmul.f32 %v3738_v54, %v7188_v4  ;;  %v3749_v55 = vsub.f32 %v3741_v9, %v3745_v7  ;;  %v7236_v4 = vld [vmem:[#allocation2] sm:$0xff]  ;;  %v3808_v20 = vunpack.c.h.bf16 %v7258_v19  ;;  %v7310_v7 = vld [vmem:[#allocation2 + $0x8] sm:$0xff]  ;;  %v3814_v37 = vunpack.c.h.bf16 %v3800_v16 }
 0x36c   : > { %v3747_v58 = vsub.f32 %v3739_v62, %v3743_v8  ;;  %v3744_v12 = vmul.f32 %v3736_v41, %v7190_v24  ;;  %v3805_v28 = vunpack.c.l.bf16 %v7236_v4  ;;  %v3806_v45 = vunpack.c.h.bf16 %v7236_v4  ;;  %v7316_v9 = vld [vmem:[#allocation2 + $0xc0] sm:$0xff] }
 0x36d   : > { %v3750_v24 = vsub.f32 %v3742_v63, %v3746_v47  ;;  %v7312_v63 = vld [vmem:[#allocation2 + $0x78] sm:$0xff]  ;;  %v3813_v8 = vunpack.c.l.bf16 %v3800_v16  ;;  %v7318_v38 = vld [vmem:[#allocation2 + $0x20] sm:$0xff] }
 0x36e   : > { %3773 = vperm.xlu2 %4932, %v3747_v58   ;;  %v3748_v46 = vsub.f32 %v3740_v32, %v3744_v12  ;;  %v7304_v58 = vld [vmem:[#allocation2 + $0xf0] sm:$0xff] }
 0x371   : > { %3768 = vperm.xlu1 %4931, %v3738_v54   ;;  %v7320_v54 = vld [vmem:[#allocation2 + $0x98] sm:$0xff] }
 0x372   : > { %3758 = vperm.xlu0 %4930, %v3736_v41   ;;  %v7302_v41 = vld [vmem:[#allocation2 + $0x60] sm:$0xff] }
 0x376   : > { %3778 = vperm.xlu2 %4932, %v3748_v46   ;;  %v7314_v46 = vld [vmem:[#allocation2 + $0x70] sm:$0xff] }
 0x379   : > { %3788 = vperm.xlu1 %4931, %v3750_v24   ;;  %v3811_v24 = vunpack.c.l.bf16 %v3799_v61 }
 0x37a   : > { %3783 = vperm.xlu0 %4930, %v3749_v55   ;;  %v3812_v55 = vunpack.c.h.bf16 %v3799_v61 }
 0x3c8   : > { %v3774_v44 = vpop.permute.xlu2 %3773 }
 0x3db   : > { %v7334_v5 = vpop.permute.xlu1 %3763 }
 0x3dc   : > { %v3754_v10 = vpop.permute.xlu0 %3753  ;;  %v7341_v16 = vmul.f32 %v3811_v24, %v7334_v5  ;;  %v7344_v11 = vmul.f32 %v3812_v55, %v7334_v5  ;;  %v7347_v32 = vmul.f32 %v3813_v8, %v7334_v5  ;;  %v7350_v47 = vmul.f32 %v3814_v37, %v7334_v5 }
 0x3dd   : > { %v3819_v12 = vmul.f32 %v3803_v49, %v3754_v10  ;;  %v3820_v34 = vmul.f32 %v3804_v50, %v3754_v10  ;;  %v3821_v61 = vmul.f32 %v3805_v28, %v3754_v10  ;;  %v3822_v24 = vmul.f32 %v3806_v45, %v3754_v10 }
 0x3de   : > { %v3911_v55 = vmul.f32 %v3895_v26, %v3754_v10  ;;  %v3912_v8 = vmul.f32 %v3896_v30, %v3754_v10  ;;  %v3913_v37 = vmul.f32 %v3897_v2, %v3754_v10  ;;  %v3914_v49 = vmul.f32 %v3898_v22, %v3754_v10 }
 0x3df   : > { %v4004_v60 = vmul.f32 %v3988_v31, %v3754_v10  ;;  %v4005_v50 = vmul.f32 %v3989_v6, %v3754_v10  ;;  %v4006_v4 = vmul.f32 %v3990_v27, %v3754_v10  ;;  %v4007_v28 = vmul.f32 %v3991_v43, %v3754_v10 }
 0x3e0   : > { %v4097_v52 = vmul.f32 %v4081_v51, %v3754_v10  ;;  %v4098_v45 = vmul.f32 %v4082_v56, %v3754_v10  ;;  %v4099_v33 = vmul.f32 %v4083_v53, %v3754_v10  ;;  %v4100_v26 = vmul.f32 %v4084_v59, %v3754_v10 }
 0x3e1   : > { %v3835_v30 = vadd.f32 %v3819_v12, %v3774_v44  ;;  %v3836_v2 = vadd.f32 %v3820_v34, %v3774_v44  ;;  %v3837_v22 = vadd.f32 %v3821_v61, %v3774_v44  ;;  %v3838_v31 = vadd.f32 %v3822_v24, %v3774_v44 }
 0x3e2   : > { %v3927_v6 = vadd.f32 %v3911_v55, %v3774_v44  ;;  %v3928_v17 = vadd.f32 %v3912_v8, %v3774_v44  ;;  %v3929_v27 = vadd.f32 %v3913_v37, %v3774_v44  ;;  %v3930_v43 = vadd.f32 %v3914_v49, %v3774_v44 }
 0x3e3   : > { %v3851_v62 = vmax.f32 %v3835_v30, 0.0  ;;  %v3852_v51 = vmax.f32 %v3836_v2, 0.0  ;;  %v3853_v1 = vmax.f32 %v3837_v22, 0.0  ;;  %v3854_v48 = vmax.f32 %v3838_v31, 0.0 }
 0x3e4   : > { %v3943_v56 = vmax.f32 %v3927_v6, 0.0  ;;  %v3944_v18 = vmax.f32 %v3928_v17, 0.0  ;;  %v3945_v35 = vmax.f32 %v3929_v27, 0.0  ;;  %v3946_v53 = vmax.f32 %v3930_v43, 0.0  ;;  %v3759_v55 = vpop.permute.xlu0 %3758 }
 0x3e5   : > { %v3867_v3 = vpack.c.bf16 %v3852_v51, %v3851_v62  ;;  %v3868_v13 = vpack.c.bf16 %v3854_v48, %v3853_v1  ;;  %v4020_v59 = vadd.f32 %v4004_v60, %v3774_v44  ;;  %v4021_v10 = vadd.f32 %v4005_v50, %v3774_v44 }
 0x3e6   : > { %v3959_v12 = vpack.c.bf16 %v3944_v18, %v3943_v56  ;;  %v3960_v34 = vpack.c.bf16 %v3946_v53, %v3945_v35  ;;  %v4022_v61 = vadd.f32 %v4006_v4, %v3774_v44  ;;  %v4023_v24 = vadd.f32 %v4007_v28, %v3774_v44 }
 0x3e7   : > { %3875 = vst [vmem:[%s7581_s4] sm:$0xff] %v3867_v3  ;;  %v4036_v8 = vmax.f32 %v4020_v59, 0.0  ;;  %v4037_v37 = vmax.f32 %v4021_v10, 0.0  ;;  %v4113_v49 = vadd.f32 %v4097_v52, %v3774_v44  ;;  %v4114_v30 = vadd.f32 %v4098_v45, %v3774_v44 }
 0x3e8   : > { %3876 = vst [vmem:[%s7581_s4 + $0x8] sm:$0xff] %v3868_v13  ;;  %v4038_v1 = vmax.f32 %v4022_v61, 0.0  ;;  %v4039_v62 = vmax.f32 %v4023_v24, 0.0  ;;  %v4115_v60 = vadd.f32 %v4099_v33, %v3774_v44  ;;  %v4116_v18 = vadd.f32 %v4100_v26, %v3774_v44  ;;  %v3779_v24 = vpop.permute.xlu2 %3778 }
 0x3e9   : > { %4858 = vst [vmem:[%s7581_s4 + $0x40] sm:$0xff] %v3959_v12  ;;  %v4052_v35 = vpack.c.bf16 %v4037_v37, %v4036_v8  ;;  %v4129_v50 = vmax.f32 %v4113_v49, 0.0  ;;  %v4130_v4 = vmax.f32 %v4114_v30, 0.0  ;;  %v3823_v3 = vmul.f32 %v3807_v25, %v3759_v55  ;;  %v3769_v30 = vpop.permute.xlu1 %3768 }
 0x3ea   : > { %4859 = vst [vmem:[%s7581_s4 + $0x48] sm:$0xff] %v3960_v34  ;;  %v4053_v28 = vpack.c.bf16 %v4039_v62, %v4038_v1  ;;  %v4131_v52 = vmax.f32 %v4115_v60, 0.0  ;;  %v4132_v45 = vmax.f32 %v4116_v18, 0.0  ;;  %v3824_v33 = vmul.f32 %v3808_v20, %v3759_v55 }
 0x3eb   : > { %4874 = vst [vmem:[%s7581_s4 + $0x80] sm:$0xff] %v4052_v35  ;;  %v4145_v26 = vpack.c.bf16 %v4130_v4, %v4129_v50  ;;  %v3825_v44 = vmul.f32 %v3809_v23, %v3759_v55  ;;  %v3826_v25 = vmul.f32 %v3810_v36, %v3759_v55  ;;  %v7758_v2 = vunpack.c.l.bf16 %v7266_v42 }
 0x3ec   : > { %4875 = vst [vmem:[%s7581_s4 + $0x88] sm:$0xff] %v4053_v28  ;;  %v4146_v19 = vpack.c.bf16 %v4132_v45, %v4131_v52  ;;  %v7759_v20 = vunpack.c.h.bf16 %v7266_v42  ;;  %v7760_v6 = vunpack.c.l.bf16 %v7268_v0  ;;  %v7761_v27 = vunpack.c.h.bf16 %v7268_v0 }
 0x3ed   : > { %v3915_v22 = vmul.f32 %v7758_v2, %v3759_v55  ;;  %4890 = vst [vmem:[%s7581_s4 + $0xc0] sm:$0xff] %v4145_v26  ;;  %v4008_v36 = vmul.f32 %v7762_v29, %v3759_v55  ;;  %v7763_v43 = vunpack.c.h.bf16 %v7274_v57  ;;  %v7764_v48 = vunpack.c.l.bf16 %v7276_v15 }
 0x3ee   : > { %v3916_v31 = vmul.f32 %v7759_v20, %v3759_v55  ;;  %v3917_v17 = vmul.f32 %v7760_v6, %v3759_v55  ;;  %v3918_v23 = vmul.f32 %v7761_v27, %v3759_v55  ;;  %v7765_v56 = vunpack.c.h.bf16 %v7276_v15  ;;  %4891 = vst [vmem:[%s7581_s4 + $0xc8] sm:$0xff] %v4146_v19 }
 0x3ef   : > { %v4009_v51 = vmul.f32 %v7763_v43, %v3759_v55  ;;  %v4010_v42 = vmul.f32 %v7764_v48, %v3759_v55  ;;  %v7766_v0 = vunpack.c.l.bf16 %v7282_v40  ;;  %v7767_v59 = vunpack.c.h.bf16 %v7282_v40 }
 0x3f0   : > { %v4011_v53 = vmul.f32 %v7765_v56, %v3759_v55  ;;  %v7768_v12 = vunpack.c.l.bf16 %v7284_v14  ;;  %v7769_v34 = vunpack.c.h.bf16 %v7284_v14  ;;  %v3839_v8 = vadd.f32 %v3823_v3, %v3779_v24 }
 0x3f1   : > { %v4101_v13 = vmul.f32 %v7766_v0, %v3759_v55  ;;  %v4102_v10 = vmul.f32 %v7767_v59, %v3759_v55  ;;  %v3840_v15 = vadd.f32 %v3824_v33, %v3779_v24  ;;  %v3841_v37 = vadd.f32 %v3825_v44, %v3779_v24 }
 0x3f2   : > { %v4103_v57 = vmul.f32 %v7768_v12, %v3759_v55  ;;  %v4104_v61 = vmul.f32 %v7769_v34, %v3759_v55  ;;  %v3842_v49 = vadd.f32 %v3826_v25, %v3779_v24  ;;  %v3931_v1 = vadd.f32 %v3915_v22, %v3779_v24 }
 0x3f3   : > { %v3932_v62 = vadd.f32 %v3916_v31, %v3779_v24  ;;  %v3933_v60 = vadd.f32 %v3917_v17, %v3779_v24  ;;  %v3934_v18 = vadd.f32 %v3918_v23, %v3779_v24  ;;  %v3855_v35 = vmax.f32 %v3839_v8, 0.0 }
 0x3f4   : > { %v3856_v50 = vmax.f32 %v3840_v15, 0.0  ;;  %v3857_v40 = vmax.f32 %v3841_v37, 0.0  ;;  %v3858_v4 = vmax.f32 %v3842_v49, 0.0  ;;  %v3947_v28 = vmax.f32 %v3931_v1, 0.0 }
 0x3f5   : > { %v3948_v52 = vmax.f32 %v3932_v62, 0.0  ;;  %v3949_v45 = vmax.f32 %v3933_v60, 0.0  ;;  %v3950_v26 = vmax.f32 %v3934_v18, 0.0  ;;  %v4024_v2 = vadd.f32 %v4008_v36, %v3779_v24  ;;  %v3789_v18 = vpop.permute.xlu1 %3788 }
 0x3f6   : > { %v3869_v14 = vpack.c.bf16 %v3856_v50, %v3855_v35  ;;  %v3870_v55 = vpack.c.bf16 %v3858_v4, %v3857_v40  ;;  %v4025_v3 = vadd.f32 %v4009_v51, %v3779_v24  ;;  %v4026_v25 = vadd.f32 %v4010_v42, %v3779_v24 }
 0x3f7   : > { %v3961_v33 = vpack.c.bf16 %v3948_v52, %v3947_v28  ;;  %v3962_v44 = vpack.c.bf16 %v3950_v26, %v3949_v45  ;;  %v4027_v19 = vadd.f32 %v4011_v53, %v3779_v24  ;;  %v4040_v22 = vmax.f32 %v4024_v2, 0.0 }
 0x3f8   : > { %3877 = vst [vmem:[%s7581_s4 + $0x10] sm:$0xff] %v3869_v14  ;;  %v4041_v20 = vmax.f32 %v4025_v3, 0.0  ;;  %v4117_v31 = vadd.f32 %v4101_v13, %v3779_v24  ;;  %v4118_v6 = vadd.f32 %v4102_v10, %v3779_v24  ;;  %v4042_v17 = vmax.f32 %v4026_v25, 0.0 }
 0x3f9   : > { %3878 = vst [vmem:[%s7581_s4 + $0x18] sm:$0xff] %v3870_v55  ;;  %v4043_v27 = vmax.f32 %v4027_v19, 0.0  ;;  %v4119_v23 = vadd.f32 %v4103_v57, %v3779_v24  ;;  %v4120_v29 = vadd.f32 %v4104_v61, %v3779_v24  ;;  %v7770_v48 = vunpack.c.l.bf16 %v7290_v21 }
 0x3fa   : > { %4860 = vst [vmem:[%s7581_s4 + $0x50] sm:$0xff] %v3961_v33  ;;  %v4054_v36 = vpack.c.bf16 %v4041_v20, %v4040_v22  ;;  %v4133_v43 = vmax.f32 %v4117_v31, 0.0  ;;  %v4134_v51 = vmax.f32 %v4118_v6, 0.0  ;;  %v7771_v13 = vunpack.c.h.bf16 %v7290_v21 }
 0x3fb   : > { %v3831_v42 = vmul.f32 %v7770_v48, %v3769_v30  ;;  %4861 = vst [vmem:[%s7581_s4 + $0x58] sm:$0xff] %v3962_v44  ;;  %v4055_v56 = vpack.c.bf16 %v4043_v27, %v4042_v17  ;;  %v4135_v53 = vmax.f32 %v4119_v23, 0.0  ;;  %v4136_v0 = vmax.f32 %v4120_v29, 0.0 }
 0x3fc   : > { %v3832_v59 = vmul.f32 %v7771_v13, %v3769_v30  ;;  %4876 = vst [vmem:[%s7581_s4 + $0x90] sm:$0xff] %v4054_v36  ;;  %v4147_v10 = vpack.c.bf16 %v4134_v51, %v4133_v43  ;;  %v7772_v12 = vunpack.c.l.bf16 %v7292_v39  ;;  %v7773_v34 = vunpack.c.h.bf16 %v7292_v39 }
 0x3fd   : > { %v7774_v24 = vunpack.c.l.bf16 %v7310_v7  ;;  %4877 = vst [vmem:[%s7581_s4 + $0x98] sm:$0xff] %v4055_v56  ;;  %v4148_v21 = vpack.c.bf16 %v4136_v0, %v4135_v53  ;;  %v7775_v15 = vunpack.c.h.bf16 %v7310_v7  ;;  %v7776_v49 = vunpack.c.l.bf16 %v7312_v63 }
 0x3fe   : > { %v3833_v57 = vmul.f32 %v7772_v12, %v3769_v30  ;;  %v3834_v61 = vmul.f32 %v7773_v34, %v3769_v30  ;;  %v7777_v62 = vunpack.c.h.bf16 %v7312_v63  ;;  %4892 = vst [vmem:[%s7581_s4 + $0xd0] sm:$0xff] %v4147_v10  ;;  %v7778_v39 = vunpack.c.l.bf16 %v7314_v46 }
 0x3ff   : > { %v3923_v8 = vmul.f32 %v7774_v24, %v3769_v30  ;;  %v3924_v37 = vmul.f32 %v7775_v15, %v3769_v30  ;;  %v3925_v1 = vmul.f32 %v7776_v49, %v3769_v30  ;;  %v7779_v50 = vunpack.c.h.bf16 %v7314_v46  ;;  %4893 = vst [vmem:[%s7581_s4 + $0xd8] sm:$0xff] %v4148_v21 }
 0x400   : > { %v3926_v60 = vmul.f32 %v7777_v62, %v3769_v30  ;;  %v4016_v35 = vmul.f32 %v7778_v39, %v3769_v30  ;;  %v7780_v7 = vunpack.c.l.bf16 %v7316_v9  ;;  %v7781_v28 = vunpack.c.h.bf16 %v7316_v9  ;;  %v4871_v62 = vld [vmem:[#allocation2 + $0x90] sm:$0xff] }
 0x401   : > { %v4017_v40 = vmul.f32 %v7779_v50, %v3769_v30  ;;  %v7782_v63 = vunpack.c.l.bf16 %v7318_v38  ;;  %v7783_v26 = vunpack.c.h.bf16 %v7318_v38  ;;  %v7784_v55 = vunpack.c.l.bf16 %v7320_v54 }
 0x402   : > { %v4018_v4 = vmul.f32 %v7780_v7, %v3769_v30  ;;  %v4019_v52 = vmul.f32 %v7781_v28, %v3769_v30  ;;  %v7785_v2 = vunpack.c.h.bf16 %v7320_v54  ;;  %v3847_v33 = vadd.f32 %v3831_v42, %v3789_v18  ;;  %v4887_v7 = vld [vmem:[#allocation2 + $0xf8] sm:$0xff] }
 0x403   : > { %v4109_v45 = vmul.f32 %v7782_v63, %v3769_v30  ;;  %v4110_v14 = vmul.f32 %v7783_v26, %v3769_v30  ;;  %v4111_v46 = vmul.f32 %v7784_v55, %v3769_v30  ;;  %v3848_v44 = vadd.f32 %v3832_v59, %v3789_v18 }
 0x404   : > { %v4112_v3 = vmul.f32 %v7785_v2, %v3769_v30  ;;  %v3849_v9 = vadd.f32 %v3833_v57, %v3789_v18  ;;  %v3850_v25 = vadd.f32 %v3834_v61, %v3789_v18  ;;  %v3939_v19 = vadd.f32 %v3923_v8, %v3789_v18  ;;  %v4870_v8 = vld [vmem:[#allocation2 + $0xe0] sm:$0xff]  ;;  %v3784_v2 = vpop.permute.xlu0 %3783 }
 0x405   : > { %v3940_v22 = vadd.f32 %v3924_v37, %v3789_v18  ;;  %v3941_v20 = vadd.f32 %v3925_v1, %v3789_v18  ;;  %v3942_v31 = vadd.f32 %v3926_v60, %v3789_v18  ;;  %v3863_v6 = vmax.f32 %v3847_v33, 0.0 }
 0x406   : > { %v3864_v17 = vmax.f32 %v3848_v44, 0.0  ;;  %v3865_v27 = vmax.f32 %v3849_v9, 0.0  ;;  %v3866_v23 = vmax.f32 %v3850_v25, 0.0  ;;  %v3955_v38 = vmax.f32 %v3939_v19, 0.0 }
 0x407   : > { %v3956_v29 = vmax.f32 %v3940_v22, 0.0  ;;  %v3957_v36 = vmax.f32 %v3941_v20, 0.0  ;;  %v3958_v43 = vmax.f32 %v3942_v31, 0.0  ;;  %v4032_v54 = vadd.f32 %v4016_v35, %v3789_v18 }
 0x408   : > { %v3873_v51 = vpack.c.bf16 %v3864_v17, %v3863_v6  ;;  %v3874_v48 = vpack.c.bf16 %v3866_v23, %v3865_v27  ;;  %v4033_v30 = vadd.f32 %v4017_v40, %v3789_v18  ;;  %v4034_v53 = vadd.f32 %v4018_v4, %v3789_v18  ;;  %v4886_v40 = vld [vmem:[#allocation2 + $0xa0] sm:$0xff] }
 0x409   : > { %v3965_v42 = vpack.c.bf16 %v3956_v29, %v3955_v38  ;;  %v3966_v56 = vpack.c.bf16 %v3958_v43, %v3957_v36  ;;  %v4035_v0 = vadd.f32 %v4019_v52, %v3789_v18  ;;  %v4048_v13 = vmax.f32 %v4032_v54, 0.0 }
 0x40a   : > { %3881 = vst [vmem:[%s7581_s4 + $0x30] sm:$0xff] %v3873_v51  ;;  %v4049_v59 = vmax.f32 %v4033_v30, 0.0  ;;  %v4125_v10 = vadd.f32 %v4109_v45, %v3789_v18  ;;  %v4126_v12 = vadd.f32 %v4110_v14, %v3789_v18  ;;  %v4050_v57 = vmax.f32 %v4034_v53, 0.0 }
 0x40b   : > { %3882 = vst [vmem:[%s7581_s4 + $0x38] sm:$0xff] %v3874_v48  ;;  %v4051_v34 = vmax.f32 %v4035_v0, 0.0  ;;  %v4127_v61 = vadd.f32 %v4111_v46, %v3789_v18  ;;  %v4128_v24 = vadd.f32 %v4112_v3, %v3789_v18  ;;  %v7786_v49 = vunpack.c.l.bf16 %v7302_v41 }
 0x40c   : > { %4864 = vst [vmem:[%s7581_s4 + $0x70] sm:$0xff] %v3965_v42  ;;  %v4058_v21 = vpack.c.bf16 %v4049_v59, %v4048_v13  ;;  %v4141_v15 = vmax.f32 %v4125_v10, 0.0  ;;  %v4142_v37 = vmax.f32 %v4126_v12, 0.0  ;;  %v7787_v35 = vunpack.c.h.bf16 %v7302_v41 }
 0x40d   : > { %v3919_v1 = vmul.f32 %v7786_v49, %v7334_v5  ;;  %4865 = vst [vmem:[%s7581_s4 + $0x78] sm:$0xff] %v3966_v56  ;;  %v4059_v60 = vpack.c.bf16 %v4051_v34, %v4050_v57  ;;  %v4143_v39 = vmax.f32 %v4127_v61, 0.0  ;;  %v4144_v18 = vmax.f32 %v4128_v24, 0.0 }
 0x40e   : > { %v3920_v50 = vmul.f32 %v7787_v35, %v7334_v5  ;;  %4880 = vst [vmem:[%s7581_s4 + $0xb0] sm:$0xff] %v4058_v21  ;;  %v4151_v4 = vpack.c.bf16 %v4142_v37, %v4141_v15  ;;  %v7788_v28 = vunpack.c.l.bf16 %v7304_v58  ;;  %v7789_v63 = vunpack.c.h.bf16 %v7304_v58 }
 0x40f   : > { %v3996_v26 = vunpack.c.l.bf16 %v4870_v8  ;;  %4881 = vst [vmem:[%s7581_s4 + $0xb8] sm:$0xff] %v4059_v60  ;;  %v4152_v41 = vpack.c.bf16 %v4144_v18, %v4143_v39  ;;  %v3997_v14 = vunpack.c.h.bf16 %v4870_v8  ;;  %v3998_v55 = vunpack.c.l.bf16 %v4871_v62 }
 0x410   : > { %v3921_v52 = vmul.f32 %v7788_v28, %v7334_v5  ;;  %v3922_v45 = vmul.f32 %v7789_v63, %v7334_v5  ;;  %v3999_v46 = vunpack.c.h.bf16 %v4871_v62  ;;  %4896 = vst [vmem:[%s7581_s4 + $0xf0] sm:$0xff] %v4151_v4  ;;  %v4089_v33 = vunpack.c.l.bf16 %v4886_v40 }
 0x411   : > { %v4012_v3 = vmul.f32 %v3996_v26, %v7334_v5  ;;  %v4090_v44 = vunpack.c.h.bf16 %v4886_v40  ;;  %v4091_v58 = vunpack.c.l.bf16 %v4887_v7  ;;  %4897 = vst [vmem:[%s7581_s4 + $0xf8] sm:$0xff] %v4152_v41  ;;  %v4013_v9 = vmul.f32 %v3997_v14, %v7334_v5 }
 0x412   : > { %v4014_v25 = vmul.f32 %v3998_v55, %v7334_v5  ;;  %v4015_v19 = vmul.f32 %v3999_v46, %v7334_v5  ;;  %v4092_v22 = vunpack.c.h.bf16 %v4887_v7  ;;  %v4105_v20 = vmul.f32 %v4089_v33, %v7334_v5 }
 0x413   : > { %v4106_v31 = vmul.f32 %v4090_v44, %v7334_v5  ;;  %v4107_v6 = vmul.f32 %v4091_v58, %v7334_v5  ;;  %v3843_v17 = vadd.f32 %v7341_v16, %v3784_v2  ;;  %v3844_v23 = vadd.f32 %v7344_v11, %v3784_v2 }
 0x414   : > { %v4108_v27 = vmul.f32 %v4092_v22, %v7334_v5  ;;  %v3845_v38 = vadd.f32 %v7347_v32, %v3784_v2  ;;  %v3846_v29 = vadd.f32 %v7350_v47, %v3784_v2  ;;  %v3935_v43 = vadd.f32 %v3919_v1, %v3784_v2 }
 0x415   : > { %v3859_v36 = vmax.f32 %v3843_v17, 0.0  ;;  %v3936_v51 = vadd.f32 %v3920_v50, %v3784_v2  ;;  %v3937_v48 = vadd.f32 %v3921_v52, %v3784_v2  ;;  %v3860_v54 = vmax.f32 %v3844_v23, 0.0 }
 0x416   : > { %v3861_v30 = vmax.f32 %v3845_v38, 0.0  ;;  %v3862_v42 = vmax.f32 %v3846_v29, 0.0  ;;  %v3938_v56 = vadd.f32 %v3922_v45, %v3784_v2  ;;  %v3951_v53 = vmax.f32 %v3935_v43, 0.0 }
 0x417   : > { %v3952_v0 = vmax.f32 %v3936_v51, 0.0  ;;  %v3953_v13 = vmax.f32 %v3937_v48, 0.0  ;;  %v4028_v16 = vadd.f32 %v4012_v3, %v3784_v2  ;;  %v3871_v59 = vpack.c.bf16 %v3860_v54, %v3859_v36 }
 0x418   : > { %v3872_v5 = vpack.c.bf16 %v3862_v42, %v3861_v30  ;;  %v3954_v10 = vmax.f32 %v3938_v56, 0.0  ;;  %v4029_v11 = vadd.f32 %v4013_v9, %v3784_v2  ;;  %v4030_v32 = vadd.f32 %v4014_v25, %v3784_v2 }
 0x419   : > { %v3963_v12 = vpack.c.bf16 %v3952_v0, %v3951_v53  ;;  %v4031_v57 = vadd.f32 %v4015_v19, %v3784_v2  ;;  %v4044_v47 = vmax.f32 %v4028_v16, 0.0  ;;  %3879 = vst [vmem:[%s7581_s4 + $0x20] sm:$0xff] %v3871_v59  ;;  %v4121_v24 = vadd.f32 %v4105_v20, %v3784_v2 }
 0x41a   : > { %v3964_v34 = vpack.c.bf16 %v3954_v10, %v3953_v13  ;;  %v4045_v61 = vmax.f32 %v4029_v11, 0.0  ;;  %v4122_v8 = vadd.f32 %v4106_v31, %v3784_v2  ;;  %3880 = vst [vmem:[%s7581_s4 + $0x28] sm:$0xff] %v3872_v5  ;;  %v4046_v21 = vmax.f32 %v4030_v32, 0.0 }
 0x41b   : > { %v4047_v15 = vmax.f32 %v4031_v57, 0.0  ;;  %v4123_v37 = vadd.f32 %v4107_v6, %v3784_v2  ;;  %v4124_v49 = vadd.f32 %v4108_v27, %v3784_v2  ;;  %4862 = vst [vmem:[%s7581_s4 + $0x60] sm:$0xff] %v3963_v12  ;;  %v4137_v62 = vmax.f32 %v4121_v24, 0.0 }
 0x41c   : > { %v4056_v1 = vpack.c.bf16 %v4045_v61, %v4044_v47  ;;  %v4138_v60 = vmax.f32 %v4122_v8, 0.0  ;;  %4863 = vst [vmem:[%s7581_s4 + $0x68] sm:$0xff] %v3964_v34 }
 0x41d   : > { %v4057_v39 = vpack.c.bf16 %v4047_v15, %v4046_v21  ;;  %v4139_v18 = vmax.f32 %v4123_v37, 0.0  ;;  %v4140_v35 = vmax.f32 %v4124_v49, 0.0 }
 0x41e   : > { %4878 = vst [vmem:[%s7581_s4 + $0xa0] sm:$0xff] %v4056_v1  ;;  %v4149_v50 = vpack.c.bf16 %v4138_v60, %v4137_v62 }
 0x41f   : > { %4879 = vst [vmem:[%s7581_s4 + $0xa8] sm:$0xff] %v4057_v39  ;;  %v4150_v40 = vpack.c.bf16 %v4140_v35, %v4139_v18 }
 0x420   : > { %4894 = vst [vmem:[%s7581_s4 + $0xe0] sm:$0xff] %v4149_v50 }
 0x421   : > { %4895 = vst [vmem:[%s7581_s4 + $0xe8] sm:$0xff] %v4150_v40 }
 0x422 PF: > { %s14_s17 = sadd.s32 1, %s4965_s17   ;;  %s7790_s15 = smov %s4961_s16 }
 0x423   : > { %p11_p7 = scmp.ge.s32.totalorder %s14_s17, 4   ;;  %s7791_s16 = smov %s7793_s18 }
 0x425   :  { %13 = sbr.rel (!%p11_p7) target bundleno = 2 (0x2), region = 112 }

</bundles_post_ra>
